<compile_context>
chip_gen: v7x
topology: tpu7x:2x2x1
jax: 0.10.0
libtpu: 0.0.40
codegen_flags: <defaults>
</compile_context>

<pallas_src>
import functools

import jax
import jax.numpy as jnp
from jax.experimental import pallas as pl
from jax.experimental.pallas import tpu as pltpu


# ----------------------------------------------------------------------------- helpers

def _vmem():
    return pl.BlockSpec(memory_space=pltpu.MemorySpace.VMEM)


def _cost(flops, *arrays, out_bytes=0):
    nbytes = sum(int(a.size) * a.dtype.itemsize for a in arrays) + out_bytes
    return pl.CostEstimate(flops=int(flops), transcendentals=0, bytes_accessed=int(nbytes))


def _pad_rows_flat(x_nhwc):
    """Zero-pad H by 2 rows on each side and flatten spatial -> (N, (H+4)*W, C)."""
    n, h, w, c = x_nhwc.shape
    xp = jnp.pad(x_nhwc, ((0, 0), (2, 2), (0, 0), (0, 0)))
    return xp.reshape(n, (h + 4) * w, c)


def _edge_masks(h, w):
    """(HW, 1) masks that zero the taps which wrap across image-row boundaries."""
    col = jnp.arange(h * w, dtype=jnp.int32) % w
    ml = (col != 0).astype(jnp.float32).reshape(h * w, 1)          # kills the x-1 tap at x==0
    mr = (col != w - 1).astype(jnp.float32).reshape(h * w, 1)      # kills the x+1 tap at x==W-1
    return ml, mr


def _pool_matrix(h, w):
    """(HW/4, HW) matrix with 0.25 at the four source pixels of each 2x2-pooled pixel."""
    m = jnp.arange(h * w, dtype=jnp.int32)
    my, mx = m // w, m % w
    o = jnp.arange((h // 2) * (w // 2), dtype=jnp.int32)
    oy, ox = o // (w // 2), o % (w // 2)
    hit = (my[None, :] // 2 == oy[:, None]) & (mx[None, :] // 2 == ox[:, None])
    return hit.astype(jnp.float32) * 0.25


def _im2col_slab(src, W, HW, ml, mr):
    """Build the 3x3 'same'-conv im2col slab (HW, 9*C) from a 2-row-padded flat source
    of shape ((H+4)*W, C).  `src` may be a loaded value or a VMEM ref; every tap is a
    stride-1 row-offset slice, with the row-wrap taps masked to zero."""
    pieces = []
    for ky in range(3):
        for kx in range(3):
            s = (ky + 1) * W + kx - 1
            p = src[s:s + HW, :]
            if kx == 0:
                p = p * ml
            elif kx == 2:
                p = p * mr
            pieces.append(p)
    return jnp.concatenate(pieces, axis=-1)


# ----------------------------------------------------------------------------- kernels

def _down_block_kernel(xp_ref, w1_ref, b1_ref, w2_ref, b2_ref, wb_ref, bb_ref,
                       ml_ref, mr_ref, pool_ref, out_ref, pad_ref, *, W, HW, first):
    """FirstResBlockDiscriminator (first=True) / ResBlockDiscriminator stride=2 (first=False)."""
    ml, mr = ml_ref[...], mr_ref[...]
    xp = xp_ref[0]                                                  # ((H+4)*W, Cin), f32
    x1 = xp if first else jnp.maximum(xp, 0.0)                      # pre-activation, applied once

    # conv1: single (HW, 9*Cin) @ (9*Cin, Cout) MXU matmul.
    slab1 = _im2col_slab(x1, W, HW, ml, mr)
    h1 = jnp.dot(slab1.astype(jnp.bfloat16), w1_ref[...],
                 preferred_element_type=jnp.float32) + b1_ref[...]
    h1 = jnp.maximum(h1, 0.0)

    # Zero-pad h1 by 2*W flat rows on each side (VMEM scratch) and run conv2 the same way.
    pad_ref[...] = jnp.zeros(pad_ref.shape, pad_ref.dtype)
    pad_ref[2 * W:2 * W + HW, :] = h1
    slab2 = _im2col_slab(pad_ref, W, HW, ml, mr)
    h2 = jnp.dot(slab2.astype(jnp.bfloat16), w2_ref[...],
                 preferred_element_type=jnp.float32) + b2_ref[...]

    # 1x1 bypass conv on the raw (un-activated) block input.
    xres = xp[2 * W:2 * W + HW, :]
    byp = jnp.dot(xres.astype(jnp.bfloat16), wb_ref[...],
                  preferred_element_type=jnp.float32) + bb_ref[...]

    # Fused AvgPool2d(2): pooling commutes with the linear 1x1 bypass, so add pre-pool.
    out_ref[0] = jnp.dot(pool_ref[...], h2 + byp, preferred_element_type=jnp.float32)


def _same_block_kernel(xp_ref, w1_ref, b1_ref, w2_ref, b2_ref,
                       ml_ref, mr_ref, out_ref, pad_ref, *, W, HW):
    """ResBlockDiscriminator stride=1 (identity bypass)."""
    ml, mr = ml_ref[...], mr_ref[...]
    xp = xp_ref[0]                                                  # ((H+4)*W, C), f32
    x1 = jnp.maximum(xp, 0.0)

    slab1 = _im2col_slab(x1, W, HW, ml, mr)
    h1 = jnp.maximum(jnp.dot(slab1.astype(jnp.bfloat16), w1_ref[...],
                             preferred_element_type=jnp.float32) + b1_ref[...], 0.0)

    pad_ref[...] = jnp.zeros(pad_ref.shape, pad_ref.dtype)
    pad_ref[2 * W:2 * W + HW, :] = h1
    slab2 = _im2col_slab(pad_ref, W, HW, ml, mr)
    h2 = jnp.dot(slab2.astype(jnp.bfloat16), w2_ref[...],
                 preferred_element_type=jnp.float32) + b2_ref[...]

    out_ref[0] = h2 + xp[2 * W:2 * W + HW, :]                       # identity residual


def _head_kernel(feat_ref, label_ref, wf_ref, bf_ref, wp_ref, bp_ref, out_ref):
    """Final ReLU -> in-kernel spatial sum -> Linear(ndf->proj) -> projection conditioning."""
    f = jnp.maximum(feat_ref[...], 0.0)                             # (N, HW, C)
    pooled = jnp.sum(f, axis=1)                                     # spatial sum -> (N, C)
    logits = jnp.dot(pooled.astype(jnp.bfloat16), wf_ref[...],
                     preferred_element_type=jnp.float32) + bf_ref[...]
    n = label_ref.shape[0]
    num_classes = wp_ref.shape[0]
    classes = jax.lax.broadcasted_iota(jnp.int32, (n, num_classes), 1)
    onehot = (classes == label_ref[...]).astype(jnp.bfloat16)       # form_onehot
    proj = jnp.dot(onehot, wp_ref[...], preferred_element_type=jnp.float32) + bp_ref[...]
    out_ref[...] = jnp.sum(proj * logits, axis=1, keepdims=True)    # 'projection' conditioning


# ----------------------------------------------------------------------------- pallas_call wrappers

def _down_block(x, p, *, first):
    n, h, w, cin = x.shape
    cout = p['conv1']['w'].shape[-1]
    hw, mp = h * w, (h + 4) * w
    xp = _pad_rows_flat(x)
    ml, mr = _edge_masks(h, w)
    pool = _pool_matrix(h, w)
    w1 = p['conv1']['w'].reshape(9 * cin, cout).astype(jnp.bfloat16)
    w2 = p['conv2']['w'].reshape(9 * cout, cout).astype(jnp.bfloat16)
    wb = p['bypass']['w'].reshape(cin, cout).astype(jnp.bfloat16)
    b1 = p['conv1']['b'].reshape(1, cout)
    b2 = p['conv2']['b'].reshape(1, cout)
    bb = p['bypass']['b'].reshape(1, cout)
    flops = n * (2 * hw * (9 * cin + 9 * cout + cin) * cout + 2 * (hw // 4) * hw * cout)

    out = pl.pallas_call(
        functools.partial(_down_block_kernel, W=w, HW=hw, first=first),
        grid=(n,),
        out_shape=jax.ShapeDtypeStruct((n, hw // 4, cout), jnp.float32),
        in_specs=[
            pl.BlockSpec((1, mp, cin), lambda i: (i, 0, 0)),
            pl.BlockSpec((9 * cin, cout), lambda i: (0, 0)),
            pl.BlockSpec((1, cout), lambda i: (0, 0)),
            pl.BlockSpec((9 * cout, cout), lambda i: (0, 0)),
            pl.BlockSpec((1, cout), lambda i: (0, 0)),
            pl.BlockSpec((cin, cout), lambda i: (0, 0)),
            pl.BlockSpec((1, cout), lambda i: (0, 0)),
            pl.BlockSpec((hw, 1), lambda i: (0, 0)),
            pl.BlockSpec((hw, 1), lambda i: (0, 0)),
            pl.BlockSpec((hw // 4, hw), lambda i: (0, 0)),
        ],
        out_specs=pl.BlockSpec((1, hw // 4, cout), lambda i: (i, 0, 0)),
        scratch_shapes=[pltpu.VMEM((mp, cout), jnp.float32)],
        compiler_params=pltpu.CompilerParams(dimension_semantics=("parallel",)),
        cost_estimate=_cost(flops, xp, w1, w2, wb, pool,
                            out_bytes=n * (hw // 4) * cout * 4),
    )(xp, w1, b1, w2, b2, wb, bb, ml, mr, pool)
    return out.reshape(n, h // 2, w // 2, cout)


def _same_block(x, p):
    n, h, w, c = x.shape
    hw, mp = h * w, (h + 4) * w
    xp = _pad_rows_flat(x)
    ml, mr = _edge_masks(h, w)
    w1 = p['conv1']['w'].reshape(9 * c, c).astype(jnp.bfloat16)
    w2 = p['conv2']['w'].reshape(9 * c, c).astype(jnp.bfloat16)
    b1 = p['conv1']['b'].reshape(1, c)
    b2 = p['conv2']['b'].reshape(1, c)
    flops = n * 2 * hw * (9 * c + 9 * c) * c

    out = pl.pallas_call(
        functools.partial(_same_block_kernel, W=w, HW=hw),
        grid=(n,),
        out_shape=jax.ShapeDtypeStruct((n, hw, c), jnp.float32),
        in_specs=[
            pl.BlockSpec((1, mp, c), lambda i: (i, 0, 0)),
            pl.BlockSpec((9 * c, c), lambda i: (0, 0)),
            pl.BlockSpec((1, c), lambda i: (0, 0)),
            pl.BlockSpec((9 * c, c), lambda i: (0, 0)),
            pl.BlockSpec((1, c), lambda i: (0, 0)),
            pl.BlockSpec((hw, 1), lambda i: (0, 0)),
            pl.BlockSpec((hw, 1), lambda i: (0, 0)),
        ],
        out_specs=pl.BlockSpec((1, hw, c), lambda i: (i, 0, 0)),
        scratch_shapes=[pltpu.VMEM((mp, c), jnp.float32)],
        compiler_params=pltpu.CompilerParams(dimension_semantics=("parallel",)),
        cost_estimate=_cost(flops, xp, w1, w2, out_bytes=n * hw * c * 4),
    )(xp, w1, b1, w2, b2, ml, mr)
    return out.reshape(n, h, w, c)


def _head(feat, label, p_final, p_proj):
    n = feat.shape[0]
    wf = p_final['w'].astype(jnp.bfloat16)
    bf = p_final['b'].reshape(1, -1)
    wp = p_proj['w'].astype(jnp.bfloat16)
    bp = p_proj['b'].reshape(1, -1)
    return pl.pallas_call(
        _head_kernel,
        out_shape=jax.ShapeDtypeStruct((n, 1), jnp.float32),
        in_specs=[_vmem()] * 6,
        out_specs=_vmem(),
    )(feat, label, wf, bf, wp, bp)


# ----------------------------------------------------------------------------- forward

def discriminator_forward(params, img_nchw, label):
    """Pallas forward of Discriminator_128x128 (projection-conditional)."""
    x = jnp.transpose(img_nchw, (0, 2, 3, 1)).astype(jnp.float32)   # NCHW -> NHWC (channels in lanes)
    x = _down_block(x, params['block1'], first=True)
    x = _down_block(x, params['block2'], first=False)
    x = _down_block(x, params['block3'], first=False)
    x = _same_block(x, params['block4'])
    x = _same_block(x, params['block5'])

    n, h, w, c = x.shape
    feat = x.reshape(n, h * w, c)
    lab = label.reshape(n, 1).astype(jnp.int32)
    out = _head(feat, lab, params['final'], params['proj'])
    return out[:, 0]


# ----------------------------------------------------------------------------- params & reference

def _xavier(key, shape, fan_in, fan_out):
    bound = float((6.0 / (fan_in + fan_out)) ** 0.5)
    return jax.random.uniform(key, shape, jnp.float32, -bound, bound)


def init_params(key, nc, ndf, num_classes, projection_dim):
    keys = iter(jax.random.split(key, 40))

    def conv3(cin, cout):
        return {'w': _xavier(next(keys), (3, 3, cin, cout), 9 * cin, 9 * cout),
                'b': jax.random.uniform(next(keys), (cout,), jnp.float32, -0.1, 0.1)}

    def conv1(cin, cout):
        return {'w': _xavier(next(keys), (1, 1, cin, cout), cin, cout),
                'b': jax.random.uniform(next(keys), (cout,), jnp.float32, -0.1, 0.1)}

    def lin(cin, cout):
        return {'w': _xavier(next(keys), (cin, cout), cin, cout),
                'b': jax.random.uniform(next(keys), (cout,), jnp.float32, -0.1, 0.1)}

    return {
        'block1': {'conv1': conv3(nc, ndf), 'conv2': conv3(ndf, ndf), 'bypass': conv1(nc, ndf)},
        'block2': {'conv1': conv3(ndf, ndf), 'conv2': conv3(ndf, ndf), 'bypass': conv1(ndf, ndf)},
        'block3': {'conv1': conv3(ndf, ndf), 'conv2': conv3(ndf, ndf), 'bypass': conv1(ndf, ndf)},
        'block4': {'conv1': conv3(ndf, ndf), 'conv2': conv3(ndf, ndf)},
        'block5': {'conv1': conv3(ndf, ndf), 'conv2': conv3(ndf, ndf)},
        'final': lin(ndf, projection_dim),
        'proj': lin(num_classes, projection_dim),
    }


def reference_forward(params, img_nchw, label, num_classes):
    """Pure-JAX (XLA, f32) reference mirroring the PyTorch forward verbatim."""
    relu = lambda v: jnp.maximum(v, 0.0)

    def conv(x, p, padding):
        y = jax.lax.conv_general_dilated(x, p['w'], window_strides=(1, 1), padding=padding,
                                         dimension_numbers=('NHWC', 'HWIO', 'NHWC'))
        return y + p['b'].reshape(1, 1, 1, -1)

    def pool2(x):
        n, h, w, c = x.shape
        return x.reshape(n, h // 2, 2, w // 2, 2, c).mean(axis=(2, 4))

    x = jnp.transpose(img_nchw, (0, 2, 3, 1)).astype(jnp.float32)

    b = params['block1']  # FirstResBlockDiscriminator
    x = (pool2(conv(relu(conv(x, b['conv1'], 'SAME')), b['conv2'], 'SAME'))
         + conv(pool2(x), b['bypass'], 'VALID'))
    for name in ('block2', 'block3'):  # ResBlockDiscriminator, stride=2
        b = params[name]
        x = (pool2(conv(relu(conv(relu(x), b['conv1'], 'SAME')), b['conv2'], 'SAME'))
             + pool2(conv(x, b['bypass'], 'VALID')))
    for name in ('block4', 'block5'):  # ResBlockDiscriminator, stride=1
        b = params[name]
        x = conv(relu(conv(relu(x), b['conv1'], 'SAME')), b['conv2'], 'SAME') + x
    x = relu(x)

    feat = jnp.sum(x, axis=(1, 2))                                   # torch.sum(feat, (2, 3))
    logits = feat @ params['final']['w'] + params['final']['b']      # final_layer
    onehot = jax.nn.one_hot(label, num_classes, dtype=jnp.float32)   # form_onehot
    proj = onehot @ params['proj']['w'] + params['proj']['b']        # projection
    return jnp.sum(proj * logits, axis=1)                            # 'projection' conditioning


# ----------------------------------------------------------------------------- demo / check

if __name__ == "__main__":
    key = jax.random.PRNGKey(0)
    k_img, k_lab, k_par = jax.random.split(key, 3)

    N, NC, H, W = 2, 4, 16, 16            # small demo shapes (real model: 3x128x128)
    NDF, NUM_CLASSES, PROJ_DIM = 32, 10, 32

    img = jax.random.normal(k_img, (N, NC, H, W), dtype=jnp.float32)
    label = jax.random.randint(k_lab, (N,), 0, NUM_CLASSES, dtype=jnp.int32)
    params = init_params(k_par, NC, NDF, NUM_CLASSES, PROJ_DIM)

    fwd = jax.jit(discriminator_forward)
    out = fwd(params, img, label)
    jax.block_until_ready(out)

    ref = reference_forward(params, img, label, NUM_CLASSES)
    assert out.shape == (N,), out.shape
    # Tolerance accounts for bf16 matmul operands (f32 accumulation) vs the pure-f32 reference.
    assert jnp.allclose(out, ref, atol=1e-1, rtol=1e-1), (out, ref)

    print("KERNEL_OK")
</pallas_src>

<mosaic_0001>
module attributes {stable_mosaic.version = 11 : i64} {
  func.func @_down_block_kernel(%arg0: i32, %arg1: memref<1x320x4xf32, #tpu.memory_space<vmem>>, %arg2: memref<36x32xbf16, #tpu.memory_space<vmem>>, %arg3: memref<1x32xf32, #tpu.memory_space<vmem>>, %arg4: memref<288x32xbf16, #tpu.memory_space<vmem>>, %arg5: memref<1x32xf32, #tpu.memory_space<vmem>>, %arg6: memref<4x32xbf16, #tpu.memory_space<vmem>>, %arg7: memref<1x32xf32, #tpu.memory_space<vmem>>, %arg8: memref<256x1xf32, #tpu.memory_space<vmem>>, %arg9: memref<256x1xf32, #tpu.memory_space<vmem>>, %arg10: memref<64x256xf32, #tpu.memory_space<vmem>>, %arg11: memref<1x64x32xf32, #tpu.memory_space<vmem>>, %arg12: memref<320x32xf32, #tpu.memory_space<vmem>>) attributes {dimension_semantics = [#tpu.dimension_semantics<parallel>], iteration_bounds = array<i64: 2>, scalar_prefetch = 0 : i64, scratch_operands = 1 : i64, tpu.core_type = #tpu.core_type<tc>, window_params = [{transform_indices = @transform_0, window_bounds = array<i64: 1, 320, 4>}, {pipeline_mode = #tpu.pipeline_mode<synchronous>, transform_indices = @transform_1, window_bounds = array<i64: 36, 32>}, {pipeline_mode = #tpu.pipeline_mode<synchronous>, transform_indices = @transform_2, window_bounds = array<i64: 1, 32>}, {pipeline_mode = #tpu.pipeline_mode<synchronous>, transform_indices = @transform_3, window_bounds = array<i64: 288, 32>}, {pipeline_mode = #tpu.pipeline_mode<synchronous>, transform_indices = @transform_4, window_bounds = array<i64: 1, 32>}, {pipeline_mode = #tpu.pipeline_mode<synchronous>, transform_indices = @transform_5, window_bounds = array<i64: 4, 32>}, {pipeline_mode = #tpu.pipeline_mode<synchronous>, transform_indices = @transform_6, window_bounds = array<i64: 1, 32>}, {pipeline_mode = #tpu.pipeline_mode<synchronous>, transform_indices = @transform_7, window_bounds = array<i64: 256, 1>}, {pipeline_mode = #tpu.pipeline_mode<synchronous>, transform_indices = @transform_8, window_bounds = array<i64: 256, 1>}, {pipeline_mode = #tpu.pipeline_mode<synchronous>, transform_indices = @transform_9, window_bounds = array<i64: 64, 256>}, {transform_indices = @transform_10, window_bounds = array<i64: 1, 64, 32>}]} {
    %c0 = arith.constant 0 : index
    %c0_0 = arith.constant 0 : index
    %0 = vector.load %arg8[%c0, %c0_0] : memref<256x1xf32, #tpu.memory_space<vmem>>, vector<256x1xf32>
    %c0_1 = arith.constant 0 : index
    %c0_2 = arith.constant 0 : index
    %1 = vector.load %arg9[%c0_1, %c0_2] : memref<256x1xf32, #tpu.memory_space<vmem>>, vector<256x1xf32>
    %c0_3 = arith.constant 0 : index
    %c0_4 = arith.constant 0 : index
    %c0_5 = arith.constant 0 : index
    %2 = vector.load %arg1[%c0_3, %c0_4, %c0_5] : memref<1x320x4xf32, #tpu.memory_space<vmem>>, vector<1x320x4xf32>
    %3 = vector.shape_cast %2 : vector<1x320x4xf32> to vector<320x4xf32>
    %4 = vector.extract_strided_slice %3 {offsets = [15, 0], sizes = [256, 4], strides = [1, 1]} : vector<320x4xf32> to vector<256x4xf32>
    %5 = vector.broadcast %0 : vector<256x1xf32> to vector<256x4xf32>
    %6 = arith.mulf %4, %5 : vector<256x4xf32>
    %7 = vector.extract_strided_slice %3 {offsets = [16, 0], sizes = [256, 4], strides = [1, 1]} : vector<320x4xf32> to vector<256x4xf32>
    %8 = vector.extract_strided_slice %3 {offsets = [17, 0], sizes = [256, 4], strides = [1, 1]} : vector<320x4xf32> to vector<256x4xf32>
    %9 = vector.broadcast %1 : vector<256x1xf32> to vector<256x4xf32>
    %10 = arith.mulf %8, %9 : vector<256x4xf32>
    %11 = vector.extract_strided_slice %3 {offsets = [31, 0], sizes = [256, 4], strides = [1, 1]} : vector<320x4xf32> to vector<256x4xf32>
    %12 = vector.broadcast %0 : vector<256x1xf32> to vector<256x4xf32>
    %13 = arith.mulf %11, %12 : vector<256x4xf32>
    %14 = vector.extract_strided_slice %3 {offsets = [32, 0], sizes = [256, 4], strides = [1, 1]} : vector<320x4xf32> to vector<256x4xf32>
    %15 = vector.extract_strided_slice %3 {offsets = [33, 0], sizes = [256, 4], strides = [1, 1]} : vector<320x4xf32> to vector<256x4xf32>
    %16 = vector.broadcast %1 : vector<256x1xf32> to vector<256x4xf32>
    %17 = arith.mulf %15, %16 : vector<256x4xf32>
    %18 = vector.extract_strided_slice %3 {offsets = [47, 0], sizes = [256, 4], strides = [1, 1]} : vector<320x4xf32> to vector<256x4xf32>
    %19 = vector.broadcast %0 : vector<256x1xf32> to vector<256x4xf32>
    %20 = arith.mulf %18, %19 : vector<256x4xf32>
    %21 = vector.extract_strided_slice %3 {offsets = [48, 0], sizes = [256, 4], strides = [1, 1]} : vector<320x4xf32> to vector<256x4xf32>
    %22 = vector.extract_strided_slice %3 {offsets = [49, 0], sizes = [256, 4], strides = [1, 1]} : vector<320x4xf32> to vector<256x4xf32>
    %23 = vector.broadcast %1 : vector<256x1xf32> to vector<256x4xf32>
    %24 = arith.mulf %22, %23 : vector<256x4xf32>
    %25 = tpu.concatenate %6, %7, %10, %13, %14, %17, %20, %21, %24 in 1 : vector<256x4xf32>, vector<256x4xf32>, vector<256x4xf32>, vector<256x4xf32>, vector<256x4xf32>, vector<256x4xf32>, vector<256x4xf32>, vector<256x4xf32>, vector<256x4xf32> -> vector<256x36xf32>
    %26 = arith.truncf %25 : vector<256x36xf32> to vector<256x36xbf16>
    %c0_6 = arith.constant 0 : index
    %c0_7 = arith.constant 0 : index
    %27 = vector.load %arg2[%c0_6, %c0_7] : memref<36x32xbf16, #tpu.memory_space<vmem>>, vector<36x32xbf16>
    %cst = arith.constant dense<0.000000e+00> : vector<256x32xf32>
    %28 = tpu.matmul %26, %27, %cst {dimension_numbers = #tpu.dot_dimension_numbers<[1], [0], [0], [1], [0, 0, 1, 1], [], []>} : vector<256x36xbf16>, vector<36x32xbf16>, vector<256x32xf32> -> vector<256x32xf32>
    %c0_8 = arith.constant 0 : index
    %c0_9 = arith.constant 0 : index
    %29 = vector.load %arg3[%c0_8, %c0_9] : memref<1x32xf32, #tpu.memory_space<vmem>>, vector<1x32xf32>
    %30 = vector.broadcast %29 : vector<1x32xf32> to vector<256x32xf32>
    %31 = arith.addf %28, %30 : vector<256x32xf32>
    %cst_10 = arith.constant 0.000000e+00 : f32
    %32 = vector.broadcast %cst_10 : f32 to vector<256x32xf32>
    %33 = arith.maximumf %31, %32 : vector<256x32xf32>
    %cst_11 = arith.constant 0.000000e+00 : f32
    %34 = vector.broadcast %cst_11 : f32 to vector<320x32xf32>
    %c0_12 = arith.constant 0 : index
    %c0_13 = arith.constant 0 : index
    %35 = vector.load %arg12[%c0_12, %c0_13] : memref<320x32xf32, #tpu.memory_space<vmem>>, vector<320x32xf32>
    tpu.vector_store %arg12[%c0_12, %c0_13], %34 {strides = array<i32>} : memref<320x32xf32, #tpu.memory_space<vmem>>, vector<320x32xf32>,
    %c32 = arith.constant 32 : index
    %c0_14 = arith.constant 0 : index
    %36 = vector.load %arg12[%c32, %c0_14] : memref<320x32xf32, #tpu.memory_space<vmem>>, vector<256x32xf32>
    tpu.vector_store %arg12[%c32, %c0_14], %33 {strides = array<i32>} : memref<320x32xf32, #tpu.memory_space<vmem>>, vector<256x32xf32>,
    %c15 = arith.constant 15 : index
    %c0_15 = arith.constant 0 : index
    %37 = vector.load %arg12[%c15, %c0_15] : memref<320x32xf32, #tpu.memory_space<vmem>>, vector<256x32xf32>
    %38 = vector.broadcast %0 : vector<256x1xf32> to vector<256x32xf32>
    %39 = arith.mulf %37, %38 : vector<256x32xf32>
    %c16 = arith.constant 16 : index
    %c0_16 = arith.constant 0 : index
    %40 = vector.load %arg12[%c16, %c0_16] : memref<320x32xf32, #tpu.memory_space<vmem>>, vector<256x32xf32>
    %c17 = arith.constant 17 : index
    %c0_17 = arith.constant 0 : index
    %41 = vector.load %arg12[%c17, %c0_17] : memref<320x32xf32, #tpu.memory_space<vmem>>, vector<256x32xf32>
    %42 = vector.broadcast %1 : vector<256x1xf32> to vector<256x32xf32>
    %43 = arith.mulf %41, %42 : vector<256x32xf32>
    %c31 = arith.constant 31 : index
    %c0_18 = arith.constant 0 : index
    %44 = vector.load %arg12[%c31, %c0_18] : memref<320x32xf32, #tpu.memory_space<vmem>>, vector<256x32xf32>
    %45 = vector.broadcast %0 : vector<256x1xf32> to vector<256x32xf32>
    %46 = arith.mulf %44, %45 : vector<256x32xf32>
    %c32_19 = arith.constant 32 : index
    %c0_20 = arith.constant 0 : index
    %47 = vector.load %arg12[%c32_19, %c0_20] : memref<320x32xf32, #tpu.memory_space<vmem>>, vector<256x32xf32>
    %c33 = arith.constant 33 : index
    %c0_21 = arith.constant 0 : index
    %48 = vector.load %arg12[%c33, %c0_21] : memref<320x32xf32, #tpu.memory_space<vmem>>, vector<256x32xf32>
    %49 = vector.broadcast %1 : vector<256x1xf32> to vector<256x32xf32>
    %50 = arith.mulf %48, %49 : vector<256x32xf32>
    %c47 = arith.constant 47 : index
    %c0_22 = arith.constant 0 : index
    %51 = vector.load %arg12[%c47, %c0_22] : memref<320x32xf32, #tpu.memory_space<vmem>>, vector<256x32xf32>
    %52 = vector.broadcast %0 : vector<256x1xf32> to vector<256x32xf32>
    %53 = arith.mulf %51, %52 : vector<256x32xf32>
    %c48 = arith.constant 48 : index
    %c0_23 = arith.constant 0 : index
    %54 = vector.load %arg12[%c48, %c0_23] : memref<320x32xf32, #tpu.memory_space<vmem>>, vector<256x32xf32>
    %c49 = arith.constant 49 : index
    %c0_24 = arith.constant 0 : index
    %55 = vector.load %arg12[%c49, %c0_24] : memref<320x32xf32, #tpu.memory_space<vmem>>, vector<256x32xf32>
    %56 = vector.broadcast %1 : vector<256x1xf32> to vector<256x32xf32>
    %57 = arith.mulf %55, %56 : vector<256x32xf32>
    %58 = tpu.concatenate %39, %40, %43, %46, %47, %50, %53, %54, %57 in 1 : vector<256x32xf32>, vector<256x32xf32>, vector<256x32xf32>, vector<256x32xf32>, vector<256x32xf32>, vector<256x32xf32>, vector<256x32xf32>, vector<256x32xf32>, vector<256x32xf32> -> vector<256x288xf32>
    %59 = arith.truncf %58 : vector<256x288xf32> to vector<256x288xbf16>
    %c0_25 = arith.constant 0 : index
    %c0_26 = arith.constant 0 : index
    %60 = vector.load %arg4[%c0_25, %c0_26] : memref<288x32xbf16, #tpu.memory_space<vmem>>, vector<288x32xbf16>
    %cst_27 = arith.constant dense<0.000000e+00> : vector<256x32xf32>
    %61 = tpu.matmul %59, %60, %cst_27 {dimension_numbers = #tpu.dot_dimension_numbers<[1], [0], [0], [1], [0, 0, 1, 1], [], []>} : vector<256x288xbf16>, vector<288x32xbf16>, vector<256x32xf32> -> vector<256x32xf32>
    %c0_28 = arith.constant 0 : index
    %c0_29 = arith.constant 0 : index
    %62 = vector.load %arg5[%c0_28, %c0_29] : memref<1x32xf32, #tpu.memory_space<vmem>>, vector<1x32xf32>
    %63 = vector.broadcast %62 : vector<1x32xf32> to vector<256x32xf32>
    %64 = arith.addf %61, %63 : vector<256x32xf32>
    %65 = vector.extract_strided_slice %3 {offsets = [32, 0], sizes = [256, 4], strides = [1, 1]} : vector<320x4xf32> to vector<256x4xf32>
    %66 = arith.truncf %65 : vector<256x4xf32> to vector<256x4xbf16>
    %c0_30 = arith.constant 0 : index
    %c0_31 = arith.constant 0 : index
    %67 = vector.load %arg6[%c0_30, %c0_31] : memref<4x32xbf16, #tpu.memory_space<vmem>>, vector<4x32xbf16>
    %cst_32 = arith.constant dense<0.000000e+00> : vector<256x32xf32>
    %68 = tpu.matmul %66, %67, %cst_32 {dimension_numbers = #tpu.dot_dimension_numbers<[1], [0], [0], [1], [0, 0, 1, 1], [], []>} : vector<256x4xbf16>, vector<4x32xbf16>, vector<256x32xf32> -> vector<256x32xf32>
    %c0_33 = arith.constant 0 : index
    %c0_34 = arith.constant 0 : index
    %69 = vector.load %arg7[%c0_33, %c0_34] : memref<1x32xf32, #tpu.memory_space<vmem>>, vector<1x32xf32>
    %70 = vector.broadcast %69 : vector<1x32xf32> to vector<256x32xf32>
    %71 = arith.addf %68, %70 : vector<256x32xf32>
    %c0_35 = arith.constant 0 : index
    %c0_36 = arith.constant 0 : index
    %72 = vector.load %arg10[%c0_35, %c0_36] : memref<64x256xf32, #tpu.memory_space<vmem>>, vector<64x256xf32>
    %73 = arith.addf %64, %71 : vector<256x32xf32>
    %cst_37 = arith.constant dense<0.000000e+00> : vector<64x32xf32>
    %74 = tpu.matmul %72, %73, %cst_37 {dimension_numbers = #tpu.dot_dimension_numbers<[1], [0], [0], [1], [0, 0, 1, 1], [], []>} : vector<64x256xf32>, vector<256x32xf32>, vector<64x32xf32> -> vector<64x32xf32>
    %c0_38 = arith.constant 0 : index
    %c0_39 = arith.constant 0 : index
    %c0_40 = arith.constant 0 : index
    %75 = vector.load %arg11[%c0_38, %c0_39, %c0_40] : memref<1x64x32xf32, #tpu.memory_space<vmem>>, vector<1x64x32xf32>
    %76 = vector.shape_cast %75 : vector<1x64x32xf32> to vector<64x32xf32>
    %77 = vector.shape_cast %74 : vector<64x32xf32> to vector<1x64x32xf32>
    tpu.vector_store %arg11[%c0_38, %c0_39, %c0_40], %77 {strides = array<i32>} : memref<1x64x32xf32, #tpu.memory_space<vmem>>, vector<1x64x32xf32>,
    return
  }
  func.func @transform_0(%arg0: i32) -> (i32, i32, i32) {
    %c0_i32 = arith.constant 0 : i32
    %c0_i32_0 = arith.constant 0 : i32
    %c0_i32_1 = arith.constant 0 : i32
    return %arg0, %c0_i32, %c0_i32_0 : i32, i32, i32
  }
  func.func @transform_1(%arg0: i32) -> (i32, i32) {
    %c0_i32 = arith.constant 0 : i32
    %c0_i32_0 = arith.constant 0 : i32
    %c0_i32_1 = arith.constant 0 : i32
    return %c0_i32, %c0_i32_0 : i32, i32
  }
  func.func @transform_2(%arg0: i32) -> (i32, i32) {
    %c0_i32 = arith.constant 0 : i32
    %c0_i32_0 = arith.constant 0 : i32
    %c0_i32_1 = arith.constant 0 : i32
    return %c0_i32, %c0_i32_0 : i32, i32
  }
  func.func @transform_3(%arg0: i32) -> (i32, i32) {
    %c0_i32 = arith.constant 0 : i32
    %c0_i32_0 = arith.constant 0 : i32
    %c0_i32_1 = arith.constant 0 : i32
    return %c0_i32, %c0_i32_0 : i32, i32
  }
  func.func @transform_4(%arg0: i32) -> (i32, i32) {
    %c0_i32 = arith.constant 0 : i32
    %c0_i32_0 = arith.constant 0 : i32
    %c0_i32_1 = arith.constant 0 : i32
    return %c0_i32, %c0_i32_0 : i32, i32
  }
  func.func @transform_5(%arg0: i32) -> (i32, i32) {
    %c0_i32 = arith.constant 0 : i32
    %c0_i32_0 = arith.constant 0 : i32
    %c0_i32_1 = arith.constant 0 : i32
    return %c0_i32, %c0_i32_0 : i32, i32
  }
  func.func @transform_6(%arg0: i32) -> (i32, i32) {
    %c0_i32 = arith.constant 0 : i32
    %c0_i32_0 = arith.constant 0 : i32
    %c0_i32_1 = arith.constant 0 : i32
    return %c0_i32, %c0_i32_0 : i32, i32
  }
  func.func @transform_7(%arg0: i32) -> (i32, i32) {
    %c0_i32 = arith.constant 0 : i32
    %c0_i32_0 = arith.constant 0 : i32
    %c0_i32_1 = arith.constant 0 : i32
    return %c0_i32, %c0_i32_0 : i32, i32
  }
  func.func @transform_8(%arg0: i32) -> (i32, i32) {
    %c0_i32 = arith.constant 0 : i32
    %c0_i32_0 = arith.constant 0 : i32
    %c0_i32_1 = arith.constant 0 : i32
    return %c0_i32, %c0_i32_0 : i32, i32
  }
  func.func @transform_9(%arg0: i32) -> (i32, i32) {
    %c0_i32 = arith.constant 0 : i32
    %c0_i32_0 = arith.constant 0 : i32
    %c0_i32_1 = arith.constant 0 : i32
    return %c0_i32, %c0_i32_0 : i32, i32
  }
  func.func @transform_10(%arg0: i32) -> (i32, i32, i32) {
    %c0_i32 = arith.constant 0 : i32
    %c0_i32_0 = arith.constant 0 : i32
    %c0_i32_1 = arith.constant 0 : i32
    return %arg0, %c0_i32, %c0_i32_0 : i32, i32, i32
  }
}

module attributes {stable_mosaic.version = 11 : i64} {
  func.func @_down_block_kernel(%arg0: i32, %arg1: memref<1x96x32xf32, #tpu.memory_space<vmem>>, %arg2: memref<288x32xbf16, #tpu.memory_space<vmem>>, %arg3: memref<1x32xf32, #tpu.memory_space<vmem>>, %arg4: memref<288x32xbf16, #tpu.memory_space<vmem>>, %arg5: memref<1x32xf32, #tpu.memory_space<vmem>>, %arg6: memref<32x32xbf16, #tpu.memory_space<vmem>>, %arg7: memref<1x32xf32, #tpu.memory_space<vmem>>, %arg8: memref<64x1xf32, #tpu.memory_space<vmem>>, %arg9: memref<64x1xf32, #tpu.memory_space<vmem>>, %arg10: memref<16x64xf32, #tpu.memory_space<vmem>>, %arg11: memref<1x16x32xf32, #tpu.memory_space<vmem>>, %arg12: memref<96x32xf32, #tpu.memory_space<vmem>>) attributes {dimension_semantics = [#tpu.dimension_semantics<parallel>], iteration_bounds = array<i64: 2>, scalar_prefetch = 0 : i64, scratch_operands = 1 : i64, tpu.core_type = #tpu.core_type<tc>, window_params = [{transform_indices = @transform_0, window_bounds = array<i64: 1, 96, 32>}, {pipeline_mode = #tpu.pipeline_mode<synchronous>, transform_indices = @transform_1, window_bounds = array<i64: 288, 32>}, {pipeline_mode = #tpu.pipeline_mode<synchronous>, transform_indices = @transform_2, window_bounds = array<i64: 1, 32>}, {pipeline_mode = #tpu.pipeline_mode<synchronous>, transform_indices = @transform_3, window_bounds = array<i64: 288, 32>}, {pipeline_mode = #tpu.pipeline_mode<synchronous>, transform_indices = @transform_4, window_bounds = array<i64: 1, 32>}, {pipeline_mode = #tpu.pipeline_mode<synchronous>, transform_indices = @transform_5, window_bounds = array<i64: 32, 32>}, {pipeline_mode = #tpu.pipeline_mode<synchronous>, transform_indices = @transform_6, window_bounds = array<i64: 1, 32>}, {pipeline_mode = #tpu.pipeline_mode<synchronous>, transform_indices = @transform_7, window_bounds = array<i64: 64, 1>}, {pipeline_mode = #tpu.pipeline_mode<synchronous>, transform_indices = @transform_8, window_bounds = array<i64: 64, 1>}, {pipeline_mode = #tpu.pipeline_mode<synchronous>, transform_indices = @transform_9, window_bounds = array<i64: 16, 64>}, {transform_indices = @transform_10, window_bounds = array<i64: 1, 16, 32>}]} {
    %c0 = arith.constant 0 : index
    %c0_0 = arith.constant 0 : index
    %0 = vector.load %arg8[%c0, %c0_0] : memref<64x1xf32, #tpu.memory_space<vmem>>, vector<64x1xf32>
    %c0_1 = arith.constant 0 : index
    %c0_2 = arith.constant 0 : index
    %1 = vector.load %arg9[%c0_1, %c0_2] : memref<64x1xf32, #tpu.memory_space<vmem>>, vector<64x1xf32>
    %c0_3 = arith.constant 0 : index
    %c0_4 = arith.constant 0 : index
    %c0_5 = arith.constant 0 : index
    %2 = vector.load %arg1[%c0_3, %c0_4, %c0_5] : memref<1x96x32xf32, #tpu.memory_space<vmem>>, vector<1x96x32xf32>
    %3 = vector.shape_cast %2 : vector<1x96x32xf32> to vector<96x32xf32>
    %cst = arith.constant 0.000000e+00 : f32
    %4 = vector.broadcast %cst : f32 to vector<96x32xf32>
    %5 = arith.maximumf %3, %4 : vector<96x32xf32>
    %6 = vector.extract_strided_slice %5 {offsets = [7, 0], sizes = [64, 32], strides = [1, 1]} : vector<96x32xf32> to vector<64x32xf32>
    %7 = vector.broadcast %0 : vector<64x1xf32> to vector<64x32xf32>
    %8 = arith.mulf %6, %7 : vector<64x32xf32>
    %9 = vector.extract_strided_slice %5 {offsets = [8, 0], sizes = [64, 32], strides = [1, 1]} : vector<96x32xf32> to vector<64x32xf32>
    %10 = vector.extract_strided_slice %5 {offsets = [9, 0], sizes = [64, 32], strides = [1, 1]} : vector<96x32xf32> to vector<64x32xf32>
    %11 = vector.broadcast %1 : vector<64x1xf32> to vector<64x32xf32>
    %12 = arith.mulf %10, %11 : vector<64x32xf32>
    %13 = vector.extract_strided_slice %5 {offsets = [15, 0], sizes = [64, 32], strides = [1, 1]} : vector<96x32xf32> to vector<64x32xf32>
    %14 = vector.broadcast %0 : vector<64x1xf32> to vector<64x32xf32>
    %15 = arith.mulf %13, %14 : vector<64x32xf32>
    %16 = vector.extract_strided_slice %5 {offsets = [16, 0], sizes = [64, 32], strides = [1, 1]} : vector<96x32xf32> to vector<64x32xf32>
    %17 = vector.extract_strided_slice %5 {offsets = [17, 0], sizes = [64, 32], strides = [1, 1]} : vector<96x32xf32> to vector<64x32xf32>
    %18 = vector.broadcast %1 : vector<64x1xf32> to vector<64x32xf32>
    %19 = arith.mulf %17, %18 : vector<64x32xf32>
    %20 = vector.extract_strided_slice %5 {offsets = [23, 0], sizes = [64, 32], strides = [1, 1]} : vector<96x32xf32> to vector<64x32xf32>
    %21 = vector.broadcast %0 : vector<64x1xf32> to vector<64x32xf32>
    %22 = arith.mulf %20, %21 : vector<64x32xf32>
    %23 = vector.extract_strided_slice %5 {offsets = [24, 0], sizes = [64, 32], strides = [1, 1]} : vector<96x32xf32> to vector<64x32xf32>
    %24 = vector.extract_strided_slice %5 {offsets = [25, 0], sizes = [64, 32], strides = [1, 1]} : vector<96x32xf32> to vector<64x32xf32>
    %25 = vector.broadcast %1 : vector<64x1xf32> to vector<64x32xf32>
    %26 = arith.mulf %24, %25 : vector<64x32xf32>
    %27 = tpu.concatenate %8, %9, %12, %15, %16, %19, %22, %23, %26 in 1 : vector<64x32xf32>, vector<64x32xf32>, vector<64x32xf32>, vector<64x32xf32>, vector<64x32xf32>, vector<64x32xf32>, vector<64x32xf32>, vector<64x32xf32>, vector<64x32xf32> -> vector<64x288xf32>
    %28 = arith.truncf %27 : vector<64x288xf32> to vector<64x288xbf16>
    %c0_6 = arith.constant 0 : index
    %c0_7 = arith.constant 0 : index
    %29 = vector.load %arg2[%c0_6, %c0_7] : memref<288x32xbf16, #tpu.memory_space<vmem>>, vector<288x32xbf16>
    %cst_8 = arith.constant dense<0.000000e+00> : vector<64x32xf32>
    %30 = tpu.matmul %28, %29, %cst_8 {dimension_numbers = #tpu.dot_dimension_numbers<[1], [0], [0], [1], [0, 0, 1, 1], [], []>} : vector<64x288xbf16>, vector<288x32xbf16>, vector<64x32xf32> -> vector<64x32xf32>
    %c0_9 = arith.constant 0 : index
    %c0_10 = arith.constant 0 : index
    %31 = vector.load %arg3[%c0_9, %c0_10] : memref<1x32xf32, #tpu.memory_space<vmem>>, vector<1x32xf32>
    %32 = vector.broadcast %31 : vector<1x32xf32> to vector<64x32xf32>
    %33 = arith.addf %30, %32 : vector<64x32xf32>
    %cst_11 = arith.constant 0.000000e+00 : f32
    %34 = vector.broadcast %cst_11 : f32 to vector<64x32xf32>
    %35 = arith.maximumf %33, %34 : vector<64x32xf32>
    %cst_12 = arith.constant 0.000000e+00 : f32
    %36 = vector.broadcast %cst_12 : f32 to vector<96x32xf32>
    %c0_13 = arith.constant 0 : index
    %c0_14 = arith.constant 0 : index
    %37 = vector.load %arg12[%c0_13, %c0_14] : memref<96x32xf32, #tpu.memory_space<vmem>>, vector<96x32xf32>
    tpu.vector_store %arg12[%c0_13, %c0_14], %36 {strides = array<i32>} : memref<96x32xf32, #tpu.memory_space<vmem>>, vector<96x32xf32>,
    %c16 = arith.constant 16 : index
    %c0_15 = arith.constant 0 : index
    %38 = vector.load %arg12[%c16, %c0_15] : memref<96x32xf32, #tpu.memory_space<vmem>>, vector<64x32xf32>
    tpu.vector_store %arg12[%c16, %c0_15], %35 {strides = array<i32>} : memref<96x32xf32, #tpu.memory_space<vmem>>, vector<64x32xf32>,
    %c7 = arith.constant 7 : index
    %c0_16 = arith.constant 0 : index
    %39 = vector.load %arg12[%c7, %c0_16] : memref<96x32xf32, #tpu.memory_space<vmem>>, vector<64x32xf32>
    %40 = vector.broadcast %0 : vector<64x1xf32> to vector<64x32xf32>
    %41 = arith.mulf %39, %40 : vector<64x32xf32>
    %c8 = arith.constant 8 : index
    %c0_17 = arith.constant 0 : index
    %42 = vector.load %arg12[%c8, %c0_17] : memref<96x32xf32, #tpu.memory_space<vmem>>, vector<64x32xf32>
    %c9 = arith.constant 9 : index
    %c0_18 = arith.constant 0 : index
    %43 = vector.load %arg12[%c9, %c0_18] : memref<96x32xf32, #tpu.memory_space<vmem>>, vector<64x32xf32>
    %44 = vector.broadcast %1 : vector<64x1xf32> to vector<64x32xf32>
    %45 = arith.mulf %43, %44 : vector<64x32xf32>
    %c15 = arith.constant 15 : index
    %c0_19 = arith.constant 0 : index
    %46 = vector.load %arg12[%c15, %c0_19] : memref<96x32xf32, #tpu.memory_space<vmem>>, vector<64x32xf32>
    %47 = vector.broadcast %0 : vector<64x1xf32> to vector<64x32xf32>
    %48 = arith.mulf %46, %47 : vector<64x32xf32>
    %c16_20 = arith.constant 16 : index
    %c0_21 = arith.constant 0 : index
    %49 = vector.load %arg12[%c16_20, %c0_21] : memref<96x32xf32, #tpu.memory_space<vmem>>, vector<64x32xf32>
    %c17 = arith.constant 17 : index
    %c0_22 = arith.constant 0 : index
    %50 = vector.load %arg12[%c17, %c0_22] : memref<96x32xf32, #tpu.memory_space<vmem>>, vector<64x32xf32>
    %51 = vector.broadcast %1 : vector<64x1xf32> to vector<64x32xf32>
    %52 = arith.mulf %50, %51 : vector<64x32xf32>
    %c23 = arith.constant 23 : index
    %c0_23 = arith.constant 0 : index
    %53 = vector.load %arg12[%c23, %c0_23] : memref<96x32xf32, #tpu.memory_space<vmem>>, vector<64x32xf32>
    %54 = vector.broadcast %0 : vector<64x1xf32> to vector<64x32xf32>
    %55 = arith.mulf %53, %54 : vector<64x32xf32>
    %c24 = arith.constant 24 : index
    %c0_24 = arith.constant 0 : index
    %56 = vector.load %arg12[%c24, %c0_24] : memref<96x32xf32, #tpu.memory_space<vmem>>, vector<64x32xf32>
    %c25 = arith.constant 25 : index
    %c0_25 = arith.constant 0 : index
    %57 = vector.load %arg12[%c25, %c0_25] : memref<96x32xf32, #tpu.memory_space<vmem>>, vector<64x32xf32>
    %58 = vector.broadcast %1 : vector<64x1xf32> to vector<64x32xf32>
    %59 = arith.mulf %57, %58 : vector<64x32xf32>
    %60 = tpu.concatenate %41, %42, %45, %48, %49, %52, %55, %56, %59 in 1 : vector<64x32xf32>, vector<64x32xf32>, vector<64x32xf32>, vector<64x32xf32>, vector<64x32xf32>, vector<64x32xf32>, vector<64x32xf32>, vector<64x32xf32>, vector<64x32xf32> -> vector<64x288xf32>
    %61 = arith.truncf %60 : vector<64x288xf32> to vector<64x288xbf16>
    %c0_26 = arith.constant 0 : index
    %c0_27 = arith.constant 0 : index
    %62 = vector.load %arg4[%c0_26, %c0_27] : memref<288x32xbf16, #tpu.memory_space<vmem>>, vector<288x32xbf16>
    %cst_28 = arith.constant dense<0.000000e+00> : vector<64x32xf32>
    %63 = tpu.matmul %61, %62, %cst_28 {dimension_numbers = #tpu.dot_dimension_numbers<[1], [0], [0], [1], [0, 0, 1, 1], [], []>} : vector<64x288xbf16>, vector<288x32xbf16>, vector<64x32xf32> -> vector<64x32xf32>
    %c0_29 = arith.constant 0 : index
    %c0_30 = arith.constant 0 : index
    %64 = vector.load %arg5[%c0_29, %c0_30] : memref<1x32xf32, #tpu.memory_space<vmem>>, vector<1x32xf32>
    %65 = vector.broadcast %64 : vector<1x32xf32> to vector<64x32xf32>
    %66 = arith.addf %63, %65 : vector<64x32xf32>
    %67 = vector.extract_strided_slice %3 {offsets = [16, 0], sizes = [64, 32], strides = [1, 1]} : vector<96x32xf32> to vector<64x32xf32>
    %68 = arith.truncf %67 : vector<64x32xf32> to vector<64x32xbf16>
    %c0_31 = arith.constant 0 : index
    %c0_32 = arith.constant 0 : index
    %69 = vector.load %arg6[%c0_31, %c0_32] : memref<32x32xbf16, #tpu.memory_space<vmem>>, vector<32x32xbf16>
    %cst_33 = arith.constant dense<0.000000e+00> : vector<64x32xf32>
    %70 = tpu.matmul %68, %69, %cst_33 {dimension_numbers = #tpu.dot_dimension_numbers<[1], [0], [0], [1], [0, 0, 1, 1], [], []>} : vector<64x32xbf16>, vector<32x32xbf16>, vector<64x32xf32> -> vector<64x32xf32>
    %c0_34 = arith.constant 0 : index
    %c0_35 = arith.constant 0 : index
    %71 = vector.load %arg7[%c0_34, %c0_35] : memref<1x32xf32, #tpu.memory_space<vmem>>, vector<1x32xf32>
    %72 = vector.broadcast %71 : vector<1x32xf32> to vector<64x32xf32>
    %73 = arith.addf %70, %72 : vector<64x32xf32>
    %c0_36 = arith.constant 0 : index
    %c0_37 = arith.constant 0 : index
    %74 = vector.load %arg10[%c0_36, %c0_37] : memref<16x64xf32, #tpu.memory_space<vmem>>, vector<16x64xf32>
    %75 = arith.addf %66, %73 : vector<64x32xf32>
    %cst_38 = arith.constant dense<0.000000e+00> : vector<16x32xf32>
    %76 = tpu.matmul %74, %75, %cst_38 {dimension_numbers = #tpu.dot_dimension_numbers<[1], [0], [0], [1], [0, 0, 1, 1], [], []>} : vector<16x64xf32>, vector<64x32xf32>, vector<16x32xf32> -> vector<16x32xf32>
    %c0_39 = arith.constant 0 : index
    %c0_40 = arith.constant 0 : index
    %c0_41 = arith.constant 0 : index
    %77 = vector.load %arg11[%c0_39, %c0_40, %c0_41] : memref<1x16x32xf32, #tpu.memory_space<vmem>>, vector<1x16x32xf32>
    %78 = vector.shape_cast %77 : vector<1x16x32xf32> to vector<16x32xf32>
    %79 = vector.shape_cast %76 : vector<16x32xf32> to vector<1x16x32xf32>
    tpu.vector_store %arg11[%c0_39, %c0_40, %c0_41], %79 {strides = array<i32>} : memref<1x16x32xf32, #tpu.memory_space<vmem>>, vector<1x16x32xf32>,
    return
  }
  func.func @transform_0(%arg0: i32) -> (i32, i32, i32) {
    %c0_i32 = arith.constant 0 : i32
    %c0_i32_0 = arith.constant 0 : i32
    %c0_i32_1 = arith.constant 0 : i32
    return %arg0, %c0_i32, %c0_i32_0 : i32, i32, i32
  }
  func.func @transform_1(%arg0: i32) -> (i32, i32) {
    %c0_i32 = arith.constant 0 : i32
    %c0_i32_0 = arith.constant 0 : i32
    %c0_i32_1 = arith.constant 0 : i32
    return %c0_i32, %c0_i32_0 : i32, i32
  }
  func.func @transform_2(%arg0: i32) -> (i32, i32) {
    %c0_i32 = arith.constant 0 : i32
    %c0_i32_0 = arith.constant 0 : i32
    %c0_i32_1 = arith.constant 0 : i32
    return %c0_i32, %c0_i32_0 : i32, i32
  }
  func.func @transform_3(%arg0: i32) -> (i32, i32) {
    %c0_i32 = arith.constant 0 : i32
    %c0_i32_0 = arith.constant 0 : i32
    %c0_i32_1 = arith.constant 0 : i32
    return %c0_i32, %c0_i32_0 : i32, i32
  }
  func.func @transform_4(%arg0: i32) -> (i32, i32) {
    %c0_i32 = arith.constant 0 : i32
    %c0_i32_0 = arith.constant 0 : i32
    %c0_i32_1 = arith.constant 0 : i32
    return %c0_i32, %c0_i32_0 : i32, i32
  }
  func.func @transform_5(%arg0: i32) -> (i32, i32) {
    %c0_i32 = arith.constant 0 : i32
    %c0_i32_0 = arith.constant 0 : i32
    %c0_i32_1 = arith.constant 0 : i32
    return %c0_i32, %c0_i32_0 : i32, i32
  }
  func.func @transform_6(%arg0: i32) -> (i32, i32) {
    %c0_i32 = arith.constant 0 : i32
    %c0_i32_0 = arith.constant 0 : i32
    %c0_i32_1 = arith.constant 0 : i32
    return %c0_i32, %c0_i32_0 : i32, i32
  }
  func.func @transform_7(%arg0: i32) -> (i32, i32) {
    %c0_i32 = arith.constant 0 : i32
    %c0_i32_0 = arith.constant 0 : i32
    %c0_i32_1 = arith.constant 0 : i32
    return %c0_i32, %c0_i32_0 : i32, i32
  }
  func.func @transform_8(%arg0: i32) -> (i32, i32) {
    %c0_i32 = arith.constant 0 : i32
    %c0_i32_0 = arith.constant 0 : i32
    %c0_i32_1 = arith.constant 0 : i32
    return %c0_i32, %c0_i32_0 : i32, i32
  }
  func.func @transform_9(%arg0: i32) -> (i32, i32) {
    %c0_i32 = arith.constant 0 : i32
    %c0_i32_0 = arith.constant 0 : i32
    %c0_i32_1 = arith.constant 0 : i32
    return %c0_i32, %c0_i32_0 : i32, i32
  }
  func.func @transform_10(%arg0: i32) -> (i32, i32, i32) {
    %c0_i32 = arith.constant 0 : i32
    %c0_i32_0 = arith.constant 0 : i32
    %c0_i32_1 = arith.constant 0 : i32
    return %arg0, %c0_i32, %c0_i32_0 : i32, i32, i32
  }
}

module attributes {stable_mosaic.version = 11 : i64} {
  func.func @_down_block_kernel(%arg0: i32, %arg1: memref<1x32x32xf32, #tpu.memory_space<vmem>>, %arg2: memref<288x32xbf16, #tpu.memory_space<vmem>>, %arg3: memref<1x32xf32, #tpu.memory_space<vmem>>, %arg4: memref<288x32xbf16, #tpu.memory_space<vmem>>, %arg5: memref<1x32xf32, #tpu.memory_space<vmem>>, %arg6: memref<32x32xbf16, #tpu.memory_space<vmem>>, %arg7: memref<1x32xf32, #tpu.memory_space<vmem>>, %arg8: memref<16x1xf32, #tpu.memory_space<vmem>>, %arg9: memref<16x1xf32, #tpu.memory_space<vmem>>, %arg10: memref<4x16xf32, #tpu.memory_space<vmem>>, %arg11: memref<1x4x32xf32, #tpu.memory_space<vmem>>, %arg12: memref<32x32xf32, #tpu.memory_space<vmem>>) attributes {dimension_semantics = [#tpu.dimension_semantics<parallel>], iteration_bounds = array<i64: 2>, scalar_prefetch = 0 : i64, scratch_operands = 1 : i64, tpu.core_type = #tpu.core_type<tc>, window_params = [{transform_indices = @transform_0, window_bounds = array<i64: 1, 32, 32>}, {pipeline_mode = #tpu.pipeline_mode<synchronous>, transform_indices = @transform_1, window_bounds = array<i64: 288, 32>}, {pipeline_mode = #tpu.pipeline_mode<synchronous>, transform_indices = @transform_2, window_bounds = array<i64: 1, 32>}, {pipeline_mode = #tpu.pipeline_mode<synchronous>, transform_indices = @transform_3, window_bounds = array<i64: 288, 32>}, {pipeline_mode = #tpu.pipeline_mode<synchronous>, transform_indices = @transform_4, window_bounds = array<i64: 1, 32>}, {pipeline_mode = #tpu.pipeline_mode<synchronous>, transform_indices = @transform_5, window_bounds = array<i64: 32, 32>}, {pipeline_mode = #tpu.pipeline_mode<synchronous>, transform_indices = @transform_6, window_bounds = array<i64: 1, 32>}, {pipeline_mode = #tpu.pipeline_mode<synchronous>, transform_indices = @transform_7, window_bounds = array<i64: 16, 1>}, {pipeline_mode = #tpu.pipeline_mode<synchronous>, transform_indices = @transform_8, window_bounds = array<i64: 16, 1>}, {pipeline_mode = #tpu.pipeline_mode<synchronous>, transform_indices = @transform_9, window_bounds = array<i64: 4, 16>}, {transform_indices = @transform_10, window_bounds = array<i64: 1, 4, 32>}]} {
    %c0 = arith.constant 0 : index
    %c0_0 = arith.constant 0 : index
    %0 = vector.load %arg8[%c0, %c0_0] : memref<16x1xf32, #tpu.memory_space<vmem>>, vector<16x1xf32>
    %c0_1 = arith.constant 0 : index
    %c0_2 = arith.constant 0 : index
    %1 = vector.load %arg9[%c0_1, %c0_2] : memref<16x1xf32, #tpu.memory_space<vmem>>, vector<16x1xf32>
    %c0_3 = arith.constant 0 : index
    %c0_4 = arith.constant 0 : index
    %c0_5 = arith.constant 0 : index
    %2 = vector.load %arg1[%c0_3, %c0_4, %c0_5] : memref<1x32x32xf32, #tpu.memory_space<vmem>>, vector<1x32x32xf32>
    %3 = vector.shape_cast %2 : vector<1x32x32xf32> to vector<32x32xf32>
    %cst = arith.constant 0.000000e+00 : f32
    %4 = vector.broadcast %cst : f32 to vector<32x32xf32>
    %5 = arith.maximumf %3, %4 : vector<32x32xf32>
    %6 = vector.extract_strided_slice %5 {offsets = [3, 0], sizes = [16, 32], strides = [1, 1]} : vector<32x32xf32> to vector<16x32xf32>
    %7 = vector.broadcast %0 : vector<16x1xf32> to vector<16x32xf32>
    %8 = arith.mulf %6, %7 : vector<16x32xf32>
    %9 = vector.extract_strided_slice %5 {offsets = [4, 0], sizes = [16, 32], strides = [1, 1]} : vector<32x32xf32> to vector<16x32xf32>
    %10 = vector.extract_strided_slice %5 {offsets = [5, 0], sizes = [16, 32], strides = [1, 1]} : vector<32x32xf32> to vector<16x32xf32>
    %11 = vector.broadcast %1 : vector<16x1xf32> to vector<16x32xf32>
    %12 = arith.mulf %10, %11 : vector<16x32xf32>
    %13 = vector.extract_strided_slice %5 {offsets = [7, 0], sizes = [16, 32], strides = [1, 1]} : vector<32x32xf32> to vector<16x32xf32>
    %14 = vector.broadcast %0 : vector<16x1xf32> to vector<16x32xf32>
    %15 = arith.mulf %13, %14 : vector<16x32xf32>
    %16 = vector.extract_strided_slice %5 {offsets = [8, 0], sizes = [16, 32], strides = [1, 1]} : vector<32x32xf32> to vector<16x32xf32>
    %17 = vector.extract_strided_slice %5 {offsets = [9, 0], sizes = [16, 32], strides = [1, 1]} : vector<32x32xf32> to vector<16x32xf32>
    %18 = vector.broadcast %1 : vector<16x1xf32> to vector<16x32xf32>
    %19 = arith.mulf %17, %18 : vector<16x32xf32>
    %20 = vector.extract_strided_slice %5 {offsets = [11, 0], sizes = [16, 32], strides = [1, 1]} : vector<32x32xf32> to vector<16x32xf32>
    %21 = vector.broadcast %0 : vector<16x1xf32> to vector<16x32xf32>
    %22 = arith.mulf %20, %21 : vector<16x32xf32>
    %23 = vector.extract_strided_slice %5 {offsets = [12, 0], sizes = [16, 32], strides = [1, 1]} : vector<32x32xf32> to vector<16x32xf32>
    %24 = vector.extract_strided_slice %5 {offsets = [13, 0], sizes = [16, 32], strides = [1, 1]} : vector<32x32xf32> to vector<16x32xf32>
    %25 = vector.broadcast %1 : vector<16x1xf32> to vector<16x32xf32>
    %26 = arith.mulf %24, %25 : vector<16x32xf32>
    %27 = tpu.concatenate %8, %9, %12, %15, %16, %19, %22, %23, %26 in 1 : vector<16x32xf32>, vector<16x32xf32>, vector<16x32xf32>, vector<16x32xf32>, vector<16x32xf32>, vector<16x32xf32>, vector<16x32xf32>, vector<16x32xf32>, vector<16x32xf32> -> vector<16x288xf32>
    %28 = arith.truncf %27 : vector<16x288xf32> to vector<16x288xbf16>
    %c0_6 = arith.constant 0 : index
    %c0_7 = arith.constant 0 : index
    %29 = vector.load %arg2[%c0_6, %c0_7] : memref<288x32xbf16, #tpu.memory_space<vmem>>, vector<288x32xbf16>
    %cst_8 = arith.constant dense<0.000000e+00> : vector<16x32xf32>
    %30 = tpu.matmul %28, %29, %cst_8 {dimension_numbers = #tpu.dot_dimension_numbers<[1], [0], [0], [1], [0, 0, 1, 1], [], []>} : vector<16x288xbf16>, vector<288x32xbf16>, vector<16x32xf32> -> vector<16x32xf32>
    %c0_9 = arith.constant 0 : index
    %c0_10 = arith.constant 0 : index
    %31 = vector.load %arg3[%c0_9, %c0_10] : memref<1x32xf32, #tpu.memory_space<vmem>>, vector<1x32xf32>
    %32 = vector.broadcast %31 : vector<1x32xf32> to vector<16x32xf32>
    %33 = arith.addf %30, %32 : vector<16x32xf32>
    %cst_11 = arith.constant 0.000000e+00 : f32
    %34 = vector.broadcast %cst_11 : f32 to vector<16x32xf32>
    %35 = arith.maximumf %33, %34 : vector<16x32xf32>
    %cst_12 = arith.constant 0.000000e+00 : f32
    %36 = vector.broadcast %cst_12 : f32 to vector<32x32xf32>
    %c0_13 = arith.constant 0 : index
    %c0_14 = arith.constant 0 : index
    %37 = vector.load %arg12[%c0_13, %c0_14] : memref<32x32xf32, #tpu.memory_space<vmem>>, vector<32x32xf32>
    tpu.vector_store %arg12[%c0_13, %c0_14], %36 {strides = array<i32>} : memref<32x32xf32, #tpu.memory_space<vmem>>, vector<32x32xf32>,
    %c8 = arith.constant 8 : index
    %c0_15 = arith.constant 0 : index
    %38 = vector.load %arg12[%c8, %c0_15] : memref<32x32xf32, #tpu.memory_space<vmem>>, vector<16x32xf32>
    tpu.vector_store %arg12[%c8, %c0_15], %35 {strides = array<i32>} : memref<32x32xf32, #tpu.memory_space<vmem>>, vector<16x32xf32>,
    %c3 = arith.constant 3 : index
    %c0_16 = arith.constant 0 : index
    %39 = vector.load %arg12[%c3, %c0_16] : memref<32x32xf32, #tpu.memory_space<vmem>>, vector<16x32xf32>
    %40 = vector.broadcast %0 : vector<16x1xf32> to vector<16x32xf32>
    %41 = arith.mulf %39, %40 : vector<16x32xf32>
    %c4 = arith.constant 4 : index
    %c0_17 = arith.constant 0 : index
    %42 = vector.load %arg12[%c4, %c0_17] : memref<32x32xf32, #tpu.memory_space<vmem>>, vector<16x32xf32>
    %c5 = arith.constant 5 : index
    %c0_18 = arith.constant 0 : index
    %43 = vector.load %arg12[%c5, %c0_18] : memref<32x32xf32, #tpu.memory_space<vmem>>, vector<16x32xf32>
    %44 = vector.broadcast %1 : vector<16x1xf32> to vector<16x32xf32>
    %45 = arith.mulf %43, %44 : vector<16x32xf32>
    %c7 = arith.constant 7 : index
    %c0_19 = arith.constant 0 : index
    %46 = vector.load %arg12[%c7, %c0_19] : memref<32x32xf32, #tpu.memory_space<vmem>>, vector<16x32xf32>
    %47 = vector.broadcast %0 : vector<16x1xf32> to vector<16x32xf32>
    %48 = arith.mulf %46, %47 : vector<16x32xf32>
    %c8_20 = arith.constant 8 : index
    %c0_21 = arith.constant 0 : index
    %49 = vector.load %arg12[%c8_20, %c0_21] : memref<32x32xf32, #tpu.memory_space<vmem>>, vector<16x32xf32>
    %c9 = arith.constant 9 : index
    %c0_22 = arith.constant 0 : index
    %50 = vector.load %arg12[%c9, %c0_22] : memref<32x32xf32, #tpu.memory_space<vmem>>, vector<16x32xf32>
    %51 = vector.broadcast %1 : vector<16x1xf32> to vector<16x32xf32>
    %52 = arith.mulf %50, %51 : vector<16x32xf32>
    %c11 = arith.constant 11 : index
    %c0_23 = arith.constant 0 : index
    %53 = vector.load %arg12[%c11, %c0_23] : memref<32x32xf32, #tpu.memory_space<vmem>>, vector<16x32xf32>
    %54 = vector.broadcast %0 : vector<16x1xf32> to vector<16x32xf32>
    %55 = arith.mulf %53, %54 : vector<16x32xf32>
    %c12 = arith.constant 12 : index
    %c0_24 = arith.constant 0 : index
    %56 = vector.load %arg12[%c12, %c0_24] : memref<32x32xf32, #tpu.memory_space<vmem>>, vector<16x32xf32>
    %c13 = arith.constant 13 : index
    %c0_25 = arith.constant 0 : index
    %57 = vector.load %arg12[%c13, %c0_25] : memref<32x32xf32, #tpu.memory_space<vmem>>, vector<16x32xf32>
    %58 = vector.broadcast %1 : vector<16x1xf32> to vector<16x32xf32>
    %59 = arith.mulf %57, %58 : vector<16x32xf32>
    %60 = tpu.concatenate %41, %42, %45, %48, %49, %52, %55, %56, %59 in 1 : vector<16x32xf32>, vector<16x32xf32>, vector<16x32xf32>, vector<16x32xf32>, vector<16x32xf32>, vector<16x32xf32>, vector<16x32xf32>, vector<16x32xf32>, vector<16x32xf32> -> vector<16x288xf32>
    %61 = arith.truncf %60 : vector<16x288xf32> to vector<16x288xbf16>
    %c0_26 = arith.constant 0 : index
    %c0_27 = arith.constant 0 : index
    %62 = vector.load %arg4[%c0_26, %c0_27] : memref<288x32xbf16, #tpu.memory_space<vmem>>, vector<288x32xbf16>
    %cst_28 = arith.constant dense<0.000000e+00> : vector<16x32xf32>
    %63 = tpu.matmul %61, %62, %cst_28 {dimension_numbers = #tpu.dot_dimension_numbers<[1], [0], [0], [1], [0, 0, 1, 1], [], []>} : vector<16x288xbf16>, vector<288x32xbf16>, vector<16x32xf32> -> vector<16x32xf32>
    %c0_29 = arith.constant 0 : index
    %c0_30 = arith.constant 0 : index
    %64 = vector.load %arg5[%c0_29, %c0_30] : memref<1x32xf32, #tpu.memory_space<vmem>>, vector<1x32xf32>
    %65 = vector.broadcast %64 : vector<1x32xf32> to vector<16x32xf32>
    %66 = arith.addf %63, %65 : vector<16x32xf32>
    %67 = vector.extract_strided_slice %3 {offsets = [8, 0], sizes = [16, 32], strides = [1, 1]} : vector<32x32xf32> to vector<16x32xf32>
    %68 = arith.truncf %67 : vector<16x32xf32> to vector<16x32xbf16>
    %c0_31 = arith.constant 0 : index
    %c0_32 = arith.constant 0 : index
    %69 = vector.load %arg6[%c0_31, %c0_32] : memref<32x32xbf16, #tpu.memory_space<vmem>>, vector<32x32xbf16>
    %cst_33 = arith.constant dense<0.000000e+00> : vector<16x32xf32>
    %70 = tpu.matmul %68, %69, %cst_33 {dimension_numbers = #tpu.dot_dimension_numbers<[1], [0], [0], [1], [0, 0, 1, 1], [], []>} : vector<16x32xbf16>, vector<32x32xbf16>, vector<16x32xf32> -> vector<16x32xf32>
    %c0_34 = arith.constant 0 : index
    %c0_35 = arith.constant 0 : index
    %71 = vector.load %arg7[%c0_34, %c0_35] : memref<1x32xf32, #tpu.memory_space<vmem>>, vector<1x32xf32>
    %72 = vector.broadcast %71 : vector<1x32xf32> to vector<16x32xf32>
    %73 = arith.addf %70, %72 : vector<16x32xf32>
    %c0_36 = arith.constant 0 : index
    %c0_37 = arith.constant 0 : index
    %74 = vector.load %arg10[%c0_36, %c0_37] : memref<4x16xf32, #tpu.memory_space<vmem>>, vector<4x16xf32>
    %75 = arith.addf %66, %73 : vector<16x32xf32>
    %cst_38 = arith.constant dense<0.000000e+00> : vector<4x32xf32>
    %76 = tpu.matmul %74, %75, %cst_38 {dimension_numbers = #tpu.dot_dimension_numbers<[1], [0], [0], [1], [0, 0, 1, 1], [], []>} : vector<4x16xf32>, vector<16x32xf32>, vector<4x32xf32> -> vector<4x32xf32>
    %c0_39 = arith.constant 0 : index
    %c0_40 = arith.constant 0 : index
    %c0_41 = arith.constant 0 : index
    %77 = vector.load %arg11[%c0_39, %c0_40, %c0_41] : memref<1x4x32xf32, #tpu.memory_space<vmem>>, vector<1x4x32xf32>
    %78 = vector.shape_cast %77 : vector<1x4x32xf32> to vector<4x32xf32>
    %79 = vector.shape_cast %76 : vector<4x32xf32> to vector<1x4x32xf32>
    tpu.vector_store %arg11[%c0_39, %c0_40, %c0_41], %79 {strides = array<i32>} : memref<1x4x32xf32, #tpu.memory_space<vmem>>, vector<1x4x32xf32>,
    return
  }
  func.func @transform_0(%arg0: i32) -> (i32, i32, i32) {
    %c0_i32 = arith.constant 0 : i32
    %c0_i32_0 = arith.constant 0 : i32
    %c0_i32_1 = arith.constant 0 : i32
    return %arg0, %c0_i32, %c0_i32_0 : i32, i32, i32
  }
  func.func @transform_1(%arg0: i32) -> (i32, i32) {
    %c0_i32 = arith.constant 0 : i32
    %c0_i32_0 = arith.constant 0 : i32
    %c0_i32_1 = arith.constant 0 : i32
    return %c0_i32, %c0_i32_0 : i32, i32
  }
  func.func @transform_2(%arg0: i32) -> (i32, i32) {
    %c0_i32 = arith.constant 0 : i32
    %c0_i32_0 = arith.constant 0 : i32
    %c0_i32_1 = arith.constant 0 : i32
    return %c0_i32, %c0_i32_0 : i32, i32
  }
  func.func @transform_3(%arg0: i32) -> (i32, i32) {
    %c0_i32 = arith.constant 0 : i32
    %c0_i32_0 = arith.constant 0 : i32
    %c0_i32_1 = arith.constant 0 : i32
    return %c0_i32, %c0_i32_0 : i32, i32
  }
  func.func @transform_4(%arg0: i32) -> (i32, i32) {
    %c0_i32 = arith.constant 0 : i32
    %c0_i32_0 = arith.constant 0 : i32
    %c0_i32_1 = arith.constant 0 : i32
    return %c0_i32, %c0_i32_0 : i32, i32
  }
  func.func @transform_5(%arg0: i32) -> (i32, i32) {
    %c0_i32 = arith.constant 0 : i32
    %c0_i32_0 = arith.constant 0 : i32
    %c0_i32_1 = arith.constant 0 : i32
    return %c0_i32, %c0_i32_0 : i32, i32
  }
  func.func @transform_6(%arg0: i32) -> (i32, i32) {
    %c0_i32 = arith.constant 0 : i32
    %c0_i32_0 = arith.constant 0 : i32
    %c0_i32_1 = arith.constant 0 : i32
    return %c0_i32, %c0_i32_0 : i32, i32
  }
  func.func @transform_7(%arg0: i32) -> (i32, i32) {
    %c0_i32 = arith.constant 0 : i32
    %c0_i32_0 = arith.constant 0 : i32
    %c0_i32_1 = arith.constant 0 : i32
    return %c0_i32, %c0_i32_0 : i32, i32
  }
  func.func @transform_8(%arg0: i32) -> (i32, i32) {
    %c0_i32 = arith.constant 0 : i32
    %c0_i32_0 = arith.constant 0 : i32
    %c0_i32_1 = arith.constant 0 : i32
    return %c0_i32, %c0_i32_0 : i32, i32
  }
  func.func @transform_9(%arg0: i32) -> (i32, i32) {
    %c0_i32 = arith.constant 0 : i32
    %c0_i32_0 = arith.constant 0 : i32
    %c0_i32_1 = arith.constant 0 : i32
    return %c0_i32, %c0_i32_0 : i32, i32
  }
  func.func @transform_10(%arg0: i32) -> (i32, i32, i32) {
    %c0_i32 = arith.constant 0 : i32
    %c0_i32_0 = arith.constant 0 : i32
    %c0_i32_1 = arith.constant 0 : i32
    return %arg0, %c0_i32, %c0_i32_0 : i32, i32, i32
  }
}

module attributes {stable_mosaic.version = 11 : i64} {
  func.func @_same_block_kernel(%arg0: i32, %arg1: memref<1x12x32xf32, #tpu.memory_space<vmem>>, %arg2: memref<288x32xbf16, #tpu.memory_space<vmem>>, %arg3: memref<1x32xf32, #tpu.memory_space<vmem>>, %arg4: memref<288x32xbf16, #tpu.memory_space<vmem>>, %arg5: memref<1x32xf32, #tpu.memory_space<vmem>>, %arg6: memref<4x1xf32, #tpu.memory_space<vmem>>, %arg7: memref<4x1xf32, #tpu.memory_space<vmem>>, %arg8: memref<1x4x32xf32, #tpu.memory_space<vmem>>, %arg9: memref<12x32xf32, #tpu.memory_space<vmem>>) attributes {dimension_semantics = [#tpu.dimension_semantics<parallel>], iteration_bounds = array<i64: 2>, scalar_prefetch = 0 : i64, scratch_operands = 1 : i64, tpu.core_type = #tpu.core_type<tc>, window_params = [{transform_indices = @transform_0, window_bounds = array<i64: 1, 12, 32>}, {pipeline_mode = #tpu.pipeline_mode<synchronous>, transform_indices = @transform_1, window_bounds = array<i64: 288, 32>}, {pipeline_mode = #tpu.pipeline_mode<synchronous>, transform_indices = @transform_2, window_bounds = array<i64: 1, 32>}, {pipeline_mode = #tpu.pipeline_mode<synchronous>, transform_indices = @transform_3, window_bounds = array<i64: 288, 32>}, {pipeline_mode = #tpu.pipeline_mode<synchronous>, transform_indices = @transform_4, window_bounds = array<i64: 1, 32>}, {pipeline_mode = #tpu.pipeline_mode<synchronous>, transform_indices = @transform_5, window_bounds = array<i64: 4, 1>}, {pipeline_mode = #tpu.pipeline_mode<synchronous>, transform_indices = @transform_6, window_bounds = array<i64: 4, 1>}, {transform_indices = @transform_7, window_bounds = array<i64: 1, 4, 32>}]} {
    %c0 = arith.constant 0 : index
    %c0_0 = arith.constant 0 : index
    %0 = vector.load %arg6[%c0, %c0_0] : memref<4x1xf32, #tpu.memory_space<vmem>>, vector<4x1xf32>
    %c0_1 = arith.constant 0 : index
    %c0_2 = arith.constant 0 : index
    %1 = vector.load %arg7[%c0_1, %c0_2] : memref<4x1xf32, #tpu.memory_space<vmem>>, vector<4x1xf32>
    %c0_3 = arith.constant 0 : index
    %c0_4 = arith.constant 0 : index
    %c0_5 = arith.constant 0 : index
    %2 = vector.load %arg1[%c0_3, %c0_4, %c0_5] : memref<1x12x32xf32, #tpu.memory_space<vmem>>, vector<1x12x32xf32>
    %3 = vector.shape_cast %2 : vector<1x12x32xf32> to vector<12x32xf32>
    %cst = arith.constant 0.000000e+00 : f32
    %4 = vector.broadcast %cst : f32 to vector<12x32xf32>
    %5 = arith.maximumf %3, %4 : vector<12x32xf32>
    %6 = vector.extract_strided_slice %5 {offsets = [1, 0], sizes = [4, 32], strides = [1, 1]} : vector<12x32xf32> to vector<4x32xf32>
    %7 = vector.broadcast %0 : vector<4x1xf32> to vector<4x32xf32>
    %8 = arith.mulf %6, %7 : vector<4x32xf32>
    %9 = vector.extract_strided_slice %5 {offsets = [2, 0], sizes = [4, 32], strides = [1, 1]} : vector<12x32xf32> to vector<4x32xf32>
    %10 = vector.extract_strided_slice %5 {offsets = [3, 0], sizes = [4, 32], strides = [1, 1]} : vector<12x32xf32> to vector<4x32xf32>
    %11 = vector.broadcast %1 : vector<4x1xf32> to vector<4x32xf32>
    %12 = arith.mulf %10, %11 : vector<4x32xf32>
    %13 = vector.extract_strided_slice %5 {offsets = [3, 0], sizes = [4, 32], strides = [1, 1]} : vector<12x32xf32> to vector<4x32xf32>
    %14 = vector.broadcast %0 : vector<4x1xf32> to vector<4x32xf32>
    %15 = arith.mulf %13, %14 : vector<4x32xf32>
    %16 = vector.extract_strided_slice %5 {offsets = [4, 0], sizes = [4, 32], strides = [1, 1]} : vector<12x32xf32> to vector<4x32xf32>
    %17 = vector.extract_strided_slice %5 {offsets = [5, 0], sizes = [4, 32], strides = [1, 1]} : vector<12x32xf32> to vector<4x32xf32>
    %18 = vector.broadcast %1 : vector<4x1xf32> to vector<4x32xf32>
    %19 = arith.mulf %17, %18 : vector<4x32xf32>
    %20 = vector.extract_strided_slice %5 {offsets = [5, 0], sizes = [4, 32], strides = [1, 1]} : vector<12x32xf32> to vector<4x32xf32>
    %21 = vector.broadcast %0 : vector<4x1xf32> to vector<4x32xf32>
    %22 = arith.mulf %20, %21 : vector<4x32xf32>
    %23 = vector.extract_strided_slice %5 {offsets = [6, 0], sizes = [4, 32], strides = [1, 1]} : vector<12x32xf32> to vector<4x32xf32>
    %24 = vector.extract_strided_slice %5 {offsets = [7, 0], sizes = [4, 32], strides = [1, 1]} : vector<12x32xf32> to vector<4x32xf32>
    %25 = vector.broadcast %1 : vector<4x1xf32> to vector<4x32xf32>
    %26 = arith.mulf %24, %25 : vector<4x32xf32>
    %27 = tpu.concatenate %8, %9, %12, %15, %16, %19, %22, %23, %26 in 1 : vector<4x32xf32>, vector<4x32xf32>, vector<4x32xf32>, vector<4x32xf32>, vector<4x32xf32>, vector<4x32xf32>, vector<4x32xf32>, vector<4x32xf32>, vector<4x32xf32> -> vector<4x288xf32>
    %28 = arith.truncf %27 : vector<4x288xf32> to vector<4x288xbf16>
    %c0_6 = arith.constant 0 : index
    %c0_7 = arith.constant 0 : index
    %29 = vector.load %arg2[%c0_6, %c0_7] : memref<288x32xbf16, #tpu.memory_space<vmem>>, vector<288x32xbf16>
    %cst_8 = arith.constant dense<0.000000e+00> : vector<4x32xf32>
    %30 = tpu.matmul %28, %29, %cst_8 {dimension_numbers = #tpu.dot_dimension_numbers<[1], [0], [0], [1], [0, 0, 1, 1], [], []>} : vector<4x288xbf16>, vector<288x32xbf16>, vector<4x32xf32> -> vector<4x32xf32>
    %c0_9 = arith.constant 0 : index
    %c0_10 = arith.constant 0 : index
    %31 = vector.load %arg3[%c0_9, %c0_10] : memref<1x32xf32, #tpu.memory_space<vmem>>, vector<1x32xf32>
    %32 = vector.broadcast %31 : vector<1x32xf32> to vector<4x32xf32>
    %33 = arith.addf %30, %32 : vector<4x32xf32>
    %cst_11 = arith.constant 0.000000e+00 : f32
    %34 = vector.broadcast %cst_11 : f32 to vector<4x32xf32>
    %35 = arith.maximumf %33, %34 : vector<4x32xf32>
    %cst_12 = arith.constant 0.000000e+00 : f32
    %36 = vector.broadcast %cst_12 : f32 to vector<12x32xf32>
    %c0_13 = arith.constant 0 : index
    %c0_14 = arith.constant 0 : index
    %37 = vector.load %arg9[%c0_13, %c0_14] : memref<12x32xf32, #tpu.memory_space<vmem>>, vector<12x32xf32>
    tpu.vector_store %arg9[%c0_13, %c0_14], %36 {strides = array<i32>} : memref<12x32xf32, #tpu.memory_space<vmem>>, vector<12x32xf32>,
    %c4 = arith.constant 4 : index
    %c0_15 = arith.constant 0 : index
    %38 = vector.load %arg9[%c4, %c0_15] : memref<12x32xf32, #tpu.memory_space<vmem>>, vector<4x32xf32>
    tpu.vector_store %arg9[%c4, %c0_15], %35 {strides = array<i32>} : memref<12x32xf32, #tpu.memory_space<vmem>>, vector<4x32xf32>,
    %c1 = arith.constant 1 : index
    %c0_16 = arith.constant 0 : index
    %39 = vector.load %arg9[%c1, %c0_16] : memref<12x32xf32, #tpu.memory_space<vmem>>, vector<4x32xf32>
    %40 = vector.broadcast %0 : vector<4x1xf32> to vector<4x32xf32>
    %41 = arith.mulf %39, %40 : vector<4x32xf32>
    %c2 = arith.constant 2 : index
    %c0_17 = arith.constant 0 : index
    %42 = vector.load %arg9[%c2, %c0_17] : memref<12x32xf32, #tpu.memory_space<vmem>>, vector<4x32xf32>
    %c3 = arith.constant 3 : index
    %c0_18 = arith.constant 0 : index
    %43 = vector.load %arg9[%c3, %c0_18] : memref<12x32xf32, #tpu.memory_space<vmem>>, vector<4x32xf32>
    %44 = vector.broadcast %1 : vector<4x1xf32> to vector<4x32xf32>
    %45 = arith.mulf %43, %44 : vector<4x32xf32>
    %c3_19 = arith.constant 3 : index
    %c0_20 = arith.constant 0 : index
    %46 = vector.load %arg9[%c3_19, %c0_20] : memref<12x32xf32, #tpu.memory_space<vmem>>, vector<4x32xf32>
    %47 = vector.broadcast %0 : vector<4x1xf32> to vector<4x32xf32>
    %48 = arith.mulf %46, %47 : vector<4x32xf32>
    %c4_21 = arith.constant 4 : index
    %c0_22 = arith.constant 0 : index
    %49 = vector.load %arg9[%c4_21, %c0_22] : memref<12x32xf32, #tpu.memory_space<vmem>>, vector<4x32xf32>
    %c5 = arith.constant 5 : index
    %c0_23 = arith.constant 0 : index
    %50 = vector.load %arg9[%c5, %c0_23] : memref<12x32xf32, #tpu.memory_space<vmem>>, vector<4x32xf32>
    %51 = vector.broadcast %1 : vector<4x1xf32> to vector<4x32xf32>
    %52 = arith.mulf %50, %51 : vector<4x32xf32>
    %c5_24 = arith.constant 5 : index
    %c0_25 = arith.constant 0 : index
    %53 = vector.load %arg9[%c5_24, %c0_25] : memref<12x32xf32, #tpu.memory_space<vmem>>, vector<4x32xf32>
    %54 = vector.broadcast %0 : vector<4x1xf32> to vector<4x32xf32>
    %55 = arith.mulf %53, %54 : vector<4x32xf32>
    %c6 = arith.constant 6 : index
    %c0_26 = arith.constant 0 : index
    %56 = vector.load %arg9[%c6, %c0_26] : memref<12x32xf32, #tpu.memory_space<vmem>>, vector<4x32xf32>
    %c7 = arith.constant 7 : index
    %c0_27 = arith.constant 0 : index
    %57 = vector.load %arg9[%c7, %c0_27] : memref<12x32xf32, #tpu.memory_space<vmem>>, vector<4x32xf32>
    %58 = vector.broadcast %1 : vector<4x1xf32> to vector<4x32xf32>
    %59 = arith.mulf %57, %58 : vector<4x32xf32>
    %60 = tpu.concatenate %41, %42, %45, %48, %49, %52, %55, %56, %59 in 1 : vector<4x32xf32>, vector<4x32xf32>, vector<4x32xf32>, vector<4x32xf32>, vector<4x32xf32>, vector<4x32xf32>, vector<4x32xf32>, vector<4x32xf32>, vector<4x32xf32> -> vector<4x288xf32>
    %61 = arith.truncf %60 : vector<4x288xf32> to vector<4x288xbf16>
    %c0_28 = arith.constant 0 : index
    %c0_29 = arith.constant 0 : index
    %62 = vector.load %arg4[%c0_28, %c0_29] : memref<288x32xbf16, #tpu.memory_space<vmem>>, vector<288x32xbf16>
    %cst_30 = arith.constant dense<0.000000e+00> : vector<4x32xf32>
    %63 = tpu.matmul %61, %62, %cst_30 {dimension_numbers = #tpu.dot_dimension_numbers<[1], [0], [0], [1], [0, 0, 1, 1], [], []>} : vector<4x288xbf16>, vector<288x32xbf16>, vector<4x32xf32> -> vector<4x32xf32>
    %c0_31 = arith.constant 0 : index
    %c0_32 = arith.constant 0 : index
    %64 = vector.load %arg5[%c0_31, %c0_32] : memref<1x32xf32, #tpu.memory_space<vmem>>, vector<1x32xf32>
    %65 = vector.broadcast %64 : vector<1x32xf32> to vector<4x32xf32>
    %66 = arith.addf %63, %65 : vector<4x32xf32>
    %67 = vector.extract_strided_slice %3 {offsets = [4, 0], sizes = [4, 32], strides = [1, 1]} : vector<12x32xf32> to vector<4x32xf32>
    %68 = arith.addf %66, %67 : vector<4x32xf32>
    %c0_33 = arith.constant 0 : index
    %c0_34 = arith.constant 0 : index
    %c0_35 = arith.constant 0 : index
    %69 = vector.load %arg8[%c0_33, %c0_34, %c0_35] : memref<1x4x32xf32, #tpu.memory_space<vmem>>, vector<1x4x32xf32>
    %70 = vector.shape_cast %69 : vector<1x4x32xf32> to vector<4x32xf32>
    %71 = vector.shape_cast %68 : vector<4x32xf32> to vector<1x4x32xf32>
    tpu.vector_store %arg8[%c0_33, %c0_34, %c0_35], %71 {strides = array<i32>} : memref<1x4x32xf32, #tpu.memory_space<vmem>>, vector<1x4x32xf32>,
    return
  }
  func.func @transform_0(%arg0: i32) -> (i32, i32, i32) {
    %c0_i32 = arith.constant 0 : i32
    %c0_i32_0 = arith.constant 0 : i32
    %c0_i32_1 = arith.constant 0 : i32
    return %arg0, %c0_i32, %c0_i32_0 : i32, i32, i32
  }
  func.func @transform_1(%arg0: i32) -> (i32, i32) {
    %c0_i32 = arith.constant 0 : i32
    %c0_i32_0 = arith.constant 0 : i32
    %c0_i32_1 = arith.constant 0 : i32
    return %c0_i32, %c0_i32_0 : i32, i32
  }
  func.func @transform_2(%arg0: i32) -> (i32, i32) {
    %c0_i32 = arith.constant 0 : i32
    %c0_i32_0 = arith.constant 0 : i32
    %c0_i32_1 = arith.constant 0 : i32
    return %c0_i32, %c0_i32_0 : i32, i32
  }
  func.func @transform_3(%arg0: i32) -> (i32, i32) {
    %c0_i32 = arith.constant 0 : i32
    %c0_i32_0 = arith.constant 0 : i32
    %c0_i32_1 = arith.constant 0 : i32
    return %c0_i32, %c0_i32_0 : i32, i32
  }
  func.func @transform_4(%arg0: i32) -> (i32, i32) {
    %c0_i32 = arith.constant 0 : i32
    %c0_i32_0 = arith.constant 0 : i32
    %c0_i32_1 = arith.constant 0 : i32
    return %c0_i32, %c0_i32_0 : i32, i32
  }
  func.func @transform_5(%arg0: i32) -> (i32, i32) {
    %c0_i32 = arith.constant 0 : i32
    %c0_i32_0 = arith.constant 0 : i32
    %c0_i32_1 = arith.constant 0 : i32
    return %c0_i32, %c0_i32_0 : i32, i32
  }
  func.func @transform_6(%arg0: i32) -> (i32, i32) {
    %c0_i32 = arith.constant 0 : i32
    %c0_i32_0 = arith.constant 0 : i32
    %c0_i32_1 = arith.constant 0 : i32
    return %c0_i32, %c0_i32_0 : i32, i32
  }
  func.func @transform_7(%arg0: i32) -> (i32, i32, i32) {
    %c0_i32 = arith.constant 0 : i32
    %c0_i32_0 = arith.constant 0 : i32
    %c0_i32_1 = arith.constant 0 : i32
    return %arg0, %c0_i32, %c0_i32_0 : i32, i32, i32
  }
}

module attributes {stable_mosaic.version = 11 : i64} {
  func.func @_head_kernel(%arg0: memref<2x4x32xf32, #tpu.memory_space<vmem>>, %arg1: memref<2x1xi32, #tpu.memory_space<vmem>>, %arg2: memref<32x32xbf16, #tpu.memory_space<vmem>>, %arg3: memref<1x32xf32, #tpu.memory_space<vmem>>, %arg4: memref<10x32xbf16, #tpu.memory_space<vmem>>, %arg5: memref<1x32xf32, #tpu.memory_space<vmem>>, %arg6: memref<2x1xf32, #tpu.memory_space<vmem>>) attributes {dimension_semantics = [], scalar_prefetch = 0 : i64, scratch_operands = 0 : i64, tpu.core_type = #tpu.core_type<tc>} {
    %c0 = arith.constant 0 : index
    %c0_0 = arith.constant 0 : index
    %c0_1 = arith.constant 0 : index
    %0 = vector.load %arg0[%c0, %c0_0, %c0_1] : memref<2x4x32xf32, #tpu.memory_space<vmem>>, vector<2x4x32xf32>
    %cst = arith.constant 0.000000e+00 : f32
    %1 = vector.broadcast %cst : f32 to vector<2x4x32xf32>
    %2 = arith.maximumf %0, %1 : vector<2x4x32xf32>
    %cst_2 = arith.constant dense<0.000000e+00> : vector<2x32xf32>
    %3 = vector.multi_reduction <add>, %2, %cst_2 [1] : vector<2x4x32xf32> to vector<2x32xf32>
    %4 = arith.truncf %3 : vector<2x32xf32> to vector<2x32xbf16>
    %c0_3 = arith.constant 0 : index
    %c0_4 = arith.constant 0 : index
    %5 = vector.load %arg2[%c0_3, %c0_4] : memref<32x32xbf16, #tpu.memory_space<vmem>>, vector<32x32xbf16>
    %cst_5 = arith.constant dense<0.000000e+00> : vector<2x32xf32>
    %6 = tpu.matmul %4, %5, %cst_5 {dimension_numbers = #tpu.dot_dimension_numbers<[1], [0], [0], [1], [0, 0, 1, 1], [], []>} : vector<2x32xbf16>, vector<32x32xbf16>, vector<2x32xf32> -> vector<2x32xf32>
    %c0_6 = arith.constant 0 : index
    %c0_7 = arith.constant 0 : index
    %7 = vector.load %arg3[%c0_6, %c0_7] : memref<1x32xf32, #tpu.memory_space<vmem>>, vector<1x32xf32>
    %8 = vector.broadcast %7 : vector<1x32xf32> to vector<2x32xf32>
    %9 = arith.addf %6, %8 : vector<2x32xf32>
    %10 = tpu.iota {dimensions = array<i32: 1>} : vector<2x10xi32>
    %c0_8 = arith.constant 0 : index
    %c0_9 = arith.constant 0 : index
    %11 = vector.load %arg1[%c0_8, %c0_9] : memref<2x1xi32, #tpu.memory_space<vmem>>, vector<2x1xi32>
    %12 = vector.broadcast %11 : vector<2x1xi32> to vector<2x10xi32>
    %13 = arith.cmpi eq, %10, %12 : vector<2x10xi32>
    %14 = arith.extui %13 : vector<2x10xi1> to vector<2x10xi32>
    %15 = arith.sitofp %14 : vector<2x10xi32> to vector<2x10xf32>
    %16 = arith.truncf %15 : vector<2x10xf32> to vector<2x10xbf16>
    %c0_10 = arith.constant 0 : index
    %c0_11 = arith.constant 0 : index
    %17 = vector.load %arg4[%c0_10, %c0_11] : memref<10x32xbf16, #tpu.memory_space<vmem>>, vector<10x32xbf16>
    %cst_12 = arith.constant dense<0.000000e+00> : vector<2x32xf32>
    %18 = tpu.matmul %16, %17, %cst_12 {dimension_numbers = #tpu.dot_dimension_numbers<[1], [0], [0], [1], [0, 0, 1, 1], [], []>} : vector<2x10xbf16>, vector<10x32xbf16>, vector<2x32xf32> -> vector<2x32xf32>
    %c0_13 = arith.constant 0 : index
    %c0_14 = arith.constant 0 : index
    %19 = vector.load %arg5[%c0_13, %c0_14] : memref<1x32xf32, #tpu.memory_space<vmem>>, vector<1x32xf32>
    %20 = vector.broadcast %19 : vector<1x32xf32> to vector<2x32xf32>
    %21 = arith.addf %18, %20 : vector<2x32xf32>
    %22 = arith.mulf %21, %9 : vector<2x32xf32>
    %cst_15 = arith.constant dense<0.000000e+00> : vector<2xf32>
    %23 = vector.multi_reduction <add>, %22, %cst_15 [1] : vector<2x32xf32> to vector<2xf32>
    %24 = vector.shape_cast %23 : vector<2xf32> to vector<2x1xf32>
    %c0_16 = arith.constant 0 : index
    %c0_17 = arith.constant 0 : index
    %25 = vector.load %arg6[%c0_16, %c0_17] : memref<2x1xf32, #tpu.memory_space<vmem>>, vector<2x1xf32>
    tpu.vector_store %arg6[%c0_16, %c0_17], %24 {strides = array<i32>} : memref<2x1xf32, #tpu.memory_space<vmem>>, vector<2x1xf32>,
    return
  }
}

</mosaic_0001>

<bundles_post_ra>
// kernel: discriminator_forward.9
= control target key start
LH: loop header
LB: loop body
LE: loop exit
PB: predicated region body
PF: predicated region fallthrough
CT: control target
= control target key end

     0   :  { %s1228_s24 = smov 0   ;;  %s1442_s0 = inlined_call_operand.vmem [shape: f32[2,12,32], index: 0, kind: input, shape index: {}]   ;;  %s1443_s1 = inlined_call_operand.vmem [shape: bf16[288,32], index: 1, kind: input, shape index: {}]   ;;  %s1444_s2 = inlined_call_operand.vmem [shape: f32[1,32], index: 2, kind: input, shape index: {}]   ;;  %s1445_s3 = inlined_call_operand.vmem [shape: bf16[288,32], index: 3, kind: input, shape index: {}]   ;;  %s1446_s4 = inlined_call_operand.vmem [shape: f32[1,32], index: 4, kind: input, shape index: {}]   ;;  %s1447_s5 = inlined_call_operand.vmem [shape: f32[4,1], index: 5, kind: input, shape index: {}]   ;;  %s1448_s6 = inlined_call_operand.vmem [shape: f32[4,1], index: 6, kind: input, shape index: {}]   ;;  %s1449_s7 = inlined_call_operand.vmem [shape: f32[2,4,32], index: 7, kind: output, shape index: {}]  }
   0x1 LB: > { %s976_s25 = sadd.s32 4294967295, %s1180_s24   ;;  %p980_p0 = scmp.ge.s32.totalorder %s1180_s24, 1  ;;  %s1180_s24 = sphi %s1228_s24, %s17_s24  }
   0x2   : > { %p237_p1 = scmp.lt.s32.totalorder %s1180_s24, 3 }
   0x4   : > { %p238_p2 = pnand %p980_p0, %p237_p1 }
   0x5   : > { %v279_v0 = vld [vmem:[%s1448_s6] sm:$0xf] (!%p238_p2)  ;;  %v1182_v1 = vmov (!%p238_p2), 0   ;;  %v1183_v4 = vmov (!%p238_p2), 0.0   ;;  %v1139_v5 = vld [vmem:[%s1443_s1 + $0x88] sm:$0xff] (!%p238_p2)   ;;  %vm364_vm0 = vcmask (!%p238_p2), 261120  }
   0x6   : > { %241 = sbr.rel (%p238_p2) target bundleno = 858 (0x35a), region = 48  ;;  %1107 = vset.pattern.permute.xlu0 (!%p238_p2), %v1182_v1  ;;  %v278_v2 = vld [vmem:[%s1447_s5] sm:$0xf] (!%p238_p2)  ;;  %1077 = vmatprep.subr.bf16.mxu1 (!%p238_p2), %v1183_v4  ;;  %vm1184_vm1 = vmmov (!%p238_p2), 0   ;;  %634 = vst.msk [vmem:[#allocation2] sm:$0xff] (!%p238_p2), %vm364_vm0, %v1183_v4  ;;  %v1142_v8 = vld [vmem:[%s1443_s1 + $0x48] sm:$0xff] (!%p238_p2)  }
   0x7   : > { %294 = vperm.xlu0 (!%p238_p2), %1107, %v279_v0   ;;  %v1138_v3 = vld [vmem:[%s1443_s1 + $0x80] sm:$0xff] (!%p238_p2)   ;;  %1081 = vmatprep.mubr.msk.bf16.mxu1 (!%p238_p2), %vm1184_vm1, %v1183_v4  ;;  %v1143_v9 = vld [vmem:[%s1443_s1 + $0x8] sm:$0xff] (!%p238_p2)   ;;  %v1144_v10 = vld [vmem:[%s1443_s1 + $0x50] sm:$0xff] (!%p238_p2)   ;;  %p268_p3 = scmp.lt.s32.totalorder (!%p238_p2), %s976_s25, 1  ;;  %vm334_vm2 = vcmask (!%p238_p2), 1043456   ;;  %vm359_vm3 = vcmask (!%p238_p2), 1041408  }
   0x8   : > { %1078 = vmatpush3.bf16.msra.mxu1 (!%p238_p2), %v1138_v3  ;;  %v1140_v6 = vld [vmem:[%s1443_s1 + $0x40] sm:$0xff] (!%p238_p2)   ;;  %v1145_v11 = vld [vmem:[%s1443_s1 + $0x10] sm:$0xff] (!%p238_p2)   ;;  %v1146_v12 = vld [vmem:[%s1443_s1 + $0x58] sm:$0xff] (!%p238_p2)   ;;  %vm350_vm4 = vcmask (!%p238_p2), 1042432   ;;  %s1185_s28 = smov (!%p238_p2), 32   ;;  %s1187_s30 = smov (!%p238_p2), 64  }
   0x9   : > { %1079 = vmatprep.subr.bf16.mxu1 (!%p238_p2), %v1183_v4  ;;  %v1141_v7 = vld [vmem:[%s1443_s1] sm:$0xff] (!%p238_p2)   ;;  %1027 = vmatprep.subr.bf16.mxu0 (!%p238_p2), %v1140_v6  ;;  %v1147_v13 = vld [vmem:[%s1443_s1 + $0x18] sm:$0xff] (!%p238_p2)   ;;  %v1150_v23 = vld [vmem:[%s1443_s1 + $0x68] sm:$0xff] (!%p238_p2)   ;;  %vm366_vm5 = vcmask (!%p238_p2), 523264   ;;  %vm368_vm6 = vcmask (!%p238_p2), 785408   ;;  %vm635_vm7 = vcmask (!%p238_p2), 257024  }
   0xa   : > { %1028 = vmatpush3.bf16.msra.mxu0 (!%p238_p2), %v1141_v7  ;;  %v1148_v16 = vld [vmem:[%s1443_s1 + $0x60] sm:$0xff] (!%p238_p2)   ;;  %v1151_v25 = vld [vmem:[%s1443_s1 + $0x28] sm:$0xff] (!%p238_p2)   ;;  %v1152_v34 = vld [vmem:[%s1443_s1 + $0x70] sm:$0xff] (!%p238_p2)   ;;  %636 = vst.msk [vmem:[#allocation2 + $0x8] sm:$0xf] (!%p238_p2), %vm635_vm7, %v1183_v4 }
   0xb   : > { %286 = vperm.xlu0 (!%p238_p2), %1107, %v278_v2   ;;  %1029 = vmatprep.subr.bf16.mxu0 (!%p238_p2), %v1142_v8  ;;  %v1149_v17 = vld [vmem:[%s1443_s1 + $0x20] sm:$0xff] (!%p238_p2)   ;;  %v1153_v35 = vld [vmem:[%s1443_s1 + $0x30] sm:$0xff] (!%p238_p2)   ;;  %v1154_v39 = vld [vmem:[%s1443_s1 + $0x78] sm:$0xff] (!%p238_p2)  }
   0xc   : > { %1080 = vmatpush3.bf16.msra.mxu1 (!%p238_p2), %v1139_v5  ;;  %v1155_v50 = vld [vmem:[%s1443_s1 + $0x38] sm:$0xff] (!%p238_p2)  }
   0xd   : > { %s1451_s25 = smov (!%p268_p3, %s976_s25), 1 }
   0xe   : > { %1030 = vmatpush3.bf16.msra.mxu0 %v1143_v9  ;;  %s1026_s29 = sshll.u32 %s1451_s25, 4 }
   0xf   : > { %1031 = vmatprep.subr.bf16.mxu0 %v1144_v10  ;;  %s272_s9 = scalar_lea.vmem %s1442_s0, %s1026_s29  ;;  %s1186_s29 = smov 96  }
  0x10   : > { %v1288_v14 = vld [vmem:[%s272_s9] sm:$0xff]  ;;  %v281_v15 = vld [vmem:[%s272_s9 + $0x8] sm:$0xf] }
  0x11   : > { %v1297_v18 = vmax.f32 %v1288_v14, 0.0  ;;  %v283_v19 = vmax.f32 %v281_v15, 0.0 }
  0x12   : > { %1032 = vmatpush3.bf16.msra.mxu0 %v1145_v11 }
  0x13   : > { %1033 = vmatprep.subr.bf16.mxu0 %v1146_v12  ;;  %v316_v31 = vrot.slane %v1297_v18, 1  ;;  %v351_v32 = vrot.slane %v1297_v18, 5  ;;  %v352_v33 = vrot.slane %v283_v19, 5  ;;  %v330_v2 = vrot.slane %v1297_v18, 3 }
  0x15   : > { %v353_v52 = vsel %vm350_vm4, %v351_v32, %v352_v33 }
  0x16   : > { %1034 = vmatpush3.bf16.msra.mxu0 %v1147_v13 }
  0x17   : > { %1035 = vmatprep.subr.bf16.mxu0 %v1148_v16 }
  0x1a   : > { %1036 = vmatpush3.bf16.msra.mxu0 %v1149_v17 }
  0x1b   : > { %1037 = vmatprep.subr.bf16.mxu0 %v1150_v23 }
  0x1e   : > { %1038 = vmatpush3.bf16.msra.mxu0 %v1151_v25 }
  0x1f   : > { %1039 = vmatprep.subr.bf16.mxu0 %v1152_v34 }
  0x22   : > { %1040 = vmatpush3.bf16.msra.mxu0 %v1153_v35 }
  0x23   : > { %1041 = vmatprep.subr.bf16.mxu0 %v1154_v39  ;;  %v1159_v39 = vld [vmem:[%s1445_s3] sm:$0xff]  }
  0x26   : > { %1042 = vmatpush3.bf16.msra.mxu0 %v1155_v50  ;;  %v984_v50 = vld [vmem:[%s1444_s2] ss:$0 sm:$0xff] }
  0x27   : > { %1085 = vmatprep.subr.bf16.mxu0 %v1183_v4 }
  0x86   : > { %v1299_v20 = vpop.permute.xlu0 %294 }
  0x87   : > { %v311_v21 = vrot.slane %v1299_v20, 1  ;;  %v303_v22 = vrot.slane %v1299_v20, 3  ;;  %v297_v24 = vrot.slane %v1299_v20, 5 }
  0x89   : > { %v313_v26 = vmul.f32 %v311_v21, %v1297_v18  ;;  %v314_v27 = vmul.f32 %v311_v21, %v283_v19  ;;  %v305_v28 = vmul.f32 %v303_v22, %v1297_v18  ;;  %v306_v29 = vmul.f32 %v303_v22, %v283_v19 }
  0x8a   : > { %v1312_v30 = vpop.permute.xlu0 %286  ;;  %v299_v43 = vmul.f32 %v297_v24, %v1297_v18 }
  0x8b   : > { %v360_v36 = vrot.slane %v313_v26, 6  ;;  %v361_v37 = vrot.slane %v314_v27, 6  ;;  %v307_v38 = vrot.slane %v1312_v30, 3  ;;  %v335_v40 = vrot.slane %v305_v28, 4 }
  0x8c   : > { %v336_v41 = vrot.slane %v306_v29, 4  ;;  %v300_v42 = vrot.slane %v1312_v30, 5  ;;  %v321_v56 = vrot.slane %v299_v43, 2  ;;  %v289_v0 = vrot.slane %v1312_v30, 7  ;;  %v1164_v43 = vld [vmem:[%s1445_s3 + $0x58] sm:$0xff]  }
  0x8d   : > { %v309_v44 = vmul.f32 %v307_v38, %v1297_v18  ;;  %v310_v45 = vmul.f32 %v307_v38, %v283_v19  ;;  %v362_v46 = vsel %vm359_vm3, %v360_v36, %v361_v37  ;;  %v1156_v36 = vld [vmem:[%s1445_s3 + $0x80] sm:$0xff]   ;;  %v1157_v37 = vld [vmem:[%s1445_s3 + $0x88] sm:$0xff]  }
  0x8e   : > { %v337_v47 = vsel %vm334_vm2, %v335_v40, %v336_v41  ;;  %v302_v48 = vmul.f32 %v300_v42, %v1297_v18  ;;  %v375_v49 = vpack.c.bf16 %v362_v46, %v362_v46  ;;  %v291_v7 = vmul.f32 %v289_v0, %v1297_v18  ;;  %v1158_v38 = vld [vmem:[%s1445_s3 + $0x40] sm:$0xff]   ;;  %v1160_v40 = vld [vmem:[%s1445_s3 + $0x48] sm:$0xff]   ;;  %v1163_v42 = vld [vmem:[%s1445_s3 + $0x10] sm:$0xff]  }
  0x8f   : > { %v1108_v51 = vpack.i.bf16 %v316_v31, %v337_v47  ;;  %v343_v53 = vrot.slane %v309_v44, 4  ;;  %v344_v54 = vrot.slane %v310_v45, 4  ;;  %1052 = vmatprep.subr.bf16.mxu1 %v1158_v38  ;;  %v1161_v41 = vld [vmem:[%s1445_s3 + $0x8] sm:$0xff]   ;;  %v1165_v44 = vld [vmem:[%s1445_s3 + $0x18] sm:$0xff]   ;;  %v1166_v45 = vld [vmem:[%s1445_s3 + $0x60] sm:$0xff]  }
  0x90   : > { %v326_v55 = vrot.slane %v302_v48, 2  ;;  %v436_v57 = vshll.u32 %v375_v49, 16  ;;  %v434_v61 = vshrl.u32 %v375_v49, 16  ;;  %v1167_v46 = vld [vmem:[%s1445_s3 + $0x20] sm:$0xff]   ;;  %v1168_v47 = vld [vmem:[%s1445_s3 + $0x68] sm:$0xff]  }
  0x91   : > { %1109 = vrot.lane.b32.xlu1 %v1108_v51, %s1185_s28  ;;  %v345_v58 = vsel %vm334_vm2, %v343_v53, %v344_v54  ;;  %v1169_v48 = vld [vmem:[%s1445_s3 + $0x28] sm:$0xff]  }
  0x92   : > { %v1118_v59 = vpack.i.bf16 %v326_v55, %v353_v52  ;;  %v1113_v60 = vpack.i.bf16 %v321_v56, %v345_v58  ;;  %v438_v62 = vrot.slane %v436_v57, 1  ;;  %v1170_v58 = vld [vmem:[%s1445_s3 + $0x70] sm:$0xff]  }
  0x94   : > { %1119 = vrot.lane.b32.xlu0 %v1118_v59, %s1186_s29  ;;  %v439_v63 = vor.u32 %v438_v62, %v434_v61  ;;  %v1171_v59 = vld [vmem:[%s1445_s3 + $0x30] sm:$0xff]   ;;  %v1173_v61 = vld [vmem:[%s1445_s3 + $0x38] sm:$0xff]  }
  0x95   : > { %1114 = vrot.lane.b32.xlu1 %v1113_v60, %s1187_s30  ;;  %v1172_v60 = vld [vmem:[%s1445_s3 + $0x78] sm:$0xff]  }
  0x96   : > { %1082 = vmatmul.mubr.msk.bf16.vlgmr.msra.gmra.mrb[0].mxu1 %vm364_vm0, %v439_v63 }
  0x97   : > { %1053 = vmatpush3.bf16.msra.mxu1 %v1159_v39  ;;  %v1004_v39 = vld [vmem:[%s1446_s4] ss:$0 sm:$0xff] }
  0x98   : > { %1054 = vmatprep.subr.bf16.mxu1 %v1160_v40 }
  0x9b   : > { %1055 = vmatpush3.bf16.msra.mxu1 %v1161_v41 }
 0x103   : > { %v1110_v1 = vpop.permute.xlu1 %1109 }
 0x104   : > { %v1112_v3 = vunpack.i.h.bf16 %v1110_v1  ;;  %v1111_v5 = vunpack.i.l.bf16 %v1110_v1 }
 0x106   : > { %v1120_v6 = vpop.permute.xlu0 %1119  ;;  %v365_v11 = vsel %vm364_vm0, %v291_v7, %v1112_v3  ;;  %v370_v12 = vsel %vm364_vm0, %v330_v2, %v1111_v5 }
 0x107   : > { %v1115_v8 = vpop.permute.xlu1 %1114  ;;  %v1122_v13 = vunpack.i.h.bf16 %v1120_v6  ;;  %v1121_v15 = vunpack.i.l.bf16 %v1120_v6 }
 0x108   : > { %v1117_v9 = vunpack.i.h.bf16 %v1115_v8  ;;  %v1116_v10 = vunpack.i.l.bf16 %v1115_v8 }
 0x10a   : > { %v367_v16 = vsel %vm366_vm5, %v365_v11, %v1117_v9  ;;  %v371_v17 = vsel %vm366_vm5, %v370_v12, %v1116_v10 }
 0x10b   : > { %v372_v19 = vsel %vm368_vm6, %v371_v17, %v1121_v15  ;;  %v369_v21 = vsel %vm368_vm6, %v367_v16, %v1122_v13 }
 0x10c   : > { %v374_v18 = vpack.c.bf16 %v372_v19, %v372_v19  ;;  %v373_v22 = vpack.c.bf16 %v369_v21, %v369_v21 }
 0x10e   : > { %v429_v23 = vshll.u32 %v374_v18, 16  ;;  %v422_v24 = vshll.u32 %v373_v22, 16  ;;  %v427_v25 = vshrl.u32 %v374_v18, 16  ;;  %v420_v27 = vshrl.u32 %v373_v22, 16 }
 0x110   : > { %v431_v26 = vrot.slane %v429_v23, 1  ;;  %v424_v28 = vrot.slane %v422_v24, 1 }
 0x112   : > { %v432_v29 = vor.u32 %v431_v26, %v427_v25  ;;  %v425_v31 = vor.u32 %v424_v28, %v420_v27 }
 0x114   : > { %585 = vmatprep.mubr.bf16.mxu0 %v432_v29 }
 0x115   : > { %586 = vmatmul.mubr.bf16.vlgmr.msra.gmra.mrb[0].mxu0 %v425_v31 }
 0x116   : > { %1089 = vmatprep.mubr.msk.bf16.mxu0 %vm1184_vm1, %v1183_v4  ;;  %1086 = vmatpush3.bf16.msra.mxu0 %v1156_v36 }
 0x117   : > { %1087 = vmatprep.subr.bf16.mxu0 %v1183_v4  ;;  %v1162_v4 = vld [vmem:[%s1445_s3 + $0x50] sm:$0xff]  }
 0x118   : > { %1056 = vmatprep.subr.bf16.mxu1 %v1162_v4 }
 0x119   : > { %1057 = vmatpush3.bf16.msra.mxu1 %v1163_v42 }
 0x11a   : > { %1088 = vmatpush3.bf16.msra.mxu0 %v1157_v37  ;;  %1058 = vmatprep.subr.bf16.mxu1 %v1164_v43 }
 0x11d   : > { %1059 = vmatpush3.bf16.msra.mxu1 %v1165_v44  ;;  %v919_v44 = vrot.slane %v1288_v14, 4 }
 0x11e   : > { %1060 = vmatprep.subr.bf16.mxu1 %v1166_v45 }
 0x121   : > { %1061 = vmatpush3.bf16.msra.mxu1 %v1167_v46 }
 0x122   : > { %1062 = vmatprep.subr.bf16.mxu1 %v1168_v47 }
 0x125   : > { %1063 = vmatpush3.bf16.msra.mxu1 %v1169_v48 }
 0x126   : > { %1064 = vmatprep.subr.bf16.mxu1 %v1170_v58 }
 0x129   : > { %1065 = vmatpush3.bf16.msra.mxu1 %v1171_v59 }
 0x12a   : > { %1066 = vmatprep.subr.bf16.mxu1 %v1172_v60 }
 0x12d   : > { %1067 = vmatpush3.bf16.msra.mxu1 %v1173_v61 }
 0x169   : > { %v627_v32 = vpop.f32.mrb[0].mxu1 }
 0x16a   : > { %v1083_v33 = vpop.f32.mrb[1].mxu1 }
 0x16b   : > { %v630_v34 = vpop.f32.mrb[2].mxu1 }
 0x16c   : > { %v1084_v35 = vpop.f32.mrb[3].mxu1 }
 0x1e8   : > { %v1043_v49 = vpop.f32.mrb[0].mxu0 }
 0x1e9   : > { %v1044_v51 = vpop.f32.mrb[1].mxu0 }
 0x1ea   : > { %v1045_v52 = vadd.f32 %v1044_v51, %v1043_v49  ;;  %v1046_v53 = vpop.f32.mrb[2].mxu0 }
 0x1eb   : > { %v1047_v54 = vpop.f32.mrb[3].mxu0 }
 0x1ec   : > { %v588_v55 = vadd.f32 %v1045_v52, %v984_v50 }
 0x1ee   : > { %v628_v56 = vadd.f32 %v627_v32, %v588_v55 }
 0x1f0   : > { %v633_v57 = vmax.f32 %v628_v56, 0.0 }
 0x1f2   : > { %637 = vst.msk [vmem:[#allocation2 + $0x4] sm:$0xf] %vm635_vm7, %v633_v57 }
 0x1f9   : > { %v649_v62 = vld [vmem:[#allocation2 + $0x7] sm:$0xf]  ;;  %v641_v63 = vld [vmem:[#allocation2 + $0x3] sm:$0xf] }
 0x1fa   : > { %v645_v0 = vld [vmem:[#allocation2 + $0x5] sm:$0xf]  ;;  %v650_v1 = vmul.f32 %v649_v62, %v1299_v20  ;;  %v642_v2 = vmul.f32 %v641_v63, %v1299_v20  ;;  %v643_v10 = vmul.f32 %v641_v63, %v1312_v30  ;;  %v638_v13 = vld [vmem:[#allocation2 + $0x1] sm:$0xf] }
 0x1fb   : > { %v647_v3 = vmul.f32 %v645_v0, %v1312_v30  ;;  %v646_v5 = vmul.f32 %v645_v0, %v1299_v20  ;;  %v640_v6 = vld [vmem:[#allocation2 + $0x2] sm:$0xf]  ;;  %v648_v11 = vld [vmem:[#allocation2 + $0x6] sm:$0xf]  ;;  %v639_v19 = vmul.f32 %v638_v13, %v1312_v30 }
 0x1fc   : > { %v683_v7 = vpack.c.bf16 %v650_v1, %v650_v1  ;;  %v1133_v12 = vpack.i.bf16 %v643_v10, %v648_v11  ;;  %v644_v22 = vld [vmem:[#allocation2 + $0x4] sm:$0xf] }
 0x1fd   : > { %v1128_v8 = vpack.i.bf16 %v642_v2, %v647_v3  ;;  %v1123_v9 = vpack.i.bf16 %v640_v6, %v646_v5 }
 0x1fe   : > { %1090 = vmatmul.mubr.msk.bf16.vlgmr.msra.gmra.mrb[4].mxu0 %vm364_vm0, %v683_v7 }
 0x1ff   : > { %1129 = vrot.lane.b32.xlu0 %v1128_v8, %s1187_s30  ;;  %1124 = vrot.lane.b32.xlu1 %v1123_v9, %s1185_s28  ;;  %s983_s30 = sshll.u32 %s1451_s25, 2 }
 0x200   : > { %s276_s12 = scalar_lea.vmem %s1449_s7, %s983_s30 }
 0x203   : > { %1134 = vrot.lane.b32.xlu1 %v1133_v12, %s1186_s29 }
 0x271   : > { %v1130_v15 = vpop.permute.xlu0 %1129  ;;  %v1125_v20 = vpop.permute.xlu1 %1124 }
 0x272   : > { %v1127_v16 = vunpack.i.h.bf16 %v1125_v20  ;;  %v1126_v17 = vunpack.i.l.bf16 %v1125_v20  ;;  %v1132_v21 = vunpack.i.h.bf16 %v1130_v15  ;;  %v1131_v18 = vunpack.i.l.bf16 %v1130_v15 }
 0x274   : > { %v675_v23 = vsel %vm364_vm0, %v639_v19, %v1127_v16  ;;  %v678_v24 = vsel %vm364_vm0, %v644_v22, %v1126_v17 }
 0x275   : > { %v1135_v25 = vpop.permute.xlu1 %1134  ;;  %v676_v28 = vsel %vm366_vm5, %v675_v23, %v1132_v21  ;;  %v679_v29 = vsel %vm366_vm5, %v678_v24, %v1131_v18 }
 0x276   : > { %v1137_v26 = vunpack.i.h.bf16 %v1135_v25  ;;  %v1136_v27 = vunpack.i.l.bf16 %v1135_v25 }
 0x278   : > { %v677_v31 = vsel %vm368_vm6, %v676_v28, %v1137_v26  ;;  %v680_v32 = vsel %vm368_vm6, %v679_v29, %v1136_v27 }
 0x279   : > { %v681_v30 = vpack.c.bf16 %v677_v31, %v677_v31  ;;  %v682_v33 = vpack.c.bf16 %v680_v32, %v680_v32 }
 0x27b   : > { %870 = vmatprep.mubr.bf16.mxu1 %v682_v33 }
 0x27c   : > { %871 = vmatmul.mubr.bf16.vlgmr.msra.gmra.mrb[4].mxu1 %v681_v30 }
 0x2d1   : > { %v912_v34 = vpop.f32.mrb[4].mxu0 }
 0x2d2   : > { %v1091_v35 = vpop.f32.mrb[5].mxu0 }
 0x2d3   : > { %v915_v36 = vpop.f32.mrb[6].mxu0 }
 0x2d4   : > { %v1092_v37 = vpop.f32.mrb[7].mxu0 }
 0x34f   : > { %v1068_v38 = vpop.f32.mrb[4].mxu1 }
 0x350   : > { %v1069_v40 = vpop.f32.mrb[5].mxu1 }
 0x351   : > { %v1070_v41 = vadd.f32 %v1069_v40, %v1068_v38  ;;  %v1071_v4 = vpop.f32.mrb[6].mxu1 }
 0x352   : > { %v1072_v42 = vpop.f32.mrb[7].mxu1 }
 0x353   : > { %v873_v43 = vadd.f32 %v1070_v41, %v1004_v39 }
 0x355   : > { %v913_v45 = vadd.f32 %v912_v34, %v873_v43 }
 0x357   : > { %v921_v46 = vadd.f32 %v919_v44, %v913_v45 }
 0x359   : > { %922 = vst.msk [vmem:[%s276_s12] sm:$0xf] %vm635_vm7, %v921_v46 }
 0x35a PF: > { %s17_s24 = sadd.s32 1, %s1180_s24  }
 0x35b   : > { %p14_p4 = scmp.ge.s32.totalorder %s17_s24, 4  }
 0x35d   :  { %16 = sbr.rel (!%p14_p4) target bundleno = 1 (0x1), region = 78 }

// kernel: discriminator_forward.8
= control target key start
LH: loop header
LB: loop body
LE: loop exit
PB: predicated region body
PF: predicated region fallthrough
CT: control target
= control target key end

     0   :  { %s1753_s13 = smov 0   ;;  %s2094_s0 = inlined_call_operand.vmem [shape: f32[2,32,32], index: 0, kind: input, shape index: {}]   ;;  %s2095_s1 = inlined_call_operand.vmem [shape: bf16[288,32], index: 1, kind: input, shape index: {}]   ;;  %s2096_s2 = inlined_call_operand.vmem [shape: f32[1,32], index: 2, kind: input, shape index: {}]   ;;  %s2097_s3 = inlined_call_operand.vmem [shape: bf16[288,32], index: 3, kind: input, shape index: {}]   ;;  %s2098_s4 = inlined_call_operand.vmem [shape: f32[1,32], index: 4, kind: input, shape index: {}]   ;;  %s2099_s5 = inlined_call_operand.vmem [shape: bf16[32,32], index: 5, kind: input, shape index: {}]   ;;  %s2100_s6 = inlined_call_operand.vmem [shape: f32[1,32], index: 6, kind: input, shape index: {}]   ;;  %s2101_s7 = inlined_call_operand.vmem [shape: f32[16,1], index: 7, kind: input, shape index: {}]   ;;  %s2102_s8 = inlined_call_operand.vmem [shape: f32[16,1], index: 8, kind: input, shape index: {}]   ;;  %s2103_s9 = inlined_call_operand.vmem [shape: f32[4,16], index: 9, kind: input, shape index: {}]   ;;  %s2104_s10 = inlined_call_operand.vmem [shape: f32[2,4,32], index: 10, kind: output, shape index: {}]  }
   0x1 LB: > { %s1399_s14 = sadd.s32 4294967295, %s1689_s13   ;;  %p1403_p0 = scmp.ge.s32.totalorder %s1689_s13, 1  ;;  %s1689_s13 = sphi %s1753_s13, %s20_s13  }
   0x2   : > { %p312_p1 = scmp.lt.s32.totalorder %s1689_s13, 3 }
   0x4   : > { %p313_p2 = pnand %p1403_p0, %p312_p1 }
   0x5   : > { %v361_v0 = vld [vmem:[%s2102_s8] sm:$0xff] (!%p313_p2)  ;;  %p349_p3 = scmp.lt.s32.totalorder (!%p313_p2), %s1399_s14, 1  ;;  %v1691_v2 = vmov (!%p313_p2), 0   ;;  %v362_v3 = vld [vmem:[%s2102_s8 + $0x8] sm:$0xff] (!%p313_p2)  ;;  %vm411_vm0 = vcmask (!%p313_p2), 1046528   ;;  %vm549_vm1 = vcmask (!%p313_p2), 261120  }
   0x6   : > { %316 = sbr.rel (%p313_p2) target bundleno = 1092 (0x444), region = 60  ;;  %v359_v1 = vld [vmem:[%s2101_s7] sm:$0xff] (!%p313_p2)  ;;  %1569 = vset.pattern.permute.xlu1 (!%p313_p2), %v1691_v2  ;;  %1568 = vset.pattern.permute.xlu0 (!%p313_p2), %v1691_v2  ;;  %v360_v4 = vld [vmem:[%s2101_s7 + $0x8] sm:$0xff] (!%p313_p2)  ;;  %s1692_s29 = smov (!%p313_p2), 32   ;;  %v1693_v19 = vmov (!%p313_p2), 0.0   ;;  %vm1695_vm2 = vmmov (!%p313_p2), 0  }
   0x7   : > { %393 = vperm.xlu0 (!%p313_p2), %1568, %v361_v0   ;;  %373 = vperm.xlu1 (!%p313_p2), %1569, %v359_v1   ;;  %v1645_v17 = vld [vmem:[%s2095_s1 + $0x80] sm:$0xff] (!%p313_p2)   ;;  %868 = vst.msk [vmem:[#allocation2] sm:$0xff] (!%p313_p2), %vm549_vm1, %v1693_v19  ;;  %869 = vst.msk [vmem:[#allocation2 + $0x8] sm:$0xff] (!%p313_p2), %vm549_vm1, %v1693_v19  ;;  %v1646_v20 = vld [vmem:[%s2095_s1 + $0x88] sm:$0xff] (!%p313_p2)   ;;  %s1694_s12 = smov (!%p313_p2), 96   ;;  %vm381_vm3 = vcmask (!%p313_p2), 1042432  }
   0x8   : > { %1511 = vmatprep.subr.bf16.mxu1 (!%p313_p2), %v1693_v19  ;;  %870 = vst.msk [vmem:[#allocation2 + $0x10] sm:$0xff] (!%p313_p2), %vm549_vm1, %v1693_v19  ;;  %871 = vst.msk [vmem:[#allocation2 + $0x18] sm:$0xff] (!%p313_p2), %vm549_vm1, %v1693_v19  ;;  %1515 = vmatprep.mubr.msk.bf16.mxu1 (!%p313_p2), %vm1695_vm2, %v1693_v19  ;;  %v1647_v21 = vld [vmem:[%s2095_s1 + $0x40] sm:$0xff] (!%p313_p2)   ;;  %v1649_v23 = vld [vmem:[%s2095_s1 + $0x48] sm:$0xff] (!%p313_p2)   ;;  %vm421_vm4 = vcmask (!%p313_p2), 1040384   ;;  %vm499_vm5 = vcmask (!%p313_p2), 1041408  }
   0x9   : > { %1512 = vmatpush3.bf16.msra.mxu1 (!%p313_p2), %v1645_v17  ;;  %v1648_v22 = vld [vmem:[%s2095_s1] sm:$0xff] (!%p313_p2)   ;;  %v1650_v24 = vld [vmem:[%s2095_s1 + $0x8] sm:$0xff] (!%p313_p2)   ;;  %1455 = vmatprep.subr.bf16.mxu0 (!%p313_p2), %v1647_v21  ;;  %v1651_v26 = vld [vmem:[%s2095_s1 + $0x50] sm:$0xff] (!%p313_p2)   ;;  %vm401_vm6 = vcmask (!%p313_p2), 1044480   ;;  %vm457_vm7 = vcmask (!%p313_p2), 1045504   ;;  %vm475_vm8 = vcmask (!%p313_p2), 1043456  }
   0xa   : > { %1513 = vmatprep.subr.bf16.mxu1 (!%p313_p2), %v1693_v19  ;;  %1456 = vmatpush3.bf16.msra.mxu0 (!%p313_p2), %v1648_v22  ;;  %v1652_v27 = vld [vmem:[%s2095_s1 + $0x10] sm:$0xff] (!%p313_p2)   ;;  %v1653_v41 = vld [vmem:[%s2095_s1 + $0x58] sm:$0xff] (!%p313_p2)   ;;  %v1655_v58 = vld [vmem:[%s2095_s1 + $0x60] sm:$0xff] (!%p313_p2)   ;;  %s1696_s19 = smov (!%p313_p2), 64   ;;  %vm619_vm9 = vsmask.f32 (!%p313_p2), 6400 }
   0xb   : > { %398 = vperm.xlu0 (!%p313_p2), %1568, %v362_v3   ;;  %378 = vperm.xlu1 (!%p313_p2), %1569, %v360_v4   ;;  %v1654_v42 = vld [vmem:[%s2095_s1 + $0x18] sm:$0xff] (!%p313_p2)   ;;  %v1656_v59 = vld [vmem:[%s2095_s1 + $0x20] sm:$0xff] (!%p313_p2)   ;;  %vm553_vm10 = vcmask (!%p313_p2), 523264   ;;  %vm557_vm11 = vcmask (!%p313_p2), 785408   ;;  %vm1270_vm12 = vcmask (!%p313_p2), 130048   ;;  %vm1344_vm13 = vcmask (!%p313_p2), 257024  }
   0xc   : > { %1457 = vmatprep.subr.bf16.mxu0 (!%p313_p2), %v1649_v23 }
   0xd   : > { %s2106_s14 = smov (!%p349_p3, %s1399_s14), 1  ;;  %1514 = vmatpush3.bf16.msra.mxu1 %v1646_v20 }
   0xe   : > { %s1454_s23 = sshll.u32 %s2106_s14, 5  ;;  %1458 = vmatpush3.bf16.msra.mxu0 %v1650_v24  ;;  %s1406_s16 = sshll.u32 %s2106_s14, 2 }
   0xf   : > { %s1779_s26 = scalar_lea.vmem %s2094_s0, %s1454_s23  ;;  %1459 = vmatprep.subr.bf16.mxu0 %v1651_v26  ;;  %s357_s20 = scalar_lea.vmem %s2104_s10, %s1406_s16 }
  0x10   : > { %v1782_v5 = vld [vmem:[%s1779_s26 + $0x8] sm:$0xff]  ;;  %v1785_v6 = vld [vmem:[%s1779_s26 + $0x10] sm:$0xff]  ;;  %v366_v7 = vld [vmem:[%s1779_s26 + $0x18] sm:$0xff] }
  0x11   : > { %v1789_v8 = vmax.f32 %v1782_v5, 0.0  ;;  %v1792_v9 = vmax.f32 %v1785_v6, 0.0  ;;  %v1794_v10 = vmax.f32 %v366_v7, 0.0  ;;  %v363_v25 = vld [vmem:[%s1779_s26] sm:$0xff] }
  0x12   : > { %v1846_v30 = vmax.f32 %v363_v25, 0.0  ;;  %1460 = vmatpush3.bf16.msra.mxu0 %v1652_v27  ;;  %v1657_v27 = vld [vmem:[%s2095_s1 + $0x68] sm:$0xff]  }
  0x13   : > { %v441_v11 = vrot.slane %v1789_v8, 1  ;;  %v443_v12 = vrot.slane %v1792_v9, 1  ;;  %v527_v13 = vrot.slane %v1794_v10, 1  ;;  %1461 = vmatprep.subr.bf16.mxu0 %v1653_v41 }
  0x14   : > { %v440_v33 = vrot.slane %v1846_v30, 1 }
  0x15   : > { %v444_v14 = vsel %vm411_vm0, %v441_v11, %v443_v12  ;;  %v528_v15 = vsel %vm411_vm0, %v443_v12, %v527_v13 }
  0x16   : > { %v1570_v16 = vpack.i.bf16 %v443_v12, %v444_v14  ;;  %v1575_v18 = vpack.i.bf16 %v528_v15, %v444_v14  ;;  %v442_v45 = vsel %vm411_vm0, %v440_v33, %v441_v11  ;;  %1462 = vmatpush3.bf16.msra.mxu0 %v1654_v42 }
  0x17   : > { %1463 = vmatprep.subr.bf16.mxu0 %v1655_v58 }
  0x18   : > { %1571 = vrot.lane.b32.xlu0 %v1570_v16, %s1692_s29 }
  0x1a   : > { %1464 = vmatpush3.bf16.msra.mxu0 %v1656_v59 }
  0x1b   : > { %1465 = vmatprep.subr.bf16.mxu0 %v1657_v27 }
  0x1c   : > { %1576 = vrot.lane.b32.xlu0 %v1575_v18, %s1694_s12 }
  0x86   : > { %v1842_v28 = vpop.permute.xlu0 %393  ;;  %v1844_v29 = vpop.permute.xlu1 %373 }
  0x87   : > { %v422_v31 = vrot.slane %v1842_v28, 7  ;;  %v402_v32 = vrot.slane %v1842_v28, 3  ;;  %v1852_v34 = vrot.slane %v1844_v29, 5  ;;  %v412_v44 = vrot.slane %v1844_v29, 1 }
  0x89   : > { %v428_v40 = vmul.f32 %v422_v31, %v1789_v8  ;;  %v434_v43 = vmul.f32 %v402_v32, %v1789_v8  ;;  %v408_v49 = vmul.f32 %v402_v32, %v1846_v30  ;;  %v431_v50 = vmul.f32 %v1852_v34, %v1789_v8 }
  0x8a   : > { %v1854_v35 = vpop.permute.xlu0 %398  ;;  %v1856_v36 = vpop.permute.xlu1 %378  ;;  %v418_v3 = vmul.f32 %v412_v44, %v1846_v30 }
  0x8b   : > { %v403_v37 = vrot.slane %v1854_v35, 3  ;;  %v423_v38 = vrot.slane %v1854_v35, 7  ;;  %v1861_v39 = vrot.slane %v1856_v36, 5  ;;  %v500_v55 = vrot.slane %v428_v40, 6 }
  0x8c   : > { %v413_v57 = vrot.slane %v1856_v36, 1  ;;  %v541_v0 = vrot.slane %v434_v43, 2  ;;  %v458_v2 = vrot.slane %v408_v49, 2 }
  0x8d   : > { %v436_v46 = vmul.f32 %v403_v37, %v1794_v10  ;;  %v1877_v47 = vsel %vm381_vm3, %v1852_v34, %v1861_v39  ;;  %v424_v48 = vsel %vm421_vm4, %v422_v31, %v423_v38  ;;  %v430_v53 = vmul.f32 %v423_v38, %v1794_v10  ;;  %v1658_v31 = vld [vmem:[%s2095_s1 + $0x28] sm:$0xff]  }
  0x8e   : > { %v432_v51 = vmul.f32 %v1877_v47, %v1792_v9  ;;  %v429_v52 = vmul.f32 %v424_v48, %v1792_v9  ;;  %v404_v56 = vsel %vm401_vm6, %v402_v32, %v403_v37  ;;  %v410_v12 = vmul.f32 %v403_v37, %v1792_v9  ;;  %v1659_v32 = vld [vmem:[%s2095_s1 + $0x70] sm:$0xff]   ;;  %1466 = vmatpush3.bf16.msra.mxu0 %v1658_v31 }
  0x8f   : > { %v544_v54 = vrot.slane %v436_v46, 2  ;;  %v503_v62 = vrot.slane %v430_v53, 6  ;;  %v409_v63 = vmul.f32 %v404_v56, %v1789_v8  ;;  %v435_v1 = vmul.f32 %v404_v56, %v1792_v9  ;;  %1467 = vmatprep.subr.bf16.mxu0 %v1659_v32 }
  0x90   : > { %v1580_v60 = vpack.i.bf16 %v432_v51, %v431_v50  ;;  %v501_v61 = vrot.slane %v429_v52, 6  ;;  %v461_v20 = vrot.slane %v410_v12, 2  ;;  %v414_v21 = vsel %vm411_vm0, %v412_v44, %v413_v57  ;;  %v1660_v50 = vld [vmem:[%s2095_s1 + $0x30] sm:$0xff]   ;;  %v1661_v52 = vld [vmem:[%s2095_s1 + $0x78] sm:$0xff]  }
  0x91   : > { %v459_v11 = vrot.slane %v409_v63, 2  ;;  %v542_v16 = vrot.slane %v435_v1, 2  ;;  %v575_v17 = vpack.c.bf16 %v544_v54, %v544_v54  ;;  %v420_v22 = vmul.f32 %v413_v57, %v1792_v9  ;;  %v1572_v63 = vpop.permute.xlu0 %1571 }
  0x92   : > { %1581 = vrot.lane.b32.xlu1 %v1580_v60, %s1696_s19  ;;  %v502_v4 = vsel %vm499_vm5, %v500_v55, %v501_v61  ;;  %v504_v7 = vsel %vm499_vm5, %v501_v61, %v503_v62  ;;  %v433_v23 = vmul.f32 %v1861_v39, %v1794_v10  ;;  %v419_v40 = vmul.f32 %v414_v21, %v1789_v8  ;;  %v1662_v61 = vld [vmem:[%s2095_s1 + $0x38] sm:$0xff]  }
  0x93   : > { %v1585_v14 = vpack.i.bf16 %v502_v4, %v500_v55  ;;  %v1590_v15 = vpack.i.bf16 %v442_v45, %v504_v7  ;;  %v460_v18 = vsel %vm457_vm7, %v458_v2, %v459_v11  ;;  %v543_v24 = vsel %vm457_vm7, %v541_v0, %v542_v16  ;;  %1468 = vmatpush3.bf16.msra.mxu0 %v1660_v50 }
  0x94   : > { %v545_v25 = vsel %vm457_vm7, %v542_v16, %v544_v54  ;;  %v663_v26 = vshrl.u32 %v575_v17, 16  ;;  %v462_v33 = vsel %vm457_vm7, %v459_v11, %v461_v20  ;;  %v666_v38 = vshll.u32 %v575_v17, 16  ;;  %1469 = vmatprep.subr.bf16.mxu0 %v1661_v52 }
  0x95   : > { %1586 = vrot.lane.b32.xlu0 %v1585_v14, %s1692_s29  ;;  %v572_v37 = vpack.c.bf16 %v545_v25, %v543_v24  ;;  %v1595_v41 = vpack.i.bf16 %v460_v18, %v433_v23  ;;  %v1600_v42 = vpack.i.bf16 %v461_v20, %v462_v33  ;;  %v479_v44 = vrot.slane %v420_v22, 4  ;;  %v1577_v10 = vpop.permute.xlu0 %1576 }
  0x96   : > { %1591 = vrot.lane.b32.xlu1 %v1590_v15, %s1692_s29  ;;  %v665_v43 = vrot.slane %v663_v26, 1  ;;  %v668_v48 = vrot.slane %v666_v38, 2  ;;  %v477_v49 = vrot.slane %v419_v40, 4  ;;  %v476_v51 = vrot.slane %v418_v3, 4 }
  0x97   : > { %v655_v45 = vshrl.u32 %v572_v37, 16  ;;  %v658_v46 = vshll.u32 %v572_v37, 16  ;;  %1470 = vmatpush3.bf16.msra.mxu0 %v1662_v61  ;;  %v491_v0 = vrot.slane %v1792_v9, 5  ;;  %v1574_v4 = vunpack.i.h.bf16 %v1572_v63 }
  0x98   : > { %v480_v55 = vsel %vm475_vm8, %v477_v49, %v479_v44  ;;  %v478_v57 = vsel %vm475_vm8, %v476_v51, %v477_v49  ;;  %v669_v59 = vor.u32 %v668_v48, %v665_v43  ;;  %1519 = vmatprep.subr.bf16.mxu0 %v1693_v19  ;;  %v389_v7 = vmul.f32 %v1877_v47, %v1789_v8 }
  0x99   : > { %1596 = vrot.lane.b32.xlu0 %v1595_v41, %s1696_s19  ;;  %v657_v53 = vrot.slane %v655_v45, 1  ;;  %v660_v54 = vrot.slane %v658_v46, 2  ;;  %v1610_v56 = vpack.i.bf16 %v479_v44, %v480_v55  ;;  %v1605_v60 = vpack.i.bf16 %v478_v57, %v527_v13 }
  0x9a   : > { %1601 = vrot.lane.b32.xlu1 %v1600_v42, %s1696_s19  ;;  %v490_v13 = vrot.slane %v1789_v8, 5  ;;  %v1573_v15 = vunpack.i.l.bf16 %v1572_v63  ;;  %v1579_v18 = vunpack.i.h.bf16 %v1577_v10  ;;  %v1578_v20 = vunpack.i.l.bf16 %v1577_v10 }
  0x9b   : > { %v661_v58 = vor.u32 %v660_v54, %v657_v53  ;;  %v388_v47 = vmul.f32 %v1852_v34, %v1846_v30  ;;  %v390_v33 = vmul.f32 %v1861_v39, %v1792_v9 }
  0x9c   : > { %v492_v2 = vsel %vm381_vm3, %v490_v13, %v491_v0  ;;  %v551_v44 = vsel %vm549_vm1, %v389_v7, %v1573_v15 }
  0x9d   : > { %1611 = vrot.lane.b32.xlu0 %v1610_v56, %s1694_s12  ;;  %v670_v62 = vsel %vm619_vm9, %v661_v58, %v669_v59  ;;  %v552_v43 = vsel %vm549_vm1, %v390_v33, %v1574_v4  ;;  %v1669_v33 = vld [vmem:[%s2097_s3 + $0x48] sm:$0xff]  }
  0x9e   : > { %1606 = vrot.lane.b32.xlu1 %v1605_v60, %s1694_s12  ;;  %1516 = vmatmul.mubr.msk.bf16.vlgmr.msra.gmra.mrb[0].mxu1 %vm549_vm1, %v670_v62 }
 0x104   : > { %v1582_v1 = vpop.permute.xlu1 %1581 }
 0x105   : > { %v1584_v16 = vunpack.i.h.bf16 %v1582_v1  ;;  %v1583_v17 = vunpack.i.l.bf16 %v1582_v1 }
 0x107   : > { %v1587_v3 = vpop.permute.xlu0 %1586 }
 0x108   : > { %v1589_v11 = vunpack.i.h.bf16 %v1587_v3  ;;  %v1588_v12 = vunpack.i.l.bf16 %v1587_v3  ;;  %v1592_v14 = vpop.permute.xlu1 %1591 }
 0x109   : > { %v1594_v25 = vunpack.i.h.bf16 %v1592_v14  ;;  %v1593_v26 = vunpack.i.l.bf16 %v1592_v14 }
 0x10a   : > { %v562_v21 = vsel %vm549_vm1, %v492_v2, %v1589_v11  ;;  %v561_v22 = vsel %vm549_vm1, %v490_v13, %v1588_v12 }
 0x10b   : > { %v565_v23 = vsel %vm553_vm10, %v562_v21, %v1584_v16  ;;  %v564_v24 = vsel %vm553_vm10, %v561_v22, %v1583_v17  ;;  %v1597_v8 = vpop.permute.xlu0 %1596  ;;  %v550_v45 = vsel %vm549_vm1, %v388_v47, %v1594_v25  ;;  %v563_v30 = vsel %vm549_vm1, %v491_v0, %v1593_v26  ;;  %v1663_v47 = vld [vmem:[%s2097_s3 + $0x80] sm:$0xff]  }
 0x10c   : > { %v1602_v27 = vpop.permute.xlu1 %1601  ;;  %v567_v31 = vsel %vm557_vm11, %v564_v24, %v1578_v20  ;;  %v568_v32 = vsel %vm557_vm11, %v565_v23, %v1579_v18  ;;  %v1599_v41 = vunpack.i.h.bf16 %v1597_v8  ;;  %v1598_v42 = vunpack.i.l.bf16 %v1597_v8 }
 0x10d   : > { %v1604_v37 = vunpack.i.h.bf16 %v1602_v27  ;;  %v1603_v38 = vunpack.i.l.bf16 %v1602_v27  ;;  %v571_v40 = vpack.c.bf16 %v568_v32, %v567_v31  ;;  %v1664_v27 = vld [vmem:[%s2097_s3 + $0x88] sm:$0xff]   ;;  %v1667_v31 = vld [vmem:[%s2097_s3 + $0x40] sm:$0xff]  }
 0x10e   : > { %v554_v54 = vsel %vm553_vm10, %v550_v45, %v1599_v41  ;;  %v566_v55 = vsel %vm553_vm10, %v563_v30, %v1598_v42  ;;  %v1668_v32 = vld [vmem:[%s2097_s3] sm:$0xff]   ;;  %1480 = vmatprep.subr.bf16.mxu1 %v1667_v31  ;;  %v1673_v41 = vld [vmem:[%s2097_s3 + $0x58] sm:$0xff]  }
 0x10f   : > { %v1612_v34 = vpop.permute.xlu0 %1611  ;;  %v556_v46 = vsel %vm553_vm10, %v552_v43, %v1604_v37  ;;  %v555_v48 = vsel %vm553_vm10, %v551_v44, %v1603_v38  ;;  %v638_v52 = vshrl.u32 %v571_v40, 16  ;;  %v641_v53 = vshll.u32 %v571_v40, 16  ;;  %1481 = vmatpush3.bf16.msra.mxu1 %v1668_v32  ;;  %v1670_v37 = vld [vmem:[%s2097_s3 + $0x8] sm:$0xff]   ;;  %v1671_v38 = vld [vmem:[%s2097_s3 + $0x50] sm:$0xff]   ;;  %v1674_v42 = vld [vmem:[%s2097_s3 + $0x18] sm:$0xff]  }
 0x110   : > { %v1614_v49 = vunpack.i.h.bf16 %v1612_v34  ;;  %v1613_v9 = vunpack.i.l.bf16 %v1612_v34  ;;  %v1607_v39 = vpop.permute.xlu1 %1606  ;;  %1482 = vmatprep.subr.bf16.mxu1 %v1669_v33  ;;  %v1672_v40 = vld [vmem:[%s2097_s3 + $0x10] sm:$0xff]   ;;  %v1407_v44 = vld [vmem:[%s2096_s2] ss:$0 sm:$0xff]  ;;  %v1199_v32 = vpack.c.bf16 %v1785_v6, %v1782_v5 }
 0x111   : > { %v1609_v50 = vunpack.i.h.bf16 %v1607_v39  ;;  %v1608_v51 = vunpack.i.l.bf16 %v1607_v39  ;;  %v640_v13 = vrot.slane %v638_v52, 1  ;;  %v643_v0 = vrot.slane %v641_v53, 2  ;;  %v1675_v53 = vld [vmem:[%s2097_s3 + $0x60] sm:$0xff]  }
 0x112   : > { %v560_v56 = vsel %vm557_vm11, %v556_v46, %v1614_v49  ;;  %v559_v57 = vsel %vm557_vm11, %v555_v48, %v1613_v9 }
 0x113   : > { %v573_v58 = vpack.c.bf16 %v560_v56, %v560_v56  ;;  %v558_v59 = vsel %vm557_vm11, %v554_v54, %v1609_v50  ;;  %v569_v60 = vsel %vm557_vm11, %v566_v55, %v1608_v51  ;;  %v644_v18 = vor.u32 %v643_v0, %v640_v13  ;;  %1483 = vmatpush3.bf16.msra.mxu1 %v1670_v37  ;;  %v1676_v54 = vld [vmem:[%s2097_s3 + $0x20] sm:$0xff]   ;;  %v1677_v55 = vld [vmem:[%s2097_s3 + $0x68] sm:$0xff]  }
 0x114   : > { %v570_v61 = vpack.c.bf16 %v559_v57, %v558_v59  ;;  %v574_v62 = vpack.c.bf16 %v569_v60, %v569_v60  ;;  %1484 = vmatprep.subr.bf16.mxu1 %v1671_v38  ;;  %v1678_v56 = vld [vmem:[%s2097_s3 + $0x28] sm:$0xff]  }
 0x115   : > { %v629_v63 = vshrl.u32 %v573_v58, 16  ;;  %v632_v10 = vshll.u32 %v573_v58, 16 }
 0x116   : > { %v646_v1 = vshrl.u32 %v574_v62, 16  ;;  %v649_v2 = vshll.u32 %v574_v62, 16  ;;  %v621_v3 = vshrl.u32 %v570_v61, 16  ;;  %v624_v4 = vshll.u32 %v570_v61, 16 }
 0x117   : > { %v631_v7 = vrot.slane %v629_v63, 1  ;;  %v634_v11 = vrot.slane %v632_v10, 2  ;;  %1485 = vmatpush3.bf16.msra.mxu1 %v1672_v40 }
 0x118   : > { %v648_v12 = vrot.slane %v646_v1, 1  ;;  %v651_v14 = vrot.slane %v649_v2, 2  ;;  %v623_v15 = vrot.slane %v621_v3, 1  ;;  %v626_v16 = vrot.slane %v624_v4, 2  ;;  %1486 = vmatprep.subr.bf16.mxu1 %v1673_v41 }
 0x119   : > { %v635_v17 = vor.u32 %v634_v11, %v631_v7 }
 0x11a   : > { %v652_v20 = vor.u32 %v651_v14, %v648_v12  ;;  %v627_v21 = vor.u32 %v626_v16, %v623_v15 }
 0x11b   : > { %1487 = vmatpush3.bf16.msra.mxu1 %v1674_v42 }
 0x11c   : > { %v653_v22 = vsel %vm619_vm9, %v644_v18, %v652_v20  ;;  %v636_v23 = vsel %vm619_vm9, %v627_v21, %v635_v17  ;;  %1488 = vmatprep.subr.bf16.mxu1 %v1675_v53  ;;  %v1665_v17 = vld [vmem:[%s2099_s5] sm:$0xff]   ;;  %v1679_v18 = vld [vmem:[%s2097_s3 + $0x70] sm:$0xff]  }
 0x11d   : > { %816 = vmatprep.mubr.bf16.mxu0 %v653_v22 }
 0x11e   : > { %817 = vmatmul.mubr.bf16.vlgmr.msra.gmra.mrb[0].mxu0 %v636_v23  ;;  %v1681_v23 = vld [vmem:[%s2097_s3 + $0x78] sm:$0xff]  }
 0x11f   : > { %1523 = vmatprep.mubr.msk.bf16.mxu0 %vm1695_vm2, %v1693_v19  ;;  %1520 = vmatpush3.bf16.msra.mxu0 %v1663_v47 }
 0x120   : > { %1521 = vmatprep.subr.bf16.mxu0 %v1693_v19  ;;  %1489 = vmatpush3.bf16.msra.mxu1 %v1676_v54 }
 0x121   : > { %1490 = vmatprep.subr.bf16.mxu1 %v1677_v55 }
 0x123   : > { %1522 = vmatpush3.bf16.msra.mxu0 %v1664_v27 }
 0x124   : > { %1527 = vmatprep.subr.bf16.mxu0 %v1693_v19  ;;  %1491 = vmatpush3.bf16.msra.mxu1 %v1678_v56 }
 0x125   : > { %1492 = vmatprep.subr.bf16.mxu1 %v1679_v18 }
 0x171   : > { %v859_v24 = vpop.f32.mrb[0].mxu1 }
 0x172   : > { %v1517_v25 = vpop.f32.mrb[1].mxu1 }
 0x173   : > { %v862_v26 = vpop.f32.mrb[2].mxu1 }
 0x174   : > { %v1518_v8 = vpop.f32.mrb[3].mxu1 }
 0x175   : > { %v1666_v8 = vld [vmem:[%s2099_s5 + $0x8] sm:$0xff]  }
 0x1f1   : > { %v1471_v43 = vpop.f32.mrb[0].mxu0 }
 0x1f2   : > { %v1472_v45 = vpop.f32.mrb[1].mxu0 }
 0x1f3   : > { %v1473_v30 = vadd.f32 %v1472_v45, %v1471_v43  ;;  %v1474_v34 = vpop.f32.mrb[2].mxu0 }
 0x1f4   : > { %v1475_v46 = vpop.f32.mrb[3].mxu0 }
 0x1f5   : > { %v819_v48 = vadd.f32 %v1473_v30, %v1407_v44  ;;  %v1476_v49 = vadd.f32 %v1475_v46, %v1474_v34 }
 0x1f7   : > { %v860_v9 = vadd.f32 %v859_v24, %v819_v48  ;;  %v822_v39 = vadd.f32 %v1476_v49, %v1407_v44  ;;  %v1682_v24 = vld [vmem:[%s2097_s3 + $0x38] sm:$0xff]  }
 0x1f9   : > { %v866_v50 = vmax.f32 %v860_v9, 0.0  ;;  %v863_v51 = vadd.f32 %v862_v26, %v822_v39 }
 0x1fb   : > { %872 = vst.msk [vmem:[#allocation2 + $0x8] sm:$0xff] %vm549_vm1, %v866_v50  ;;  %v867_v52 = vmax.f32 %v863_v51, 0.0 }
 0x1fd   : > { %873 = vst.msk [vmem:[#allocation2 + $0x10] sm:$0xff] %vm549_vm1, %v867_v52 }
 0x202   : > { %v878_v57 = vld [vmem:[#allocation2 + $0x4] sm:$0xff] }
 0x203   : > { %v880_v58 = vld [vmem:[#allocation2 + $0x5] sm:$0xff] }
 0x204   : > { %v879_v59 = vld [vmem:[#allocation2 + $0xc] sm:$0xff]  ;;  %v898_v0 = vld [vmem:[#allocation2 + $0x15] sm:$0xff]  ;;  %v882_v14 = vmul.f32 %v880_v58, %v1842_v28  ;;  %v874_v40 = vld [vmem:[#allocation2 + $0x3] sm:$0xff] }
 0x205   : > { %v890_v60 = vld [vmem:[#allocation2 + $0x9] sm:$0xff]  ;;  %v891_v61 = vld [vmem:[#allocation2 + $0x11] sm:$0xff]  ;;  %v1615_v62 = vpack.i.bf16 %v879_v59, %v878_v57  ;;  %v900_v3 = vmul.f32 %v898_v0, %v1854_v35  ;;  %v876_v48 = vmul.f32 %v874_v40, %v1844_v29 }
 0x206   : > { %v892_v63 = vmul.f32 %v890_v60, %v1842_v28  ;;  %v893_v10 = vmul.f32 %v891_v61, %v1854_v35  ;;  %v881_v13 = vld [vmem:[#allocation2 + $0xd] sm:$0xff] }
 0x207   : > { %v875_v1 = vld [vmem:[#allocation2 + $0xb] sm:$0xff]  ;;  %v899_v2 = vmul.f32 %v881_v13, %v1842_v28  ;;  %v883_v4 = vmul.f32 %v881_v13, %v1854_v35  ;;  %v894_v7 = vld [vmem:[#allocation2 + $0x13] sm:$0xff]  ;;  %1616 = vrot.lane.b32.xlu0 %v1615_v62, %s1692_s29 }
 0x208   : > { %v885_v11 = vld [vmem:[#allocation2 + $0xf] sm:$0xff]  ;;  %v1620_v12 = vpack.i.bf16 %v893_v10, %v892_v63  ;;  %v895_v15 = vmul.f32 %v875_v1, %v1844_v29  ;;  %v896_v16 = vmul.f32 %v894_v7, %v1856_v36  ;;  %v884_v21 = vld [vmem:[#allocation2 + $0x7] sm:$0xff]  ;;  %v877_v46 = vmul.f32 %v875_v1, %v1856_v36 }
 0x209   : > { %v1680_v35 = vld [vmem:[%s2097_s3 + $0x30] sm:$0xff]   ;;  %v962_v20 = vpack.c.bf16 %v900_v3, %v899_v2  ;;  %v1630_v28 = vpack.i.bf16 %v883_v4, %v882_v14  ;;  %v887_v22 = vmul.f32 %v885_v11, %v1856_v36  ;;  %v886_v26 = vmul.f32 %v884_v21, %v1844_v29  ;;  %v888_v39 = vld [vmem:[#allocation2 + $0x8] sm:$0xff] }
 0x20a   : > { %1621 = vrot.lane.b32.xlu1 %v1620_v12, %s1692_s29  ;;  %1493 = vmatpush3.bf16.msra.mxu1 %v1680_v35  ;;  %v1625_v25 = vpack.i.bf16 %v896_v16, %v895_v15  ;;  %v897_v47 = vld [vmem:[#allocation2 + $0x14] sm:$0xff]  ;;  %v1697_v1 = vmov 0.0|0.0   ;;  %v1427_v12 = vld [vmem:[%s2098_s4] ss:$0 sm:$0xff] }
 0x20b   : > { %1524 = vmatmul.mubr.msk.bf16.vlgmr.msra.gmra.mrb[4].mxu0 %vm549_vm1, %v962_v20  ;;  %1631 = vrot.lane.b32.xlu0 %v1630_v28, %s1696_s19  ;;  %v1640_v27 = vpack.i.bf16 %v887_v22, %v886_v26  ;;  %v1635_v31 = vpack.i.bf16 %v897_v47, %v879_v59  ;;  %v889_v6 = vld [vmem:[#allocation2 + $0x10] sm:$0xff] }
 0x20c   : > { %1528 = vmatpush3.bf16.msra.mxu0 %v1665_v17  ;;  %1531 = vmatprep.mubr.msk.bf16.mxu0 %vm1695_vm2, %v1693_v19  ;;  %v1447_v17 = vld [vmem:[%s2100_s6] ss:$0 sm:$0xff] }
 0x20d   : > { %1529 = vmatprep.subr.bf16.mxu0 %v1693_v19  ;;  %1494 = vmatprep.subr.bf16.mxu1 %v1681_v23 }
 0x20e   : > { %1626 = vrot.lane.b32.xlu1 %v1625_v25, %s1696_s19  ;;  %1495 = vmatpush3.bf16.msra.mxu1 %v1682_v24  ;;  %v1267_v25 = vld [vmem:[%s2103_s9] sm:$0xf] }
 0x20f   : > { %1641 = vrot.lane.b32.xlu0 %v1640_v27, %s1694_s12  ;;  %1542 = vmatprep.subr.bf16.mxu1 %v1697_v1 }
 0x210   : > { %1530 = vmatpush3.bf16.msra.mxu0 %v1666_v8 }
 0x212   : > { %1636 = vrot.lane.b32.xlu1 %v1635_v31, %s1694_s12 }
 0x217   : > { %1532 = vmatmul.mubr.msk.bf16.vlgmr.msra.gmra.mrb[4].mxu0 %vm549_vm1, %v1199_v32 }
 0x279   : > { %v1617_v33 = vpop.permute.xlu0 %1616 }
 0x27a   : > { %v1619_v41 = vunpack.i.h.bf16 %v1617_v33  ;;  %v1618_v42 = vunpack.i.l.bf16 %v1617_v33 }
 0x27c   : > { %v1622_v37 = vpop.permute.xlu1 %1621  ;;  %v948_v52 = vsel %vm549_vm1, %v876_v48, %v1618_v42  ;;  %v949_v53 = vsel %vm549_vm1, %v877_v46, %v1619_v41 }
 0x27d   : > { %v1632_v38 = vpop.permute.xlu0 %1631  ;;  %v1624_v43 = vunpack.i.h.bf16 %v1622_v37  ;;  %v1623_v44 = vunpack.i.l.bf16 %v1622_v37 }
 0x27e   : > { %v1634_v30 = vunpack.i.h.bf16 %v1632_v38  ;;  %v1633_v34 = vunpack.i.l.bf16 %v1632_v38 }
 0x27f   : > { %v955_v54 = vsel %vm549_vm1, %v889_v6, %v1624_v43  ;;  %v954_v55 = vsel %vm549_vm1, %v888_v39, %v1623_v44 }
 0x280   : > { %v1627_v45 = vpop.permute.xlu1 %1626  ;;  %v950_v36 = vsel %vm553_vm10, %v948_v52, %v1633_v34  ;;  %v951_v29 = vsel %vm553_vm10, %v949_v53, %v1634_v30 }
 0x281   : > { %v1629_v49 = vunpack.i.h.bf16 %v1627_v45  ;;  %v1628_v9 = vunpack.i.l.bf16 %v1627_v45  ;;  %v1642_v5 = vpop.permute.xlu0 %1641 }
 0x282   : > { %v1644_v50 = vunpack.i.h.bf16 %v1642_v5  ;;  %v1643_v51 = vunpack.i.l.bf16 %v1642_v5 }
 0x283   : > { %v957_v59 = vsel %vm553_vm10, %v955_v54, %v1629_v49  ;;  %v956_v60 = vsel %vm553_vm10, %v954_v55, %v1628_v9 }
 0x284   : > { %v1637_v56 = vpop.permute.xlu1 %1636  ;;  %v952_v61 = vsel %vm557_vm11, %v950_v36, %v1643_v51  ;;  %v953_v62 = vsel %vm557_vm11, %v951_v29, %v1644_v50 }
 0x285   : > { %v1639_v57 = vunpack.i.h.bf16 %v1637_v56  ;;  %v1638_v58 = vunpack.i.l.bf16 %v1637_v56  ;;  %v960_v0 = vpack.c.bf16 %v953_v62, %v952_v61 }
 0x287   : > { %v958_v63 = vsel %vm557_vm11, %v956_v60, %v1638_v58  ;;  %v959_v10 = vsel %vm557_vm11, %v957_v59, %v1639_v57 }
 0x288   : > { %v961_v13 = vpack.c.bf16 %v959_v10, %v958_v63 }
 0x28a   : > { %1149 = vmatprep.mubr.bf16.mxu1 %v961_v13 }
 0x28b   : > { %1150 = vmatmul.mubr.bf16.vlgmr.msra.gmra.mrb[4].mxu1 %v960_v0 }
 0x28c   : > { %1539 = vmatprep.mubr.msk.f32.mxu1 %vm1695_vm2, %v1693_v19 }
 0x2ea   : > { %v1260_v2 = vpop.f32.mrb[4].mxu0 }
 0x2eb   : > { %v1533_v3 = vpop.f32.mrb[5].mxu0 }
 0x2ec   : > { %v1263_v4 = vpop.f32.mrb[6].mxu0 }
 0x2ed   : > { %v1534_v7 = vpop.f32.mrb[7].mxu0 }
 0x35e   : > { %v1496_v11 = vpop.f32.mrb[4].mxu1 }
 0x35f   : > { %v1497_v14 = vpop.f32.mrb[5].mxu1 }
 0x360   : > { %v1498_v15 = vadd.f32 %v1497_v14, %v1496_v11  ;;  %v1499_v16 = vpop.f32.mrb[6].mxu1 }
 0x361   : > { %v1500_v19 = vpop.f32.mrb[7].mxu1 }
 0x362   : > { %v1152_v18 = vadd.f32 %v1498_v15, %v1427_v12  ;;  %v1501_v35 = vadd.f32 %v1500_v19, %v1499_v16 }
 0x364   : > { %v1545_v20 = vadd.f32 %v1447_v17, %v1152_v18  ;;  %v1155_v21 = vadd.f32 %v1501_v35, %v1427_v12 }
 0x366   : > { %v1546_v28 = vadd.f32 %v1545_v20, %v1260_v2  ;;  %v1547_v22 = vadd.f32 %v1447_v17, %v1155_v21 }
 0x368   : > { %v1548_v23 = vadd.f32 %v1547_v22, %v1263_v4 }
 0x36a   : > { %v1543_v24 = vpack.c.bf16 %v1548_v23, %v1546_v28 }
 0x36c   : > { %1544 = vmatpush3.bf16.msra.mxu1 %v1543_v24 }
 0x36f   : > { %1540 = vmatmul.mubr.msk.f32.vlgmr.msra.gmra.mrb[8].mxu1 %vm1270_vm12, %v1267_v25 }
 0x442   : > { %v1340_v26 = vpop.f32.mrb[8].mxu1 }
 0x443   : > { %1345 = vst.msk [vmem:[%s357_s20] sm:$0xf] %vm1344_vm13, %v1340_v26  ;;  %v1541_v8 = vpop.f32.mrb[9].mxu1 }
 0x444 PF: > { %s20_s13 = sadd.s32 1, %s1689_s13  }
 0x445   : > { %p17_p4 = scmp.ge.s32.totalorder %s20_s13, 4  }
 0x447   :  { %19 = sbr.rel (!%p17_p4) target bundleno = 1 (0x1), region = 90 }

// kernel: discriminator_forward.7
= control target key start
LH: loop header
LB: loop body
LE: loop exit
PB: predicated region body
PF: predicated region fallthrough
CT: control target
= control target key end

     0   :  { %s2948_s13 = smov 0   ;;  %s3959_s0 = inlined_call_operand.vmem [shape: f32[2,96,32], index: 0, kind: input, shape index: {}]   ;;  %s3960_s1 = inlined_call_operand.vmem [shape: bf16[288,32], index: 1, kind: input, shape index: {}]   ;;  %s3961_s2 = inlined_call_operand.vmem [shape: f32[1,32], index: 2, kind: input, shape index: {}]   ;;  %s3962_s3 = inlined_call_operand.vmem [shape: bf16[288,32], index: 3, kind: input, shape index: {}]   ;;  %s3963_s4 = inlined_call_operand.vmem [shape: f32[1,32], index: 4, kind: input, shape index: {}]   ;;  %s3964_s5 = inlined_call_operand.vmem [shape: bf16[32,32], index: 5, kind: input, shape index: {}]   ;;  %s3965_s6 = inlined_call_operand.vmem [shape: f32[1,32], index: 6, kind: input, shape index: {}]   ;;  %s3966_s7 = inlined_call_operand.vmem [shape: f32[64,1], index: 7, kind: input, shape index: {}]   ;;  %s3967_s8 = inlined_call_operand.vmem [shape: f32[64,1], index: 8, kind: input, shape index: {}]   ;;  %s3968_s9 = inlined_call_operand.vmem [shape: f32[16,64], index: 9, kind: input, shape index: {}]   ;;  %s3969_s10 = inlined_call_operand.vmem [shape: f32[2,16,32], index: 10, kind: output, shape index: {}]  }
   0x1 LB: > { %s2294_s14 = sadd.s32 4294967295, %s2886_s13   ;;  %p2298_p0 = scmp.ge.s32.totalorder %s2886_s13, 1  ;;  %s2886_s13 = sphi %s2948_s13, %s20_s13  }
   0x2   : > { %p312_p1 = scmp.lt.s32.totalorder %s2886_s13, 3 }
   0x4   : > { %p313_p2 = pnand %p2298_p0, %p312_p1 }
   0x6   : > { %316 = sbr.rel (%p313_p2) target bundleno = 1177 (0x499), region = 60 }
   0xd   : > { %v371_v0 = vld [vmem:[%s3967_s8 + $0x10] sm:$0xff]  ;;  %v369_v1 = vld [vmem:[%s3967_s8] sm:$0xff]  ;;  %p350_p3 = scmp.lt.s32.totalorder %s2294_s14, 1  ;;  %v2888_v2 = vmov 0   ;;  %vm891_vm0 = vcmask 261120   ;;  %v372_v3 = vld [vmem:[%s3967_s8 + $0x18] sm:$0xff] }
   0xe   : > { %2578 = vset.pattern.permute.xlu1 %v2888_v2  ;;  %2577 = vset.pattern.permute.xlu0 %v2888_v2  ;;  %v370_v4 = vld [vmem:[%s3967_s8 + $0x8] sm:$0xff]  ;;  %v2889_v5 = vmov 0.0   ;;  %v361_v7 = vld [vmem:[%s3966_s7] sm:$0xff]  ;;  %v364_v12 = vld [vmem:[%s3966_s7 + $0x18] sm:$0xff]  ;;  %vm441_vm1 = vcmask 1046528   ;;  %s2890_s20 = smov 32  }
   0xf   : > { %487 = vperm.xlu1 %2578, %v371_v0   ;;  %477 = vperm.xlu0 %2577, %v369_v1   ;;  %s4013_s14 = smov (!%p350_p3, %s2294_s14), 1  ;;  %1405 = vst.msk [vmem:[#allocation2] sm:$0xff] %vm891_vm0, %v2889_v5  ;;  %1406 = vst.msk [vmem:[#allocation2 + $0x8] sm:$0xff] %vm891_vm0, %v2889_v5  ;;  %v362_v6 = vld [vmem:[%s3966_s7 + $0x8] sm:$0xff]  ;;  %v363_v13 = vld [vmem:[%s3966_s7 + $0x10] sm:$0xff]  ;;  %s2891_s21 = smov 96  }
  0x10   : > { %1407 = vst.msk [vmem:[#allocation2 + $0x10] sm:$0xff] %vm891_vm0, %v2889_v5  ;;  %1408 = vst.msk [vmem:[#allocation2 + $0x18] sm:$0xff] %vm891_vm0, %v2889_v5  ;;  %s2563_s23 = smul.u32 96, %s4013_s14  ;;  %v374_v20 = vld [vmem:[%s3967_s8 + $0x28] sm:$0xff]  ;;  %v373_v21 = vld [vmem:[%s3967_s8 + $0x20] sm:$0xff]  ;;  %vm515_vm2 = vcmask 1040384  }
  0x11   : > { %1409 = vst.msk [vmem:[#allocation2 + $0x20] sm:$0xff] %vm891_vm0, %v2889_v5  ;;  %1410 = vst.msk [vmem:[#allocation2 + $0x28] sm:$0xff] %vm891_vm0, %v2889_v5  ;;  %v366_v26 = vld [vmem:[%s3966_s7 + $0x28] sm:$0xff]  ;;  %v365_v27 = vld [vmem:[%s3966_s7 + $0x20] sm:$0xff]  ;;  %vm644_vm3 = vcmask 1045504   ;;  %s2892_s17 = smov 64  }
  0x12   : > { %1411 = vst.msk [vmem:[#allocation2 + $0x30] sm:$0xff] %vm891_vm0, %v2889_v5  ;;  %1412 = vst.msk [vmem:[#allocation2 + $0x38] sm:$0xff] %vm891_vm0, %v2889_v5  ;;  %s2986_s26 = scalar_lea.vmem %s3959_s0, %s2563_s23  ;;  %v376_v28 = vld [vmem:[%s3967_s8 + $0x38] sm:$0xff]  ;;  %v375_v29 = vld [vmem:[%s3967_s8 + $0x30] sm:$0xff]  ;;  %vm1006_vm4 = vsmask.f32 4352 }
  0x13   : > { %1413 = vst.msk [vmem:[#allocation2 + $0x40] sm:$0xff] %vm891_vm0, %v2889_v5  ;;  %1414 = vst.msk [vmem:[#allocation2 + $0x48] sm:$0xff] %vm891_vm0, %v2889_v5  ;;  %492 = vperm.xlu1 %2578, %v372_v3   ;;  %482 = vperm.xlu0 %2577, %v370_v4   ;;  %v379_v8 = vld [vmem:[%s2986_s26 + $0x10] sm:$0xff]  ;;  %v380_v9 = vld [vmem:[%s2986_s26 + $0x18] sm:$0xff]  ;;  %vm901_vm5 = vcmask 523264   ;;  %vm911_vm6 = vcmask 785408  }
  0x14   : > { %1415 = vst.msk [vmem:[#allocation2 + $0x50] sm:$0xff] %vm891_vm0, %v2889_v5  ;;  %1416 = vst.msk [vmem:[#allocation2 + $0x58] sm:$0xff] %vm891_vm0, %v2889_v5  ;;  %v381_v10 = vld [vmem:[%s2986_s26 + $0x20] sm:$0xff]  ;;  %v378_v11 = vld [vmem:[%s2986_s26 + $0x8] sm:$0xff]  ;;  %v3004_v14 = vmax.f32 %v379_v8, 0.0  ;;  %v3006_v15 = vmax.f32 %v380_v9, 0.0 }
  0x15   : > { %v382_v16 = vld [vmem:[%s2986_s26 + $0x28] sm:$0xff]  ;;  %v383_v17 = vld [vmem:[%s2986_s26 + $0x30] sm:$0xff]  ;;  %v3010_v18 = vmax.f32 %v381_v10, 0.0  ;;  %v3012_v19 = vmax.f32 %v378_v11, 0.0  ;;  %v384_v30 = vld [vmem:[%s2986_s26 + $0x38] sm:$0xff]  ;;  %s2359_s11 = sshll.u32 %s4013_s14, 4 }
  0x16   : > { %v3020_v22 = vmax.f32 %v382_v16, 0.0  ;;  %v3022_v23 = vmax.f32 %v383_v17, 0.0  ;;  %v3025_v24 = vrot.slane %v3004_v14, 1  ;;  %v596_v25 = vrot.slane %v3006_v15, 1  ;;  %v385_v33 = vld [vmem:[%s2986_s26 + $0x40] sm:$0xff]  ;;  %v368_v34 = vld [vmem:[%s3966_s7 + $0x38] sm:$0xff]  ;;  %s359_s16 = scalar_lea.vmem %s3969_s10, %s2359_s11 }
  0x17   : > { %408 = vperm.xlu1 %2578, %v362_v6   ;;  %403 = vperm.xlu0 %2577, %v361_v7   ;;  %v598_v31 = vrot.slane %v3010_v18, 1  ;;  %v593_v32 = vrot.slane %v3012_v19, 1  ;;  %v3049_v37 = vmax.f32 %v384_v30, 0.0  ;;  %v367_v38 = vld [vmem:[%s3966_s7 + $0x30] sm:$0xff]  ;;  %v3063_v42 = vmax.f32 %v385_v33, 0.0  ;;  %v2834_v46 = vld [vmem:[%s3960_s1 + $0x80] sm:$0xff]  }
  0x18   : > { %v600_v35 = vrot.slane %v3020_v22, 1  ;;  %v602_v36 = vrot.slane %v3022_v23, 1  ;;  %v3056_v39 = vsel %vm441_vm1, %v3025_v24, %v596_v25  ;;  %v2835_v50 = vld [vmem:[%s3960_s1 + $0x88] sm:$0xff]   ;;  %2468 = vmatprep.subr.bf16.mxu1 %v2834_v46  ;;  %v2836_v59 = vld [vmem:[%s3960_s1 + $0x40] sm:$0xff]   ;;  %v387_v30 = vld [vmem:[%s2986_s26 + $0x50] sm:$0xff] }
  0x19   : > { %v3059_v40 = vsel %vm441_vm1, %v596_v25, %v598_v31  ;;  %v595_v41 = vsel %vm441_vm1, %v593_v32, %v3025_v24  ;;  %v604_v45 = vrot.slane %v3049_v37, 1  ;;  %v3078_v49 = vrot.slane %v3063_v42, 1  ;;  %2469 = vmatpush3.bf16.msra.mxu1 %v2834_v46  ;;  %v2837_v60 = vld [vmem:[%s3960_s1] sm:$0xff]   ;;  %2360 = vmatprep.subr.bf16.mxu0 %v2836_v59  ;;  %v386_v3 = vld [vmem:[%s2986_s26 + $0x48] sm:$0xff] }
  0x1a   : > { %v2584_v43 = vpack.i.bf16 %v3059_v40, %v3056_v39  ;;  %v2579_v44 = vpack.i.bf16 %v595_v41, %v593_v32  ;;  %v3072_v47 = vsel %vm441_vm1, %v598_v31, %v600_v35  ;;  %v3075_v48 = vsel %vm441_vm1, %v600_v35, %v602_v36  ;;  %2470 = vmatprep.subr.bf16.mxu1 %v2835_v50  ;;  %v2838_v7 = vld [vmem:[%s3960_s1 + $0x48] sm:$0xff]  }
  0x1b   : > { %418 = vperm.xlu1 %2578, %v364_v12   ;;  %413 = vperm.xlu0 %2577, %v363_v13   ;;  %v2594_v51 = vpack.i.bf16 %v3075_v48, %v3072_v47  ;;  %v2589_v52 = vpack.i.bf16 %v3059_v40, %v596_v25  ;;  %v3089_v53 = vsel %vm441_vm1, %v602_v36, %v604_v45  ;;  %v2839_v8 = vld [vmem:[%s3960_s1 + $0x8] sm:$0xff]  }
  0x1c   : > { %v3093_v54 = vsel %vm441_vm1, %v604_v45, %v3078_v49  ;;  %2361 = vmatpush3.bf16.msra.mxu0 %v2837_v60 }
  0x1d   : > { %2471 = vmatpush3.bf16.msra.mxu1 %v2835_v50  ;;  %v3099_v55 = vpack.i.bf16 %v3093_v54, %v3089_v53  ;;  %2362 = vmatprep.subr.bf16.mxu0 %v2838_v7 }
  0x1f   : > { %502 = vperm.xlu1 %2578, %v374_v20   ;;  %497 = vperm.xlu0 %2577, %v373_v21   ;;  %v3161_v20 = vmax.f32 %v386_v3, 0.0 }
  0x20   : > { %2363 = vmatpush3.bf16.msra.mxu0 %v2839_v8 }
  0x23   : > { %428 = vperm.xlu1 %2578, %v366_v26   ;;  %423 = vperm.xlu0 %2577, %v365_v27  }
  0x27   : > { %512 = vperm.xlu1 %2578, %v376_v28   ;;  %507 = vperm.xlu0 %2577, %v375_v29  }
  0x2b   : > { %438 = vperm.xlu1 %2578, %v368_v34   ;;  %433 = vperm.xlu0 %2577, %v367_v38  }
  0x2f   : > { %2585 = vrot.lane.b32.xlu1 %v2584_v43, %s2890_s20  ;;  %2580 = vrot.lane.b32.xlu0 %v2579_v44, %s2890_s20  ;;  %v2840_v43 = vld [vmem:[%s3960_s1 + $0x50] sm:$0xff]  }
  0x30   : > { %v2841_v44 = vld [vmem:[%s3960_s1 + $0x10] sm:$0xff]   ;;  %2364 = vmatprep.subr.bf16.mxu0 %v2840_v43 }
  0x31   : > { %2365 = vmatpush3.bf16.msra.mxu0 %v2841_v44 }
  0x33   : > { %2595 = vrot.lane.b32.xlu1 %v2594_v51, %s2891_s21  ;;  %2590 = vrot.lane.b32.xlu0 %v2589_v52, %s2891_s21 }
  0x37   : > { %2600 = vrot.lane.b32.xlu1 %v2594_v51, %s2890_s20  ;;  %2605 = vrot.lane.b32.xlu0 %v3099_v55, %s2891_s21 }
  0x8e   : > { %v3104_v56 = vpop.permute.xlu1 %487  ;;  %v3106_v57 = vpop.permute.xlu0 %477 }
  0x8f   : > { %3988 = vst [vmem:[#allocation3_spill] sm:$0xff] %v3104_v56  ;;  %v3109_v58 = vrot.slane %v3106_v57, 7  ;;  %v519_v63 = vrot.slane %v3104_v56, 7 }
  0x91   : > { %v576_v2 = vmul.f32 %v3109_v58, %v3006_v15 }
  0x92   : > { %v3117_v61 = vpop.permute.xlu1 %492  ;;  %v3119_v62 = vpop.permute.xlu0 %482 }
  0x93   : > { %v521_v0 = vrot.slane %v3117_v61, 7  ;;  %v517_v1 = vrot.slane %v3119_v62, 7  ;;  %v865_v27 = vrot.slane %v576_v2, 2 }
  0x95   : > { %v3130_v4 = vsel %vm515_vm2, %v519_v63, %v521_v0  ;;  %v3134_v5 = vsel %vm515_vm2, %v3109_v58, %v517_v1  ;;  %v3137_v6 = vsel %vm515_vm2, %v517_v1, %v519_v63  ;;  %v3202_v63 = vmax.f32 %v387_v30, 0.0 }
  0x96   : > { %v3147_v9 = vmul.f32 %v3130_v4, %v3022_v23  ;;  %v577_v10 = vmul.f32 %v3134_v5, %v3010_v18  ;;  %v578_v11 = vmul.f32 %v3137_v6, %v3020_v22  ;;  %v3153_v12 = vpop.permute.xlu1 %408  ;;  %v3155_v13 = vpop.permute.xlu0 %403  ;;  %v3173_v31 = vmul.f32 %v3134_v5, %v3006_v15 }
  0x97   : > { %v443_v16 = vrot.slane %v3153_v12, 1  ;;  %v3159_v17 = vrot.slane %v3155_v13, 1  ;;  %v3177_v32 = vmul.f32 %v3137_v6, %v3010_v18  ;;  %v3212_v3 = vmul.f32 %v3130_v4, %v3020_v22 }
  0x98   : > { %v3970_v21 = vrot.slane %v3147_v9, 2  ;;  %v866_v25 = vrot.slane %v577_v10, 2  ;;  %v868_v26 = vrot.slane %v578_v11, 2 }
  0x99   : > { %v3166_v28 = vsel %vm441_vm1, %v3159_v17, %v443_v16  ;;  %v567_v29 = vmul.f32 %v3159_v17, %v3004_v14  ;;  %v549_v36 = vmul.f32 %v3159_v17, %v3012_v19 }
  0x9a   : > { %v3179_v33 = vpop.permute.xlu1 %418  ;;  %v3181_v34 = vpop.permute.xlu0 %413  ;;  %v568_v35 = vmul.f32 %v3166_v28, %v3006_v15  ;;  %v550_v38 = vmul.f32 %v3166_v28, %v3004_v14  ;;  %v867_v41 = vsel %vm644_vm3, %v865_v27, %v866_v25  ;;  %v869_v50 = vsel %vm644_vm3, %v866_v25, %v868_v26 }
  0x9b   : > { %3989 = vst [vmem:[#allocation4_spill] sm:$0xff] %v3179_v33  ;;  %3990 = vst [vmem:[#allocation5_spill] sm:$0xff] %v3181_v34  ;;  %v447_v45 = vrot.slane %v3179_v33, 1  ;;  %v445_v46 = vrot.slane %v3181_v34, 1  ;;  %v871_v51 = vsel %vm644_vm3, %v868_v26, %v3970_v21  ;;  %v950_v59 = vpack.c.bf16 %v867_v41, %v865_v27 }
  0x9c   : > { %v2609_v52 = vpack.i.bf16 %v568_v35, %v567_v29  ;;  %v953_v60 = vpack.c.bf16 %v871_v51, %v869_v50  ;;  %v2619_v25 = vpack.i.bf16 %v550_v38, %v549_v36  ;;  %v749_v26 = vrot.slane %v3177_v32, 2  ;;  %v377_v51 = vld [vmem:[%s2986_s26] sm:$0xff] }
  0x9d   : > { %v3205_v1 = vsel %vm441_vm1, %v443_v16, %v445_v46  ;;  %v3208_v2 = vsel %vm441_vm1, %v445_v46, %v447_v45  ;;  %v1042_v30 = vshrl.u32 %v950_v59, 16  ;;  %v1045_v35 = vshll.u32 %v950_v59, 16  ;;  %v2843_v59 = vld [vmem:[%s3960_s1 + $0x18] sm:$0xff]  }
  0x9e   : > { %v3215_v8 = vpop.permute.xlu1 %502  ;;  %v3217_v10 = vpop.permute.xlu0 %497  ;;  %2610 = vrot.lane.b32.xlu0 %v2609_v52, %s2892_s17  ;;  %v569_v11 = vmul.f32 %v3205_v1, %v3010_v18  ;;  %v570_v16 = vmul.f32 %v3208_v2, %v3020_v22  ;;  %v1050_v43 = vshrl.u32 %v953_v60, 16  ;;  %v1053_v44 = vshll.u32 %v953_v60, 16  ;;  %v2842_v52 = vld [vmem:[%s3960_s1 + $0x58] sm:$0xff]  }
  0x9f   : > { %3991 = vst [vmem:[#allocation6_spill] sm:$0xff] %v3215_v8  ;;  %3992 = vst [vmem:[#allocation7_spill] sm:$0xff] %v3217_v10  ;;  %v525_v27 = vrot.slane %v3215_v8, 7  ;;  %v523_v29 = vrot.slane %v3217_v10, 7  ;;  %v551_v46 = vmul.f32 %v3205_v1, %v3006_v15  ;;  %v1044_v32 = vrot.slane %v1042_v30, 3  ;;  %2366 = vmatprep.subr.bf16.mxu0 %v2842_v52 }
  0xa0   : > { %v2614_v41 = vpack.i.bf16 %v570_v16, %v569_v11  ;;  %v1047_v38 = vrot.slane %v1045_v35, 4  ;;  %v1052_v16 = vrot.slane %v1050_v43, 3  ;;  %v552_v10 = vmul.f32 %v3208_v2, %v3010_v18  ;;  %2367 = vmatpush3.bf16.msra.mxu0 %v2843_v59 }
  0xa1   : > { %v3232_v50 = vsel %vm515_vm2, %v521_v0, %v523_v29  ;;  %v3235_v36 = vsel %vm515_vm2, %v523_v29, %v525_v27  ;;  %v1055_v29 = vrot.slane %v1053_v44, 4  ;;  %v558_v43 = vmul.f32 %v3109_v58, %v3004_v14 }
  0xa2   : > { %v3246_v60 = vmul.f32 %v3232_v50, %v3049_v37  ;;  %v3248_v0 = vpop.permute.xlu1 %428  ;;  %v3250_v11 = vpop.permute.xlu0 %423  ;;  %2615 = vrot.lane.b32.xlu1 %v2614_v41, %s2892_s17  ;;  %2620 = vrot.lane.b32.xlu0 %v2619_v25, %s2891_s21  ;;  %v1048_v7 = vor.u32 %v1047_v38, %v1044_v32  ;;  %v3261_v8 = vmul.f32 %v3235_v36, %v3063_v42  ;;  %v389_v25 = vmax.f32 %v377_v51, 0.0 }
  0xa3   : > { %3993 = vst [vmem:[#allocation8_spill] sm:$0xff] %v3250_v11  ;;  %v3975_v35 = vrot.slane %v3248_v0, 1  ;;  %v449_v21 = vrot.slane %v3250_v11, 1  ;;  %v3263_v41 = vor.u32 %v1055_v29, %v1052_v16  ;;  %v2624_v44 = vpack.i.bf16 %v552_v10, %v551_v46 }
  0xa4   : > { %v3994_v30 = vrot.slane %v3173_v31, 2  ;;  %v3997_v10 = vrot.slane %v3212_v3, 2  ;;  %v3321_v33 = vmul.f32 %v3130_v4, %v3010_v18 }
  0xa5   : > { %v3271_v38 = vsel %vm441_vm1, %v447_v45, %v449_v21  ;;  %v3276_v52 = vsel %vm441_vm1, %v449_v21, %v3975_v35  ;;  %v1057_v51 = vsel %vm1006_vm4, %v1048_v7, %v3263_v41  ;;  %v872_v21 = vrot.slane %v3246_v60, 2  ;;  %v2845_v60 = vld [vmem:[%s3960_s1 + $0x20] sm:$0xff]   ;;  %v388_v35 = vld [vmem:[%s2986_s26 + $0x58] sm:$0xff] }
  0xa6   : > { %v750_v32 = vsel %vm644_vm3, %v3994_v30, %v749_v26  ;;  %v3280_v16 = vpop.permute.xlu1 %512  ;;  %v3282_v59 = vpop.permute.xlu0 %507  ;;  %v752_v46 = vsel %vm644_vm3, %v749_v26, %v3997_v10  ;;  %v571_v45 = vmul.f32 %v3271_v38, %v3022_v23  ;;  %v572_v29 = vmul.f32 %v3276_v52, %v3049_v37  ;;  %2472 = vmatprep.mubr.msk.bf16.mxu1 %vm891_vm0, %v1057_v51  ;;  %v2844_v10 = vld [vmem:[%s3960_s1 + $0x60] sm:$0xff]  }
  0xa7   : > { %3995 = vst [vmem:[#allocation9_spill] sm:$0xff] %v3280_v16  ;;  %3996 = vst [vmem:[#allocation10_spill] sm:$0xff] %v3282_v59  ;;  %v3294_v7 = vrot.slane %v3280_v16, 7  ;;  %v527_v30 = vrot.slane %v3282_v59, 7  ;;  %2625 = vrot.lane.b32.xlu1 %v2624_v44, %s2891_s21  ;;  %v540_v26 = vmul.f32 %v3109_v58, %v3012_v19  ;;  %v541_v59 = vmul.f32 %v3134_v5, %v3004_v14 }
  0xa8   : > { %v2629_v16 = vpack.i.bf16 %v572_v29, %v571_v45  ;;  %v542_v44 = vmul.f32 %v3137_v6, %v3006_v15  ;;  %v2639_v34 = vpack.i.bf16 %v752_v46, %v750_v32  ;;  %2368 = vmatprep.subr.bf16.mxu0 %v2844_v10  ;;  %v400_v29 = vmax.f32 %v388_v35, 0.0 }
  0xa9   : > { %v3313_v58 = vsel %vm515_vm2, %v525_v27, %v527_v30  ;;  %v3317_v11 = vsel %vm515_vm2, %v527_v30, %v3294_v7  ;;  %v646_v45 = vrot.slane %v541_v59, 2  ;;  %2369 = vmatpush3.bf16.msra.mxu0 %v2845_v60  ;;  %v650_v6 = vrot.slane %v3321_v33, 2  ;;  %v2847_v33 = vld [vmem:[%s3960_s1 + $0x28] sm:$0xff]  }
  0xaa   : > { %2630 = vrot.lane.b32.xlu0 %v2629_v16, %s2892_s17  ;;  %v648_v5 = vrot.slane %v542_v44, 2  ;;  %v746_v27 = vrot.slane %v558_v43, 2  ;;  %v645_v51 = vrot.slane %v540_v26, 2  ;;  %v582_v32 = vmul.f32 %v3313_v58, %v3161_v20 }
  0xab   : > { %2640 = vrot.lane.b32.xlu1 %v2639_v34, %s2890_s20  ;;  %v3330_v4 = vmul.f32 %v3317_v11, %v3202_v63  ;;  %v3334_v16 = vmul.f32 %v3159_v17, %v389_v25  ;;  %v2846_v34 = vld [vmem:[%s3960_s1 + $0x68] sm:$0xff]   ;;  %v3998_v43 = vrot.slane %v3173_v31, 2  ;;  %v3999_v30 = vrot.slane %v3147_v9, 2  ;;  %v3355_v31 = vpop.permute.xlu1 %438 }
  0xac   : > { %v649_v46 = vsel %vm644_vm3, %v646_v45, %v648_v5  ;;  %v651_v35 = vsel %vm644_vm3, %v648_v5, %v650_v6  ;;  %v4000_v17 = vrot.slane %v3261_v8, 2  ;;  %v553_v56 = vmul.f32 %v3271_v38, %v3020_v22  ;;  %2370 = vmatprep.subr.bf16.mxu0 %v2846_v34  ;;  %v3363_v34 = vpop.permute.xlu0 %433 }
  0xad   : > { %v748_v59 = vsel %vm644_vm3, %v746_v27, %v3998_v43  ;;  %v873_v26 = vsel %vm644_vm3, %v3999_v30, %v872_v21  ;;  %v2649_v10 = vpack.i.bf16 %v651_v35, %v649_v46  ;;  %v584_v5 = vmul.f32 %v3294_v7, %v400_v29  ;;  %2371 = vmatpush3.bf16.msra.mxu0 %v2847_v33 }
  0xae   : > { %v875_v25 = vsel %vm644_vm3, %v872_v21, %v4000_v17  ;;  %v2634_v60 = vpack.i.bf16 %v748_v59, %v746_v27  ;;  %v554_v21 = vmul.f32 %v3276_v52, %v3022_v23  ;;  %v647_v27 = vsel %vm644_vm3, %v645_v51, %v646_v45  ;;  %v2849_v17 = vld [vmem:[%s3960_s1 + $0x30] sm:$0xff]  }
  0xaf   : > { %v956_v44 = vpack.c.bf16 %v875_v25, %v873_v26  ;;  %2650 = vrot.lane.b32.xlu1 %v2649_v10, %s2892_s17  ;;  %v876_v46 = vrot.slane %v582_v32, 2  ;;  %v878_v35 = vrot.slane %v3330_v4, 2  ;;  %v2644_v30 = vpack.i.bf16 %v647_v27, %v645_v51  ;;  %v2848_v26 = vld [vmem:[%s3960_s1 + $0x70] sm:$0xff]  }
  0xb0   : > { %2635 = vrot.lane.b32.xlu0 %v2634_v60, %s2890_s20  ;;  %v2654_v59 = vpack.i.bf16 %v554_v21, %v553_v56  ;;  %v880_v25 = vrot.slane %v584_v5, 2  ;;  %v3372_v45 = vrot.slane %v3355_v31, 1  ;;  %v544_v32 = vmul.f32 %v3232_v50, %v3020_v22  ;;  %2372 = vmatprep.subr.bf16.mxu0 %v2848_v26 }
  0xb1   : > { %v1077_v9 = vshrl.u32 %v956_v44, 16  ;;  %v1080_v43 = vshll.u32 %v956_v44, 16  ;;  %v545_v4 = vmul.f32 %v3235_v36, %v3022_v23  ;;  %v453_v56 = vrot.slane %v3363_v34, 1  ;;  %v2850_v44 = vld [vmem:[%s3960_s1 + $0x78] sm:$0xff]   ;;  %2373 = vmatpush3.bf16.msra.mxu0 %v2849_v17 }
  0xb2   : > { %v562_v10 = vmul.f32 %v3232_v50, %v3022_v23  ;;  %v3385_v60 = vmul.f32 %v3235_v36, %v3049_v37  ;;  %v652_v5 = vrot.slane %v544_v32, 2  ;;  %v879_v27 = vsel %vm644_vm3, %v876_v46, %v878_v35  ;;  %2374 = vmatprep.subr.bf16.mxu0 %v2850_v44 }
  0xb3   : > { %v1079_v29 = vrot.slane %v1077_v9, 3  ;;  %v1082_v33 = vrot.slane %v1080_v43, 4  ;;  %2655 = vrot.lane.b32.xlu1 %v2654_v59, %s2891_s21  ;;  %v654_v9 = vrot.slane %v545_v4, 2  ;;  %v4001_v43 = vrot.slane %v3261_v8, 2  ;;  %v2851_v59 = vld [vmem:[%s3960_s1 + $0x38] sm:$0xff]  }
  0xb4   : > { %2645 = vrot.lane.b32.xlu0 %v2644_v30, %s2892_s17  ;;  %v755_v36 = vrot.slane %v3385_v60, 2  ;;  %v653_v8 = vsel %vm644_vm3, %v650_v6, %v652_v5  ;;  %v4002_v26 = vrot.slane %v3212_v3, 2  ;;  %v881_v6 = vsel %vm644_vm3, %v878_v35, %v880_v25 }
  0xb5   : > { %v1083_v51 = vor.u32 %v1082_v33, %v1079_v29  ;;  %v877_v21 = vsel %vm644_vm3, %v4001_v43, %v876_v46  ;;  %v753_v29 = vrot.slane %v562_v10, 2  ;;  %v655_v30 = vsel %vm644_vm3, %v652_v5, %v654_v9  ;;  %2375 = vmatpush3.bf16.msra.mxu0 %v2851_v59 }
  0xb6   : > { %v959_v33 = vpack.c.bf16 %v879_v27, %v877_v21  ;;  %v3404_v46 = vrot.slane %v3161_v20, 1  ;;  %v4003_v5 = vrot.slane %v3248_v0, 1  ;;  %v3419_v3 = vsel %vm441_vm1, %v453_v56, %v3372_v45 }
  0xb7   : > { %v1084_v50 = vsel %vm1006_vm4, %v3263_v41, %v1083_v51  ;;  %v2664_v41 = vpack.i.bf16 %v655_v30, %v653_v8  ;;  %v754_v32 = vsel %vm644_vm3, %v4002_v26, %v753_v29  ;;  %v756_v17 = vsel %vm644_vm3, %v753_v29, %v755_v36 }
  0xb8   : > { %2473 = vmatmul.mubr.msk.bf16.vlgmr.msra.gmra.mrb[0].mxu1 %vm891_vm0, %v1084_v50  ;;  %v1104_v4 = vshrl.u32 %v959_v33, 16  ;;  %v2659_v10 = vpack.i.bf16 %v756_v17, %v754_v32  ;;  %v1107_v60 = vshll.u32 %v959_v33, 16  ;;  %v3415_v21 = vsel %vm441_vm1, %v4003_v5, %v453_v56 }
  0xb9   : > { %2665 = vrot.lane.b32.xlu1 %v2664_v41, %s2892_s17  ;;  %v962_v27 = vpack.c.bf16 %v881_v6, %v881_v6  ;;  %v573_v50 = vmul.f32 %v3415_v21, %v3063_v42  ;;  %v574_v35 = vmul.f32 %v3419_v3, %v3161_v20  ;;  %v546_v25 = vmul.f32 %v3313_v58, %v3049_v37 }
  0xba   : > { %v1106_v43 = vrot.slane %v1104_v4, 3  ;;  %2660 = vrot.lane.b32.xlu0 %v2659_v10, %s2890_s20  ;;  %v1109_v44 = vrot.slane %v1107_v60, 4  ;;  %v547_v29 = vmul.f32 %v3317_v11, %v3063_v42  ;;  %v3433_v56 = vsel %vm441_vm1, %v3078_v49, %v3404_v46 }
  0xbb   : > { %v827_v33 = vrot.slane %v3202_v63, 1  ;;  %v1131_v8 = vshrl.u32 %v962_v27, 16  ;;  %v1134_v30 = vshll.u32 %v962_v27, 16  ;;  %v2674_v41 = vpack.i.bf16 %v574_v35, %v573_v50 }
  0xbc   : > { %v1110_v59 = vor.u32 %v1109_v44, %v1106_v43  ;;  %v656_v26 = vrot.slane %v546_v25, 2  ;;  %v658_v32 = vrot.slane %v547_v29, 2  ;;  %v564_v17 = vmul.f32 %v3313_v58, %v3063_v42 }
  0xbd   : > { %2670 = vrot.lane.b32.xlu1 %v3099_v55, %s2890_s20  ;;  %v565_v4 = vmul.f32 %v3317_v11, %v3161_v20  ;;  %v1133_v60 = vrot.slane %v1131_v8, 3  ;;  %v1136_v6 = vrot.slane %v1134_v30, 4  ;;  %v555_v43 = vmul.f32 %v3415_v21, %v3049_v37 }
  0xbe   : > { %v1111_v10 = vsel %vm1006_vm4, %v1083_v51, %v1110_v59  ;;  %2675 = vrot.lane.b32.xlu0 %v2674_v41, %s2892_s17  ;;  %v657_v55 = vsel %vm644_vm3, %v654_v9, %v656_v26  ;;  %v659_v5 = vsel %vm644_vm3, %v656_v26, %v658_v32  ;;  %v757_v44 = vrot.slane %v564_v17, 2 }
  0xbf   : > { %2476 = vmatprep.mubr.msk.bf16.mxu1 %vm891_vm0, %v1111_v10  ;;  %v759_v58 = vrot.slane %v565_v4, 2  ;;  %v1137_v27 = vor.u32 %v1136_v6, %v1133_v60  ;;  %v2689_v50 = vpack.i.bf16 %v659_v5, %v657_v55  ;;  %v556_v11 = vmul.f32 %v3419_v3, %v3063_v42 }
  0xc0   : > { %v548_v51 = vmul.f32 %v3294_v7, %v3161_v20  ;;  %v758_v35 = vsel %vm644_vm3, %v755_v36, %v757_v44  ;;  %v828_v29 = vsel %vm441_vm1, %v3404_v46, %v827_v33  ;;  %v566_v9 = vmul.f32 %v3294_v7, %v3202_v63 }
  0xc1   : > { %v760_v25 = vsel %vm644_vm3, %v757_v44, %v759_v58  ;;  %v1138_v8 = vsel %vm1006_vm4, %v1110_v59, %v1137_v27  ;;  %2690 = vrot.lane.b32.xlu1 %v2689_v50, %s2892_s17  ;;  %v2694_v36 = vpack.i.bf16 %v556_v11, %v555_v43  ;;  %v2684_v17 = vpack.i.bf16 %v828_v29, %v3433_v56 }
  0xc2   : > { %v2679_v30 = vpack.i.bf16 %v760_v25, %v758_v35  ;;  %v660_v41 = vrot.slane %v548_v51, 2  ;;  %2477 = vmatmul.mubr.msk.bf16.gmra.mrb[4].mxu1 %vm891_vm0, %v1138_v8  ;;  %v761_v26 = vrot.slane %v566_v9, 2  ;;  %v575_v4 = vmul.f32 %v3372_v45, %v3202_v63  ;;  %v2581_v63 = vpop.permute.xlu0 %2580 }
  0xc3   : > { %v557_v6 = vmul.f32 %v3372_v45, %v3161_v20  ;;  %v2583_v20 = vunpack.i.h.bf16 %v2581_v63  ;;  %v2582_v35 = vunpack.i.l.bf16 %v2581_v63  ;;  %v468_v29 = vmul.f32 %v3205_v1, %v3004_v14 }
  0xc4   : > { %2680 = vrot.lane.b32.xlu0 %v2679_v30, %s2890_s20  ;;  %v661_v10 = vsel %vm644_vm3, %v658_v32, %v660_v41  ;;  %v762_v7 = vsel %vm644_vm3, %v759_v58, %v761_v26  ;;  %v2586_v32 = vpop.permute.xlu1 %2585  ;;  %v467_v9 = vmul.f32 %v3166_v28, %v3012_v19  ;;  %v470_v8 = vmul.f32 %v3271_v38, %v3010_v18 }
  0xc5   : > { %2695 = vrot.lane.b32.xlu1 %v2694_v36, %s2891_s21  ;;  %v2704_v59 = vpack.i.bf16 %v661_v10, %v575_v4  ;;  %v2699_v60 = vpack.i.bf16 %v3078_v49, %v762_v7  ;;  %v2709_v43 = vpack.i.bf16 %v557_v6, %v827_v33  ;;  %v2588_v11 = vunpack.i.h.bf16 %v2586_v32 }
  0xc6   : > { %v3476_v55 = vpop.permute.xlu0 %2590  ;;  %v2587_v49 = vunpack.i.l.bf16 %v2586_v32  ;;  %v469_v33 = vmul.f32 %v3208_v2, %v3006_v15  ;;  %v471_v41 = vmul.f32 %v3276_v52, %v3020_v22  ;;  %v892_v14 = vsel %vm891_vm0, %v3334_v16, %v2582_v35 }
  0xc7   : > { %v893_v15 = vsel %vm891_vm0, %v467_v9, %v2583_v20  ;;  %v2593_v18 = vunpack.i.h.bf16 %v3476_v55  ;;  %v2592_v16 = vunpack.i.l.bf16 %v3476_v55 }
  0xc8   : > { %2685 = vrot.lane.b32.xlu0 %v2684_v17, %s2891_s21  ;;  %v2596_v5 = vpop.permute.xlu1 %2595  ;;  %v895_v26 = vsel %vm891_vm0, %v469_v33, %v2588_v11  ;;  %v894_v36 = vsel %vm891_vm0, %v468_v29, %v2587_v49 }
  0xc9   : > { %2705 = vrot.lane.b32.xlu1 %v2704_v59, %s2892_s17  ;;  %v2598_v19 = vunpack.i.h.bf16 %v2596_v5  ;;  %v2597_v28 = vunpack.i.l.bf16 %v2596_v5 }
  0xca   : > { %v3478_v44 = vpop.permute.xlu0 %2605 }
  0xcb   : > { %v2608_v6 = vunpack.i.h.bf16 %v3478_v44 }
  0xcc   : > { %2700 = vrot.lane.b32.xlu0 %v2699_v60, %s2890_s20  ;;  %v2601_v58 = vpop.permute.xlu1 %2600 }
  0xcd   : > { %v2603_v30 = vunpack.i.h.bf16 %v2601_v58  ;;  %v2602_v17 = vunpack.i.l.bf16 %v2601_v58 }
  0xcf   : > { %v3501_v38 = vsel %vm891_vm0, %v471_v41, %v2603_v30  ;;  %v3504_v7 = vsel %vm891_vm0, %v470_v8, %v2602_v17 }
  0xd0   : > { %2710 = vrot.lane.b32.xlu0 %v2709_v43, %s2891_s21  ;;  %v2607_v43 = vunpack.i.l.bf16 %v3478_v44 }
 0x110   : > { %v2611_v27 = vpop.permute.xlu0 %2610 }
 0x111   : > { %v2613_v5 = vunpack.i.h.bf16 %v2611_v27  ;;  %v2612_v58 = vunpack.i.l.bf16 %v2611_v27 }
 0x114   : > { %v2616_v50 = vpop.permute.xlu1 %2615  ;;  %v3480_v51 = vpop.permute.xlu0 %2620 }
 0x115   : > { %v2618_v52 = vunpack.i.h.bf16 %v2616_v50  ;;  %v2617_v10 = vunpack.i.l.bf16 %v2616_v50  ;;  %v2623_v33 = vunpack.i.h.bf16 %v3480_v51 }
 0x119   : > { %v2626_v25 = vpop.permute.xlu1 %2625 }
 0x11a   : > { %v2628_v29 = vunpack.i.h.bf16 %v2626_v25  ;;  %v2627_v9 = vunpack.i.l.bf16 %v2626_v25 }
 0x11c   : > { %v3494_v4 = vpop.permute.xlu0 %2630 }
 0x11d   : > { %v2641_v1 = vpop.permute.xlu1 %2640 }
 0x11e   : > { %v2643_v2 = vunpack.i.h.bf16 %v2641_v1  ;;  %v2642_v22 = vunpack.i.l.bf16 %v2641_v1 }
 0x120   : > { %v924_v59 = vsel %vm891_vm0, %v3072_v47, %v2643_v2  ;;  %v923_v60 = vsel %vm891_vm0, %v3059_v40, %v2642_v22 }
 0x121   : > { %v932_v63 = vsel %vm901_vm5, %v923_v60, %v2617_v10  ;;  %v933_v32 = vsel %vm901_vm5, %v924_v59, %v2618_v52  ;;  %v2651_v50 = vpop.permute.xlu1 %2650 }
 0x122   : > { %v2636_v11 = vpop.permute.xlu0 %2635  ;;  %v941_v55 = vsel %vm911_vm6, %v932_v63, %v2597_v28  ;;  %v942_v49 = vsel %vm911_vm6, %v933_v32, %v2598_v19  ;;  %v2653_v47 = vunpack.i.h.bf16 %v2651_v50  ;;  %v2652_v20 = vunpack.i.l.bf16 %v2651_v50 }
 0x123   : > { %v2638_v35 = vunpack.i.h.bf16 %v2636_v11  ;;  %v2637_v40 = vunpack.i.l.bf16 %v2636_v11  ;;  %v952_v8 = vpack.c.bf16 %v942_v49, %v941_v55  ;;  %v2632_v63 = vunpack.i.l.bf16 %v3494_v4 }
 0x124   : > { %v905_v30 = vsel %vm901_vm5, %v895_v26, %v2653_v47  ;;  %v904_v41 = vsel %vm901_vm5, %v894_v36, %v2652_v20  ;;  %v2622_v26 = vunpack.i.l.bf16 %v3480_v51  ;;  %v2633_v36 = vunpack.i.h.bf16 %v3494_v4 }
 0x125   : > { %v922_v27 = vsel %vm891_vm0, %v3056_v39, %v2638_v35  ;;  %v921_v17 = vsel %vm891_vm0, %v3025_v24, %v2637_v40  ;;  %v915_v19 = vsel %vm911_vm6, %v905_v30, %v2628_v29  ;;  %v914_v28 = vsel %vm911_vm6, %v904_v41, %v2627_v9  ;;  %v2656_v25 = vpop.permute.xlu1 %2655 }
 0x126   : > { %v931_v1 = vsel %vm901_vm5, %v922_v27, %v2613_v5  ;;  %v930_v2 = vsel %vm901_vm5, %v921_v17, %v2612_v58  ;;  %v2646_v22 = vpop.permute.xlu0 %2645  ;;  %v951_v52 = vpack.c.bf16 %v915_v19, %v914_v28  ;;  %v1033_v60 = vshrl.u32 %v952_v8, 16 }
 0x127   : > { %v2648_v10 = vunpack.i.h.bf16 %v2646_v22  ;;  %v2647_v39 = vunpack.i.l.bf16 %v2646_v22  ;;  %v939_v59 = vsel %vm911_vm6, %v930_v2, %v2592_v16  ;;  %v940_v24 = vsel %vm911_vm6, %v931_v1, %v2593_v18 }
 0x128   : > { %v949_v5 = vpack.c.bf16 %v940_v24, %v939_v59  ;;  %v1036_v58 = vshll.u32 %v952_v8, 16  ;;  %v2658_v50 = vunpack.i.h.bf16 %v2656_v25  ;;  %v1035_v55 = vrot.slane %v1033_v60, 3 }
 0x129   : > { %v903_v32 = vsel %vm901_vm5, %v893_v15, %v2648_v10  ;;  %v902_v11 = vsel %vm901_vm5, %v892_v14, %v2647_v39  ;;  %v2657_v35 = vunpack.i.l.bf16 %v2656_v25  ;;  %v1016_v29 = vshrl.u32 %v951_v52, 16 }
 0x12a   : > { %v913_v51 = vsel %vm911_vm6, %v903_v32, %v2623_v33  ;;  %v912_v49 = vsel %vm911_vm6, %v902_v11, %v2622_v26  ;;  %v1025_v47 = vshrl.u32 %v949_v5, 16  ;;  %v1028_v20 = vshll.u32 %v949_v5, 16 }
 0x12b   : > { %v1038_v16 = vrot.slane %v1036_v58, 4  ;;  %v948_v18 = vpack.c.bf16 %v913_v51, %v912_v49  ;;  %v2666_v40 = vpop.permute.xlu1 %2665  ;;  %v1019_v4 = vshll.u32 %v951_v52, 16 }
 0x12c   : > { %v2668_v9 = vunpack.i.h.bf16 %v2666_v40  ;;  %v2667_v15 = vunpack.i.l.bf16 %v2666_v40  ;;  %v2661_v30 = vpop.permute.xlu0 %2660  ;;  %v1027_v8 = vrot.slane %v1025_v47, 3  ;;  %v1030_v41 = vrot.slane %v1028_v20, 4 }
 0x12d   : > { %v2663_v27 = vunpack.i.h.bf16 %v2661_v30  ;;  %v2662_v14 = vunpack.i.l.bf16 %v2661_v30  ;;  %v3537_v17 = vor.u32 %v1038_v16, %v1035_v55  ;;  %v1008_v33 = vshrl.u32 %v948_v18, 16 }
 0x12e   : > { %v907_v19 = vsel %vm901_vm5, %v3501_v38, %v2668_v9  ;;  %v906_v28 = vsel %vm901_vm5, %v3504_v7, %v2667_v15  ;;  %v1031_v1 = vor.u32 %v1030_v41, %v1027_v8  ;;  %v1011_v2 = vshll.u32 %v948_v18, 16 }
 0x12f   : > { %v916_v25 = vsel %vm911_vm6, %v906_v28, %v2657_v35  ;;  %v917_v22 = vsel %vm911_vm6, %v907_v19, %v2658_v50  ;;  %v926_v26 = vsel %vm891_vm0, %v3089_v53, %v2663_v27  ;;  %v925_v52 = vsel %vm891_vm0, %v3075_v48, %v2662_v14  ;;  %v2671_v10 = vpop.permute.xlu1 %2670 }
 0x130   : > { %v954_v39 = vpack.c.bf16 %v917_v22, %v916_v25  ;;  %v935_v59 = vsel %vm901_vm5, %v926_v26, %v2633_v36  ;;  %v934_v38 = vsel %vm901_vm5, %v925_v52, %v2632_v63  ;;  %v2673_v24 = vunpack.i.h.bf16 %v2671_v10  ;;  %v2676_v7 = vpop.permute.xlu0 %2675 }
 0x131   : > { %v944_v60 = vsel %vm911_vm6, %v935_v59, %v2608_v6  ;;  %v943_v32 = vsel %vm911_vm6, %v934_v38, %v2607_v43  ;;  %v1018_v53 = vrot.slane %v1016_v29, 3  ;;  %v1021_v5 = vrot.slane %v1019_v4, 4 }
 0x132   : > { %v473_v48 = vmul.f32 %v3419_v3, %v3049_v37  ;;  %v1040_v36 = vsel %vm1006_vm4, %v1031_v1, %v3537_v17  ;;  %v1010_v58 = vrot.slane %v1008_v33, 3  ;;  %v472_v63 = vmul.f32 %v3415_v21, %v3022_v23 }
 0x133   : > { %v2672_v50 = vunpack.i.l.bf16 %v2671_v10  ;;  %1299 = vmatprep.mubr.bf16.mxu0 %v1040_v36  ;;  %v1013_v11 = vrot.slane %v1011_v2, 4  ;;  %v955_v6 = vpack.c.bf16 %v944_v60, %v943_v32  ;;  %v2678_v51 = vunpack.i.h.bf16 %v2676_v7  ;;  %v2691_v43 = vpop.permute.xlu1 %2690 }
 0x134   : > { %v899_v44 = vsel %vm891_vm0, %v473_v48, %v2673_v24  ;;  %v1059_v55 = vshrl.u32 %v954_v39, 16  ;;  %v1062_v49 = vshll.u32 %v954_v39, 16  ;;  %v2693_v47 = vunpack.i.h.bf16 %v2691_v43 }
 0x135   : > { %v1014_v20 = vor.u32 %v1013_v11, %v1010_v58  ;;  %v1022_v37 = vor.u32 %v1021_v5, %v1018_v53  ;;  %v1068_v3 = vshrl.u32 %v955_v6, 16  ;;  %v2692_v16 = vunpack.i.l.bf16 %v2691_v43 }
 0x136   : > { %v2681_v35 = vpop.permute.xlu0 %2680  ;;  %v1071_v18 = vshll.u32 %v955_v6, 16  ;;  %v1061_v40 = vrot.slane %v1059_v55, 3  ;;  %v1064_v29 = vrot.slane %v1062_v49, 4  ;;  %v898_v23 = vsel %vm891_vm0, %v472_v63, %v2672_v50 }
 0x137   : > { %v2677_v21 = vunpack.i.l.bf16 %v2676_v7  ;;  %v2683_v4 = vunpack.i.h.bf16 %v2681_v35  ;;  %v2682_v9 = vunpack.i.l.bf16 %v2681_v35  ;;  %v1023_v15 = vsel %vm1006_vm4, %v1014_v20, %v1022_v37  ;;  %v2696_v30 = vpop.permute.xlu1 %2695 }
 0x138   : > { %v1070_v8 = vrot.slane %v1068_v3, 3  ;;  %v1073_v41 = vrot.slane %v1071_v18, 4  ;;  %v1065_v27 = vor.u32 %v1064_v29, %v1061_v40  ;;  %1300 = vmatmul.mubr.bf16.vlgmr.msra.gmra.mrb[0].mxu0 %v1023_v15  ;;  %v2698_v19 = vunpack.i.h.bf16 %v2696_v30 }
 0x139   : > { %v928_v14 = vsel %vm891_vm0, %v3433_v56, %v2683_v4  ;;  %v927_v33 = vsel %vm891_vm0, %v3093_v54, %v2682_v9  ;;  %v2697_v28 = vunpack.i.l.bf16 %v2696_v30  ;;  %v908_v1 = vsel %vm901_vm5, %v898_v23, %v2692_v16 }
 0x13a   : > { %v909_v2 = vsel %vm901_vm5, %v899_v44, %v2693_v47  ;;  %v2686_v25 = vpop.permute.xlu0 %2685  ;;  %v1074_v22 = vor.u32 %v1073_v41, %v1070_v8  ;;  %v1066_v26 = vsel %vm1006_vm4, %v1022_v37, %v1065_v27  ;;  %v936_v54 = vsel %vm901_vm5, %v927_v33, %v2677_v21 }
 0x13b   : > { %v918_v52 = vsel %vm911_vm6, %v908_v1, %v2697_v28  ;;  %v919_v10 = vsel %vm911_vm6, %v909_v2, %v2698_v19  ;;  %v2688_v39 = vunpack.i.h.bf16 %v2686_v25  ;;  %v2687_v56 = vunpack.i.l.bf16 %v2686_v25  ;;  %v2706_v7 = vpop.permute.xlu1 %2705 }
 0x13c   : > { %v957_v59 = vpack.c.bf16 %v919_v10, %v918_v52  ;;  %v937_v38 = vsel %vm901_vm5, %v928_v14, %v2678_v51  ;;  %v1075_v24 = vsel %vm1006_vm4, %v3537_v17, %v1074_v22  ;;  %v474_v5 = vmul.f32 %v3372_v45, %v3063_v42 }
 0x13d   : > { %v945_v60 = vsel %vm911_vm6, %v936_v54, %v2687_v56  ;;  %v946_v32 = vsel %vm911_vm6, %v937_v38, %v2688_v39  ;;  %1307 = vmatprep.mubr.bf16.mxu0 %v1075_v24  ;;  %v2708_v63 = vunpack.i.h.bf16 %v2706_v7  ;;  %v2707_v50 = vunpack.i.l.bf16 %v2706_v7  ;;  %v2852_v54 = vld [vmem:[%s3962_s3 + $0x40] sm:$0xff]   ;;  %v2854_v24 = vld [vmem:[%s3962_s3 + $0x48] sm:$0xff]  }
 0x13e   : > { %v958_v53 = vpack.c.bf16 %v946_v32, %v945_v60  ;;  %v2701_v48 = vpop.permute.xlu0 %2700  ;;  %v1086_v36 = vshrl.u32 %v957_v59, 16  ;;  %v1089_v58 = vshll.u32 %v957_v59, 16  ;;  %v2853_v38 = vld [vmem:[%s3962_s3] sm:$0xff]   ;;  %2406 = vmatprep.subr.bf16.mxu1 %v2852_v54  ;;  %v2855_v7 = vld [vmem:[%s3962_s3 + $0x8] sm:$0xff]   ;;  %v2856_v60 = vld [vmem:[%s3962_s3 + $0x50] sm:$0xff]  }
 0x13f   : > { %v2703_v11 = vunpack.i.h.bf16 %v2701_v48  ;;  %v2702_v6 = vunpack.i.l.bf16 %v2701_v48  ;;  %2407 = vmatpush3.bf16.msra.mxu1 %v2853_v38  ;;  %v2863_v38 = vld [vmem:[%s3962_s3 + $0x28] sm:$0xff]  }
 0x140   : > { %v1095_v44 = vshrl.u32 %v958_v53, 16  ;;  %v1098_v51 = vshll.u32 %v958_v53, 16  ;;  %v1088_v17 = vrot.slane %v1086_v36, 3  ;;  %v1091_v43 = vrot.slane %v1089_v58, 4  ;;  %1308 = vmatmul.mubr.bf16.gmra.mrb[4].mxu0 %v1066_v26  ;;  %2408 = vmatprep.subr.bf16.mxu1 %v2854_v24  ;;  %v3620_v53 = vld [vmem:[%s3961_s2] ss:$0 sm:$0xff] }
 0x141   : > { %v900_v55 = vsel %vm891_vm0, %v474_v5, %v2703_v11  ;;  %v929_v49 = vsel %vm891_vm0, %v3404_v46, %v2702_v6 }
 0x142   : > { %v2711_v47 = vpop.permute.xlu0 %2710  ;;  %v1097_v20 = vrot.slane %v1095_v44, 3  ;;  %v1100_v42 = vrot.slane %v1098_v51, 4  ;;  %v1092_v3 = vor.u32 %v1091_v43, %v1088_v17  ;;  %v910_v16 = vsel %vm901_vm5, %v900_v55, %v2708_v63  ;;  %v2857_v55 = vld [vmem:[%s3962_s3 + $0x10] sm:$0xff]  }
 0x143   : > { %v2713_v45 = vunpack.i.h.bf16 %v2711_v47  ;;  %v2712_v37 = vunpack.i.l.bf16 %v2711_v47  ;;  %v938_v35 = vsel %vm901_vm5, %v929_v49, %v2707_v50  ;;  %2409 = vmatpush3.bf16.msra.mxu1 %v2855_v7  ;;  %v2858_v49 = vld [vmem:[%s3962_s3 + $0x58] sm:$0xff]  }
 0x144   : > { %v1101_v18 = vor.u32 %v1100_v42, %v1097_v20  ;;  %v1093_v23 = vsel %vm1006_vm4, %v1065_v27, %v1092_v3  ;;  %2410 = vmatprep.subr.bf16.mxu1 %v2856_v60 }
 0x145   : > { %v920_v40 = vsel %vm911_vm6, %v910_v16, %v2713_v45  ;;  %v947_v29 = vsel %vm911_vm6, %v938_v35, %v2712_v37  ;;  %v2859_v16 = vld [vmem:[%s3962_s3 + $0x18] sm:$0xff]   ;;  %v2860_v35 = vld [vmem:[%s3962_s3 + $0x60] sm:$0xff]  }
 0x146   : > { %v960_v21 = vpack.c.bf16 %v920_v40, %v920_v40  ;;  %v961_v46 = vpack.c.bf16 %v947_v29, %v947_v29  ;;  %v1102_v4 = vsel %vm1006_vm4, %v1074_v22, %v1101_v18  ;;  %v1441_v29 = vld [vmem:[#allocation2 + $0x8] sm:$0xff] }
 0x147   : > { %1315 = vmatprep.mubr.bf16.mxu0 %v1102_v4  ;;  %2411 = vmatpush3.bf16.msra.mxu1 %v2857_v55 }
 0x148   : > { %v1113_v9 = vshrl.u32 %v960_v21, 16  ;;  %v1116_v15 = vshll.u32 %v960_v21, 16  ;;  %v1122_v30 = vshrl.u32 %v961_v46, 16  ;;  %v1125_v8 = vshll.u32 %v961_v46, 16  ;;  %1316 = vmatmul.mubr.bf16.gmra.mrb[8].mxu0 %v1093_v23  ;;  %2412 = vmatprep.subr.bf16.mxu1 %v2858_v49  ;;  %v2865_v49 = vld [vmem:[%s3962_s3 + $0x30] sm:$0xff]  }
 0x14a   : > { %v1124_v41 = vrot.slane %v1122_v30, 3  ;;  %v1127_v14 = vrot.slane %v1125_v8, 4  ;;  %v1115_v33 = vrot.slane %v1113_v9, 3  ;;  %v1118_v19 = vrot.slane %v1116_v15, 4 }
 0x14b   : > { %2413 = vmatpush3.bf16.msra.mxu1 %v2859_v16 }
 0x14c   : > { %v1128_v28 = vor.u32 %v1127_v14, %v1124_v41  ;;  %v1119_v1 = vor.u32 %v1118_v19, %v1115_v33  ;;  %2414 = vmatprep.subr.bf16.mxu1 %v2860_v35  ;;  %v2861_v33 = vld [vmem:[%s3962_s3 + $0x20] sm:$0xff]   ;;  %v2862_v19 = vld [vmem:[%s3962_s3 + $0x68] sm:$0xff]   ;;  %v2867_v35 = vld [vmem:[%s3962_s3 + $0x38] sm:$0xff]  }
 0x14e   : > { %v1129_v2 = vsel %vm1006_vm4, %v1101_v18, %v1128_v28  ;;  %v1120_v27 = vsel %vm1006_vm4, %v1092_v3, %v1119_v1 }
 0x14f   : > { %1323 = vmatprep.mubr.bf16.mxu0 %v1129_v2  ;;  %2415 = vmatpush3.bf16.msra.mxu1 %v2861_v33 }
 0x150   : > { %1324 = vmatmul.mubr.bf16.gmra.mrb[12].mxu0 %v1120_v27  ;;  %2416 = vmatprep.subr.bf16.mxu1 %v2862_v19 }
 0x153   : > { %2417 = vmatpush3.bf16.msra.mxu1 %v2863_v38 }
 0x18b   : > { %v2474_v25 = vpop.f32.mrb[0].mxu1 }
 0x18c   : > { %v1366_v22 = vpop.f32.mrb[1].mxu1 }
 0x18d   : > { %v2475_v26 = vpop.f32.mrb[2].mxu1 }
 0x18e   : > { %v1369_v52 = vpop.f32.mrb[3].mxu1 }
 0x195   : > { %v3594_v10 = vpop.f32.mrb[4].mxu1 }
 0x196   : > { %v3596_v39 = vpop.f32.mrb[5].mxu1 }
 0x197   : > { %v3598_v56 = vpop.f32.mrb[6].mxu1 }
 0x198   : > { %v3600_v59 = vpop.f32.mrb[7].mxu1 }
 0x20b   : > { %v2376_v32 = vpop.f32.mrb[0].mxu0 }
 0x20c   : > { %v2377_v5 = vpop.f32.mrb[1].mxu0 }
 0x20d   : > { %v2378_v48 = vadd.f32 %v2377_v5, %v2376_v32  ;;  %v2379_v36 = vpop.f32.mrb[2].mxu0  ;;  %v2864_v32 = vld [vmem:[%s3962_s3 + $0x70] sm:$0xff]  }
 0x20e   : > { %v2380_v58 = vpop.f32.mrb[3].mxu0  ;;  %2418 = vmatprep.subr.bf16.mxu1 %v2864_v32 }
 0x20f   : > { %v1302_v63 = vadd.f32 %v2378_v48, %v3620_v53  ;;  %v2381_v50 = vadd.f32 %v2380_v58, %v2379_v36  ;;  %2419 = vmatpush3.bf16.msra.mxu1 %v2865_v49 }
 0x211   : > { %v1367_v11 = vadd.f32 %v1366_v22, %v1302_v63  ;;  %v1305_v6 = vadd.f32 %v2381_v50, %v3620_v53 }
 0x213   : > { %v1397_v44 = vmax.f32 %v1367_v11, 0.0  ;;  %v1370_v51 = vadd.f32 %v1369_v52, %v1305_v6  ;;  %v2382_v17 = vpop.f32.mrb[4].mxu0 }
 0x214   : > { %v2383_v43 = vpop.f32.mrb[5].mxu0 }
 0x215   : > { %1417 = vst.msk [vmem:[#allocation2 + $0x10] sm:$0xff] %vm891_vm0, %v1397_v44  ;;  %v1398_v47 = vmax.f32 %v1370_v51, 0.0  ;;  %v2384_v20 = vadd.f32 %v2383_v43, %v2382_v17  ;;  %v2385_v42 = vpop.f32.mrb[6].mxu0 }
 0x216   : > { %v2386_v45 = vpop.f32.mrb[7].mxu0 }
 0x217   : > { %1418 = vst.msk [vmem:[#allocation2 + $0x18] sm:$0xff] %vm891_vm0, %v1398_v47  ;;  %v1310_v37 = vadd.f32 %v2384_v20, %v3620_v53  ;;  %v2387_v3 = vadd.f32 %v2386_v45, %v2385_v42  ;;  %v2866_v47 = vld [vmem:[%s3962_s3 + $0x78] sm:$0xff]  }
 0x218   : > { %2420 = vmatprep.subr.bf16.mxu1 %v2866_v47 }
 0x219   : > { %v1375_v18 = vadd.f32 %v2474_v25, %v1310_v37  ;;  %v1313_v40 = vadd.f32 %v2387_v3, %v3620_v53  ;;  %2421 = vmatpush3.bf16.msra.mxu1 %v2867_v35 }
 0x21b   : > { %v1399_v23 = vmax.f32 %v1375_v18, 0.0  ;;  %v1378_v21 = vadd.f32 %v2475_v26, %v1313_v40  ;;  %v2388_v46 = vpop.f32.mrb[8].mxu0 }
 0x21c   : > { %v2389_v4 = vpop.f32.mrb[9].mxu0  ;;  %v3640_v9 = vld [vmem:[#allocation2 + $0x10] sm:$0xff] }
 0x21d   : > { %v1449_v15 = vld [vmem:[#allocation2 + $0x9] sm:$0xff]  ;;  %1419 = vst.msk [vmem:[#allocation2 + $0x20] sm:$0xff] %vm891_vm0, %v1399_v23  ;;  %v1400_v30 = vmax.f32 %v1378_v21, 0.0  ;;  %v2390_v8 = vadd.f32 %v2389_v4, %v2388_v46  ;;  %v2391_v41 = vpop.f32.mrb[10].mxu0  ;;  %v2714_v14 = vpack.i.bf16 %v3640_v9, %v1441_v29 }
 0x21e   : > { %v2392_v28 = vpop.f32.mrb[11].mxu0  ;;  %v1450_v1 = vld [vmem:[#allocation2 + $0x11] sm:$0xff]  ;;  %v1457_v22 = vmul.f32 %v1449_v15, %v3106_v57 }
 0x21f   : > { %v3650_v2 = vld [vmem:[#allocation2 + $0x17] sm:$0xff]  ;;  %1420 = vst.msk [vmem:[#allocation2 + $0x28] sm:$0xff] %vm891_vm0, %v1400_v30  ;;  %v1318_v27 = vadd.f32 %v2390_v8, %v3620_v53  ;;  %v2393_v25 = vadd.f32 %v2392_v28, %v2391_v41  ;;  %2715 = vrot.lane.b32.xlu0 %v2714_v14, %s2890_s20  ;;  %v1458_v26 = vmul.f32 %v1450_v1, %v3119_v62  ;;  %v3657_v52 = vld [vmem:[#allocation2 + $0xf] sm:$0xff] }
 0x220   : > { %v1467_v54 = vmul.f32 %v3650_v2, %v3153_v12  ;;  %v1466_v5 = vmul.f32 %v3657_v52, %v3155_v13  ;;  %v3673_v50 = vld [vmem:[#allocation2 + $0x18] sm:$0xff]  ;;  %v1476_v3 = vmul.f32 %v1450_v1, %v3106_v57 }
 0x221   : > { %v1383_v24 = vadd.f32 %v3596_v39, %v1318_v27  ;;  %v1321_v7 = vadd.f32 %v2393_v25, %v3620_v53  ;;  %v2719_v60 = vpack.i.bf16 %v1458_v26, %v1457_v22  ;;  %v4006_v27 = vld [vmem:[#allocation5_spill] sm:$0xff] }
 0x222   : > { %v2724_v11 = vpack.i.bf16 %v1467_v54, %v1466_v5 }
 0x223   : > { %v1401_v48 = vmax.f32 %v1383_v24, 0.0  ;;  %v1386_v36 = vadd.f32 %v3600_v59, %v1321_v7  ;;  %v2394_v58 = vpop.f32.mrb[12].mxu0  ;;  %2720 = vrot.lane.b32.xlu0 %v2719_v60, %s2892_s17 }
 0x224   : > { %v2395_v63 = vpop.f32.mrb[13].mxu0  ;;  %v3675_v39 = vld [vmem:[#allocation2 + $0x20] sm:$0xff] }
 0x225   : > { %v1451_v6 = vld [vmem:[#allocation2 + $0x19] sm:$0xff]  ;;  %1421 = vst.msk [vmem:[#allocation2 + $0x30] sm:$0xff] %vm891_vm0, %v1401_v48  ;;  %v1402_v44 = vmax.f32 %v1386_v36, 0.0  ;;  %v2396_v51 = vadd.f32 %v2395_v63, %v2394_v58  ;;  %v2397_v17 = vpop.f32.mrb[14].mxu0  ;;  %v2729_v43 = vpack.i.bf16 %v3675_v39, %v3673_v50 }
 0x226   : > { %v1477_v59 = vmul.f32 %v1451_v6, %v3119_v62  ;;  %v3681_v55 = vld [vmem:[#allocation2 + $0x1f] sm:$0xff]  ;;  %v2398_v20 = vpop.f32.mrb[15].mxu0  ;;  %v3702_v21 = vld [vmem:[#allocation2 + $0x27] sm:$0xff]  ;;  %v3705_v46 = vmul.f32 %v1451_v6, %v3106_v57 }
 0x227   : > { %v1452_v42 = vld [vmem:[#allocation2 + $0x21] sm:$0xff]  ;;  %1422 = vst.msk [vmem:[#allocation2 + $0x38] sm:$0xff] %vm891_vm0, %v1402_v44  ;;  %v1326_v45 = vadd.f32 %v2396_v51, %v3620_v53  ;;  %v2399_v37 = vadd.f32 %v2398_v20, %v2397_v17  ;;  %2730 = vrot.lane.b32.xlu1 %v2729_v43, %s2891_s21  ;;  %2725 = vrot.lane.b32.xlu0 %v2724_v11, %s2891_s21  ;;  %v4007_v58 = vld [vmem:[#allocation6_spill] sm:$0xff] }
 0x228   : > { %v1486_v16 = vmul.f32 %v3681_v55, %v3153_v12  ;;  %v2739_v29 = vpack.i.bf16 %v1477_v59, %v1476_v3  ;;  %v1460_v23 = vmul.f32 %v1452_v42, %v3117_v61  ;;  %v3708_v4 = vmul.f32 %v1452_v42, %v3119_v62  ;;  %v3734_v54 = vld [vmem:[#allocation2 + $0x28] sm:$0xff]  ;;  %v4008_v44 = vld [vmem:[#allocation7_spill] sm:$0xff] }
 0x229   : > { %v1391_v18 = vadd.f32 %v3594_v10, %v1326_v45  ;;  %v1329_v40 = vadd.f32 %v2399_v37, %v3620_v53  ;;  %v1485_v10 = vmul.f32 %v3650_v2, %v3155_v13  ;;  %v4004_v53 = vld [vmem:[#allocation3_spill] sm:$0xff]  ;;  %v1468_v25 = vmul.f32 %v3681_v55, %v4006_v27  ;;  %v4009_v3 = vld [vmem:[#allocation8_spill] sm:$0xff] }
 0x22a   : > { %v1459_v8 = vmul.f32 %v1451_v6, %v4004_v53  ;;  %v1739_v57 = vpack.c.bf16 %v3708_v4, %v3705_v46  ;;  %v1478_v5 = vmul.f32 %v1452_v42, %v4004_v53  ;;  %v1487_v6 = vmul.f32 %v3702_v21, %v4006_v27  ;;  %v2869_v59 = vld [vmem:[%s3964_s5] sm:$0xff]  }
 0x22b   : > { %v1403_v15 = vmax.f32 %v1391_v18, 0.0  ;;  %v1394_v30 = vadd.f32 %v3598_v56, %v1329_v40  ;;  %2740 = vrot.lane.b32.xlu1 %v2739_v29, %s2890_s20  ;;  %2735 = vrot.lane.b32.xlu0 %v2729_v43, %s2890_s20  ;;  %v2744_v14 = vpack.i.bf16 %v1486_v16, %v1485_v10  ;;  %v4005_v56 = vld [vmem:[#allocation4_spill] sm:$0xff] }
 0x22c   : > { %v1453_v41 = vld [vmem:[#allocation2 + $0x29] sm:$0xff]  ;;  %v2749_v33 = vpack.i.bf16 %v1460_v23, %v1459_v8  ;;  %v1469_v19 = vmul.f32 %v3702_v21, %v4005_v56  ;;  %2492 = vmatprep.subr.bf16.mxu0 %v2869_v59 }
 0x22d   : > { %1423 = vst.msk [vmem:[#allocation2 + $0x40] sm:$0xff] %vm891_vm0, %v1403_v15  ;;  %v1404_v62 = vmax.f32 %v1394_v30, 0.0  ;;  %v3721_v28 = vld [vmem:[#allocation2 + $0x30] sm:$0xff]  ;;  %v3729_v22 = vmul.f32 %v1453_v41, %v4004_v53  ;;  %v1479_v7 = vmul.f32 %v1453_v41, %v3117_v61  ;;  %v1461_v51 = vmul.f32 %v1453_v41, %v4008_v44  ;;  %2493 = vmatpush3.bf16.msra.mxu0 %v2869_v59 }
 0x22e   : > { %v1454_v1 = vld [vmem:[#allocation2 + $0x31] sm:$0xff]  ;;  %v2759_v38 = vpack.i.bf16 %v3721_v28, %v3734_v54  ;;  %v2754_v24 = vpack.i.bf16 %v1469_v19, %v1468_v25 }
 0x22f   : > { %1424 = vst.msk [vmem:[#allocation2 + $0x48] sm:$0xff] %vm891_vm0, %v1404_v62  ;;  %2745 = vrot.lane.b32.xlu1 %v2744_v14, %s2892_s17  ;;  %2750 = vrot.lane.b32.xlu0 %v2749_v33, %s2892_s17  ;;  %v3732_v26 = vmul.f32 %v1454_v1, %v3117_v61  ;;  %v3741_v32 = vld [vmem:[#allocation2 + $0x2f] sm:$0xff]  ;;  %v2769_v48 = vpack.i.bf16 %v1479_v7, %v1478_v5  ;;  %v3752_v61 = vld [vmem:[%s3962_s3 + $0x80] sm:$0xff]   ;;  %v3754_v11 = vld [vmem:[#allocation2 + $0x37] sm:$0xff] }
 0x230   : > { %v1488_v36 = vmul.f32 %v3741_v32, %v4005_v56  ;;  %v1462_v63 = vmul.f32 %v1454_v1, %v4007_v58  ;;  %2480 = vmatprep.subr.bf16.mxu1 %v3752_v61  ;;  %v1471_v20 = vmul.f32 %v3754_v11, %v3248_v0  ;;  %v1470_v16 = vmul.f32 %v3741_v32, %v4009_v3  ;;  %v3779_v35 = vld [vmem:[#allocation2 + $0x38] sm:$0xff]  ;;  %v4010_v8 = vld [vmem:[#allocation9_spill] sm:$0xff] }
 0x231   : > { %v1742_v60 = vpack.c.bf16 %v3732_v26, %v3729_v22  ;;  %v1480_v30 = vmul.f32 %v1454_v1, %v4008_v44  ;;  %v1489_v33 = vmul.f32 %v3754_v11, %v4009_v3  ;;  %v4011_v19 = vld [vmem:[#allocation10_spill] sm:$0xff]  ;;  %v1493_v59 = vld [vmem:[#allocation2 + $0x50] sm:$0xff] }
 0x232   : > { %v2774_v49 = vpack.i.bf16 %v1488_v36, %v1487_v6  ;;  %v2779_v47 = vpack.i.bf16 %v1462_v63, %v1461_v51  ;;  %v2784_v29 = vpack.i.bf16 %v1471_v20, %v1470_v16  ;;  %v2871_v36 = vld [vmem:[%s3964_s5 + $0x8] sm:$0xff]   ;;  %v2873_v20 = vld [vmem:[%s2986_s26 + $0x18] sm:$0xff] }
 0x233   : > { %2760 = vrot.lane.b32.xlu1 %v2759_v38, %s2891_s21  ;;  %2755 = vrot.lane.b32.xlu0 %v2754_v24, %s2891_s21 }
 0x234   : > { %v1455_v17 = vld [vmem:[#allocation2 + $0x39] sm:$0xff]  ;;  %2494 = vmatprep.subr.bf16.mxu0 %v2871_v36 }
 0x235   : > { %v3767_v42 = vld [vmem:[#allocation2 + $0x40] sm:$0xff]  ;;  %v3770_v45 = vmul.f32 %v1455_v17, %v4008_v44  ;;  %v1481_v23 = vmul.f32 %v1455_v17, %v4007_v58  ;;  %v1463_v25 = vmul.f32 %v1455_v17, %v4011_v19  ;;  %2495 = vmatpush3.bf16.msra.mxu0 %v2871_v36 }
 0x236   : > { %v1456_v43 = vld [vmem:[#allocation2 + $0x41] sm:$0xff]  ;;  %v2789_v40 = vpack.i.bf16 %v3767_v42, %v3779_v35  ;;  %v3794_v62 = vld [vmem:[#allocation2 + $0x49] sm:$0xff] }
 0x237   : > { %2770 = vrot.lane.b32.xlu1 %v2769_v48, %s2890_s20  ;;  %2765 = vrot.lane.b32.xlu0 %v2759_v38, %s2890_s20  ;;  %v3773_v37 = vmul.f32 %v1456_v43, %v4007_v58  ;;  %v3786_v15 = vld [vmem:[#allocation2 + $0x3f] sm:$0xff]  ;;  %v2799_v10 = vpack.i.bf16 %v1481_v23, %v1480_v30  ;;  %v1464_v41 = vmul.f32 %v1456_v43, %v4010_v8  ;;  %v1465_v14 = vld [vmem:[#allocation2 + $0x47] sm:$0xff]  ;;  %v1484_v48 = vld [vmem:[#allocation2 + $0x4f] sm:$0xff] }
 0x238   : > { %v1490_v53 = vmul.f32 %v3786_v15, %v3248_v0  ;;  %v1482_v1 = vmul.f32 %v1456_v43, %v4011_v19  ;;  %v1483_v7 = vmul.f32 %v3794_v62, %v4010_v8  ;;  %v1473_v5 = vmul.f32 %v1465_v14, %v3355_v31  ;;  %v3816_v43 = vld [vmem:[#allocation2 + $0x48] sm:$0xff]  ;;  %v2876_v30 = vld [vmem:[%s2986_s26 + $0x30] sm:$0xff] }
 0x239   : > { %v1745_v18 = vpack.c.bf16 %v3773_v37, %v3770_v45  ;;  %v2819_v24 = vpack.i.bf16 %v1464_v41, %v1463_v25  ;;  %v1472_v58 = vmul.f32 %v3786_v15, %v3363_v34  ;;  %v1491_v44 = vmul.f32 %v1465_v14, %v3363_v34  ;;  %v2878_v41 = vld [vmem:[%s2986_s26 + $0x40] sm:$0xff]  ;;  %v2879_v14 = vld [vmem:[%s2986_s26 + $0x48] sm:$0xff] }
 0x23a   : > { %v2804_v38 = vpack.i.bf16 %v1490_v53, %v1489_v33  ;;  %v2809_v63 = vpack.i.bf16 %v1483_v7, %v1482_v1  ;;  %v1492_v51 = vmul.f32 %v1484_v48, %v3355_v31  ;;  %v2045_v33 = vpack.c.bf16 %v2879_v14, %v2878_v41  ;;  %v1425_v7 = vld [vmem:[#allocation2 + $0x7] sm:$0xff] }
 0x23b   : > { %2775 = vrot.lane.b32.xlu1 %v2774_v49, %s2892_s17  ;;  %2780 = vrot.lane.b32.xlu0 %v2779_v47, %s2892_s17  ;;  %v2829_v6 = vpack.i.bf16 %v1473_v5, %v1472_v58  ;;  %v2824_v49 = vpack.i.bf16 %v1493_v59, %v3816_v43  ;;  %v2872_v47 = vld [vmem:[%s2986_s26 + $0x10] sm:$0xff]  ;;  %v2146_v37 = vld [vmem:[%s3968_s9] sm:$0xff] }
 0x23c   : > { %v2814_v17 = vpack.i.bf16 %v1492_v51, %v1491_v44  ;;  %v2042_v16 = vpack.c.bf16 %v2873_v20, %v2872_v47  ;;  %v1435_v44 = vmul.f32 %v3650_v2, %v4006_v27  ;;  %v1436_v51 = vmul.f32 %v3681_v55, %v4005_v56 }
 0x23e   : > { %2496 = vmatprep.mubr.msk.bf16.mxu0 %vm891_vm0, %v2042_v16 }
 0x23f   : > { %2790 = vrot.lane.b32.xlu1 %v2789_v40, %s2891_s21  ;;  %2785 = vrot.lane.b32.xlu0 %v2784_v29, %s2891_s21  ;;  %v2875_v29 = vld [vmem:[%s2986_s26 + $0x28] sm:$0xff] }
 0x243   : > { %2800 = vrot.lane.b32.xlu1 %v2799_v10, %s2890_s20  ;;  %2795 = vrot.lane.b32.xlu0 %v2789_v40, %s2890_s20  ;;  %v2874_v40 = vld [vmem:[%s2986_s26 + $0x20] sm:$0xff]  ;;  %v2877_v10 = vld [vmem:[%s2986_s26 + $0x38] sm:$0xff] }
 0x244   : > { %v2043_v23 = vpack.c.bf16 %v2875_v29, %v2874_v40  ;;  %v2044_v53 = vpack.c.bf16 %v2877_v10, %v2876_v30 }
 0x246   : > { %2497 = vmatmul.mubr.msk.bf16.vlgmr.msra.gmra.mrb[16].mxu0 %vm891_vm0, %v2043_v23 }
 0x247   : > { %2805 = vrot.lane.b32.xlu1 %v2804_v38, %s2892_s17  ;;  %2820 = vrot.lane.b32.xlu0 %v2819_v24, %s2892_s17 }
 0x248   : > { %2500 = vmatprep.mubr.msk.bf16.mxu0 %vm891_vm0, %v2044_v53 }
 0x24b   : > { %2810 = vrot.lane.b32.xlu1 %v2809_v63, %s2890_s20  ;;  %2830 = vrot.lane.b32.xlu0 %v2829_v6, %s2891_s21  ;;  %v1433_v63 = vmul.f32 %v1425_v7, %v3155_v13  ;;  %v1434_v6 = vmul.f32 %v3657_v52, %v3153_v12 }
 0x24e   : > { %2501 = vmatmul.mubr.msk.bf16.gmra.mrb[20].mxu0 %vm891_vm0, %v2045_v33 }
 0x24f   : > { %2815 = vrot.lane.b32.xlu1 %v2814_v17, %s2892_s17  ;;  %2520 = vmatprep.mubr.msk.f32.mxu0 %vm901_vm5, %v2146_v37 }
 0x253   : > { %2825 = vrot.lane.b32.xlu1 %v2824_v49, %s2891_s21 }
 0x291   : > { %v2716_v25 = vpop.permute.xlu0 %2715 }
 0x292   : > { %v2718_v5 = vunpack.i.h.bf16 %v2716_v25  ;;  %v2717_v48 = vunpack.i.l.bf16 %v2716_v25 }
 0x294   : > { %v1689_v49 = vsel %vm891_vm0, %v1433_v63, %v2717_v48  ;;  %v1690_v47 = vsel %vm891_vm0, %v1434_v6, %v2718_v5 }
 0x295   : > { %v2721_v1 = vpop.permute.xlu0 %2720 }
 0x296   : > { %v2723_v20 = vunpack.i.h.bf16 %v2721_v1  ;;  %v2722_v16 = vunpack.i.l.bf16 %v2721_v1 }
 0x298   : > { %v1697_v14 = vsel %vm901_vm5, %v1689_v49, %v2722_v16  ;;  %v1698_v33 = vsel %vm901_vm5, %v1690_v47, %v2723_v20  ;;  %v2870_v16 = vld [vmem:[%s3962_s3 + $0x88] sm:$0xff]  }
 0x299   : > { %v2731_v38 = vpop.permute.xlu1 %2730  ;;  %v2726_v24 = vpop.permute.xlu0 %2725 }
 0x29a   : > { %v2733_v40 = vunpack.i.h.bf16 %v2731_v38  ;;  %v2732_v29 = vunpack.i.l.bf16 %v2731_v38  ;;  %v2728_v13 = vunpack.i.h.bf16 %v2726_v24  ;;  %v2727_v23 = vunpack.i.l.bf16 %v2726_v24 }
 0x29c   : > { %v1705_v38 = vsel %vm911_vm6, %v1697_v14, %v2727_v23  ;;  %v1706_v24 = vsel %vm911_vm6, %v1698_v33, %v2728_v13  ;;  %v1438_v33 = vmul.f32 %v3741_v32, %v3248_v0 }
 0x29d   : > { %v2741_v36 = vpop.permute.xlu1 %2740  ;;  %v2736_v58 = vpop.permute.xlu0 %2735  ;;  %v1737_v49 = vpack.c.bf16 %v1706_v24, %v1705_v38 }
 0x29e   : > { %v2743_v17 = vunpack.i.h.bf16 %v2741_v36  ;;  %v2742_v59 = vunpack.i.l.bf16 %v2741_v36  ;;  %v2738_v52 = vunpack.i.h.bf16 %v2736_v58  ;;  %v2737_v10 = vunpack.i.l.bf16 %v2736_v58 }
 0x2a0   : > { %v1714_v55 = vsel %vm891_vm0, %v3673_v50, %v2743_v17  ;;  %v1713_v56 = vsel %vm891_vm0, %v3640_v9, %v2742_v59  ;;  %v1692_v48 = vsel %vm891_vm0, %v1436_v51, %v2738_v52  ;;  %v1691_v36 = vsel %vm891_vm0, %v1435_v44, %v2737_v10 }
 0x2a1   : > { %v2746_v30 = vpop.permute.xlu1 %2745  ;;  %v2751_v12 = vpop.permute.xlu0 %2750 }
 0x2a2   : > { %v2748_v2 = vunpack.i.h.bf16 %v2746_v30  ;;  %v2747_v27 = vunpack.i.l.bf16 %v2746_v30  ;;  %v2753_v53 = vunpack.i.h.bf16 %v2751_v12  ;;  %v2752_v41 = vunpack.i.l.bf16 %v2751_v12 }
 0x2a4   : > { %v1722_v25 = vsel %vm901_vm5, %v1714_v55, %v2748_v2  ;;  %v1721_v1 = vsel %vm901_vm5, %v1713_v56, %v2747_v27  ;;  %v1699_v6 = vsel %vm901_vm5, %v1691_v36, %v2752_v41  ;;  %v1700_v17 = vsel %vm901_vm5, %v1692_v48, %v2753_v53 }
 0x2a5   : > { %v2761_v7 = vpop.permute.xlu1 %2760  ;;  %v2756_v5 = vpop.permute.xlu0 %2755  ;;  %v1729_v50 = vsel %vm911_vm6, %v1721_v1, %v2732_v29  ;;  %v1730_v9 = vsel %vm911_vm6, %v1722_v25, %v2733_v40 }
 0x2a6   : > { %v2758_v58 = vunpack.i.h.bf16 %v2756_v5  ;;  %v2757_v63 = vunpack.i.l.bf16 %v2756_v5  ;;  %v1738_v59 = vpack.c.bf16 %v1730_v9, %v1729_v50  ;;  %v2763_v23 = vunpack.i.h.bf16 %v2761_v7 }
 0x2a7   : > { %v2762_v30 = vunpack.i.l.bf16 %v2761_v7 }
 0x2a8   : > { %v1707_v47 = vsel %vm911_vm6, %v1699_v6, %v2757_v63  ;;  %v1708_v20 = vsel %vm911_vm6, %v1700_v17, %v2758_v58  ;;  %1944 = vmatprep.mubr.bf16.mxu1 %v1738_v59 }
 0x2a9   : > { %v2771_v51 = vpop.permute.xlu1 %2770  ;;  %v2766_v40 = vpop.permute.xlu0 %2765  ;;  %v1740_v44 = vpack.c.bf16 %v1708_v20, %v1707_v47  ;;  %1945 = vmatmul.mubr.bf16.vlgmr.msra.gmra.mrb[8].mxu1 %v1737_v49 }
 0x2aa   : > { %v2773_v29 = vunpack.i.h.bf16 %v2771_v51  ;;  %v2772_v13 = vunpack.i.l.bf16 %v2771_v51  ;;  %2481 = vmatpush3.bf16.msra.mxu1 %v3752_v61  ;;  %v2768_v10 = vunpack.i.h.bf16 %v2766_v40  ;;  %v2767_v2 = vunpack.i.l.bf16 %v2766_v40 }
 0x2ab   : > { %2482 = vmatprep.subr.bf16.mxu1 %v2870_v16  ;;  %v1437_v61 = vmul.f32 %v3702_v21, %v4009_v3 }
 0x2ac   : > { %v1716_v56 = vsel %vm891_vm0, %v3734_v54, %v2773_v29  ;;  %v1715_v53 = vsel %vm891_vm0, %v3675_v39, %v2772_v13  ;;  %v1694_v39 = vsel %vm891_vm0, %v1438_v33, %v2768_v10 }
 0x2ad   : > { %v2776_v12 = vpop.permute.xlu1 %2775  ;;  %v2781_v52 = vpop.permute.xlu0 %2780  ;;  %v1693_v5 = vsel %vm891_vm0, %v1437_v61, %v2767_v2 }
 0x2ae   : > { %v2778_v27 = vunpack.i.h.bf16 %v2776_v12  ;;  %v2777_v55 = vunpack.i.l.bf16 %v2776_v12  ;;  %v2783_v41 = vunpack.i.h.bf16 %v2781_v52  ;;  %v2782_v14 = vunpack.i.l.bf16 %v2781_v52  ;;  %2483 = vmatpush3.bf16.msra.mxu1 %v2870_v16 }
 0x2af   : > { %v1440_v52 = vmul.f32 %v3786_v15, %v3355_v31 }
 0x2b0   : > { %v1723_v25 = vsel %vm901_vm5, %v1715_v53, %v2777_v55  ;;  %v1724_v1 = vsel %vm901_vm5, %v1716_v56, %v2778_v27  ;;  %v1701_v21 = vsel %vm901_vm5, %v1693_v5, %v2782_v14  ;;  %v1702_v0 = vsel %vm901_vm5, %v1694_v39, %v2783_v41 }
 0x2b1   : > { %v2791_v38 = vpop.permute.xlu1 %2790  ;;  %v2786_v24 = vpop.permute.xlu0 %2785  ;;  %v1731_v54 = vsel %vm911_vm6, %v1723_v25, %v2762_v30  ;;  %v1732_v7 = vsel %vm911_vm6, %v1724_v1, %v2763_v23 }
 0x2b2   : > { %v2788_v50 = vunpack.i.h.bf16 %v2786_v24  ;;  %v2787_v9 = vunpack.i.l.bf16 %v2786_v24  ;;  %v1741_v32 = vpack.c.bf16 %v1732_v7, %v1731_v54  ;;  %v2793_v59 = vunpack.i.h.bf16 %v2791_v38 }
 0x2b3   : > { %v2792_v49 = vunpack.i.l.bf16 %v2791_v38 }
 0x2b4   : > { %v1709_v3 = vsel %vm911_vm6, %v1701_v21, %v2787_v9  ;;  %v1710_v48 = vsel %vm911_vm6, %v1702_v0, %v2788_v50  ;;  %1952 = vmatprep.mubr.bf16.mxu1 %v1741_v32 }
 0x2b5   : > { %v2801_v36 = vpop.permute.xlu1 %2800  ;;  %v2796_v58 = vpop.permute.xlu0 %2795  ;;  %v1743_v63 = vpack.c.bf16 %v1710_v48, %v1709_v3  ;;  %1953 = vmatmul.mubr.bf16.gmra.mrb[12].mxu1 %v1740_v44  ;;  %v1439_v44 = vmul.f32 %v3754_v11, %v3363_v34 }
 0x2b6   : > { %v2803_v6 = vunpack.i.h.bf16 %v2801_v36  ;;  %v2802_v17 = vunpack.i.l.bf16 %v2801_v36  ;;  %v2798_v16 = vunpack.i.h.bf16 %v2796_v58  ;;  %v2797_v51 = vunpack.i.l.bf16 %v2796_v58 }
 0x2b8   : > { %v1718_v13 = vsel %vm891_vm0, %v3779_v35, %v2803_v6  ;;  %v1717_v23 = vsel %vm891_vm0, %v3721_v28, %v2802_v17  ;;  %v1696_v28 = vsel %vm891_vm0, %v1440_v52, %v2798_v16  ;;  %v1695_v53 = vsel %vm891_vm0, %v1439_v44, %v2797_v51 }
 0x2b9   : > { %v2806_v47 = vpop.permute.xlu1 %2805  ;;  %v2821_v20 = vpop.permute.xlu0 %2820 }
 0x2ba   : > { %v2808_v40 = vunpack.i.h.bf16 %v2806_v47  ;;  %v2807_v29 = vunpack.i.l.bf16 %v2806_v47  ;;  %v2823_v30 = vunpack.i.h.bf16 %v2821_v20  ;;  %v2822_v12 = vunpack.i.l.bf16 %v2821_v20 }
 0x2bc   : > { %v1725_v10 = vsel %vm901_vm5, %v1717_v23, %v2807_v29  ;;  %v1726_v2 = vsel %vm901_vm5, %v1718_v13, %v2808_v40  ;;  %v1703_v34 = vsel %vm901_vm5, %v1695_v53, %v2822_v12  ;;  %v1704_v31 = vsel %vm901_vm5, %v1696_v28, %v2823_v30 }
 0x2bd   : > { %v2811_v27 = vpop.permute.xlu1 %2810  ;;  %v2831_v55 = vpop.permute.xlu0 %2830  ;;  %v1733_v56 = vsel %vm911_vm6, %v1725_v10, %v2792_v49  ;;  %v1734_v35 = vsel %vm911_vm6, %v1726_v2, %v2793_v59 }
 0x2be   : > { %v2833_v41 = vunpack.i.h.bf16 %v2831_v55  ;;  %v2832_v14 = vunpack.i.l.bf16 %v2831_v55  ;;  %v1744_v11 = vpack.c.bf16 %v1734_v35, %v1733_v56  ;;  %v2813_v1 = vunpack.i.h.bf16 %v2811_v27  ;;  %v2325_v56 = vld [vmem:[%s3963_s4] ss:$0 sm:$0xff] }
 0x2bf   : > { %v2812_v38 = vunpack.i.l.bf16 %v2811_v27 }
 0x2c0   : > { %v1711_v15 = vsel %vm911_vm6, %v1703_v34, %v2832_v14  ;;  %v1712_v61 = vsel %vm911_vm6, %v1704_v31, %v2833_v41  ;;  %1960 = vmatprep.mubr.bf16.mxu1 %v1744_v11  ;;  %v1720_v39 = vsel %vm891_vm0, %v3816_v43, %v2813_v1  ;;  %v1501_v43 = vmul.f32 %v3794_v62, %v4011_v19  ;;  %v2348_v11 = vld [vmem:[%s3965_s6] ss:$0 sm:$0xff] }
 0x2c1   : > { %v2816_v33 = vpop.permute.xlu1 %2815  ;;  %v1746_v25 = vpack.c.bf16 %v1712_v61, %v1711_v15  ;;  %1961 = vmatmul.mubr.bf16.gmra.mrb[16].mxu1 %v1743_v63  ;;  %v1719_v5 = vsel %vm891_vm0, %v3767_v42, %v2812_v38  ;;  %v1494_v42 = vld [vmem:[#allocation2 + $0x51] sm:$0xff] }
 0x2c2   : > { %v2818_v24 = vunpack.i.h.bf16 %v2816_v33  ;;  %v2817_v54 = vunpack.i.l.bf16 %v2816_v33  ;;  %v1502_v36 = vmul.f32 %v1494_v42, %v4010_v8 }
 0x2c4   : > { %v1727_v21 = vsel %vm901_vm5, %v1719_v5, %v2817_v54  ;;  %v1728_v0 = vsel %vm901_vm5, %v1720_v39, %v2818_v24  ;;  %v1748_v58 = vpack.c.bf16 %v1502_v36, %v1501_v43 }
 0x2c5   : > { %v2826_v7 = vpop.permute.xlu1 %2825 }
 0x2c6   : > { %v2828_v50 = vunpack.i.h.bf16 %v2826_v7  ;;  %v2827_v9 = vunpack.i.l.bf16 %v2826_v7 }
 0x2c8   : > { %v1735_v32 = vsel %vm911_vm6, %v1727_v21, %v2827_v9  ;;  %v1736_v3 = vsel %vm911_vm6, %v1728_v0, %v2828_v50 }
 0x2c9   : > { %v1747_v48 = vpack.c.bf16 %v1736_v3, %v1735_v32 }
 0x2cb   : > { %1968 = vmatprep.mubr.bf16.mxu1 %v1747_v48 }
 0x2cc   : > { %1969 = vmatmul.mubr.bf16.gmra.mrb[20].mxu1 %v1746_v25 }
 0x2cd   : > { %2484 = vmatprep.mubr.msk.bf16.mxu1 %vm891_vm0, %v1739_v57 }
 0x2d4   : > { %2485 = vmatmul.mubr.msk.bf16.vlgmr.msra.gmra.mrb[24].mxu1 %vm891_vm0, %v1742_v60 }
 0x2d5   : > { %2488 = vmatprep.mubr.msk.bf16.mxu1 %vm891_vm0, %v1745_v18 }
 0x2dc   : > { %2489 = vmatmul.mubr.msk.bf16.gmra.mrb[28].mxu1 %vm891_vm0, %v1748_v58 }
 0x319   : > { %v2498_v46 = vpop.f32.mrb[16].mxu0 }
 0x31a   : > { %v2115_v4 = vpop.f32.mrb[17].mxu0 }
 0x31b   : > { %v2499_v57 = vpop.f32.mrb[18].mxu0 }
 0x31c   : > { %v2118_v22 = vpop.f32.mrb[19].mxu0 }
 0x321   : > { %v3924_v26 = vpop.f32.mrb[20].mxu0 }
 0x322   : > { %v3926_v60 = vpop.f32.mrb[21].mxu0 }
 0x323   : > { %v3928_v63 = vpop.f32.mrb[22].mxu0 }
 0x324   : > { %v3930_v45 = vpop.f32.mrb[23].mxu0 }
 0x37c   : > { %v2422_v18 = vpop.f32.mrb[8].mxu1 }
 0x37d   : > { %v2423_v8 = vpop.f32.mrb[9].mxu1 }
 0x37e   : > { %v2424_v62 = vadd.f32 %v2423_v8, %v2422_v18  ;;  %v2425_v19 = vpop.f32.mrb[10].mxu1 }
 0x37f   : > { %v2426_v6 = vpop.f32.mrb[11].mxu1 }
 0x380   : > { %v2427_v17 = vadd.f32 %v2426_v6, %v2425_v19  ;;  %v1947_v53 = vadd.f32 %v2424_v62, %v2325_v56 }
 0x382   : > { %v1950_v61 = vadd.f32 %v2427_v17, %v2325_v56 }
 0x388   : > { %v2428_v59 = vpop.f32.mrb[12].mxu1 }
 0x389   : > { %v2429_v49 = vpop.f32.mrb[13].mxu1 }
 0x38a   : > { %v2430_v47 = vadd.f32 %v2429_v49, %v2428_v59  ;;  %v2431_v20 = vpop.f32.mrb[14].mxu1 }
 0x38b   : > { %v2432_v16 = vpop.f32.mrb[15].mxu1 }
 0x38c   : > { %v2433_v51 = vadd.f32 %v2432_v16, %v2431_v20  ;;  %v1955_v35 = vadd.f32 %v2430_v47, %v2325_v56 }
 0x38e   : > { %v1958_v34 = vadd.f32 %v2433_v51, %v2325_v56 }
 0x394   : > { %v2434_v40 = vpop.f32.mrb[16].mxu1 }
 0x395   : > { %v2435_v29 = vpop.f32.mrb[17].mxu1 }
 0x396   : > { %v2436_v13 = vadd.f32 %v2435_v29, %v2434_v40  ;;  %v2437_v23 = vpop.f32.mrb[18].mxu1 }
 0x397   : > { %v2438_v30 = vpop.f32.mrb[19].mxu1 }
 0x398   : > { %v2439_v12 = vadd.f32 %v2438_v30, %v2437_v23  ;;  %v1963_v32 = vadd.f32 %v2436_v13, %v2325_v56 }
 0x39a   : > { %v1966_v37 = vadd.f32 %v2439_v12, %v2325_v56 }
 0x39f   : > { %v2440_v44 = vpop.f32.mrb[20].mxu1 }
 0x3a0   : > { %v2441_v52 = vpop.f32.mrb[21].mxu1 }
 0x3a1   : > { %v2442_v10 = vadd.f32 %v2441_v52, %v2440_v44  ;;  %v2443_v2 = vpop.f32.mrb[22].mxu1 }
 0x3a2   : > { %v2444_v27 = vpop.f32.mrb[23].mxu1 }
 0x3a3   : > { %v2445_v55 = vadd.f32 %v2444_v27, %v2443_v2  ;;  %v1971_v50 = vadd.f32 %v2442_v10, %v2325_v56 }
 0x3a5   : > { %v1974_v43 = vadd.f32 %v2445_v55, %v2325_v56 }
 0x3a7   : > { %v2486_v28 = vpop.f32.mrb[24].mxu1 }
 0x3a8   : > { %v2020_v41 = vadd.f32 %v2486_v28, %v1955_v35  ;;  %v2011_v14 = vpop.f32.mrb[25].mxu1 }
 0x3a9   : > { %v2012_v31 = vadd.f32 %v2011_v14, %v1947_v53  ;;  %v2487_v15 = vpop.f32.mrb[26].mxu1 }
 0x3aa   : > { %v2540_v33 = vadd.f32 %v2498_v46, %v2020_v41  ;;  %v2023_v25 = vadd.f32 %v2487_v15, %v1958_v34  ;;  %v2014_v1 = vpop.f32.mrb[27].mxu1 }
 0x3ab   : > { %v2543_v38 = vadd.f32 %v2115_v4, %v2012_v31  ;;  %v2015_v24 = vadd.f32 %v2014_v1, %v1950_v61 }
 0x3ac   : > { %v2546_v54 = vadd.f32 %v2348_v11, %v2023_v25  ;;  %v2541_v39 = vadd.f32 %v2540_v33, %v2348_v11 }
 0x3ad   : > { %v2549_v7 = vadd.f32 %v2348_v11, %v2015_v24  ;;  %v2544_v9 = vadd.f32 %v2543_v38, %v2348_v11 }
 0x3ae   : > { %v2547_v5 = vadd.f32 %v2546_v54, %v2499_v57 }
 0x3af   : > { %v2550_v21 = vadd.f32 %v2549_v7, %v2118_v22  ;;  %v2490_v0 = vpop.f32.mrb[28].mxu1 }
 0x3b0   : > { %v2527_v3 = vpack.c.bf16 %v2547_v5, %v2541_v39  ;;  %v2036_v48 = vadd.f32 %v2490_v0, %v1971_v50  ;;  %v2027_v42 = vpop.f32.mrb[29].mxu1 }
 0x3b1   : > { %v2523_v36 = vpack.c.bf16 %v2550_v21, %v2544_v9  ;;  %v2028_v58 = vadd.f32 %v2027_v42, %v1963_v32  ;;  %v2491_v46 = vpop.f32.mrb[30].mxu1 }
 0x3b2   : > { %v2552_v18 = vadd.f32 %v2348_v11, %v2036_v48  ;;  %v2039_v4 = vadd.f32 %v2491_v46, %v1974_v43  ;;  %v2030_v8 = vpop.f32.mrb[31].mxu1 }
 0x3b3   : > { %v2555_v62 = vadd.f32 %v2348_v11, %v2028_v58  ;;  %v2031_v19 = vadd.f32 %v2030_v8, %v1966_v37  ;;  %2524 = vmatprep.subr.bf16.mxu0 %v2523_v36 }
 0x3b4   : > { %v2553_v57 = vadd.f32 %v2552_v18, %v3924_v26  ;;  %v2558_v6 = vadd.f32 %v2348_v11, %v2039_v4  ;;  %2526 = vmatpush3.bf16.msra.mxu0 %v2523_v36  ;;  %v2147_v26 = vld [vmem:[%s3968_s9 + $0x8] sm:$0xff] }
 0x3b5   : > { %v2556_v22 = vadd.f32 %v2555_v62, %v3926_v60  ;;  %v2561_v17 = vadd.f32 %v2348_v11, %v2031_v19  ;;  %2528 = vmatprep.subr.bf16.mxu0 %v2527_v3 }
 0x3b6   : > { %v2559_v59 = vadd.f32 %v2558_v6, %v3928_v63 }
 0x3b7   : > { %v2562_v49 = vadd.f32 %v2561_v17, %v3930_v45 }
 0x3b8   : > { %v2535_v47 = vpack.c.bf16 %v2559_v59, %v2553_v57  ;;  %2530 = vmatpush3.bf16.msra.mxu0 %v2527_v3 }
 0x3b9   : > { %v2531_v20 = vpack.c.bf16 %v2562_v49, %v2556_v22 }
 0x3bb   : > { %2532 = vmatprep.subr.bf16.mxu0 %v2531_v20 }
 0x3bc   : > { %2534 = vmatpush3.bf16.msra.mxu0 %v2531_v20 }
 0x3bd   : > { %2536 = vmatprep.subr.bf16.mxu0 %v2535_v47 }
 0x3c0   : > { %2538 = vmatpush3.bf16.msra.mxu0 %v2535_v47 }
 0x3c3   : > { %2521 = vmatmul.mubr.msk.f32.vlgmr.msra.gmra.mrb[24].mxu0 %vm901_vm5, %v2147_v26 }
 0x496   : > { %v2522_v60 = vpop.f32.mrb[24].mxu0 }
 0x497   : > { %2238 = vst.msk [vmem:[%s359_s16 + $0x8] sm:$0xff] %vm891_vm0, %v2522_v60  ;;  %v2228_v63 = vpop.f32.mrb[25].mxu0 }
 0x498   : > { %2237 = vst.msk [vmem:[%s359_s16] sm:$0xff] %vm891_vm0, %v2228_v63 }
 0x499 PF: > { %s20_s13 = sadd.s32 1, %s2886_s13  }
 0x49a   : > { %p17_p4 = scmp.ge.s32.totalorder %s20_s13, 4  }
 0x49c   :  { %19 = sbr.rel (!%p17_p4) target bundleno = 1 (0x1), region = 90 }

// kernel: discriminator_forward.11
= control target key start
LH: loop header
LB: loop body
LE: loop exit
PB: predicated region body
PF: predicated region fallthrough
CT: control target
= control target key end

     0   :  { %v236_v0 = vmov 0   ;;  %v237_v2 = vmov 0.0   ;;  %vm28_vm0 = vcmask 257024   ;;  %vm238_vm1 = vmmov 0   ;;  %s301_s1 = inlined_call_operand.vmem [shape: s32[2,1], index: 1, kind: input, shape index: {}]   ;;  %s302_s2 = inlined_call_operand.vmem [shape: bf16[32,32], index: 2, kind: input, shape index: {}]   ;;  %s303_s0 = inlined_call_operand.vmem [shape: f32[2,4,32], index: 0, kind: input, shape index: {}]   ;;  %s304_s4 = inlined_call_operand.vmem [shape: bf16[10,32], index: 4, kind: input, shape index: {}]   ;;  %s305_s3 = inlined_call_operand.vmem [shape: f32[1,32], index: 3, kind: input, shape index: {}]   ;;  %s306_s5 = inlined_call_operand.vmem [shape: f32[1,32], index: 5, kind: input, shape index: {}]   ;;  %s307_s6 = inlined_call_operand.vmem [shape: f32[2,1], index: 6, kind: output, shape index: {}]  }
   0x1   :  { %232 = vset.pattern.permute.xlu0 %v236_v0  ;;  %v121_v1 = vld [vmem:[%s301_s1] sm:$0x3]  ;;  %215 = vmatprep.subr.bf16.mxu0 %v237_v2  ;;  %v25_v5 = vld [vmem:[%s303_s0 + $0x4] sm:$0xf]  ;;  %v234_v6 = vld [vmem:[%s302_s2 + $0x8] sm:$0xff]   ;;  %vm147_vm2 = vcmask 1044480   ;;  %v119_v31 = vlaneseq }
   0x2   :  { %123 = vperm.xlu0 %232, %v121_v1   ;;  %v233_v3 = vld [vmem:[%s302_s2] sm:$0xff]   ;;  %223 = vmatprep.subr.bf16.mxu1 %v237_v2  ;;  %v27_v8 = vmax.f32 %v25_v5, 0.0  ;;  %vm60_vm3 = vcmask 1041409   ;;  %vm75_vm4 = vcmask 261120   ;;  %vm143_vm6 = vcmask 80896  }
   0x3   :  { %v24_v4 = vld [vmem:[%s303_s0] sm:$0xf]  ;;  %216 = vmatpush3.bf16.msra.mxu0 %v233_v3  ;;  %219 = vmatprep.mubr.msk.bf16.mxu0 %vm238_vm1, %v237_v2  ;;  %v120_v32 = vand.u32 127, %v119_v31  ;;  %vm192_vm7 = vcmask 254976   ;;  %vm196_vm8 = vcmask 1024  }
   0x4   :  { %v26_v7 = vmax.f32 %v24_v4, 0.0  ;;  %217 = vmatprep.subr.bf16.mxu0 %v237_v2  ;;  %v235_v9 = vld [vmem:[%s304_s4] sm:$0x1f]   ;;  %225 = vmatprep.mubr.msk.bf16.mxu1 %vm238_vm1, %v237_v2  ;;  %v36_v11 = vsel %vm28_vm0, %v27_v8, 0.0 }
   0x5   :  { %v37_v13 = vrot.slane %v36_v11, 4  ;;  %v149_v14 = vsel %vm147_vm2, %v235_v9, 0  ;;  %v202_v40 = vld [vmem:[%s305_s3] ss:$0 sm:$0xff] }
   0x6   :  { %v29_v10 = vsel %vm28_vm0, %v26_v7, 0.0  ;;  %224 = vmatpush3.bf16.msra.mxu1 %v149_v14  ;;  %v207_v41 = vld [vmem:[%s306_s5] ss:$0 sm:$0xff] }
   0x7   :  { %v30_v12 = vrot.slane %v29_v10, 4  ;;  %218 = vmatpush3.bf16.msra.mxu0 %v234_v6  ;;  %v38_v16 = vadd.f32 %v37_v13, %v36_v11 }
   0x9   :  { %v31_v15 = vadd.f32 %v30_v12, %v29_v10  ;;  %v39_v18 = vrot.slane %v38_v16, 2 }
   0xb   :  { %v32_v17 = vrot.slane %v31_v15, 2  ;;  %v40_v20 = vadd.f32 %v39_v18, %v38_v16 }
   0xd   :  { %v33_v19 = vadd.f32 %v32_v17, %v31_v15  ;;  %v41_v22 = vrot.slane %v40_v20, 1 }
   0xf   :  { %v34_v21 = vrot.slane %v33_v19, 1  ;;  %v42_v24 = vadd.f32 %v41_v22, %v40_v20 }
  0x11   :  { %v35_v23 = vadd.f32 %v34_v21, %v33_v19  ;;  %v44_v26 = vpack.c.bf16 %v42_v24, %v42_v24 }
  0x13   :  { %v43_v25 = vpack.c.bf16 %v35_v23, %v35_v23  ;;  %v59_v28 = vunpack.c.l.b16 %v44_v26 }
  0x15   :  { %v58_v27 = vunpack.c.l.b16 %v43_v25 }
  0x17   :  { %v61_v29 = vsel %vm60_vm3, %v59_v28, %v58_v27 }
  0x18   :  { %v62_v30 = vpack.c.b16 %v61_v29, %v61_v29 }
  0x1a   :  { %220 = vmatmul.mubr.msk.bf16.vlgmr.msra.gmra.mrb[0].mxu0 %vm75_vm4, %v62_v30 }
  0x81   :  { %v124_v33 = vpop.permute.xlu0 %123 }
  0x82   :  { %vm125_vm5 = vcmp.eq.s32.totalorder %v120_v32, %v124_v33 }
  0x83   :  { %v206_v34 = vsel %vm125_vm5, 1.0, %v237_v2 }
  0x84   :  { %v128_v35 = vpack.c.bf16 %v206_v34, %v206_v34 }
  0x86   :  { %226 = vmatmul.mubr.msk.bf16.vlgmr.msra.gmra.mrb[0].mxu1 %vm143_vm6, %v128_v35 }
  0xed   :  { %v113_v36 = vpop.f32.mrb[0].mxu0 }
  0xee   :  { %v221_v37 = vpop.f32.mrb[1].mxu0  ;;  %v114_v42 = vadd.f32 %v202_v40, %v113_v36 }
  0xef   :  { %v116_v38 = vpop.f32.mrb[2].mxu0 }
  0xf0   :  { %v222_v39 = vpop.f32.mrb[3].mxu0 }
 0x159   :  { %v185_v43 = vpop.f32.mrb[0].mxu1 }
 0x15a   :  { %v186_v44 = vadd.f32 %v207_v41, %v185_v43  ;;  %v227_v45 = vpop.f32.mrb[1].mxu1 }
 0x15b   :  { %v188_v46 = vpop.f32.mrb[2].mxu1 }
 0x15c   :  { %v228_v47 = vpop.f32.mrb[3].mxu1  ;;  %v191_v48 = vmul.f32 %v186_v44, %v114_v42 }
 0x15e   :  { %v193_v49 = vsel %vm192_vm7, %v191_v48, 0.0 }
 0x15f   :  { %194 = vadd.xlane.f32.xlu0 %v193_v49 }
 0x1ec   :  { %v195_v50 = vpop.xlane.xlu0 %194 }
 0x1ed   :  { %197 = vst.msk [vmem:[%s307_s6] sm:$0x3] %vm196_vm8, %v195_v50 }

// kernel: discriminator_forward.6
= control target key start
LH: loop header
LB: loop body
LE: loop exit
PB: predicated region body
PF: predicated region fallthrough
CT: control target
= control target key end

     0   :  { %s7335_s13 = smov 0   ;;  %s11472_s0 = inlined_call_operand.vmem [shape: f32[2,320,4], index: 0, kind: input, shape index: {}]   ;;  %s11473_s1 = inlined_call_operand.vmem [shape: bf16[36,32], index: 1, kind: input, shape index: {}]   ;;  %s11474_s2 = inlined_call_operand.vmem [shape: f32[1,32], index: 2, kind: input, shape index: {}]   ;;  %s11475_s3 = inlined_call_operand.vmem [shape: bf16[288,32], index: 3, kind: input, shape index: {}]   ;;  %s11476_s4 = inlined_call_operand.vmem [shape: f32[1,32], index: 4, kind: input, shape index: {}]   ;;  %s11477_s5 = inlined_call_operand.vmem [shape: bf16[4,32], index: 5, kind: input, shape index: {}]   ;;  %s11478_s6 = inlined_call_operand.vmem [shape: f32[1,32], index: 6, kind: input, shape index: {}]   ;;  %s11479_s7 = inlined_call_operand.vmem [shape: f32[256,1], index: 7, kind: input, shape index: {}]   ;;  %s11480_s8 = inlined_call_operand.vmem [shape: f32[256,1], index: 8, kind: input, shape index: {}]   ;;  %s11481_s9 = inlined_call_operand.vmem [shape: f32[64,256], index: 9, kind: input, shape index: {}]   ;;  %s11482_s10 = inlined_call_operand.vmem [shape: f32[2,64,32], index: 10, kind: output, shape index: {}]  }
   0x1 LB: > { %s5477_s14 = sadd.s32 4294967295, %s7266_s13   ;;  %p5481_p0 = scmp.ge.s32.totalorder %s7266_s13, 1  ;;  %s7266_s13 = sphi %s7335_s13, %s20_s13  }
   0x2   : > { %p312_p1 = scmp.lt.s32.totalorder %s7266_s13, 3 }
   0x4   : > { %p313_p2 = pnand %p5481_p0, %p312_p1 }
   0x6   : > { %316 = sbr.rel (%p313_p2) target bundleno = 1593 (0x639), region = 60 }
   0xd   : > { %v363_v0 = vld [vmem:[%s11479_s7 + $0x10] sm:$0xff]  ;;  %v361_v1 = vld [vmem:[%s11479_s7] sm:$0xff]  ;;  %v7268_v2 = vmov 0   ;;  %vm2609_vm0 = vcmask 261120   ;;  %v7269_v3 = vmov 0.0   ;;  %v364_v4 = vld [vmem:[%s11479_s7 + $0x18] sm:$0xff] }
   0xe   : > { %6042 = vset.pattern.permute.xlu1 %v7268_v2  ;;  %6041 = vset.pattern.permute.xlu0 %v7268_v2  ;;  %3087 = vst.msk [vmem:[#allocation2 + $0x8] sm:$0xff] %vm2609_vm0, %v7269_v3  ;;  %3088 = vst.msk [vmem:[#allocation2 + $0x10] sm:$0xff] %vm2609_vm0, %v7269_v3  ;;  %v362_v5 = vld [vmem:[%s11479_s7 + $0x8] sm:$0xff]  ;;  %v365_v7 = vld [vmem:[%s11479_s7 + $0x20] sm:$0xff]  ;;  %p350_p3 = scmp.lt.s32.totalorder %s5477_s14, 1  ;;  %vm591_vm1 = vcmask 1046528  }
   0xf   : > { %473 = vperm.xlu1 %6042, %v363_v0   ;;  %465 = vperm.xlu0 %6041, %v361_v1   ;;  %3089 = vst.msk [vmem:[#allocation2 + $0x18] sm:$0xff] %vm2609_vm0, %v7269_v3  ;;  %3090 = vst.msk [vmem:[#allocation2 + $0x20] sm:$0xff] %vm2609_vm0, %v7269_v3  ;;  %v366_v6 = vld [vmem:[%s11479_s7 + $0x28] sm:$0xff]  ;;  %v368_v8 = vld [vmem:[%s11479_s7 + $0x38] sm:$0xff]  ;;  %s7270_s19 = smov 4   ;;  %s7271_s29 = smov 16  }
  0x10   : > { %3091 = vst.msk [vmem:[#allocation2 + $0x28] sm:$0xff] %vm2609_vm0, %v7269_v3  ;;  %3092 = vst.msk [vmem:[#allocation2 + $0x30] sm:$0xff] %vm2609_vm0, %v7269_v3  ;;  %v367_v9 = vld [vmem:[%s11479_s7 + $0x30] sm:$0xff]  ;;  %v370_v10 = vld [vmem:[%s11479_s7 + $0x48] sm:$0xff]  ;;  %s12076_s14 = smov (!%p350_p3, %s5477_s14), 1  ;;  %s7272_s30 = smov 12  }
  0x11   : > { %3093 = vst.msk [vmem:[#allocation2 + $0x38] sm:$0xff] %vm2609_vm0, %v7269_v3  ;;  %3094 = vst.msk [vmem:[#allocation2 + $0x40] sm:$0xff] %vm2609_vm0, %v7269_v3  ;;  %v369_v11 = vld [vmem:[%s11479_s7 + $0x40] sm:$0xff]  ;;  %v372_v12 = vld [vmem:[%s11479_s7 + $0x58] sm:$0xff]  ;;  %s6020_s17 = smul.u32 320, %s12076_s14  ;;  %vm849_vm2 = vcmask 1040384  }
  0x12   : > { %3095 = vst.msk [vmem:[#allocation2 + $0x48] sm:$0xff] %vm2609_vm0, %v7269_v3  ;;  %3096 = vst.msk [vmem:[#allocation2 + $0x50] sm:$0xff] %vm2609_vm0, %v7269_v3  ;;  %v371_v13 = vld [vmem:[%s11479_s7 + $0x50] sm:$0xff]  ;;  %v374_v14 = vld [vmem:[%s11479_s7 + $0x68] sm:$0xff]  ;;  %vm1338_vm3 = vcmask 1045504   ;;  %s7273_s11 = smov 8  }
  0x13   : > { %3097 = vst.msk [vmem:[#allocation2 + $0x58] sm:$0xff] %vm2609_vm0, %v7269_v3  ;;  %3098 = vst.msk [vmem:[#allocation2 + $0x60] sm:$0xff] %vm2609_vm0, %v7269_v3  ;;  %477 = vperm.xlu1 %6042, %v364_v4   ;;  %469 = vperm.xlu0 %6041, %v362_v5   ;;  %v373_v15 = vld [vmem:[%s11479_s7 + $0x60] sm:$0xff]  ;;  %v376_v16 = vld [vmem:[%s11479_s7 + $0x78] sm:$0xff]  ;;  %s7535_s24 = scalar_lea.vmem %s11472_s0, %s6020_s17  ;;  %s7274_s12 = smov 20   ;;  %vm2889_vm4 = vcmask 1041408  }
  0x14   : > { %3099 = vst.msk [vmem:[#allocation2 + $0x68] sm:$0xff] %vm2609_vm0, %v7269_v3  ;;  %3100 = vst.msk [vmem:[#allocation2 + $0x70] sm:$0xff] %vm2609_vm0, %v7269_v3  ;;  %v375_v17 = vld [vmem:[%s11479_s7 + $0x70] sm:$0xff]  ;;  %v378_v18 = vld [vmem:[%s11479_s7 + $0x88] sm:$0xff]  ;;  %s7275_s15 = smov 24   ;;  %s7276_s16 = smov 28  }
  0x15   : > { %3101 = vst.msk [vmem:[#allocation2 + $0x78] sm:$0xff] %vm2609_vm0, %v7269_v3  ;;  %3102 = vst.msk [vmem:[#allocation2 + $0x80] sm:$0xff] %vm2609_vm0, %v7269_v3  ;;  %v377_v19 = vld [vmem:[%s11479_s7 + $0x80] sm:$0xff]  ;;  %v380_v20 = vld [vmem:[%s11479_s7 + $0x98] sm:$0xff]  ;;  %s7277_s22 = smov 32   ;;  %vm2371_vm5 = vcmask 31744  }
  0x16   : > { %3103 = vst.msk [vmem:[#allocation2 + $0x88] sm:$0xff] %vm2609_vm0, %v7269_v3  ;;  %3104 = vst.msk [vmem:[#allocation2 + $0x90] sm:$0xff] %vm2609_vm0, %v7269_v3  ;;  %v379_v21 = vld [vmem:[%s11479_s7 + $0x90] sm:$0xff]  ;;  %v382_v22 = vld [vmem:[%s11479_s7 + $0xa8] sm:$0xff]  ;;  %vm2405_vm6 = vcmask 64512   ;;  %vm2439_vm7 = vcmask 97280  }
  0x17   : > { %3105 = vst.msk [vmem:[#allocation2 + $0x98] sm:$0xff] %vm2609_vm0, %v7269_v3  ;;  %3106 = vst.msk [vmem:[#allocation2 + $0xa0] sm:$0xff] %vm2609_vm0, %v7269_v3  ;;  %485 = vperm.xlu1 %6042, %v366_v6   ;;  %481 = vperm.xlu0 %6041, %v365_v7   ;;  %v381_v23 = vld [vmem:[%s11479_s7 + $0xa0] sm:$0xff]  ;;  %v384_v24 = vld [vmem:[%s11479_s7 + $0xb8] sm:$0xff]  ;;  %vm2473_vm8 = vcmask 130048   ;;  %vm2507_vm9 = vcmask 162816  }
  0x18   : > { %3107 = vst.msk [vmem:[#allocation2 + $0xa8] sm:$0xff] %vm2609_vm0, %v7269_v3  ;;  %3108 = vst.msk [vmem:[#allocation2 + $0xb0] sm:$0xff] %vm2609_vm0, %v7269_v3  ;;  %v383_v25 = vld [vmem:[%s11479_s7 + $0xb0] sm:$0xff]  ;;  %v386_v26 = vld [vmem:[%s11479_s7 + $0xc8] sm:$0xff]  ;;  %vm2541_vm10 = vcmask 195584   ;;  %vm2575_vm11 = vcmask 228352  }
  0x19   : > { %3109 = vst.msk [vmem:[#allocation2 + $0xb8] sm:$0xff] %vm2609_vm0, %v7269_v3  ;;  %3110 = vst.msk [vmem:[#allocation2 + $0xc0] sm:$0xff] %vm2609_vm0, %v7269_v3  ;;  %v385_v27 = vld [vmem:[%s11479_s7 + $0xc0] sm:$0xff]  ;;  %v388_v28 = vld [vmem:[%s11479_s7 + $0xd8] sm:$0xff]  ;;  %vm2672_vm12 = vsmask.f32 4352 }
  0x1a   : > { %3111 = vst.msk [vmem:[#allocation2 + $0xc8] sm:$0xff] %vm2609_vm0, %v7269_v3  ;;  %3112 = vst.msk [vmem:[#allocation2 + $0xd0] sm:$0xff] %vm2609_vm0, %v7269_v3  ;;  %v387_v29 = vld [vmem:[%s11479_s7 + $0xd0] sm:$0xff]  ;;  %v390_v30 = vld [vmem:[%s11479_s7 + $0xe8] sm:$0xff]  ;;  %vm2840_vm13 = vcmask 293888   ;;  %vm4294_vm14 = vcmask 523264  }
  0x1b   : > { %3113 = vst.msk [vmem:[#allocation2 + $0xd8] sm:$0xff] %vm2609_vm0, %v7269_v3  ;;  %3114 = vst.msk [vmem:[#allocation2 + $0xe0] sm:$0xff] %vm2609_vm0, %v7269_v3  ;;  %493 = vperm.xlu1 %6042, %v368_v8   ;;  %489 = vperm.xlu0 %6041, %v367_v9   ;;  %v389_v31 = vld [vmem:[%s11479_s7 + $0xe0] sm:$0xff]  ;;  %v392_v32 = vld [vmem:[%s11479_s7 + $0xf8] sm:$0xff]  ;;  %vm4327_vm15 = vcmask 785408  }
  0x1c   : > { %3115 = vst.msk [vmem:[#allocation2 + $0xe8] sm:$0xff] %vm2609_vm0, %v7269_v3  ;;  %3116 = vst.msk [vmem:[#allocation2 + $0xf0] sm:$0xff] %vm2609_vm0, %v7269_v3  ;;  %v391_v33 = vld [vmem:[%s11479_s7 + $0xf0] sm:$0xff]  ;;  %v394_v34 = vld [vmem:[%s11480_s8 + $0x8] sm:$0xff] }
  0x1d   : > { %3117 = vst.msk [vmem:[#allocation2 + $0xf8] sm:$0xff] %vm2609_vm0, %v7269_v3  ;;  %3118 = vst.msk [vmem:[#allocation2 + $0x100] sm:$0xff] %vm2609_vm0, %v7269_v3  ;;  %v393_v35 = vld [vmem:[%s11480_s8] sm:$0xff]  ;;  %v396_v36 = vld [vmem:[%s11480_s8 + $0x18] sm:$0xff] }
  0x1e   : > { %3119 = vst.msk [vmem:[#allocation2 + $0x108] sm:$0xff] %vm2609_vm0, %v7269_v3  ;;  %3120 = vst.msk [vmem:[#allocation2 + $0x110] sm:$0xff] %vm2609_vm0, %v7269_v3  ;;  %v395_v37 = vld [vmem:[%s11480_s8 + $0x10] sm:$0xff]  ;;  %v398_v38 = vld [vmem:[%s11480_s8 + $0x28] sm:$0xff] }
  0x1f   : > { %3121 = vst.msk [vmem:[#allocation2 + $0x118] sm:$0xff] %vm2609_vm0, %v7269_v3  ;;  %3122 = vst.msk [vmem:[#allocation2 + $0x120] sm:$0xff] %vm2609_vm0, %v7269_v3  ;;  %501 = vperm.xlu1 %6042, %v370_v10   ;;  %497 = vperm.xlu0 %6041, %v369_v11   ;;  %v397_v39 = vld [vmem:[%s11480_s8 + $0x20] sm:$0xff]  ;;  %v400_v40 = vld [vmem:[%s11480_s8 + $0x38] sm:$0xff] }
  0x20   : > { %3123 = vst.msk [vmem:[#allocation2 + $0x128] sm:$0xff] %vm2609_vm0, %v7269_v3  ;;  %3124 = vst.msk [vmem:[#allocation2 + $0x130] sm:$0xff] %vm2609_vm0, %v7269_v3  ;;  %v399_v41 = vld [vmem:[%s11480_s8 + $0x30] sm:$0xff]  ;;  %v402_v42 = vld [vmem:[%s11480_s8 + $0x48] sm:$0xff] }
  0x21   : > { %v401_v43 = vld [vmem:[%s11480_s8 + $0x40] sm:$0xff]  ;;  %v404_v44 = vld [vmem:[%s11480_s8 + $0x58] sm:$0xff]  ;;  %v403_v45 = vld [vmem:[%s11480_s8 + $0x50] sm:$0xff] }
  0x22   : > { %v406_v46 = vld [vmem:[%s11480_s8 + $0x68] sm:$0xff]  ;;  %v405_v47 = vld [vmem:[%s11480_s8 + $0x60] sm:$0xff]  ;;  %v408_v48 = vld [vmem:[%s11480_s8 + $0x78] sm:$0xff] }
  0x23   : > { %509 = vperm.xlu1 %6042, %v372_v12   ;;  %505 = vperm.xlu0 %6041, %v371_v13   ;;  %v407_v49 = vld [vmem:[%s11480_s8 + $0x70] sm:$0xff]  ;;  %v410_v50 = vld [vmem:[%s11480_s8 + $0x88] sm:$0xff]  ;;  %v409_v51 = vld [vmem:[%s11480_s8 + $0x80] sm:$0xff] }
  0x24   : > { %v7544_v52 = vld [vmem:[%s7535_s24 + $0x18] sm:$0xff]  ;;  %v7547_v53 = vld [vmem:[%s7535_s24 + $0x20] sm:$0xff]  ;;  %v7550_v54 = vld [vmem:[%s7535_s24 + $0x28] sm:$0xff] }
  0x25   : > { %v7553_v55 = vld [vmem:[%s7535_s24 + $0x10] sm:$0xff]  ;;  %v412_v56 = vld [vmem:[%s11480_s8 + $0x98] sm:$0xff]  ;;  %v1144_v58 = vrot.slane %v7544_v52, 1  ;;  %v1146_v59 = vrot.slane %v7547_v53, 1  ;;  %v1148_v60 = vrot.slane %v7550_v54, 1  ;;  %v414_v62 = vld [vmem:[%s11480_s8 + $0xa8] sm:$0xff] }
  0x26   : > { %v411_v57 = vld [vmem:[%s11480_s8 + $0x90] sm:$0xff]  ;;  %v1143_v61 = vrot.slane %v7553_v55, 1  ;;  %v413_v63 = vld [vmem:[%s11480_s8 + $0xa0] sm:$0xff]  ;;  %v7578_v4 = vld [vmem:[%s7535_s24 + $0x38] sm:$0xff] }
  0x27   : > { %517 = vperm.xlu1 %6042, %v374_v14   ;;  %513 = vperm.xlu0 %6041, %v373_v15   ;;  %v1147_v0 = vsel %vm591_vm1, %v1144_v58, %v1146_v59  ;;  %v1149_v1 = vsel %vm591_vm1, %v1146_v59, %v1148_v60  ;;  %v7575_v3 = vld [vmem:[%s7535_s24 + $0x30] sm:$0xff]  ;;  %v1152_v8 = vrot.slane %v7578_v4, 1  ;;  %v416_v9 = vld [vmem:[%s11480_s8 + $0xb8] sm:$0xff]  ;;  %v7599_v13 = vld [vmem:[%s7535_s24 + $0x40] sm:$0xff] }
  0x28   : > { %v1145_v2 = vsel %vm591_vm1, %v1143_v61, %v1144_v58  ;;  %v6048_v5 = vpack.i.bf16 %v1149_v1, %v1147_v0  ;;  %v7581_v7 = vrot.slane %v7575_v3, 1  ;;  %v415_v10 = vld [vmem:[%s11480_s8 + $0xb0] sm:$0xff]  ;;  %v7602_v14 = vld [vmem:[%s7535_s24 + $0x48] sm:$0xff] }
  0x29   : > { %v6043_v6 = vpack.i.bf16 %v1145_v2, %v1143_v61 }
  0x2a   : > { %v1151_v11 = vsel %vm591_vm1, %v1148_v60, %v7581_v7  ;;  %v7596_v12 = vsel %vm591_vm1, %v7581_v7, %v1152_v8 }
  0x2b   : > { %525 = vperm.xlu1 %6042, %v376_v16   ;;  %521 = vperm.xlu0 %6041, %v375_v17   ;;  %v6053_v15 = vpack.i.bf16 %v7596_v12, %v1151_v11  ;;  %v417_v16 = vld [vmem:[%s11480_s8 + $0xc0] sm:$0xff]  ;;  %v1154_v17 = vrot.slane %v7599_v13, 1 }
  0x2f   : > { %533 = vperm.xlu1 %6042, %v378_v18   ;;  %529 = vperm.xlu0 %6041, %v377_v19   ;;  %v11484_v18 = vrot.slane %v7602_v14, 1  ;;  %v6058_v19 = vpack.i.bf16 %v1149_v1, %v1146_v59 }
  0x33   : > { %541 = vperm.xlu1 %6042, %v380_v20   ;;  %537 = vperm.xlu0 %6041, %v379_v21   ;;  %v418_v20 = vld [vmem:[%s11480_s8 + $0xc8] sm:$0xff]  ;;  %v1155_v21 = vsel %vm591_vm1, %v1152_v8, %v1154_v17 }
  0x37   : > { %549 = vperm.xlu1 %6042, %v382_v22   ;;  %545 = vperm.xlu0 %6041, %v381_v23   ;;  %v1157_v22 = vsel %vm591_vm1, %v1154_v17, %v11484_v18 }
  0x38   : > { %v7619_v23 = vpack.i.bf16 %v1157_v22, %v1155_v21 }
  0x3b   : > { %557 = vperm.xlu1 %6042, %v384_v24   ;;  %553 = vperm.xlu0 %6041, %v383_v25  }
  0x3f   : > { %565 = vperm.xlu1 %6042, %v386_v26   ;;  %561 = vperm.xlu0 %6041, %v385_v27  }
  0x43   : > { %573 = vperm.xlu1 %6042, %v388_v28   ;;  %569 = vperm.xlu0 %6041, %v387_v29  }
  0x47   : > { %581 = vperm.xlu1 %6042, %v390_v30   ;;  %577 = vperm.xlu0 %6041, %v389_v31  }
  0x4b   : > { %589 = vperm.xlu1 %6042, %v392_v32   ;;  %585 = vperm.xlu0 %6041, %v391_v33  }
  0x4f   : > { %727 = vperm.xlu1 %6042, %v394_v34   ;;  %723 = vperm.xlu0 %6041, %v393_v35  }
  0x53   : > { %735 = vperm.xlu1 %6042, %v396_v36   ;;  %731 = vperm.xlu0 %6041, %v395_v37  }
  0x57   : > { %743 = vperm.xlu1 %6042, %v398_v38   ;;  %739 = vperm.xlu0 %6041, %v397_v39  }
  0x5b   : > { %751 = vperm.xlu1 %6042, %v400_v40   ;;  %747 = vperm.xlu0 %6041, %v399_v41  }
  0x5f   : > { %759 = vperm.xlu1 %6042, %v402_v42   ;;  %755 = vperm.xlu0 %6041, %v401_v43  }
  0x63   : > { %767 = vperm.xlu1 %6042, %v404_v44   ;;  %763 = vperm.xlu0 %6041, %v403_v45  }
  0x67   : > { %775 = vperm.xlu1 %6042, %v406_v46   ;;  %771 = vperm.xlu0 %6041, %v405_v47  }
  0x6b   : > { %783 = vperm.xlu1 %6042, %v408_v48   ;;  %779 = vperm.xlu0 %6041, %v407_v49  }
  0x6f   : > { %791 = vperm.xlu1 %6042, %v410_v50   ;;  %787 = vperm.xlu0 %6041, %v409_v51   ;;  %v7687_v51 = vld [vmem:[%s7535_s24 + $0x50] sm:$0xff] }
  0x73   : > { %799 = vperm.xlu1 %6042, %v412_v56   ;;  %795 = vperm.xlu0 %6041, %v411_v57  }
  0x77   : > { %807 = vperm.xlu1 %6042, %v414_v62   ;;  %803 = vperm.xlu0 %6041, %v413_v63  }
  0x7b   : > { %6049 = vrot.lane.b32.xlu1 %v6048_v5, %s7270_s19  ;;  %6044 = vrot.lane.b32.xlu0 %v6043_v6, %s7270_s19 }
  0x7f   : > { %815 = vperm.xlu1 %6042, %v416_v9   ;;  %811 = vperm.xlu0 %6041, %v415_v10  }
  0x83   : > { %819 = vperm.xlu1 %6042, %v417_v16   ;;  %6054 = vrot.lane.b32.xlu0 %v6053_v15, %s7270_s19 }
  0x87   : > { %823 = vperm.xlu0 %6041, %v418_v20   ;;  %6059 = vrot.lane.b32.xlu1 %v6058_v19, %s7271_s29 }
  0x8b   : > { %6069 = vrot.lane.b32.xlu1 %v7619_v23, %s7271_s29  ;;  %6064 = vrot.lane.b32.xlu0 %v6053_v15, %s7271_s29 }
  0x8e   : > { %v7624_v24 = vpop.permute.xlu1 %473  ;;  %v7626_v25 = vpop.permute.xlu0 %465 }
  0x8f   : > { %11695 = vst [vmem:[#allocation3_spill] sm:$0xff] %v7624_v24  ;;  %11696 = vst [vmem:[#allocation4_spill] sm:$0xff] %v7626_v25  ;;  %v595_v28 = vrot.slane %v7624_v24, 1  ;;  %v7634_v29 = vrot.slane %v7626_v25, 1 }
  0x91   : > { %v979_v41 = vmul.f32 %v7634_v29, %v7544_v52  ;;  %v7684_v50 = vmul.f32 %v7634_v29, %v7550_v54 }
  0x92   : > { %v7628_v26 = vpop.permute.xlu1 %477  ;;  %v7630_v27 = vpop.permute.xlu0 %469 }
  0x93   : > { %11697 = vst [vmem:[#allocation5_spill] sm:$0xff] %v7628_v26  ;;  %11698 = vst [vmem:[#allocation6_spill] sm:$0xff] %v7630_v27  ;;  %v597_v30 = vrot.slane %v7628_v26, 1  ;;  %v593_v31 = vrot.slane %v7630_v27, 1 }
  0x95   : > { %v7639_v32 = vsel %vm591_vm1, %v593_v31, %v595_v28  ;;  %v7642_v33 = vsel %vm591_vm1, %v595_v28, %v597_v30  ;;  %v7646_v34 = vsel %vm591_vm1, %v7634_v29, %v593_v31 }
  0x96   : > { %v7648_v35 = vpop.permute.xlu1 %485  ;;  %v7650_v36 = vpop.permute.xlu0 %481  ;;  %v981_v37 = vmul.f32 %v7639_v32, %v7550_v54  ;;  %v982_v38 = vmul.f32 %v7642_v33, %v7575_v3  ;;  %v980_v42 = vmul.f32 %v7646_v34, %v7547_v53  ;;  %v7664_v44 = vmul.f32 %v7639_v32, %v7578_v4 }
  0x97   : > { %11699 = vst [vmem:[#allocation7_spill] sm:$0xff] %v7648_v35  ;;  %11700 = vst [vmem:[#allocation8_spill] sm:$0xff] %v7650_v36  ;;  %v11483_v39 = vrot.slane %v7648_v35, 1  ;;  %v599_v40 = vrot.slane %v7650_v36, 1  ;;  %v7668_v45 = vmul.f32 %v7642_v33, %v7599_v13  ;;  %v7672_v46 = vmul.f32 %v7646_v34, %v7575_v3 }
  0x98   : > { %v6078_v43 = vpack.i.bf16 %v982_v38, %v981_v37  ;;  %v6073_v47 = vpack.i.bf16 %v980_v42, %v979_v41 }
  0x99   : > { %v7675_v48 = vsel %vm591_vm1, %v597_v30, %v599_v40  ;;  %v7680_v49 = vsel %vm591_vm1, %v599_v40, %v11483_v39 }
  0x9a   : > { %v7689_v56 = vpop.permute.xlu1 %493  ;;  %v7691_v57 = vpop.permute.xlu0 %489  ;;  %6079 = vrot.lane.b32.xlu1 %v6078_v43, %s7272_s30  ;;  %v983_v58 = vmul.f32 %v7675_v48, %v7578_v4  ;;  %v984_v59 = vmul.f32 %v7680_v49, %v7599_v13  ;;  %6074 = vrot.lane.b32.xlu0 %v6073_v47, %s7272_s30  ;;  %v7705_v63 = vmul.f32 %v7675_v48, %v7602_v14 }
  0x9b   : > { %11701 = vst [vmem:[#allocation9_spill] sm:$0xff] %v7689_v56  ;;  %11702 = vst [vmem:[#allocation10_spill] sm:$0xff] %v7691_v57  ;;  %v7709_v0 = vmul.f32 %v7680_v49, %v7687_v51 }
  0x9c   : > { %v6083_v62 = vpack.i.bf16 %v984_v59, %v983_v58 }
  0x9e   : > { %v7711_v1 = vpop.permute.xlu1 %501  ;;  %v7713_v2 = vpop.permute.xlu0 %497  ;;  %6084 = vrot.lane.b32.xlu0 %v6083_v62, %s7272_s30 }
  0x9f   : > { %11703 = vst [vmem:[#allocation11_spill] sm:$0xff] %v7711_v1  ;;  %11704 = vst [vmem:[#allocation12_spill] sm:$0xff] %v7713_v2 }
  0xa2   : > { %v7718_v6 = vpop.permute.xlu1 %509  ;;  %v7720_v8 = vpop.permute.xlu0 %505 }
  0xa3   : > { %11705 = vst [vmem:[#allocation13_spill] sm:$0xff] %v7718_v6  ;;  %11706 = vst [vmem:[#allocation14_spill] sm:$0xff] %v7720_v8 }
  0xa6   : > { %v7722_v9 = vpop.permute.xlu1 %517  ;;  %v7724_v10 = vpop.permute.xlu0 %513 }
  0xa7   : > { %11707 = vst [vmem:[#allocation15_spill] sm:$0xff] %v7722_v9  ;;  %11708 = vst [vmem:[#allocation16_spill] sm:$0xff] %v7724_v10 }
  0xaa   : > { %v7726_v11 = vpop.permute.xlu1 %525  ;;  %v7728_v15 = vpop.permute.xlu0 %521 }
  0xab   : > { %11709 = vst [vmem:[#allocation17_spill] sm:$0xff] %v7726_v11  ;;  %11710 = vst [vmem:[#allocation18_spill] sm:$0xff] %v7728_v15 }
  0xae   : > { %v7730_v16 = vpop.permute.xlu1 %533  ;;  %v7732_v17 = vpop.permute.xlu0 %529 }
  0xaf   : > { %11711 = vst [vmem:[#allocation19_spill] sm:$0xff] %v7730_v16  ;;  %11712 = vst [vmem:[#allocation20_spill] sm:$0xff] %v7732_v17 }
  0xb2   : > { %v7734_v19 = vpop.permute.xlu1 %541  ;;  %v7736_v20 = vpop.permute.xlu0 %537 }
  0xb3   : > { %11713 = vst [vmem:[#allocation21_spill] sm:$0xff] %v7734_v19  ;;  %11714 = vst [vmem:[#allocation22_spill] sm:$0xff] %v7736_v20 }
  0xb6   : > { %v7738_v21 = vpop.permute.xlu1 %549  ;;  %v7740_v22 = vpop.permute.xlu0 %545 }
  0xb7   : > { %11715 = vst [vmem:[#allocation23_spill] sm:$0xff] %v7738_v21  ;;  %11716 = vst [vmem:[#allocation24_spill] sm:$0xff] %v7740_v22 }
  0xba   : > { %v7742_v28 = vpop.permute.xlu1 %557  ;;  %v7744_v30 = vpop.permute.xlu0 %553 }
  0xbb   : > { %11717 = vst [vmem:[#allocation25_spill] sm:$0xff] %v7742_v28  ;;  %11718 = vst [vmem:[#allocation26_spill] sm:$0xff] %v7744_v30 }
  0xbe   : > { %v7746_v31 = vpop.permute.xlu1 %565  ;;  %v7748_v37 = vpop.permute.xlu0 %561 }
  0xbf   : > { %11719 = vst [vmem:[#allocation27_spill] sm:$0xff] %v7746_v31  ;;  %11720 = vst [vmem:[#allocation28_spill] sm:$0xff] %v7748_v37 }
  0xc2   : > { %v7750_v38 = vpop.permute.xlu1 %573  ;;  %v7752_v40 = vpop.permute.xlu0 %569 }
  0xc3   : > { %11721 = vst [vmem:[#allocation29_spill] sm:$0xff] %v7750_v38  ;;  %11722 = vst [vmem:[#allocation30_spill] sm:$0xff] %v7752_v40 }
  0xc6   : > { %v7754_v41 = vpop.permute.xlu1 %581  ;;  %v7756_v42 = vpop.permute.xlu0 %577 }
  0xc7   : > { %11723 = vst [vmem:[#allocation31_spill] sm:$0xff] %v7754_v41  ;;  %11724 = vst [vmem:[#allocation32_spill] sm:$0xff] %v7756_v42 }
  0xca   : > { %v7758_v43 = vpop.permute.xlu1 %589  ;;  %v7760_v47 = vpop.permute.xlu0 %585 }
  0xcb   : > { %11725 = vst [vmem:[#allocation33_spill] sm:$0xff] %v7758_v43  ;;  %11726 = vst [vmem:[#allocation34_spill] sm:$0xff] %v7760_v47 }
  0xce   : > { %v7762_v58 = vpop.permute.xlu1 %727  ;;  %v7764_v59 = vpop.permute.xlu0 %723 }
  0xcf   : > { %11727 = vst [vmem:[#allocation35_spill] sm:$0xff] %v7762_v58  ;;  %11728 = vst [vmem:[#allocation36_spill] sm:$0xff] %v7764_v59  ;;  %v851_v62 = vrot.slane %v7762_v58, 7  ;;  %v7768_v39 = vrot.slane %v7764_v59, 7 }
  0xd1   : > { %v7772_v5 = vsel %vm849_vm2, %v7768_v39, %v851_v62  ;;  %v946_v18 = vmul.f32 %v7768_v39, %v7553_v55  ;;  %v1012_v26 = vmul.f32 %v7768_v39, %v7547_v53 }
  0xd2   : > { %v7776_v61 = vpop.permute.xlu1 %735  ;;  %v7778_v60 = vpop.permute.xlu0 %731  ;;  %v947_v36 = vmul.f32 %v7772_v5, %v7544_v52  ;;  %v1013_v58 = vmul.f32 %v7772_v5, %v7550_v54 }
  0xd3   : > { %11729 = vst [vmem:[#allocation37_spill] sm:$0xff] %v7776_v61  ;;  %11730 = vst [vmem:[#allocation38_spill] sm:$0xff] %v7778_v60  ;;  %v855_v24 = vrot.slane %v7776_v61, 7  ;;  %v853_v27 = vrot.slane %v7778_v60, 7  ;;  %v1339_v25 = vrot.slane %v946_v18, 2  ;;  %v1773_v60 = vrot.slane %v1012_v26, 2 }
  0xd4   : > { %v1340_v59 = vrot.slane %v947_v36, 2  ;;  %v1774_v37 = vrot.slane %v1013_v58, 2 }
  0xd5   : > { %v854_v43 = vsel %vm849_vm2, %v851_v62, %v853_v27  ;;  %v856_v47 = vsel %vm849_vm2, %v853_v27, %v855_v24 }
  0xd6   : > { %v7790_v42 = vpop.permute.xlu1 %743  ;;  %v7792_v41 = vpop.permute.xlu0 %739  ;;  %v1341_v40 = vsel %vm1338_vm3, %v1339_v25, %v1340_v59  ;;  %v948_v38 = vmul.f32 %v854_v43, %v7547_v53  ;;  %v949_v61 = vmul.f32 %v856_v47, %v7550_v54  ;;  %v1015_v27 = vmul.f32 %v856_v47, %v7578_v4 }
  0xd7   : > { %11731 = vst [vmem:[#allocation39_spill] sm:$0xff] %v7790_v42  ;;  %11732 = vst [vmem:[#allocation40_spill] sm:$0xff] %v7792_v41  ;;  %v11517_v18 = vrot.slane %v7790_v42, 7  ;;  %v857_v31 = vrot.slane %v7792_v41, 7  ;;  %v6088_v36 = vpack.i.bf16 %v1341_v40, %v1339_v25  ;;  %v1014_v26 = vmul.f32 %v854_v43, %v7575_v3 }
  0xd8   : > { %v1342_v62 = vrot.slane %v948_v38, 2  ;;  %v1344_v30 = vrot.slane %v949_v61, 2  ;;  %v1775_v58 = vsel %vm1338_vm3, %v1773_v60, %v1774_v37 }
  0xd9   : > { %6089 = vrot.lane.b32.xlu1 %v6088_v36, %s7273_s11  ;;  %v858_v28 = vsel %vm849_vm2, %v855_v24, %v857_v31  ;;  %v860_v21 = vsel %vm849_vm2, %v857_v31, %v11517_v18  ;;  %v1778_v18 = vrot.slane %v1015_v27, 2 }
  0xda   : > { %v1343_v22 = vsel %vm1338_vm3, %v1340_v59, %v1342_v62  ;;  %v1345_v25 = vsel %vm1338_vm3, %v1342_v62, %v1344_v30  ;;  %v950_v38 = vmul.f32 %v858_v28, %v7575_v3  ;;  %v7810_v61 = vmul.f32 %v860_v21, %v7578_v4 }
  0xdb   : > { %v6093_v40 = vpack.i.bf16 %v1345_v25, %v1343_v22  ;;  %v1016_v24 = vmul.f32 %v858_v28, %v7599_v13  ;;  %v7816_v31 = vmul.f32 %v860_v21, %v7602_v14  ;;  %v1776_v62 = vrot.slane %v1014_v26, 2 }
  0xdc   : > { %v1346_v36 = vrot.slane %v950_v38, 2  ;;  %v1348_v41 = vrot.slane %v7810_v61, 2  ;;  %v6103_v38 = vpack.i.bf16 %v1775_v58, %v1773_v60  ;;  %v7834_v60 = vpop.permute.xlu0 %747  ;;  %v1079_v58 = vmul.f32 %v7772_v5, %v7578_v4 }
  0xdd   : > { %6094 = vrot.lane.b32.xlu0 %v6093_v40, %s7273_s11  ;;  %v1780_v59 = vrot.slane %v1016_v24, 2  ;;  %v1782_v25 = vrot.slane %v7816_v31, 2  ;;  %v1777_v40 = vsel %vm1338_vm3, %v1774_v37, %v1776_v62  ;;  %v1779_v26 = vsel %vm1338_vm3, %v1776_v62, %v1778_v18  ;;  %11734 = vst [vmem:[#allocation42_spill] sm:$0xff] %v7834_v60 }
  0xde   : > { %v1347_v20 = vsel %vm1338_vm3, %v1344_v30, %v1346_v36  ;;  %v1349_v22 = vsel %vm1338_vm3, %v1346_v36, %v1348_v41  ;;  %v6108_v24 = vpack.i.bf16 %v1779_v26, %v1777_v40  ;;  %v7832_v36 = vpop.permute.xlu1 %751  ;;  %v1158_v37 = vrot.slane %v7687_v51, 1 }
  0xdf   : > { %v6098_v19 = vpack.i.bf16 %v1349_v22, %v1347_v20  ;;  %v1781_v17 = vsel %vm1338_vm3, %v1778_v18, %v1780_v59  ;;  %v1783_v27 = vsel %vm1338_vm3, %v1780_v59, %v1782_v25  ;;  %11733 = vst [vmem:[#allocation41_spill] sm:$0xff] %v7832_v36  ;;  %v7839_v20 = vld [vmem:[%s7535_s24 + $0x58] sm:$0xff]  ;;  %v1078_v59 = vmul.f32 %v7768_v39, %v7575_v3 }
  0xe0   : > { %v6113_v30 = vpack.i.bf16 %v1783_v27, %v1781_v17  ;;  %v1160_v18 = vrot.slane %v7839_v20, 1  ;;  %v1080_v17 = vmul.f32 %v854_v43, %v7599_v13  ;;  %v863_v62 = vrot.slane %v7832_v36, 7  ;;  %v8288_v36 = vld [vmem:[%s7535_s24 + $0xa0] sm:$0xff] }
  0xe1   : > { %6104 = vrot.lane.b32.xlu0 %v6103_v38, %s7274_s12  ;;  %6099 = vrot.lane.b32.xlu1 %v6098_v19, %s7273_s11  ;;  %v1081_v19 = vmul.f32 %v856_v47, %v7602_v14  ;;  %v861_v22 = vrot.slane %v7834_v60, 7  ;;  %v11735_v38 = vpack.i.bf16 %v7668_v45, %v7664_v44  ;;  %v11736_v5 = vpack.i.bf16 %v7672_v46, %v7684_v50  ;;  %v7869_v44 = vpop.permute.xlu0 %755 }
  0xe2   : > { %v6133_v43 = vpack.i.bf16 %v7596_v12, %v7581_v7  ;;  %v11737_v39 = vrot.slane %v7602_v14, 1  ;;  %v1161_v27 = vsel %vm591_vm1, %v1158_v37, %v1160_v18  ;;  %v7867_v40 = vpop.permute.xlu1 %759  ;;  %11739 = vst [vmem:[#allocation44_spill] sm:$0xff] %v7869_v44  ;;  %v2208_v45 = vrot.slane %v1079_v58, 2 }
  0xe3   : > { %11738 = vst [vmem:[#allocation43_spill] sm:$0xff] %v7867_v40  ;;  %v2210_v26 = vrot.slane %v1080_v17, 2  ;;  %v2207_v46 = vrot.slane %v1078_v59, 2  ;;  %v1082_v50 = vmul.f32 %v858_v28, %v7687_v51  ;;  %v7873_v7 = vmul.f32 %v860_v21, %v7839_v20 }
  0xe4   : > { %v1159_v47 = vsel %vm591_vm1, %v11737_v39, %v1158_v37  ;;  %v11740_v12 = vpack.i.bf16 %v7709_v0, %v7705_v63  ;;  %v11741_v37 = vrot.slane %v7790_v42, 7  ;;  %v7888_v28 = vsel %vm849_vm2, %v861_v22, %v863_v62  ;;  %v7163_v0 = vld [vmem:[%s11473_s1] sm:$0xff]  }
  0xe5   : > { %6114 = vrot.lane.b32.xlu0 %v6113_v30, %s7274_s12  ;;  %6109 = vrot.lane.b32.xlu1 %v6108_v24, %s7274_s12  ;;  %v2212_v30 = vrot.slane %v1081_v19, 2  ;;  %v7880_v24 = vpack.i.bf16 %v1161_v27, %v1159_v47  ;;  %v11521_v21 = vrot.slane %v7867_v40, 7  ;;  %v865_v17 = vrot.slane %v7869_v44, 7 }
  0xe6   : > { %v7885_v58 = vsel %vm849_vm2, %v11741_v37, %v861_v22  ;;  %v2211_v19 = vsel %vm1338_vm3, %v2208_v45, %v2210_v26  ;;  %v2209_v63 = vsel %vm1338_vm3, %v2207_v46, %v2208_v45  ;;  %5782 = vmatprep.subr.bf16.mxu0 %v7163_v0  ;;  %v605_v27 = vrot.slane %v7689_v56, 1 }
  0xe7   : > { %v2213_v59 = vsel %vm1338_vm3, %v2210_v26, %v2212_v30  ;;  %v952_v22 = vmul.f32 %v7885_v58, %v7599_v13  ;;  %v7908_v39 = vsel %vm849_vm2, %v863_v62, %v865_v17  ;;  %v7913_v47 = vsel %vm849_vm2, %v865_v17, %v11521_v21  ;;  %5783 = vmatpush3.bf16.msra.mxu0 %v7163_v0 }
  0xe8   : > { %v603_v45 = vrot.slane %v7691_v57, 1  ;;  %v6153_v26 = vpack.i.bf16 %v2213_v59, %v2211_v19  ;;  %v7930_v19 = vmul.f32 %v7913_v47, %v7839_v20  ;;  %v11742_v59 = vrot.slane %v7648_v35, 1 }
  0xe9   : > { %6124 = vrot.lane.b32.xlu0 %v11735_v38, %s7275_s15  ;;  %6119 = vrot.lane.b32.xlu1 %v11736_v5, %s7275_s15  ;;  %v2214_v38 = vrot.slane %v1082_v50, 2  ;;  %v11524_v5 = vrot.slane %v7873_v7, 2  ;;  %v6148_v50 = vpack.i.bf16 %v2209_v63, %v2207_v46  ;;  %v1350_v17 = vrot.slane %v952_v22, 2 }
  0xea   : > { %v954_v46 = vmul.f32 %v7908_v39, %v7687_v51  ;;  %v7935_v63 = vsel %vm591_vm1, %v11742_v59, %v603_v45  ;;  %v607_v0 = vrot.slane %v7713_v2, 1  ;;  %v7977_v59 = vld [vmem:[%s7535_s24 + $0x68] sm:$0xff] }
  0xeb   : > { %v2215_v62 = vsel %vm1338_vm3, %v2212_v30, %v2214_v38  ;;  %v2217_v37 = vsel %vm1338_vm3, %v2214_v38, %v11524_v5  ;;  %v1351_v38 = vsel %vm1338_vm3, %v1348_v41, %v1350_v17  ;;  %v985_v41 = vmul.f32 %v7935_v63, %v7602_v14 }
  0xec   : > { %v6158_v30 = vpack.i.bf16 %v2217_v37, %v2215_v62  ;;  %v7955_v62 = vsel %vm591_vm1, %v605_v27, %v607_v0  ;;  %v1018_v37 = vmul.f32 %v7885_v58, %v7687_v51  ;;  %v1051_v31 = vmul.f32 %v7935_v63, %v7839_v20 }
  0xed   : > { %6134 = vrot.lane.b32.xlu0 %v6133_v43, %s7276_s16  ;;  %6129 = vrot.lane.b32.xlu1 %v11740_v12, %s7275_s15  ;;  %v953_v43 = vmul.f32 %v7888_v28, %v7602_v14  ;;  %v7164_v12 = vld [vmem:[%s11473_s1 + $0x8] sm:$0xff]  }
  0xee   : > { %5784 = vmatprep.subr.bf16.mxu0 %v7164_v12 }
  0xef   : > { %v1352_v21 = vrot.slane %v953_v43, 2  ;;  %5785 = vmatpush3.bf16.msra.mxu0 %v7164_v12  ;;  %v7943_v43 = vsel %vm591_vm1, %v603_v45, %v605_v27  ;;  %v11522_v12 = vrot.slane %v7930_v19, 2  ;;  %v7974_v27 = vld [vmem:[%s7535_s24 + $0x60] sm:$0xff] }
  0xf0   : > { %v986_v45 = vmul.f32 %v7943_v43, %v7687_v51  ;;  %v1020_v5 = vmul.f32 %v7908_v39, %v7974_v27 }
  0xf1   : > { %6144 = vrot.lane.b32.xlu0 %v7880_v24, %s7276_s16  ;;  %6139 = vrot.lane.b32.xlu1 %v7619_v23, %s7276_s16  ;;  %v1353_v22 = vsel %vm1338_vm3, %v1350_v17, %v1352_v21 }
  0xf2   : > { %v6173_v61 = vpack.i.bf16 %v1353_v22, %v1351_v38  ;;  %v6183_v38 = vpack.i.bf16 %v986_v45, %v985_v41  ;;  %v1162_v22 = vrot.slane %v7974_v27, 1  ;;  %v7990_v41 = vmul.f32 %v7913_v47, %v7977_v59  ;;  %v7993_v45 = vpop.permute.xlu0 %763 }
  0xf3   : > { %11743 = vst [vmem:[#allocation45_spill] sm:$0xff] %v7993_v45 }
  0xf4   : > { %v11527_v2 = vrot.slane %v7990_v41, 2 }
  0xf5   : > { %6154 = vrot.lane.b32.xlu0 %v6153_v26, %s7277_s22  ;;  %6149 = vrot.lane.b32.xlu1 %v6148_v50, %s7277_s22  ;;  %v11523_v26 = vrot.slane %v7711_v1, 1  ;;  %v1354_v50 = vrot.slane %v954_v46, 2 }
  0xf7   : > { %v1355_v17 = vsel %vm1338_vm3, %v1352_v21, %v1354_v50  ;;  %v1357_v46 = vsel %vm1338_vm3, %v1354_v50, %v11522_v12  ;;  %v987_v21 = vmul.f32 %v7955_v62, %v7839_v20  ;;  %v1164_v50 = vrot.slane %v7977_v59, 1 }
  0xf8   : > { %v1784_v12 = vrot.slane %v1018_v37, 2 }
  0xf9   : > { %6164 = vrot.lane.b32.xlu0 %v7619_v23, %s7270_s19  ;;  %6159 = vrot.lane.b32.xlu1 %v6158_v30, %s7277_s22  ;;  %v1019_v23 = vmul.f32 %v7888_v28, %v7839_v20  ;;  %v7969_v30 = vsel %vm591_vm1, %v607_v0, %v11523_v26  ;;  %v1165_v37 = vsel %vm591_vm1, %v1162_v22, %v1164_v50 }
  0xfa   : > { %v988_v0 = vmul.f32 %v7969_v30, %v7974_v27 }
  0xfb   : > { %v1786_v26 = vrot.slane %v1019_v23, 2 }
  0xfc   : > { %v6188_v23 = vpack.i.bf16 %v988_v0, %v987_v21  ;;  %v8021_v21 = vpop.permute.xlu0 %771 }
  0xfd   : > { %6174 = vrot.lane.b32.xlu0 %v6173_v61, %s7273_s11  ;;  %6169 = vrot.lane.b32.xlu1 %v7880_v24, %s7270_s19  ;;  %v6178_v61 = vpack.i.bf16 %v1357_v46, %v1355_v17  ;;  %v1163_v17 = vsel %vm591_vm1, %v1160_v18, %v1162_v22  ;;  %v1785_v46 = vsel %vm1338_vm3, %v1782_v25, %v1784_v12 }
  0xfe   : > { %v8007_v18 = vpack.i.bf16 %v1165_v37, %v1163_v17  ;;  %v1052_v25 = vmul.f32 %v7943_v43, %v7974_v27  ;;  %11745 = vst [vmem:[#allocation47_spill] sm:$0xff] %v8021_v21  ;;  %v8029_v37 = vld [vmem:[%s7535_s24 + $0x70] sm:$0xff] }
 0x101   : > { %6184 = vrot.lane.b32.xlu0 %v6183_v38, %s7272_s30  ;;  %6179 = vrot.lane.b32.xlu1 %v6178_v61, %s7273_s11  ;;  %v1787_v38 = vsel %vm1338_vm3, %v1784_v12, %v1786_v26  ;;  %v1788_v61 = vrot.slane %v1020_v5, 2  ;;  %v1084_v12 = vmul.f32 %v7885_v58, %v7974_v27  ;;  %v8019_v5 = vpop.permute.xlu1 %767  ;;  %v8034_v58 = vld [vmem:[%s7535_s24 + $0x78] sm:$0xff] }
 0x102   : > { %v6203_v22 = vpack.i.bf16 %v1787_v38, %v1785_v46  ;;  %11744 = vst [vmem:[#allocation46_spill] sm:$0xff] %v8019_v5  ;;  %v1166_v46 = vrot.slane %v8029_v37, 1  ;;  %v11532_v38 = vrot.slane %v8034_v58, 1  ;;  %v871_v56 = vrot.slane %v8019_v5, 7 }
 0x103   : > { %v1789_v0 = vsel %vm1338_vm3, %v1786_v26, %v1788_v61  ;;  %v1791_v17 = vsel %vm1338_vm3, %v1788_v61, %v11527_v2  ;;  %v2218_v61 = vrot.slane %v1084_v12, 2  ;;  %v11748_v12 = vrot.slane %v7873_v7, 2 }
 0x104   : > { %v6208_v26 = vpack.i.bf16 %v1791_v17, %v1789_v0  ;;  %v1167_v44 = vsel %vm591_vm1, %v1164_v50, %v1166_v46  ;;  %v1169_v0 = vsel %vm591_vm1, %v1166_v46, %v11532_v38  ;;  %v1086_v50 = vmul.f32 %v7908_v39, %v8029_v37  ;;  %v7165_v38 = vld [vmem:[%s11473_s1 + $0x10] ss:$0 sps:$4 sm:$0x33]  }
 0x105   : > { %6194 = vrot.lane.b32.xlu0 %v7880_v24, %s7271_s29  ;;  %6189 = vrot.lane.b32.xlu1 %v6188_v23, %s7272_s30  ;;  %v8017_v24 = vmul.f32 %v7888_v28, %v7977_v59  ;;  %v6213_v28 = vpack.i.bf16 %v1052_v25, %v1051_v31  ;;  %v1053_v23 = vmul.f32 %v7955_v62, %v7977_v59  ;;  %v8045_v31 = vpop.permute.xlu1 %775  ;;  %v8047_v25 = vpop.permute.xlu0 %779  ;;  %v11749_v39 = vrot.slane %v7867_v40, 7 }
 0x106   : > { %11746 = vst [vmem:[#allocation48_spill] sm:$0xff] %v8045_v31  ;;  %11747 = vst [vmem:[#allocation49_spill] sm:$0xff] %v8047_v25  ;;  %v8065_v46 = vmul.f32 %v7913_v47, %v8034_v58  ;;  %v8068_v7 = vpack.i.bf16 %v1169_v0, %v1167_v44  ;;  %6018 = vmatprep.subr.msk.bf16.mxu0 %vm2889_vm4, %v7165_v38 }
 0x107   : > { %v2220_v2 = vrot.slane %v8017_v24, 2  ;;  %v2219_v24 = vsel %vm1338_vm3, %v11748_v12, %v2218_v61  ;;  %v611_v12 = vrot.slane %v7720_v8, 1 }
 0x109   : > { %6204 = vrot.lane.b32.xlu0 %v6203_v22, %s7274_s12  ;;  %6199 = vrot.lane.b32.xlu1 %v8007_v18, %s7271_s29  ;;  %v1054_v22 = vmul.f32 %v7969_v30, %v8029_v37  ;;  %v8084_v44 = vpop.permute.xlu1 %783  ;;  %v8086_v0 = vpop.permute.xlu0 %787 }
 0x10a   : > { %11750 = vst [vmem:[#allocation50_spill] sm:$0xff] %v8084_v44  ;;  %11751 = vst [vmem:[#allocation51_spill] sm:$0xff] %v8086_v0 }
 0x10b   : > { %v6218_v17 = vpack.i.bf16 %v1054_v22, %v1053_v23  ;;  %v425_v23 = vld [vmem:[%s7535_s24 + $0x8] sm:$0xff] }
 0x10c   : > { %v8093_v8 = vmul.f32 %v7634_v29, %v425_v23  ;;  %v419_v29 = vld [vmem:[%s11480_s8 + $0xd0] sm:$0xff] }
 0x10d   : > { %6214 = vrot.lane.b32.xlu0 %v6213_v28, %s7275_s15  ;;  %6209 = vrot.lane.b32.xlu1 %v6208_v26, %s7274_s12  ;;  %v2221_v28 = vsel %vm1338_vm3, %v2218_v61, %v2220_v2  ;;  %v869_v26 = vrot.slane %v7993_v45, 7  ;;  %v613_v61 = vrot.slane %v7718_v6, 1  ;;  %v873_v6 = vrot.slane %v8021_v21, 7 }
 0x10e   : > { %v6233_v22 = vpack.i.bf16 %v2221_v28, %v2219_v24  ;;  %v11543_v24 = vrot.slane %v8065_v46, 2 }
 0x10f   : > { %v8079_v5 = vsel %vm849_vm2, %v11749_v39, %v869_v26  ;;  %v8082_v47 = vsel %vm849_vm2, %v869_v26, %v871_v56  ;;  %v420_v26 = vld [vmem:[%s11480_s8 + $0xd8] sm:$0xff]  ;;  %v8110_v39 = vmul.f32 %v7646_v34, %v7553_v55  ;;  %v615_v34 = vrot.slane %v7724_v10, 1 }
 0x110   : > { %v956_v23 = vmul.f32 %v8079_v5, %v7974_v27  ;;  %v11758_v10 = vrot.slane %v7722_v9, 1 }
 0x111   : > { %6224 = vrot.lane.b32.xlu0 %v8007_v18, %s7276_s16  ;;  %6219 = vrot.lane.b32.xlu1 %v6218_v17, %s7275_s15  ;;  %v2222_v17 = vrot.slane %v1086_v50, 2  ;;  %v8106_v50 = vmul.f32 %v7639_v32, %v7544_v52  ;;  %v614_v32 = vsel %vm591_vm1, %v611_v12, %v613_v61 }
 0x113   : > { %v2223_v28 = vsel %vm1338_vm3, %v2220_v2, %v2222_v17  ;;  %v2225_v21 = vsel %vm1338_vm3, %v2222_v17, %v11543_v24  ;;  %v421_v2 = vld [vmem:[%s11480_s8 + $0xe0] sm:$0xff]  ;;  %v8150_v17 = vmul.f32 %v7680_v49, %v7575_v3  ;;  %v1358_v3 = vrot.slane %v956_v23, 2 }
 0x114   : > { %v616_v24 = vsel %vm591_vm1, %v613_v61, %v615_v34  ;;  %v8197_v61 = vmul.f32 %v7969_v30, %v7687_v51 }
 0x115   : > { %6234 = vrot.lane.b32.xlu0 %v6233_v22, %s7277_s22  ;;  %6229 = vrot.lane.b32.xlu1 %v8068_v7, %s7276_s16  ;;  %v8102_v22 = vmul.f32 %v7642_v33, %v7547_v53  ;;  %v8119_v53 = vmul.f32 %v8082_v47, %v7977_v59  ;;  %v11752_v33 = vrot.slane %v7711_v1, 1  ;;  %v8134_v1 = vmul.f32 %v7675_v48, %v7550_v54  ;;  %v8152_v54 = vpop.permute.xlu1 %791  ;;  %v8154_v48 = vpop.permute.xlu0 %795 }
 0x116   : > { %11755 = vst [vmem:[#allocation53_spill] sm:$0xff] %v8152_v54  ;;  %11756 = vst [vmem:[#allocation54_spill] sm:$0xff] %v8154_v48  ;;  %v8218_v30 = vmul.f32 %v616_v24, %v8034_v58 }
 0x117   : > { %v612_v52 = vsel %vm591_vm1, %v11752_v33, %v611_v12  ;;  %11753 = vst [vmem:[#allocation52_spill] sm:$0xff] %v8134_v1  ;;  %v8137_v12 = vsel %vm849_vm2, %v871_v56, %v873_v6  ;;  %v11754_v33 = vrot.slane %v8045_v31, 7  ;;  %v8158_v56 = vmul.f32 %v7935_v63, %v7578_v4  ;;  %11761 = vst [vmem:[#allocation58_spill] sm:$0xff] %v8197_v61 }
 0x118   : > { %v1360_v49 = vrot.slane %v8119_v53, 2  ;;  %v958_v4 = vmul.f32 %v8137_v12, %v8029_v37  ;;  %v8190_v23 = vmul.f32 %v612_v52, %v8034_v58 }
 0x119   : > { %831 = vperm.xlu0 %6041, %v420_v26   ;;  %v8142_v55 = vsel %vm849_vm2, %v873_v6, %v11754_v33  ;;  %827 = vperm.xlu1 %6042, %v419_v29   ;;  %v2891_v26 = vsel %vm2889_vm4, %v7165_v38, 0  ;;  %11757 = vst [vmem:[#allocation55_spill] sm:$0xff] %v8158_v56  ;;  %v8161_v6 = vmul.f32 %v612_v52, %v7977_v59  ;;  %v8167_v33 = vld [vmem:[%s7535_s24 + $0x80] sm:$0xff]  ;;  %v8226_v45 = vpop.permute.xlu0 %803 }
 0x11a   : > { %v8164_v29 = vmul.f32 %v614_v32, %v8029_v37  ;;  %5787 = vmatpush3.bf16.msra.mxu0 %v2891_v26  ;;  %v6238_v38 = vpack.i.bf16 %v2225_v21, %v2223_v28  ;;  %v8174_v63 = vmul.f32 %v8142_v55, %v8034_v58  ;;  %v618_v26 = vsel %vm591_vm1, %v615_v34, %v11758_v10  ;;  %v8205_v10 = vld [vmem:[%s7535_s24 + $0x88] sm:$0xff] }
 0x11b   : > { %v8182_v21 = vmul.f32 %v7943_v43, %v7599_v13  ;;  %v8186_v28 = vmul.f32 %v7955_v62, %v7602_v14  ;;  %v8193_v53 = vmul.f32 %v614_v32, %v8167_v33  ;;  %v422_v13 = vld [vmem:[%s11480_s8 + $0xe8] sm:$0xff]  ;;  %v8208_v43 = vld [vmem:[%s7535_s24 + $0x90] sm:$0xff]  ;;  %v8211_v62 = vmul.f32 %v612_v52, %v7839_v20  ;;  %11765 = vst [vmem:[#allocation61_spill] sm:$0xff] %v8226_v45 }
 0x11c   : > { %v6263_v14 = vpack.i.bf16 %v8164_v29, %v8161_v6  ;;  %v11763_v34 = vrot.slane %v7930_v19, 2  ;;  %v1361_v51 = vsel %vm1338_vm3, %v1358_v3, %v1360_v49  ;;  %v619_v6 = vrot.slane %v7728_v15, 1  ;;  %v8224_v29 = vpop.permute.xlu1 %799 }
 0x11d   : > { %835 = vperm.xlu0 %6041, %v421_v2   ;;  %11759 = vst [vmem:[#allocation56_spill] sm:$0xff] %v8182_v21  ;;  %11760 = vst [vmem:[#allocation57_spill] sm:$0xff] %v8186_v28  ;;  %6239 = vrot.lane.b32.xlu1 %v6238_v38, %s7277_s22  ;;  %v8221_v38 = vmul.f32 %v618_v26, %v8167_v33  ;;  %v1362_v20 = vrot.slane %v958_v4, 2  ;;  %v8232_v52 = vmul.f32 %v614_v32, %v7974_v27  ;;  %v11767_v4 = vld [vmem:[#allocation20_spill] sm:$0xff]  ;;  %v11797_v21 = vld [vmem:[#allocation26_spill] sm:$0xff] }
 0x11e   : > { %11762 = vst [vmem:[#allocation59_spill] sm:$0xff] %v8211_v62  ;;  %v1359_v2 = vsel %vm1338_vm3, %v11763_v34, %v1358_v3  ;;  %11764 = vst [vmem:[#allocation60_spill] sm:$0xff] %v8224_v29  ;;  %v621_v3 = vrot.slane %v7726_v11, 1  ;;  %v8238_v15 = vmul.f32 %v616_v24, %v8205_v10  ;;  %v8241_v40 = vmul.f32 %v618_v26, %v8208_v43 }
 0x11f   : > { %11766 = vst [vmem:[#allocation62_spill] sm:$0xff] %v8232_v52  ;;  %v623_v19 = vrot.slane %v11767_v4, 1  ;;  %v6253_v57 = vpack.i.bf16 %v1361_v51, %v1359_v2  ;;  %v6268_v27 = vpack.i.bf16 %v8221_v38, %v8218_v30  ;;  %v1022_v32 = vmul.f32 %v8079_v5, %v8029_v37 }
 0x120   : > { %v8254_v34 = vmul.f32 %v616_v24, %v7977_v59  ;;  %v11769_v2 = vrot.slane %v8174_v63, 2  ;;  %v11770_v30 = vrot.slane %v7722_v9, 1  ;;  %v8267_v4 = vmul.f32 %v618_v26, %v8029_v37  ;;  %v11775_v37 = vld [vmem:[#allocation22_spill] sm:$0xff]  ;;  %v8283_v11 = vpop.permute.xlu1 %807  ;;  %v8285_v9 = vpop.permute.xlu0 %6044 }
 0x121   : > { %6244 = vrot.lane.b32.xlu0 %v8007_v18, %s7270_s19  ;;  %839 = vperm.xlu1 %6042, %v422_v13   ;;  %v625_v18 = vrot.slane %v7730_v16, 1  ;;  %v8251_v13 = vmul.f32 %v8082_v47, %v8034_v58  ;;  %v1363_v16 = vsel %vm1338_vm3, %v1360_v49, %v1362_v20  ;;  %v1170_v59 = vrot.slane %v8167_v33, 1  ;;  %v8276_v49 = vld [vmem:[%s7535_s24 + $0x98] sm:$0xff]  ;;  %11776 = vst [vmem:[#allocation67_spill] sm:$0xff] %v8283_v11 }
 0x122   : > { %11768 = vst [vmem:[#allocation63_spill] sm:$0xff] %v8254_v34  ;;  %v1365_v51 = vsel %vm1338_vm3, %v1362_v20, %v11769_v2  ;;  %v8264_v38 = vsel %vm591_vm1, %v11770_v30, %v619_v6  ;;  %11772 = vst [vmem:[#allocation65_spill] sm:$0xff] %v8267_v4  ;;  %v8279_v20 = vsel %vm591_vm1, %v619_v6, %v621_v3  ;;  %v11774_v2 = vld [vmem:[#allocation21_spill] sm:$0xff]  ;;  %v627_v26 = vrot.slane %v11775_v37, 1  ;;  %v11785_v4 = vld [vmem:[#allocation24_spill] sm:$0xff] }
 0x123   : > { %11771 = vst [vmem:[#allocation64_spill] sm:$0xff] %v8264_v38  ;;  %11773 = vst [vmem:[#allocation66_spill] sm:$0xff] %v8279_v20  ;;  %v629_v30 = vrot.slane %v11774_v2, 1  ;;  %v8294_v24 = vsel %vm591_vm1, %v623_v19, %v625_v18  ;;  %v6258_v6 = vpack.i.bf16 %v1365_v51, %v1363_v16  ;;  %v1792_v35 = vrot.slane %v1022_v32, 2  ;;  %v8313_v16 = vld [vmem:[%s7535_s24 + $0xa8] sm:$0xff] }
 0x124   : > { %11778 = vst [vmem:[#allocation69_spill] sm:$0xff] %v8294_v24  ;;  %v1794_v60 = vrot.slane %v8251_v13, 2  ;;  %v8299_v2 = vmul.f32 %v8264_v38, %v8205_v10  ;;  %v1024_v37 = vmul.f32 %v8137_v12, %v8167_v33  ;;  %v8317_v32 = vmul.f32 %v8264_v38, %v8276_v49  ;;  %v8320_v13 = vld [vmem:[%s7535_s24 + $0xb0] sm:$0xff] }
 0x125   : > { %6254 = vrot.lane.b32.xlu0 %v6253_v57, %s7273_s11  ;;  %6249 = vrot.lane.b32.xlu1 %v8068_v7, %s7270_s19  ;;  %v8291_v57 = vsel %vm591_vm1, %v621_v3, %v623_v19  ;;  %v8306_v3 = vmul.f32 %v8142_v55, %v8205_v10  ;;  %v8310_v19 = vmul.f32 %v8279_v20, %v8208_v43  ;;  %v631_v52 = vrot.slane %v11785_v4, 1 }
 0x126   : > { %11777 = vst [vmem:[#allocation68_spill] sm:$0xff] %v8291_v57  ;;  %11779 = vst [vmem:[#allocation70_spill] sm:$0xff] %v8317_v32  ;;  %v8328_v42 = vmul.f32 %v8291_v57, %v8276_v49  ;;  %v8332_v34 = vmul.f32 %v8294_v24, %v8288_v36  ;;  %v8336_v38 = vmul.f32 %v8279_v20, %v8288_v36  ;;  %v11789_v28 = vrot.slane %v7990_v41, 2 }
 0x127   : > { %11780 = vst [vmem:[#allocation71_spill] sm:$0xff] %v8320_v13  ;;  %v8346_v62 = vsel %vm591_vm1, %v627_v26, %v629_v30  ;;  %v1795_v56 = vsel %vm1338_vm3, %v1792_v35, %v1794_v60  ;;  %v8354_v20 = vmul.f32 %v8291_v57, %v8313_v16  ;;  %v8358_v4 = vmul.f32 %v8294_v24, %v8320_v13 }
 0x128   : > { %11782 = vst [vmem:[#allocation72_spill] sm:$0xff] %v8328_v42  ;;  %11783 = vst [vmem:[#allocation73_spill] sm:$0xff] %v8332_v34  ;;  %v1793_v61 = vsel %vm1338_vm3, %v11789_v28, %v1792_v35  ;;  %v1796_v35 = vrot.slane %v1024_v37, 2  ;;  %v11796_v37 = vld [vmem:[#allocation25_spill] sm:$0xff]  ;;  %v635_v1 = vrot.slane %v11797_v21, 1  ;;  %v8398_v32 = vmul.f32 %v8082_v47, %v8205_v10 }
 0x129   : > { %6264 = vrot.lane.b32.xlu0 %v6263_v14, %s7272_s30  ;;  %6259 = vrot.lane.b32.xlu1 %v6258_v6, %s7273_s11  ;;  %v11781_v14 = vrot.slane %v8034_v58, 1  ;;  %11784 = vst [vmem:[#allocation74_spill] sm:$0xff] %v8336_v38  ;;  %v11786_v6 = vrot.slane %v8205_v10, 1  ;;  %11788 = vst [vmem:[#allocation76_spill] sm:$0xff] %v8346_v62  ;;  %v6283_v28 = vpack.i.bf16 %v1795_v56, %v1793_v61  ;;  %v1174_v47 = vrot.slane %v8208_v43, 1 }
 0x12a   : > { %11790 = vst [vmem:[#allocation77_spill] sm:$0xff] %v8354_v20  ;;  %11791 = vst [vmem:[#allocation78_spill] sm:$0xff] %v8358_v4  ;;  %v1797_v61 = vsel %vm1338_vm3, %v1794_v60, %v1796_v35  ;;  %v8452_v4 = vld [vmem:[%s7535_s24 + $0xe0] sm:$0xff]  ;;  %v2228_v34 = vrot.slane %v8398_v32, 2 }
 0x12b   : > { %v1171_v51 = vsel %vm591_vm1, %v11781_v14, %v1170_v59  ;;  %v1173_v58 = vsel %vm591_vm1, %v1170_v59, %v11786_v6  ;;  %v8343_v14 = vsel %vm591_vm1, %v625_v18, %v627_v26  ;;  %v11792_v59 = vld [vmem:[#allocation23_spill] sm:$0xff]  ;;  %v8361_v26 = vpop.permute.xlu1 %6049  ;;  %v8363_v6 = vpop.permute.xlu0 %811  ;;  %11808 = vst [vmem:[#allocation90_spill] sm:$0xff] %v8452_v4 }
 0x12c   : > { %11787 = vst [vmem:[#allocation75_spill] sm:$0xff] %v8343_v14  ;;  %v633_v18 = vrot.slane %v11792_v59, 1  ;;  %11793 = vst [vmem:[#allocation79_spill] sm:$0xff] %v8363_v6  ;;  %v8371_v24 = vpack.i.bf16 %v1173_v58, %v1171_v51  ;;  %v8377_v57 = vmul.f32 %v8343_v14, %v8313_v16  ;;  %v8389_v51 = vld [vmem:[%s7535_s24 + $0xc0] sm:$0xff]  ;;  %v8392_v58 = vsel %vm591_vm1, %v629_v30, %v631_v52 }
 0x12d   : > { %6274 = vrot.lane.b32.xlu0 %v8068_v7, %s7271_s29  ;;  %6269 = vrot.lane.b32.xlu1 %v6268_v27, %s7272_s30  ;;  %v8381_v7 = vmul.f32 %v8346_v62, %v8320_v13  ;;  %v8386_v27 = vld [vmem:[%s7535_s24 + $0xb8] sm:$0xff]  ;;  %11799 = vst [vmem:[#allocation83_spill] sm:$0xff] %v8392_v58  ;;  %v1088_v59 = vmul.f32 %v8079_v5, %v8167_v33  ;;  %v11800_v30 = vrot.slane %v8306_v3, 2 }
 0x12e   : > { %11794 = vst [vmem:[#allocation80_spill] sm:$0xff] %v8377_v57  ;;  %11798 = vst [vmem:[#allocation82_spill] sm:$0xff] %v8386_v27  ;;  %v8410_v5 = vsel %vm591_vm1, %v631_v52, %v633_v18  ;;  %v8418_v56 = vmul.f32 %v8392_v58, %v8386_v27  ;;  %v8425_v60 = vmul.f32 %v8343_v14, %v8386_v27  ;;  %v11806_v14 = vrot.slane %v11796_v37, 1 }
 0x12f   : > { %11795 = vst [vmem:[#allocation81_spill] sm:$0xff] %v8381_v7  ;;  %v1799_v21 = vsel %vm1338_vm3, %v1796_v35, %v11800_v30  ;;  %11801 = vst [vmem:[#allocation84_spill] sm:$0xff] %v8410_v5  ;;  %v8429_v52 = vmul.f32 %v8346_v62, %v8389_v51  ;;  %v8432_v35 = vld [vmem:[%s7535_s24 + $0xd0] sm:$0xff]  ;;  %v8434_v30 = vpop.permute.xlu1 %815  ;;  %v8436_v41 = vpop.permute.xlu0 %6054  ;;  %v8441_v7 = vld [vmem:[%s7535_s24 + $0xd8] sm:$0xff]  ;;  %v8444_v20 = vsel %vm591_vm1, %v633_v18, %v635_v1  ;;  %v2226_v42 = vrot.slane %v1088_v59, 2 }
 0x130   : > { %11803 = vst [vmem:[#allocation86_spill] sm:$0xff] %v8432_v35  ;;  %11804 = vst [vmem:[#allocation87_spill] sm:$0xff] %v8434_v30  ;;  %v8449_v62 = vsel %vm591_vm1, %v635_v1, %v11806_v14  ;;  %v6288_v38 = vpack.i.bf16 %v1799_v21, %v1797_v61  ;;  %v8457_v27 = vmul.f32 %v8410_v5, %v8389_v51  ;;  %v879_v57 = vrot.slane %v8084_v44, 7 }
 0x131   : > { %6284 = vrot.lane.b32.xlu0 %v6283_v28, %s7274_s12  ;;  %6279 = vrot.lane.b32.xlu1 %v8371_v24, %s7271_s29  ;;  %v8421_v28 = vld [vmem:[%s7535_s24 + $0xc8] sm:$0xff]  ;;  %11805 = vst [vmem:[#allocation88_spill] sm:$0xff] %v8444_v20  ;;  %11807 = vst [vmem:[#allocation89_spill] sm:$0xff] %v8449_v62  ;;  %v877_v18 = vrot.slane %v8047_v25, 7  ;;  %v11809_v13 = vpack.i.bf16 %v8193_v53, %v8190_v23  ;;  %v8471_v21 = vmul.f32 %v8410_v5, %v8432_v35 }
 0x132   : > { %11802 = vst [vmem:[#allocation85_spill] sm:$0xff] %v8421_v28  ;;  %v8467_v1 = vmul.f32 %v8392_v58, %v8421_v28  ;;  %v8476_v32 = vmul.f32 %v8444_v20, %v8421_v28  ;;  %v8480_v14 = vmul.f32 %v8449_v62, %v8432_v35  ;;  %v8484_v23 = vmul.f32 %v8444_v20, %v8441_v7 }
 0x133   : > { %11811 = vst [vmem:[#allocation92_spill] sm:$0xff] %v8471_v21  ;;  %v8488_v53 = vmul.f32 %v8449_v62, %v8452_v4  ;;  %v11818_v44 = vrot.slane %v8276_v49, 1  ;;  %v1090_v5 = vmul.f32 %v8137_v12, %v8208_v43  ;;  %v881_v20 = vrot.slane %v8086_v0, 7 }
 0x134   : > { %11810 = vst [vmem:[#allocation91_spill] sm:$0xff] %v8467_v1  ;;  %11812 = vst [vmem:[#allocation93_spill] sm:$0xff] %v8476_v32  ;;  %v11819_v58 = vrot.slane %v8065_v46, 2  ;;  %v2229_v4 = vsel %vm1338_vm3, %v2226_v42, %v2228_v34  ;;  %v11821_v28 = vrot.slane %v8045_v31, 7  ;;  %v8515_v12 = vsel %vm849_vm2, %v877_v18, %v879_v57  ;;  %v423_v31 = vld [vmem:[%s11480_s8 + $0xf0] sm:$0xff]  ;;  %v11840_v1 = vld [vmem:[#allocation72_spill] sm:$0xff] }
 0x135   : > { %6294 = vrot.lane.b32.xlu0 %v11809_v13, %s7275_s15  ;;  %6289 = vrot.lane.b32.xlu1 %v6288_v38, %s7274_s12  ;;  %11813 = vst [vmem:[#allocation94_spill] sm:$0xff] %v8480_v14  ;;  %11814 = vst [vmem:[#allocation95_spill] sm:$0xff] %v8484_v23  ;;  %v11816_v13 = vld [vmem:[#allocation28_spill] sm:$0xff]  ;;  %v11817_v38 = vrot.slane %v8205_v10, 1  ;;  %v1177_v25 = vsel %vm591_vm1, %v1174_v47, %v11818_v44  ;;  %v883_v46 = vrot.slane %v8152_v54, 7  ;;  %v2230_v0 = vrot.slane %v1090_v5, 2 }
 0x136   : > { %11815 = vst [vmem:[#allocation96_spill] sm:$0xff] %v8488_v53  ;;  %v639_v59 = vrot.slane %v11816_v13, 1  ;;  %v2227_v62 = vsel %vm1338_vm3, %v11819_v58, %v2226_v42  ;;  %v8506_v13 = vmul.f32 %v8142_v55, %v8276_v49  ;;  %v8512_v44 = vsel %vm849_vm2, %v11821_v28, %v877_v18  ;;  %v8520_v58 = vpop.permute.xlu0 %823 }
 0x137   : > { %v1175_v61 = vsel %vm591_vm1, %v11817_v38, %v1174_v47  ;;  %v11820_v38 = vld [vmem:[#allocation27_spill] sm:$0xff]  ;;  %v8518_v47 = vpop.permute.xlu1 %819  ;;  %11823 = vst [vmem:[#allocation98_spill] sm:$0xff] %v8520_v58  ;;  %v11824_v42 = vpack.i.bf16 %v8241_v40, %v8238_v15  ;;  %v6313_v54 = vpack.i.bf16 %v2229_v4, %v2227_v62  ;;  %v11825_v15 = vrot.slane %v11796_v37, 1 }
 0x138   : > { %11822 = vst [vmem:[#allocation97_spill] sm:$0xff] %v8518_v47  ;;  %v8528_v55 = vpack.i.bf16 %v1177_v25, %v1175_v61  ;;  %v8544_v25 = vsel %vm849_vm2, %v879_v57, %v881_v20  ;;  %v11616_v61 = vrot.slane %v8506_v13, 2  ;;  %v961_v62 = vmul.f32 %v8515_v12, %v8205_v10 }
 0x139   : > { %6304 = vrot.lane.b32.xlu0 %v8371_v24, %s7276_s16  ;;  %6299 = vrot.lane.b32.xlu1 %v11824_v42, %s7275_s15  ;;  %v8541_v40 = vsel %vm591_vm1, %v11825_v15, %v639_v59  ;;  %v960_v42 = vmul.f32 %v8512_v44, %v8167_v33  ;;  %v8552_v4 = vsel %vm849_vm2, %v881_v20, %v883_v46  ;;  %v885_v5 = vrot.slane %v8154_v48, 7  ;;  %v424_v33 = vld [vmem:[%s11480_s8 + $0xf8] sm:$0xff] }
 0x13a   : > { %11826 = vst [vmem:[#allocation99_spill] sm:$0xff] %v8541_v40  ;;  %v11827_v15 = vrot.slane %v11820_v38, 1  ;;  %v8570_v10 = vmul.f32 %v8541_v40, %v8441_v7  ;;  %v889_v20 = vrot.slane %v8226_v45, 7  ;;  %v2231_v35 = vsel %vm1338_vm3, %v2228_v34, %v2230_v0 }
 0x13b   : > { %v962_v18 = vmul.f32 %v8544_v25, %v8208_v43  ;;  %v2233_v28 = vsel %vm1338_vm3, %v2230_v0, %v11616_v61  ;;  %v1366_v37 = vrot.slane %v960_v42, 2  ;;  %v8589_v45 = vmul.f32 %v8552_v4, %v8276_v49 }
 0x13c   : > { %v8559_v57 = vsel %vm591_vm1, %v639_v59, %v11827_v15  ;;  %11828 = vst [vmem:[#allocation100_spill] sm:$0xff] %v8570_v10  ;;  %v8574_v59 = vpop.permute.xlu1 %6059  ;;  %v8576_v15 = vpop.permute.xlu0 %6064  ;;  %v8592_v48 = vsel %vm849_vm2, %v883_v46, %v885_v5  ;;  %v1178_v34 = vrot.slane %v8288_v36, 1  ;;  %v6052_v32 = vunpack.i.h.bf16 %v8361_v26 }
 0x13d   : > { %6314 = vrot.lane.b32.xlu0 %v6313_v54, %s7277_s22  ;;  %6309 = vrot.lane.b32.xlu1 %v8528_v55, %s7276_s16  ;;  %v887_v54 = vrot.slane %v8224_v29, 7  ;;  %v1368_v29 = vrot.slane %v961_v62, 2  ;;  %v6051_v0 = vunpack.i.l.bf16 %v8361_v26  ;;  %v6047_v42 = vunpack.i.h.bf16 %v8285_v9 }
 0x13e   : > { %v6046_v62 = vunpack.i.l.bf16 %v8285_v9  ;;  %v1370_v23 = vrot.slane %v962_v18, 2  ;;  %v11829_v14 = vrot.slane %v8174_v63, 2  ;;  %v11619_v26 = vrot.slane %v8589_v45, 2 }
 0x13f   : > { %v8602_v61 = vsel %vm849_vm2, %v885_v5, %v887_v54  ;;  %v8605_v46 = vsel %vm849_vm2, %v887_v54, %v889_v20  ;;  %v1369_v38 = vsel %vm1338_vm3, %v1366_v37, %v1368_v29  ;;  %v1026_v9 = vmul.f32 %v8512_v44, %v8208_v43 }
 0x140   : > { %v1367_v53 = vsel %vm1338_vm3, %v11829_v14, %v1366_v37  ;;  %v6057_v54 = vunpack.i.h.bf16 %v8436_v41  ;;  %v8623_v63 = vpop.permute.xlu0 %6074  ;;  %v8629_v37 = vmul.f32 %v8515_v12, %v8276_v49  ;;  %v8633_v43 = vsel %vm2371_vm5, %v8102_v22, %v6052_v32 }
 0x141   : > { %847 = vperm.xlu0 %6041, %v424_v33   ;;  %843 = vperm.xlu1 %6042, %v423_v31   ;;  %v6318_v33 = vpack.i.bf16 %v2233_v28, %v2231_v35  ;;  %v11830_v31 = vrot.slane %v8283_v11, 7  ;;  %v6056_v35 = vunpack.i.l.bf16 %v8436_v41  ;;  %v8621_v28 = vpop.permute.xlu1 %6069  ;;  %v8637_v14 = vsel %vm2371_vm5, %v8106_v50, %v6051_v0 }
 0x142   : > { %v8641_v41 = vsel %vm2371_vm5, %v8093_v8, %v6046_v62  ;;  %v8645_v18 = vsel %vm2371_vm5, %v8110_v39, %v6047_v42  ;;  %v6333_v22 = vpack.i.bf16 %v1369_v38, %v1367_v53  ;;  %v1371_v32 = vsel %vm1338_vm3, %v1368_v29, %v1370_v23  ;;  %v11833_v53 = vld [vmem:[#allocation52_spill] sm:$0xff] }
 0x143   : > { %v8617_v5 = vsel %vm849_vm2, %v889_v20, %v11830_v31  ;;  %v1373_v50 = vsel %vm1338_vm3, %v1370_v23, %v11619_v26  ;;  %v1800_v0 = vrot.slane %v1026_v9, 2  ;;  %v11831_v8 = vrot.slane %v8276_v49, 1 }
 0x144   : > { %v11832_v39 = vrot.slane %v8313_v16, 1  ;;  %v8666_v29 = vsel %vm2371_vm5, %v11833_v53, %v6056_v35  ;;  %v1802_v49 = vrot.slane %v8629_v37, 2  ;;  %v8680_v35 = vpop.permute.xlu0 %6084  ;;  %v1028_v37 = vmul.f32 %v8544_v25, %v8288_v36 }
 0x145   : > { %6324 = vrot.lane.b32.xlu0 %v8371_v24, %s7270_s19  ;;  %6319 = vrot.lane.b32.xlu1 %v6318_v33, %s7277_s22  ;;  %v1179_v62 = vsel %vm591_vm1, %v11831_v8, %v1178_v34  ;;  %v8662_v33 = vsel %vm2371_vm5, %v8150_v17, %v6057_v54  ;;  %v8678_v54 = vpop.permute.xlu1 %6079  ;;  %v8691_v24 = vmul.f32 %v8552_v4, %v8313_v16  ;;  %v6087_v40 = vunpack.i.h.bf16 %v8680_v35 }
 0x146   : > { %v1181_v42 = vsel %vm591_vm1, %v1178_v34, %v11832_v39  ;;  %v11834_v39 = vrot.slane %v8306_v3, 2  ;;  %v1092_v20 = vmul.f32 %v8512_v44, %v8288_v36  ;;  %v11836_v3 = vld [vmem:[#allocation71_spill] sm:$0xff]  ;;  %v964_v44 = vmul.f32 %v8592_v48, %v8288_v36 }
 0x147   : > { %v8682_v8 = vpack.i.bf16 %v1181_v42, %v1179_v62  ;;  %v1093_v62 = vmul.f32 %v8515_v12, %v8313_v16  ;;  %v1094_v42 = vmul.f32 %v8544_v25, %v11836_v3  ;;  %v1182_v36 = vrot.slane %v11836_v3, 1 }
 0x148   : > { %v1801_v53 = vsel %vm1338_vm3, %v11834_v39, %v1800_v0  ;;  %v11837_v39 = vld [vmem:[#allocation82_spill] sm:$0xff]  ;;  %v2234_v38 = vrot.slane %v1092_v20, 2  ;;  %v1374_v17 = vrot.slane %v964_v44, 2 }
 0x149   : > { %6334 = vrot.lane.b32.xlu0 %v6333_v22, %s7273_s11  ;;  %6329 = vrot.lane.b32.xlu1 %v8528_v55, %s7270_s19  ;;  %v6338_v22 = vpack.i.bf16 %v1373_v50, %v1371_v32  ;;  %v11835_v32 = vpack.i.bf16 %v8310_v19, %v8299_v2  ;;  %v1803_v50 = vsel %vm1338_vm3, %v1800_v0, %v1802_v49  ;;  %v2236_v23 = vrot.slane %v1093_v62, 2 }
 0x14a   : > { %v8706_v31 = vmul.f32 %v8552_v4, %v11837_v39  ;;  %v965_v2 = vmul.f32 %v8602_v61, %v8313_v16  ;;  %v966_v19 = vmul.f32 %v8605_v46, %v11836_v3  ;;  %v8717_v12 = vmul.f32 %v8617_v5, %v11837_v39 }
 0x14b   : > { %v6090_v0 = vpop.permute.xlu1 %6089  ;;  %v2238_v25 = vrot.slane %v1094_v42, 2  ;;  %v6363_v62 = vpack.i.bf16 %v1803_v50, %v1801_v53  ;;  %v11842_v42 = vrot.slane %v8313_v16, 1  ;;  %v11845_v16 = vrot.slane %v11837_v39, 1 }
 0x14c   : > { %11838 = vst [vmem:[#allocation52_spill] sm:$0xff] %v8717_v12  ;;  %v1376_v9 = vrot.slane %v965_v2, 2  ;;  %v1378_v10 = vrot.slane %v966_v19, 2  ;;  %v11625_v34 = vrot.slane %v8717_v12, 2  ;;  %v11844_v2 = vrot.slane %v8506_v13, 2 }
 0x14d   : > { %6344 = vrot.lane.b32.xlu0 %v11835_v32, %s7272_s30  ;;  %6339 = vrot.lane.b32.xlu1 %v6338_v22, %s7273_s11  ;;  %v1804_v22 = vrot.slane %v1028_v37, 2  ;;  %v11839_v37 = vld [vmem:[#allocation73_spill] sm:$0xff]  ;;  %v1183_v26 = vsel %vm591_vm1, %v11842_v42, %v1182_v36  ;;  %v1185_v53 = vsel %vm591_vm1, %v1182_v36, %v11845_v16  ;;  %v11846_v50 = vrot.slane %v8706_v31, 2 }
 0x14e   : > { %v11841_v21 = vpack.i.bf16 %v11839_v37, %v11840_v1  ;;  %v6086_v1 = vunpack.i.l.bf16 %v8680_v35  ;;  %v8750_v19 = vsel %vm1338_vm3, %v11844_v2, %v2234_v38  ;;  %v8760_v35 = vsel %vm1338_vm3, %v2236_v23, %v2238_v25 }
 0x14f   : > { %v8721_v32 = vpop.permute.xlu0 %6094  ;;  %v1805_v4 = vsel %vm1338_vm3, %v1802_v49, %v1804_v22  ;;  %v8754_v49 = vsel %vm1338_vm3, %v2234_v38, %v2236_v23  ;;  %v11847_v13 = vrot.slane %v8589_v45, 2  ;;  %v8775_v37 = vsel %vm1338_vm3, %v1374_v17, %v1376_v9 }
 0x150   : > { %v8778_v23 = vsel %vm1338_vm3, %v1376_v9, %v1378_v10  ;;  %v6092_v36 = vunpack.i.h.bf16 %v6090_v0  ;;  %v6097_v16 = vunpack.i.h.bf16 %v8721_v32  ;;  %v8805_v12 = vmul.f32 %v8602_v61, %v11837_v39 }
 0x151   : > { %6354 = vrot.lane.b32.xlu0 %v8528_v55, %s7271_s29  ;;  %6349 = vrot.lane.b32.xlu1 %v11841_v21, %s7272_s30  ;;  %v11843_v21 = vrot.slane %v8691_v24, 2  ;;  %v8772_v38 = vsel %vm1338_vm3, %v11847_v13, %v1374_v17  ;;  %v6096_v17 = vunpack.i.l.bf16 %v8721_v32  ;;  %v11849_v13 = vld [vmem:[#allocation70_spill] sm:$0xff] }
 0x153   : > { %v8736_v20 = vpop.permute.xlu0 %6104  ;;  %v6100_v55 = vpop.permute.xlu1 %6099  ;;  %v1807_v44 = vsel %vm1338_vm3, %v1804_v22, %v11843_v21  ;;  %v8765_v22 = vsel %vm1338_vm3, %v2238_v25, %v11846_v50  ;;  %v8783_v25 = vsel %vm1338_vm3, %v1378_v10, %v11625_v34  ;;  %v6393_v50 = vpack.i.bf16 %v8754_v49, %v8750_v19  ;;  %v11848_v10 = vld [vmem:[#allocation74_spill] sm:$0xff] }
 0x154   : > { %v6102_v42 = vunpack.i.h.bf16 %v6100_v55  ;;  %v6101_v21 = vunpack.i.l.bf16 %v6100_v55  ;;  %v6368_v9 = vpack.i.bf16 %v1807_v44, %v1805_v4  ;;  %v11850_v34 = vpack.i.bf16 %v11848_v10, %v11849_v13 }
 0x155   : > { %6364 = vrot.lane.b32.xlu0 %v6363_v62, %s7274_s12  ;;  %6359 = vrot.lane.b32.xlu1 %v8682_v8, %s7271_s29  ;;  %v6091_v62 = vunpack.i.l.bf16 %v6090_v0  ;;  %v8797_v0 = vpack.i.bf16 %v1185_v53, %v1183_v26  ;;  %v8801_v55 = vmul.f32 %v8592_v48, %v11836_v3  ;;  %v2407_v3 = vsel %vm2405_vm6, %v8645_v18, %v6092_v36  ;;  %v11855_v18 = vld [vmem:[#allocation77_spill] sm:$0xff] }
 0x156   : > { %v2411_v44 = vsel %vm2405_vm6, %v8662_v33, %v6102_v42  ;;  %v2410_v19 = vsel %vm2405_vm6, %v8666_v29, %v6101_v21  ;;  %v2408_v10 = vsel %vm2405_vm6, %v8637_v14, %v6096_v17  ;;  %v8834_v29 = vmul.f32 %v8605_v46, %v8389_v51  ;;  %v11854_v33 = vld [vmem:[#allocation78_spill] sm:$0xff] }
 0x157   : > { %v8785_v2 = vpop.permute.xlu0 %6114  ;;  %v8787_v45 = vpop.permute.xlu1 %6109  ;;  %v11852_v14 = vunpack.i.l.bf16 %v8623_v63  ;;  %v11853_v42 = vunpack.i.h.bf16 %v8623_v63  ;;  %v2444_v17 = vsel %vm2439_vm7, %v2410_v19, %v6086_v1  ;;  %v11856_v13 = vpack.i.bf16 %v11854_v33, %v11855_v18 }
 0x158   : > { %v6117_v19 = vunpack.i.h.bf16 %v8785_v2  ;;  %v6116_v18 = vunpack.i.l.bf16 %v8785_v2  ;;  %v6111_v33 = vunpack.i.l.bf16 %v8787_v45 }
 0x159   : > { %6374 = vrot.lane.b32.xlu0 %v11850_v34, %s7275_s15  ;;  %6369 = vrot.lane.b32.xlu1 %v6368_v9, %s7274_s12  ;;  %v2406_v34 = vsel %vm2405_vm6, %v8641_v41, %v6091_v62  ;;  %v2409_v9 = vsel %vm2405_vm6, %v8633_v43, %v6097_v16  ;;  %v11851_v62 = vld [vmem:[#allocation85_spill] sm:$0xff]  ;;  %v2441_v21 = vsel %vm2439_vm7, %v2407_v3, %v11853_v42  ;;  %v11857_v41 = vunpack.i.h.bf16 %v8678_v54 }
 0x15a   : > { %v8838_v43 = vmul.f32 %v8617_v5, %v11851_v62  ;;  %v2440_v36 = vsel %vm2439_vm7, %v2406_v34, %v11852_v14  ;;  %v2445_v16 = vsel %vm2439_vm7, %v2411_v44, %v6087_v40  ;;  %v11858_v34 = vunpack.i.l.bf16 %v8678_v54 }
 0x15b   : > { %v6125_v49 = vpop.permute.xlu0 %6124  ;;  %v6120_v53 = vpop.permute.xlu1 %6119  ;;  %v2443_v26 = vsel %vm2439_vm7, %v2409_v9, %v11857_v41  ;;  %v6107_v3 = vunpack.i.h.bf16 %v8736_v20  ;;  %v6106_v40 = vunpack.i.l.bf16 %v8736_v20  ;;  %v11859_v9 = vunpack.i.l.bf16 %v8574_v59 }
 0x15c   : > { %v2442_v63 = vsel %vm2439_vm7, %v2408_v10, %v11858_v34  ;;  %v11860_v10 = vunpack.i.h.bf16 %v8574_v59  ;;  %v11861_v20 = vunpack.i.l.bf16 %v8621_v28  ;;  %v11862_v42 = vunpack.i.h.bf16 %v8621_v28 }
 0x15d   : > { %6384 = vrot.lane.b32.xlu0 %v8682_v8, %s7276_s16  ;;  %6379 = vrot.lane.b32.xlu1 %v11856_v13, %s7275_s15  ;;  %v6112_v13 = vunpack.i.h.bf16 %v8787_v45  ;;  %v2474_v54 = vsel %vm2473_vm8, %v2440_v36, %v11859_v9  ;;  %v6127_v34 = vunpack.i.h.bf16 %v6125_v49  ;;  %v6126_v45 = vunpack.i.l.bf16 %v6125_v49 }
 0x15e   : > { %v2475_v41 = vsel %vm2473_vm8, %v2441_v21, %v11860_v10  ;;  %v2478_v14 = vsel %vm2473_vm8, %v2444_v17, %v11861_v20  ;;  %v2479_v2 = vsel %vm2473_vm8, %v2445_v16, %v11862_v42  ;;  %v6122_v32 = vunpack.i.h.bf16 %v6120_v53 }
 0x15f   : > { %v6135_v44 = vpop.permute.xlu0 %6134  ;;  %v6130_v1 = vpop.permute.xlu1 %6129  ;;  %v6121_v4 = vunpack.i.l.bf16 %v6120_v53  ;;  %v2508_v59 = vsel %vm2507_vm9, %v2474_v54, %v6106_v40  ;;  %v2509_v36 = vsel %vm2507_vm9, %v2475_v41, %v6107_v3  ;;  %v11863_v21 = vunpack.i.l.bf16 %v8576_v15 }
 0x160   : > { %v11864_v28 = vunpack.i.h.bf16 %v8576_v15  ;;  %v2512_v49 = vsel %vm2507_vm9, %v2478_v14, %v6116_v18  ;;  %v2513_v53 = vsel %vm2507_vm9, %v2479_v2, %v6117_v19  ;;  %v6137_v54 = vunpack.i.h.bf16 %v6135_v44 }
 0x161   : > { %6394 = vrot.lane.b32.xlu0 %v6393_v50, %s7277_s22  ;;  %6389 = vrot.lane.b32.xlu1 %v8797_v0, %s7276_s16  ;;  %v2476_v17 = vsel %vm2473_vm8, %v2442_v63, %v11863_v21  ;;  %v6136_v3 = vunpack.i.l.bf16 %v6135_v44  ;;  %v2542_v63 = vsel %vm2541_vm10, %v2508_v59, %v6121_v4  ;;  %v2543_v18 = vsel %vm2541_vm10, %v2509_v36, %v6122_v32 }
 0x162   : > { %v2477_v16 = vsel %vm2473_vm8, %v2443_v26, %v11864_v28  ;;  %v2510_v40 = vsel %vm2507_vm9, %v2476_v17, %v6111_v33  ;;  %v11865_v19 = vpack.i.bf16 %v8765_v22, %v8760_v35  ;;  %v6131_v44 = vunpack.i.l.bf16 %v6130_v1 }
 0x163   : > { %v6145_v50 = vpop.permute.xlu0 %6144  ;;  %v6140_v9 = vpop.permute.xlu1 %6139  ;;  %v2511_v10 = vsel %vm2507_vm9, %v2477_v16, %v6112_v13  ;;  %v2544_v15 = vsel %vm2541_vm10, %v2510_v40, %v6126_v45  ;;  %v6132_v13 = vunpack.i.h.bf16 %v6130_v1  ;;  %v2577_v4 = vsel %vm2575_vm11, %v2543_v18, %v6137_v54 }
 0x164   : > { %v6142_v41 = vunpack.i.h.bf16 %v6140_v9  ;;  %v6141_v20 = vunpack.i.l.bf16 %v6140_v9  ;;  %v2545_v26 = vsel %vm2541_vm10, %v2511_v10, %v6127_v34  ;;  %v6147_v33 = vunpack.i.h.bf16 %v6145_v50 }
 0x165   : > { %6404 = vrot.lane.b32.xlu0 %v8682_v8, %s7270_s19  ;;  %6399 = vrot.lane.b32.xlu1 %v11865_v19, %s7277_s22  ;;  %v6146_v14 = vunpack.i.l.bf16 %v6145_v50  ;;  %v2576_v34 = vsel %vm2575_vm11, %v2542_v63, %v6136_v3  ;;  %v11866_v35 = vpack.i.bf16 %v8775_v37, %v8772_v38  ;;  %v2546_v16 = vsel %vm2541_vm10, %v2512_v49, %v6131_v44 }
 0x166   : > { %v2578_v32 = vsel %vm2575_vm11, %v2544_v15, %v6141_v20  ;;  %v2579_v59 = vsel %vm2575_vm11, %v2545_v26, %v6142_v41  ;;  %v2547_v50 = vsel %vm2541_vm10, %v2513_v53, %v6132_v13  ;;  %v11867_v20 = vld [vmem:[#allocation81_spill] sm:$0xff]  ;;  %v11868_v15 = vld [vmem:[#allocation80_spill] sm:$0xff]  ;;  %v11870_v44 = vpack.i.bf16 %v8783_v25, %v8778_v23 }
 0x167   : > { %v6155_v42 = vpop.permute.xlu0 %6154  ;;  %v6150_v2 = vpop.permute.xlu1 %6149  ;;  %v2580_v37 = vsel %vm2575_vm11, %v2546_v16, %v6146_v14  ;;  %v2581_v54 = vsel %vm2575_vm11, %v2547_v50, %v6147_v33  ;;  %v11869_v26 = vpack.i.bf16 %v11867_v20, %v11868_v15  ;;  %v11871_v33 = vrot.slane %v8389_v51, 1 }
 0x168   : > { %v6157_v8 = vunpack.i.h.bf16 %v6155_v42  ;;  %v6156_v21 = vunpack.i.l.bf16 %v6155_v42  ;;  %v6152_v45 = vunpack.i.h.bf16 %v6150_v2  ;;  %v6151_v17 = vunpack.i.l.bf16 %v6150_v2 }
 0x169   : > { %6414 = vrot.lane.b32.xlu0 %v11866_v35, %s7273_s11  ;;  %6409 = vrot.lane.b32.xlu1 %v8797_v0, %s7270_s19  ;;  %v11872_v14 = vrot.slane %v11837_v39, 1  ;;  %v11873_v2 = vrot.slane %v11851_v62, 1  ;;  %v11875_v25 = vrot.slane %v8801_v55, 2  ;;  %v11877_v35 = vrot.slane %v8805_v12, 2 }
 0x16a   : > { %v2612_v22 = vsel %vm2609_vm0, %v2578_v32, %v6156_v21  ;;  %v2613_v1 = vsel %vm2609_vm0, %v2579_v59, %v6157_v8  ;;  %v2610_v36 = vsel %vm2609_vm0, %v2576_v34, %v6151_v17  ;;  %v2611_v28 = vsel %vm2609_vm0, %v2577_v4, %v6152_v45 }
 0x16b   : > { %v2644_v9 = vpack.c.bf16 %v2613_v1, %v2612_v22  ;;  %v2643_v10 = vpack.c.bf16 %v2611_v28, %v2610_v36  ;;  %v8917_v40 = vpop.permute.xlu0 %6164  ;;  %v6160_v38 = vpop.permute.xlu1 %6159  ;;  %v1187_v42 = vsel %vm591_vm1, %v11872_v14, %v11871_v33  ;;  %v11874_v8 = vmov %v11871_v33  ;;  %v11886_v33 = vld [vmem:[#allocation90_spill] sm:$0xff] }
 0x16c   : > { %v6162_v3 = vunpack.i.h.bf16 %v6160_v38  ;;  %v6161_v41 = vunpack.i.l.bf16 %v6160_v38  ;;  %v1189_v21 = vsel %vm591_vm1, %v11874_v8, %v11873_v2  ;;  %v11876_v59 = vrot.slane %v8691_v24, 2 }
 0x16d   : > { %6424 = vrot.lane.b32.xlu0 %v11869_v26, %s7272_s30  ;;  %v2674_v63 = vshrl.u32 %v2643_v10, 16  ;;  %v2677_v49 = vshll.u32 %v2643_v10, 16  ;;  %v2682_v18 = vshrl.u32 %v2644_v9, 16  ;;  %v2685_v53 = vshll.u32 %v2644_v9, 16  ;;  %6419 = vrot.lane.b32.xlu1 %v11870_v44, %s7273_s11 }
 0x16e   : > { %v2614_v19 = vsel %vm2609_vm0, %v2580_v37, %v6161_v41  ;;  %v2615_v13 = vsel %vm2609_vm0, %v2581_v54, %v6162_v3  ;;  %v1809_v39 = vsel %vm1338_vm3, %v11876_v59, %v11875_v25  ;;  %v11878_v22 = vmov %v11875_v25 }
 0x16f   : > { %v2645_v45 = vpack.c.bf16 %v2615_v13, %v2614_v19  ;;  %v8941_v17 = vpop.permute.xlu0 %6174  ;;  %v2676_v34 = vrot.slane %v2674_v63, 3  ;;  %v2679_v4 = vrot.slane %v2677_v49, 4  ;;  %v2684_v32 = vrot.slane %v2682_v18, 3  ;;  %v8954_v28 = vpop.permute.xlu1 %6169  ;;  %v11883_v49 = vld [vmem:[#allocation86_spill] sm:$0xff] }
 0x170   : > { %v2687_v23 = vrot.slane %v2685_v53, 4  ;;  %v1811_v1 = vsel %vm1338_vm3, %v11878_v22, %v11877_v35  ;;  %v1812_v36 = vrot.slane %v8834_v29, 2  ;;  %v11629_v24 = vrot.slane %v8838_v43, 2 }
 0x171   : > { %6434 = vrot.lane.b32.xlu0 %v8797_v0, %s7271_s29  ;;  %v2680_v16 = vor.u32 %v2679_v4, %v2676_v34  ;;  %v2691_v50 = vshrl.u32 %v2645_v45, 16  ;;  %v11879_v9 = vpack.i.bf16 %v8457_v27, %v8418_v56  ;;  %v8963_v10 = vpack.i.bf16 %v1189_v21, %v1187_v42  ;;  %v9020_v34 = vld [vmem:[%s7535_s24 + $0xf0] sm:$0xff] }
 0x172   : > { %v2688_v55 = vor.u32 %v2687_v23, %v2684_v32  ;;  %v2694_v29 = vshll.u32 %v2645_v45, 16  ;;  %v11880_v38 = vrot.slane %v8363_v6, 7  ;;  %v11881_v37 = vrot.slane %v8283_v11, 7  ;;  %v9017_v45 = vld [vmem:[%s7535_s24 + $0xe8] sm:$0xff]  ;;  %v11991_v11 = vld [vmem:[#allocation13_spill] sm:$0xff] }
 0x173   : > { %6429 = vrot.lane.b32.xlu1 %v11879_v9, %s7272_s30  ;;  %v8972_v54 = vpop.permute.xlu0 %6184  ;;  %v6443_v3 = vpack.i.bf16 %v1811_v1, %v1809_v39  ;;  %v2693_v41 = vrot.slane %v2691_v50, 3  ;;  %v1096_v27 = vmul.f32 %v8592_v48, %v8389_v51  ;;  %v11882_v15 = vmov %v11877_v35  ;;  %v9010_v14 = vpop.permute.xlu1 %6179  ;;  %v11888_v1 = vld [vmem:[#allocation29_spill] sm:$0xff]  ;;  %v11890_v50 = vld [vmem:[#allocation99_spill] sm:$0xff]  ;;  %v11891_v9 = vld [vmem:[#allocation30_spill] sm:$0xff] }
 0x174   : > { %v8970_v0 = vsel %vm849_vm2, %v11881_v37, %v11880_v38  ;;  %v2689_v56 = vsel %vm2672_vm12, %v2680_v16, %v2688_v55  ;;  %v2696_v20 = vrot.slane %v2694_v29, 4  ;;  %v1813_v26 = vsel %vm1338_vm3, %v11882_v15, %v1812_v36 }
 0x175   : > { %v1097_v63 = vmul.f32 %v8602_v61, %v11851_v62  ;;  %5788 = vmatprep.mubr.msk.bf16.mxu0 %vm2840_vm13, %v2689_v56  ;;  %6444 = vrot.lane.b32.xlu0 %v6443_v3, %s7274_s12  ;;  %v1815_v48 = vsel %vm1338_vm3, %v1812_v36, %v11629_v24  ;;  %v1098_v18 = vmul.f32 %v8605_v46, %v11883_v49  ;;  %v11884_v53 = vrot.slane %v8434_v30, 7 }
 0x176   : > { %v8991_v12 = vmul.f32 %v8617_v5, %v8441_v7  ;;  %v11885_v61 = vmov %v11880_v38  ;;  %v897_v13 = vrot.slane %v8518_v47, 7  ;;  %v9003_v44 = vor.u32 %v2696_v20, %v2693_v41 }
 0x177   : > { %v8998_v19 = vsel %vm849_vm2, %v11885_v61, %v11884_v53  ;;  %6439 = vrot.lane.b32.xlu1 %v8963_v10, %s7271_s29  ;;  %v9007_v46 = vmul.f32 %v8559_v57, %v11886_v33  ;;  %v11627_v5 = vrot.slane %v8520_v58, 7  ;;  %v9012_v42 = vpop.permute.xlu0 %6194  ;;  %v2242_v2 = vrot.slane %v1096_v27, 2  ;;  %v11895_v61 = vld [vmem:[#allocation92_spill] sm:$0xff] }
 0x178   : > { %v1190_v8 = vrot.slane %v11883_v49, 1  ;;  %v11630_v21 = vrot.slane %v8441_v7, 1  ;;  %v2698_v4 = vsel %vm2672_vm12, %v2688_v55, %v9003_v44  ;;  %v6448_v32 = vpack.i.bf16 %v1815_v48, %v1813_v26  ;;  %v11894_v26 = vld [vmem:[#allocation100_spill] sm:$0xff]  ;;  %v9069_v48 = vpop.permute.xlu1 %6189 }
 0x179   : > { %v2244_v23 = vrot.slane %v1097_v63, 2  ;;  %v968_v25 = vmul.f32 %v8970_v0, %v8389_v51  ;;  %5789 = vmatmul.mubr.msk.bf16.vlgmr.msra.gmra.mrb[0].mxu0 %vm2840_vm13, %v2698_v4  ;;  %v11887_v59 = vpack.i.bf16 %v8429_v52, %v8425_v60  ;;  %v2246_v39 = vrot.slane %v1098_v18, 2 }
 0x17a   : > { %v11628_v35 = vrot.slane %v8991_v12, 2  ;;  %v9034_v22 = vmul.f32 %v8998_v19, %v11851_v62  ;;  %v11889_v16 = vmov %v11884_v53  ;;  %v9045_v60 = vmul.f32 %v11890_v50, %v9017_v45 }
 0x17b   : > { %6454 = vrot.lane.b32.xlu0 %v11887_v59, %s7275_s15  ;;  %v9040_v51 = vsel %vm849_vm2, %v11889_v16, %v897_v13  ;;  %6449 = vrot.lane.b32.xlu1 %v6448_v32, %s7274_s12  ;;  %v9049_v52 = vmul.f32 %v8559_v57, %v9020_v34  ;;  %v643_v55 = vrot.slane %v11891_v9, 1  ;;  %v9055_v29 = vsel %vm849_vm2, %v897_v13, %v11627_v5  ;;  %v6205_v38 = vpop.permute.xlu0 %6204  ;;  %v11896_v13 = vld [vmem:[#allocation91_spill] sm:$0xff] }
 0x17c   : > { %v11892_v37 = vrot.slane %v11851_v62, 1  ;;  %v1193_v41 = vsel %vm591_vm1, %v1190_v8, %v11630_v21  ;;  %v11893_v27 = vrot.slane %v8706_v31, 2  ;;  %v2245_v20 = vsel %vm1338_vm3, %v2242_v2, %v2244_v23  ;;  %v9119_v32 = vpop.permute.xlu1 %6199 }
 0x17d   : > { %v1382_v15 = vrot.slane %v968_v25, 2  ;;  %v2247_v62 = vsel %vm1338_vm3, %v2244_v23, %v2246_v39  ;;  %v2249_v18 = vsel %vm1338_vm3, %v2246_v39, %v11628_v35  ;;  %v1384_v31 = vrot.slane %v9034_v22, 2 }
 0x17e   : > { %v1191_v3 = vsel %vm591_vm1, %v11892_v37, %v1190_v8  ;;  %v2243_v56 = vsel %vm1338_vm3, %v11893_v27, %v2242_v2  ;;  %v9080_v53 = vmul.f32 %v9040_v51, %v11883_v49  ;;  %v11897_v2 = vpack.i.bf16 %v11895_v61, %v11896_v13 }
 0x17f   : > { %6464 = vrot.lane.b32.xlu0 %v8963_v10, %s7276_s16  ;;  %v9086_v8 = vpack.i.bf16 %v1193_v41, %v1191_v3  ;;  %v9090_v4 = vmul.f32 %v9055_v29, %v8441_v7  ;;  %v6167_v23 = vunpack.i.h.bf16 %v8917_v40  ;;  %v6166_v25 = vunpack.i.l.bf16 %v8917_v40  ;;  %v6215_v59 = vpop.permute.xlu0 %6214  ;;  %v11898_v3 = vld [vmem:[#allocation52_spill] sm:$0xff] }
 0x180   : > { %6459 = vrot.lane.b32.xlu1 %v11897_v2, %s7275_s15  ;;  %v6473_v39 = vpack.i.bf16 %v2245_v20, %v2243_v56  ;;  %v6177_v16 = vunpack.i.h.bf16 %v8941_v17  ;;  %v6176_v37 = vunpack.i.l.bf16 %v8941_v17  ;;  %v6478_v27 = vpack.i.bf16 %v2249_v18, %v2247_v62  ;;  %v11900_v18 = vld [vmem:[#allocation56_spill] sm:$0xff] }
 0x181   : > { %v11899_v41 = vrot.slane %v11898_v3, 2  ;;  %v6187_v13 = vunpack.i.h.bf16 %v8972_v54  ;;  %v6186_v2 = vunpack.i.l.bf16 %v8972_v54  ;;  %v1385_v40 = vsel %vm1338_vm3, %v1382_v15, %v1384_v31  ;;  %v11901_v3 = vld [vmem:[#allocation55_spill] sm:$0xff] }
 0x182   : > { %v1386_v56 = vrot.slane %v9080_v53, 2  ;;  %v6197_v20 = vunpack.i.h.bf16 %v9012_v42  ;;  %v6196_v17 = vunpack.i.l.bf16 %v9012_v42  ;;  %v1388_v62 = vrot.slane %v9090_v4, 2 }
 0x183   : > { %v1383_v61 = vsel %vm1338_vm3, %v11899_v41, %v1382_v15  ;;  %6474 = vrot.lane.b32.xlu0 %v6473_v39, %s7277_s22  ;;  %v1034_v54 = vmul.f32 %v8970_v0, %v11883_v49  ;;  %v2379_v39 = vsel %vm2371_vm5, %v11900_v18, %v6167_v23  ;;  %v2378_v15 = vsel %vm2371_vm5, %v11901_v3, %v6166_v25  ;;  %v6225_v5 = vpop.permute.xlu0 %6224 }
 0x184   : > { %6469 = vrot.lane.b32.xlu1 %v9086_v8, %s7276_s16  ;;  %v6207_v41 = vunpack.i.h.bf16 %v6205_v38  ;;  %v6206_v53 = vunpack.i.l.bf16 %v6205_v38  ;;  %v2412_v42 = vsel %vm2405_vm6, %v2378_v15, %v6176_v37  ;;  %v2413_v35 = vsel %vm2405_vm6, %v2379_v39, %v6177_v16 }
 0x185   : > { %v6217_v63 = vunpack.i.h.bf16 %v6215_v59  ;;  %v6216_v24 = vunpack.i.l.bf16 %v6215_v59  ;;  %v2446_v21 = vsel %vm2439_vm7, %v2412_v42, %v6186_v2  ;;  %v2447_v49 = vsel %vm2439_vm7, %v2413_v35, %v6187_v13 }
 0x186   : > { %v6227_v36 = vunpack.i.h.bf16 %v6225_v5  ;;  %v6226_v23 = vunpack.i.l.bf16 %v6225_v5  ;;  %v2480_v38 = vsel %vm2473_vm8, %v2446_v21, %v6196_v17  ;;  %v2481_v25 = vsel %vm2473_vm8, %v2447_v49, %v6197_v20 }
 0x187   : > { %6484 = vrot.lane.b32.xlu0 %v8963_v10, %s7270_s19  ;;  %v6493_v37 = vpack.i.bf16 %v1385_v40, %v1383_v61  ;;  %v9132_v16 = vmul.f32 %v8998_v19, %v8441_v7  ;;  %v2514_v59 = vsel %vm2507_vm9, %v2480_v38, %v6206_v53  ;;  %v2515_v35 = vsel %vm2507_vm9, %v2481_v25, %v6207_v41  ;;  %v6235_v13 = vpop.permute.xlu0 %6234  ;;  %v9140_v61 = vpop.permute.xlu1 %6209  ;;  %v11905_v25 = vld [vmem:[#allocation94_spill] sm:$0xff] }
 0x188   : > { %6479 = vrot.lane.b32.xlu1 %v6478_v27, %s7277_s22  ;;  %v1194_v5 = vrot.slane %v11886_v33, 1  ;;  %v1196_v10 = vrot.slane %v9017_v45, 1  ;;  %v2548_v21 = vsel %vm2541_vm10, %v2514_v59, %v6216_v24  ;;  %v2549_v2 = vsel %vm2541_vm10, %v2515_v35, %v6217_v63 }
 0x189   : > { %v6237_v20 = vunpack.i.h.bf16 %v6235_v13  ;;  %v6236_v27 = vunpack.i.l.bf16 %v6235_v13  ;;  %v2582_v40 = vsel %vm2575_vm11, %v2548_v21, %v6226_v23  ;;  %v2583_v17 = vsel %vm2575_vm11, %v2549_v2, %v6227_v36 }
 0x18a   : > { %v1389_v18 = vsel %vm1338_vm3, %v1386_v56, %v1388_v62  ;;  %v1816_v39 = vrot.slane %v1034_v54, 2  ;;  %v1818_v63 = vrot.slane %v9132_v16, 2  ;;  %v9155_v15 = vmul.f32 %v9055_v29, %v9017_v45  ;;  %v11902_v54 = vld [vmem:[#allocation27_spill] sm:$0xff] }
 0x18b   : > { %6494 = vrot.lane.b32.xlu0 %v6493_v37, %s7273_s11  ;;  %v2616_v3 = vsel %vm2609_vm0, %v2582_v40, %v6236_v27  ;;  %v2617_v24 = vsel %vm2609_vm0, %v2583_v17, %v6237_v20  ;;  %v1387_v41 = vsel %vm1338_vm3, %v1384_v31, %v1386_v56  ;;  %v11903_v53 = vrot.slane %v11902_v54, 1  ;;  %v11906_v37 = vld [vmem:[#allocation93_spill] sm:$0xff]  ;;  %v9197_v20 = vld [vmem:[%s7535_s24 + $0xf8] sm:$0xff]  ;;  %v9199_v27 = vpop.permute.xlu1 %6219 }
 0x18c   : > { %6489 = vrot.lane.b32.xlu1 %v9086_v8, %s7270_s19  ;;  %v2646_v36 = vpack.c.bf16 %v2617_v24, %v2616_v3  ;;  %v11904_v49 = vrot.slane %v11888_v1, 1  ;;  %v6498_v38 = vpack.i.bf16 %v1389_v18, %v1387_v41  ;;  %v1036_v22 = vmul.f32 %v9040_v51, %v11886_v33  ;;  %v11911_v41 = vld [vmem:[#allocation32_spill] sm:$0xff] }
 0x18d   : > { %v9165_v42 = vsel %vm591_vm1, %v11903_v53, %v643_v55  ;;  %v1100_v31 = vmul.f32 %v8970_v0, %v11886_v33  ;;  %v9180_v56 = vmul.f32 %v8998_v19, %v9017_v45  ;;  %v11907_v16 = vpack.i.bf16 %v11905_v25, %v11906_v37 }
 0x18e   : > { %v9172_v23 = vsel %vm591_vm1, %v643_v55, %v11904_v49  ;;  %v2700_v59 = vshrl.u32 %v2646_v36, 16  ;;  %v2703_v35 = vshll.u32 %v2646_v36, 16  ;;  %v11908_v55 = vrot.slane %v8441_v7, 1 }
 0x18f   : > { %6504 = vrot.lane.b32.xlu0 %v11907_v16, %s7272_s30  ;;  %v11909_v21 = vrot.slane %v8838_v43, 2  ;;  %v1819_v19 = vsel %vm1338_vm3, %v1816_v39, %v1818_v63  ;;  %v1197_v33 = vsel %vm591_vm1, %v1194_v5, %v1196_v10  ;;  %v11633_v2 = vrot.slane %v9155_v15, 2 }
 0x190   : > { %v1195_v13 = vsel %vm591_vm1, %v11908_v55, %v1194_v5  ;;  %6499 = vrot.lane.b32.xlu1 %v6498_v38, %s7273_s11  ;;  %v2702_v40 = vrot.slane %v2700_v59, 3  ;;  %v2705_v7 = vrot.slane %v2703_v35, 4  ;;  %v1198_v17 = vrot.slane %v9020_v34, 1  ;;  %v11910_v5 = vld [vmem:[#allocation31_spill] sm:$0xff] }
 0x191   : > { %v1817_v0 = vsel %vm1338_vm3, %v11909_v21, %v1816_v39  ;;  %v11636_v18 = vrot.slane %v9197_v20, 1  ;;  %v1820_v3 = vrot.slane %v1036_v22, 2  ;;  %v2250_v43 = vrot.slane %v1100_v31, 2  ;;  %v6230_v21 = vpop.permute.xlu1 %6229 }
 0x192   : > { %v2252_v24 = vrot.slane %v9180_v56, 2  ;;  %v9206_v39 = vmul.f32 %v9165_v42, %v9017_v45  ;;  %v11635_v36 = vrot.slane %v11910_v5, 1  ;;  %v647_v53 = vrot.slane %v11911_v41, 1 }
 0x193   : > { %6514 = vrot.lane.b32.xlu0 %v9086_v8, %s7271_s29  ;;  %v9212_v49 = vor.u32 %v2705_v7, %v2702_v40  ;;  %v9216_v38 = vmul.f32 %v9172_v23, %v9020_v34  ;;  %v11912_v22 = vpack.i.bf16 %v9007_v46, %v11894_v26  ;;  %v6523_v31 = vpack.i.bf16 %v1819_v19, %v1817_v0 }
 0x194   : > { %v9222_v25 = vpack.i.bf16 %v1197_v33, %v1195_v13  ;;  %v1823_v37 = vsel %vm1338_vm3, %v1820_v3, %v11633_v2  ;;  %v9229_v8 = vmul.f32 %v9040_v51, %v9020_v34  ;;  %v1199_v59 = vsel %vm591_vm1, %v1196_v10, %v1198_v17 }
 0x195   : > { %6509 = vrot.lane.b32.xlu1 %v11912_v22, %s7272_s30  ;;  %v2707_v16 = vsel %vm2672_vm12, %v9003_v44, %v9212_v49  ;;  %v1201_v46 = vsel %vm591_vm1, %v1198_v17, %v11636_v18  ;;  %v9240_v26 = vmul.f32 %v9055_v29, %v9197_v20  ;;  %v6172_v35 = vunpack.i.h.bf16 %v8954_v28 }
 0x196   : > { %v6171_v55 = vunpack.i.l.bf16 %v8954_v28  ;;  %5792 = vmatprep.mubr.msk.bf16.mxu0 %vm2840_vm13, %v2707_v16  ;;  %v11913_v51 = vrot.slane %v8991_v12, 2  ;;  %v9253_v10 = vsel %vm1338_vm3, %v2250_v43, %v2252_v24  ;;  %v6182_v13 = vunpack.i.h.bf16 %v9010_v14 }
 0x197   : > { %v6181_v29 = vunpack.i.l.bf16 %v9010_v14  ;;  %6524 = vrot.lane.b32.xlu0 %v6523_v31, %s7274_s12  ;;  %v1821_v28 = vsel %vm1338_vm3, %v1818_v63, %v1820_v3  ;;  %v6191_v0 = vunpack.i.l.bf16 %v9069_v48  ;;  %v9262_v19 = vpack.i.bf16 %v1201_v46, %v1199_v59  ;;  %v11914_v63 = vld [vmem:[#allocation58_spill] sm:$0xff] }
 0x198   : > { %v9248_v44 = vsel %vm1338_vm3, %v11913_v51, %v2250_v43  ;;  %v6528_v12 = vpack.i.bf16 %v1823_v37, %v1821_v28  ;;  %v2254_v33 = vrot.slane %v9229_v8, 2  ;;  %v6192_v40 = vunpack.i.h.bf16 %v9069_v48  ;;  %v11915_v43 = vld [vmem:[#allocation57_spill] sm:$0xff]  ;;  %v9276_v8 = vpop.permute.xlu0 %831  ;;  %v9282_v51 = vpop.permute.xlu1 %827 }
 0x199   : > { %6519 = vrot.lane.b32.xlu1 %v9222_v25, %s7271_s29  ;;  %v6201_v7 = vunpack.i.l.bf16 %v9119_v32  ;;  %v6553_v14 = vpack.i.bf16 %v9253_v10, %v9248_v44  ;;  %v11632_v17 = vrot.slane %v9240_v26, 2  ;;  %v2381_v3 = vsel %vm2371_vm5, %v11914_v63, %v6172_v35  ;;  %11916 = vst [vmem:[#allocation71_spill] sm:$0xff] %v9276_v8  ;;  %11917 = vst [vmem:[#allocation82_spill] sm:$0xff] %v9282_v51  ;;  %v11918_v35 = vld [vmem:[#allocation96_spill] sm:$0xff]  ;;  %v11919_v44 = vld [vmem:[#allocation95_spill] sm:$0xff] }
 0x19a   : > { %v2380_v22 = vsel %vm2371_vm5, %v11915_v43, %v6171_v55  ;;  %v6202_v31 = vunpack.i.h.bf16 %v9119_v32  ;;  %v6211_v37 = vunpack.i.l.bf16 %v9140_v61  ;;  %v2415_v16 = vsel %vm2405_vm6, %v2381_v3, %v6182_v13 }
 0x19b   : > { %v2414_v48 = vsel %vm2405_vm6, %v2380_v22, %v6181_v29  ;;  %v6212_v59 = vunpack.i.h.bf16 %v9140_v61  ;;  %v903_v46 = vrot.slane %v9276_v8, 7  ;;  %v11920_v55 = vpack.i.bf16 %v11918_v35, %v11919_v44 }
 0x19c   : > { %v2448_v32 = vsel %vm2439_vm7, %v2414_v48, %v6191_v0  ;;  %v6222_v10 = vunpack.i.h.bf16 %v9199_v27  ;;  %v6221_v28 = vunpack.i.l.bf16 %v9199_v27  ;;  %v901_v13 = vrot.slane %v9282_v51, 7 }
 0x19d   : > { %6534 = vrot.lane.b32.xlu0 %v11920_v55, %s7275_s15  ;;  %6529 = vrot.lane.b32.xlu1 %v6528_v12, %s7274_s12  ;;  %v2449_v61 = vsel %vm2439_vm7, %v2415_v16, %v6192_v40  ;;  %v2482_v29 = vsel %vm2473_vm8, %v2448_v32, %v6201_v7  ;;  %v6232_v63 = vunpack.i.h.bf16 %v6230_v21  ;;  %v6231_v3 = vunpack.i.l.bf16 %v6230_v21  ;;  %v9305_v12 = vpop.permute.xlu0 %835  ;;  %v6240_v21 = vpop.permute.xlu1 %6239 }
 0x19e   : > { %v2483_v43 = vsel %vm2473_vm8, %v2449_v61, %v6202_v31  ;;  %v2516_v22 = vsel %vm2507_vm9, %v2482_v29, %v6211_v37  ;;  %v11921_v0 = vrot.slane %v8520_v58, 7  ;;  %v9303_v48 = vsel %vm849_vm2, %v901_v13, %v903_v46  ;;  %11922 = vst [vmem:[#allocation73_spill] sm:$0xff] %v9305_v12  ;;  %v7184_v31 = vld [vmem:[%s7535_s24 + $0xe0] sm:$0xff] }
 0x19f   : > { %v2517_v40 = vsel %vm2507_vm9, %v2483_v43, %v6212_v59  ;;  %v905_v7 = vrot.slane %v9305_v12, 7  ;;  %v9315_v16 = vmul.f32 %v9303_v48, %v9017_v45  ;;  %v2550_v35 = vsel %vm2541_vm10, %v2516_v22, %v6221_v28 }
 0x1a0   : > { %v9300_v27 = vsel %vm849_vm2, %v11921_v0, %v901_v13  ;;  %v2551_v44 = vsel %vm2541_vm10, %v2517_v40, %v6222_v10  ;;  %v6242_v55 = vunpack.i.h.bf16 %v6240_v21  ;;  %v6241_v32 = vunpack.i.l.bf16 %v6240_v21  ;;  %v9324_v13 = vld [vmem:[%s7535_s24 + $0x100] sm:$0xff] }
 0x1a1   : > { %6544 = vrot.lane.b32.xlu0 %v9222_v25, %s7276_s16  ;;  %v972_v37 = vmul.f32 %v7184_v31, %v9300_v27  ;;  %v11923_v59 = vpack.i.bf16 %v9049_v52, %v9045_v60  ;;  %v2584_v61 = vsel %vm2575_vm11, %v2550_v35, %v6231_v3  ;;  %v2585_v29 = vsel %vm2575_vm11, %v2551_v44, %v6232_v63  ;;  %v9336_v22 = vpop.permute.xlu0 %6244  ;;  %v9339_v3 = vpop.permute.xlu1 %839 }
 0x1a2   : > { %v9329_v45 = vsel %vm849_vm2, %v903_v46, %v905_v7  ;;  %v2257_v10 = vsel %vm1338_vm3, %v2254_v33, %v11632_v17  ;;  %v2618_v28 = vsel %vm2609_vm0, %v2584_v61, %v6241_v32  ;;  %v2619_v43 = vsel %vm2609_vm0, %v2585_v29, %v6242_v55  ;;  %11924 = vst [vmem:[#allocation72_spill] sm:$0xff] %v9339_v3  ;;  %v11927_v17 = vld [vmem:[#allocation33_spill] sm:$0xff] }
 0x1a3   : > { %6539 = vrot.lane.b32.xlu1 %v11923_v59, %s7275_s15  ;;  %v1390_v60 = vrot.slane %v972_v37, 2  ;;  %v1392_v52 = vrot.slane %v9315_v16, 2  ;;  %v2647_v0 = vpack.c.bf16 %v2619_v43, %v2618_v28  ;;  %v9344_v46 = vmul.f32 %v9165_v42, %v9197_v20 }
 0x1a4   : > { %v9348_v63 = vmul.f32 %v9172_v23, %v9324_v13  ;;  %v11631_v40 = vrot.slane %v9339_v3, 7  ;;  %v2255_v21 = vsel %vm1338_vm3, %v2252_v24, %v2254_v33  ;;  %v9368_v37 = vsel %vm591_vm1, %v647_v53, %v11635_v36 }
 0x1a5   : > { %6554 = vrot.lane.b32.xlu0 %v6553_v14, %s7277_s22  ;;  %v11925_v14 = vrot.slane %v11888_v1, 1  ;;  %v6558_v16 = vpack.i.bf16 %v2257_v10, %v2255_v21  ;;  %v2709_v35 = vshrl.u32 %v2647_v0, 16  ;;  %v6583_v56 = vpack.i.bf16 %v9216_v38, %v9206_v39  ;;  %v9379_v44 = vpop.permute.xlu0 %6254  ;;  %v9385_v59 = vpop.permute.xlu1 %6249  ;;  %v9410_v10 = vld [vmem:[%s7535_s24 + $0x110] sm:$0xff]  ;;  %v9416_v21 = vld [vmem:[%s7535_s24 + $0x118] sm:$0xff] }
 0x1a6   : > { %v974_v24 = vmul.f32 %v9329_v45, %v9020_v34  ;;  %v9377_v33 = vsel %vm849_vm2, %v905_v7, %v11631_v40  ;;  %v1393_v55 = vsel %vm1338_vm3, %v1390_v60, %v1392_v52  ;;  %v2712_v32 = vshll.u32 %v2647_v0, 16 }
 0x1a7   : > { %6549 = vrot.lane.b32.xlu1 %v9262_v19, %s7276_s16  ;;  %v9361_v31 = vsel %vm591_vm1, %v11925_v14, %v647_v53  ;;  %v1391_v53 = vsel %vm1338_vm3, %v1388_v62, %v1390_v60  ;;  %v2711_v39 = vrot.slane %v2709_v35, 3  ;;  %v9391_v38 = vmul.f32 %v9377_v33, %v9197_v20  ;;  %v9402_v62 = vld [vmem:[%s7535_s24 + $0x108] sm:$0xff] }
 0x1a8   : > { %v9395_v7 = vmul.f32 %v9361_v31, %v9197_v20  ;;  %v9399_v4 = vmul.f32 %v9368_v37, %v9324_v13  ;;  %v2714_v61 = vrot.slane %v2712_v32, 4  ;;  %v9407_v29 = vrot.slane %v9402_v62, 1 }
 0x1a9   : > { %6564 = vrot.lane.b32.xlu0 %v9222_v25, %s7270_s19  ;;  %v1202_v25 = vrot.slane %v9324_v13, 1  ;;  %v6573_v28 = vpack.i.bf16 %v1393_v55, %v1391_v53  ;;  %v1394_v43 = vrot.slane %v974_v24, 2  ;;  %v11634_v60 = vrot.slane %v9391_v38, 2  ;;  %v9418_v14 = vpop.permute.xlu0 %6264  ;;  %v11926_v24 = vld [vmem:[#allocation34_spill] sm:$0xff]  ;;  %v9431_v40 = vpop.permute.xlu1 %6259 }
 0x1aa   : > { %v1038_v0 = vmul.f32 %v9300_v27, %v9020_v34  ;;  %v9424_v35 = vmul.f32 %v9303_v48, %v9197_v20  ;;  %v1637_v32 = vrot.slane %v9410_v10, 1  ;;  %v9428_v53 = vrot.slane %v9416_v21, 1 }
 0x1ab   : > { %6559 = vrot.lane.b32.xlu1 %v6558_v16, %s7277_s22  ;;  %v9420_v16 = vor.u32 %v2714_v61, %v2711_v39  ;;  %v1397_v34 = vsel %vm1338_vm3, %v1394_v43, %v11634_v60  ;;  %v9439_v39 = vmul.f32 %v9361_v31, %v9402_v62  ;;  %v9443_v61 = vmul.f32 %v9368_v37, %v9410_v10 }
 0x1ac   : > { %v9446_v2 = vrot.slane %v11927_v17, 1  ;;  %v6588_v60 = vpack.i.bf16 %v9399_v4, %v9395_v7  ;;  %v1395_v55 = vsel %vm1338_vm3, %v1392_v52, %v1394_v43  ;;  %v1824_v18 = vrot.slane %v1038_v0, 2 }
 0x1ad   : > { %6574 = vrot.lane.b32.xlu0 %v6573_v28, %s7273_s11  ;;  %v2716_v28 = vsel %vm2672_vm12, %v9212_v49, %v9420_v16  ;;  %v11928_v17 = vrot.slane %v9197_v20, 1  ;;  %v1205_v12 = vsel %vm591_vm1, %v1202_v25, %v9407_v29  ;;  %v9464_v1 = vpop.permute.xlu0 %6274  ;;  %v6578_v49 = vpack.i.bf16 %v1397_v34, %v1395_v55  ;;  %v9471_v52 = vpop.permute.xlu1 %6269 }
 0x1ae   : > { %5793 = vmatmul.mubr.msk.bf16.gmra.mrb[4].mxu0 %vm2840_vm13, %v2716_v28  ;;  %v1826_v7 = vrot.slane %v9424_v35, 2  ;;  %v1638_v4 = vsel %vm591_vm1, %v9407_v29, %v1637_v32  ;;  %v1640_v28 = vsel %vm591_vm1, %v1637_v32, %v9428_v53  ;;  %v9476_v20 = vmul.f32 %v9377_v33, %v9402_v62 }
 0x1af   : > { %6569 = vrot.lane.b32.xlu1 %v9262_v19, %s7270_s19  ;;  %v1203_v41 = vsel %vm591_vm1, %v11928_v17, %v1202_v25  ;;  %v11929_v25 = vrot.slane %v11926_v24, 1  ;;  %v11930_v43 = vrot.slane %v11910_v5, 1  ;;  %v6246_v35 = vunpack.i.l.bf16 %v9336_v22 }
 0x1b0   : > { %v9489_v32 = vpack.i.bf16 %v1205_v12, %v1203_v41  ;;  %v6247_v55 = vunpack.i.h.bf16 %v9336_v22  ;;  %v6256_v34 = vunpack.i.l.bf16 %v9379_v44  ;;  %v11931_v17 = vrot.slane %v9155_v15, 2  ;;  %v11934_v15 = vld [vmem:[#allocation65_spill] sm:$0xff] }
 0x1b1   : > { %6584 = vrot.lane.b32.xlu0 %v6583_v56, %s7272_s30  ;;  %v9485_v0 = vsel %vm591_vm1, %v11930_v43, %v11929_v25  ;;  %v1040_v56 = vmul.f32 %v9329_v45, %v9324_v13  ;;  %v9498_v5 = vpack.i.bf16 %v1640_v28, %v1638_v4  ;;  %v6257_v25 = vunpack.i.h.bf16 %v9379_v44  ;;  %v6285_v12 = vpop.permute.xlu0 %6284  ;;  %v9506_v8 = vpop.permute.xlu1 %6279  ;;  %v11932_v4 = vld [vmem:[#allocation59_spill] sm:$0xff] }
 0x1b2   : > { %v1825_v36 = vsel %vm1338_vm3, %v11931_v17, %v1824_v18  ;;  %v6252_v43 = vunpack.i.h.bf16 %v9385_v59  ;;  %v6251_v41 = vunpack.i.l.bf16 %v9385_v59  ;;  %v6267_v9 = vunpack.i.h.bf16 %v9418_v14  ;;  %v11933_v17 = vld [vmem:[#allocation62_spill] sm:$0xff] }
 0x1b3   : > { %6579 = vrot.lane.b32.xlu1 %v6578_v49, %s7273_s11  ;;  %v1827_v49 = vsel %vm1338_vm3, %v1824_v18, %v1826_v7  ;;  %v6266_v22 = vunpack.i.l.bf16 %v9418_v14  ;;  %v1104_v44 = vmul.f32 %v9300_v27, %v9324_v13  ;;  %v2382_v59 = vsel %vm2371_vm5, %v11932_v4, %v6246_v35  ;;  %v11935_v4 = vld [vmem:[#allocation63_spill] sm:$0xff] }
 0x1b4   : > { %v6261_v28 = vunpack.i.l.bf16 %v9431_v40  ;;  %v1828_v18 = vrot.slane %v1040_v56, 2  ;;  %v2383_v14 = vsel %vm2371_vm5, %v11933_v17, %v6247_v55  ;;  %v2416_v54 = vsel %vm2405_vm6, %v2382_v59, %v6256_v34 }
 0x1b5   : > { %6594 = vrot.lane.b32.xlu0 %v9262_v19, %s7271_s29  ;;  %v6603_v58 = vpack.i.bf16 %v1827_v49, %v1825_v36  ;;  %v9522_v19 = vmul.f32 %v9303_v48, %v9402_v62  ;;  %v2417_v27 = vsel %vm2405_vm6, %v2383_v14, %v6257_v25  ;;  %v2385_v35 = vsel %vm2371_vm5, %v11934_v15, %v6252_v43  ;;  %v6295_v56 = vpop.permute.xlu0 %6294  ;;  %v9532_v36 = vpop.permute.xlu1 %6289 }
 0x1b6   : > { %v2384_v51 = vsel %vm2371_vm5, %v11935_v4, %v6251_v41  ;;  %v2450_v55 = vsel %vm2439_vm7, %v2416_v54, %v6266_v22  ;;  %v2451_v34 = vsel %vm2439_vm7, %v2417_v27, %v6267_v9  ;;  %v11936_v48 = vrot.slane %v9476_v20, 2 }
 0x1b7   : > { %6589 = vrot.lane.b32.xlu1 %v6588_v60, %s7272_s30  ;;  %v6262_v60 = vunpack.i.h.bf16 %v9431_v40  ;;  %v2258_v49 = vrot.slane %v1104_v44, 2  ;;  %v2418_v43 = vsel %vm2405_vm6, %v2384_v51, %v6261_v28  ;;  %v6276_v41 = vunpack.i.l.bf16 %v9464_v1 }
 0x1b8   : > { %v1831_v25 = vsel %vm1338_vm3, %v1828_v18, %v11936_v48  ;;  %v1829_v54 = vsel %vm1338_vm3, %v1826_v7, %v1828_v18  ;;  %v9545_v9 = vmul.f32 %v9377_v33, %v9416_v21  ;;  %v6271_v40 = vunpack.i.l.bf16 %v9471_v52 }
 0x1b9   : > { %6604 = vrot.lane.b32.xlu0 %v6603_v58, %s7274_s12  ;;  %v6277_v58 = vunpack.i.h.bf16 %v9464_v1  ;;  %v2260_v22 = vrot.slane %v9522_v19, 2  ;;  %v1106_v51 = vmul.f32 %v9329_v45, %v9410_v10  ;;  %v2419_v15 = vsel %vm2405_vm6, %v2385_v35, %v6262_v60  ;;  %v6305_v28 = vpop.permute.xlu0 %6304  ;;  %v9554_v14 = vpop.permute.xlu1 %6299 }
 0x1ba   : > { %v6287_v44 = vunpack.i.h.bf16 %v6285_v12  ;;  %v6286_v59 = vunpack.i.l.bf16 %v6285_v12  ;;  %v6608_v17 = vpack.i.bf16 %v1831_v25, %v1829_v54  ;;  %v6272_v7 = vunpack.i.h.bf16 %v9471_v52 }
 0x1bb   : > { %6599 = vrot.lane.b32.xlu1 %v9489_v32, %s7271_s29  ;;  %v6297_v18 = vunpack.i.h.bf16 %v6295_v56  ;;  %v6296_v33 = vunpack.i.l.bf16 %v6295_v56  ;;  %v11937_v1 = vpack.i.bf16 %v9348_v63, %v9344_v46  ;;  %v11938_v19 = vrot.slane %v9240_v26, 2 }
 0x1bc   : > { %v2484_v27 = vsel %vm2473_vm8, %v2450_v55, %v6276_v41  ;;  %v6307_v12 = vunpack.i.h.bf16 %v6305_v28  ;;  %v6306_v35 = vunpack.i.l.bf16 %v6305_v28  ;;  %v2264_v52 = vrot.slane %v9545_v9, 2 }
 0x1bd   : > { %6614 = vrot.lane.b32.xlu0 %v11937_v1, %s7275_s15  ;;  %v2259_v45 = vsel %vm1338_vm3, %v11938_v19, %v2258_v49  ;;  %v2485_v4 = vsel %vm2473_vm8, %v2451_v34, %v6277_v58  ;;  %v2452_v60 = vsel %vm2439_vm7, %v2418_v43, %v6271_v40  ;;  %v2261_v56 = vsel %vm1338_vm3, %v2258_v49, %v2260_v22  ;;  %v6315_v25 = vpop.permute.xlu0 %6314  ;;  %v6310_v58 = vpop.permute.xlu1 %6309 }
 0x1be   : > { %v2262_v46 = vrot.slane %v1106_v51, 2  ;;  %v2518_v63 = vsel %vm2507_vm9, %v2484_v27, %v6286_v59  ;;  %v2519_v26 = vsel %vm2507_vm9, %v2485_v4, %v6287_v44  ;;  %v6282_v48 = vunpack.i.h.bf16 %v9506_v8 }
 0x1bf   : > { %6609 = vrot.lane.b32.xlu1 %v6608_v17, %s7274_s12  ;;  %v6281_v55 = vunpack.i.l.bf16 %v9506_v8  ;;  %v2552_v41 = vsel %vm2541_vm10, %v2518_v63, %v6296_v33  ;;  %v2553_v54 = vsel %vm2541_vm10, %v2519_v26, %v6297_v18  ;;  %v6317_v28 = vunpack.i.h.bf16 %v6315_v25 }
 0x1c0   : > { %v6316_v34 = vunpack.i.l.bf16 %v6315_v25  ;;  %v2586_v49 = vsel %vm2575_vm11, %v2552_v41, %v6306_v35  ;;  %v2587_v43 = vsel %vm2575_vm11, %v2553_v54, %v6307_v12  ;;  %v11939_v40 = vpack.i.bf16 %v9443_v61, %v9439_v39 }
 0x1c1   : > { %6624 = vrot.lane.b32.xlu0 %v9489_v32, %s7276_s16  ;;  %v6633_v8 = vpack.i.bf16 %v2261_v56, %v2259_v45  ;;  %v2265_v51 = vsel %vm1338_vm3, %v2262_v46, %v2264_v52  ;;  %v6292_v44 = vunpack.i.h.bf16 %v9532_v36  ;;  %v6291_v59 = vunpack.i.l.bf16 %v9532_v36  ;;  %v9592_v39 = vpop.permute.xlu0 %847  ;;  %v9600_v36 = vpop.permute.xlu1 %843 }
 0x1c2   : > { %v2620_v17 = vsel %vm2609_vm0, %v2586_v49, %v6316_v34  ;;  %v2621_v18 = vsel %vm2609_vm0, %v2587_v43, %v6317_v28  ;;  %v2453_v33 = vsel %vm2439_vm7, %v2419_v15, %v6272_v7  ;;  %v2486_v1 = vsel %vm2473_vm8, %v2452_v60, %v6281_v55  ;;  %11940 = vst [vmem:[#allocation74_spill] sm:$0xff] %v9592_v39 }
 0x1c3   : > { %6619 = vrot.lane.b32.xlu1 %v11939_v40, %s7275_s15  ;;  %v2648_v19 = vpack.c.bf16 %v2621_v18, %v2620_v17  ;;  %v2263_v61 = vsel %vm1338_vm3, %v2260_v22, %v2262_v46  ;;  %v2487_v45 = vsel %vm2473_vm8, %v2453_v33, %v6282_v48  ;;  %v6301_v27 = vunpack.i.l.bf16 %v9554_v14  ;;  %11941 = vst [vmem:[#allocation70_spill] sm:$0xff] %v9600_v36 }
 0x1c4   : > { %v9598_v12 = vrot.slane %v9592_v39, 7  ;;  %v6638_v35 = vpack.i.bf16 %v2265_v51, %v2263_v61  ;;  %v6302_v15 = vunpack.i.h.bf16 %v9554_v14  ;;  %v909_v7 = vrot.slane %v9600_v36, 7 }
 0x1c5   : > { %6634 = vrot.lane.b32.xlu0 %v6633_v8, %s7277_s22  ;;  %v2718_v22 = vshrl.u32 %v2648_v19, 16  ;;  %v2721_v4 = vshll.u32 %v2648_v19, 16  ;;  %v2520_v60 = vsel %vm2507_vm9, %v2486_v1, %v6291_v59  ;;  %v2521_v56 = vsel %vm2507_vm9, %v2487_v45, %v6292_v44  ;;  %v9618_v55 = vpop.permute.xlu0 %6324  ;;  %v6320_v28 = vpop.permute.xlu1 %6319 }
 0x1c6   : > { %v6312_v46 = vunpack.i.h.bf16 %v6310_v58  ;;  %v6311_v63 = vunpack.i.l.bf16 %v6310_v58  ;;  %v11942_v26 = vrot.slane %v9339_v3, 7  ;;  %v9616_v14 = vsel %vm849_vm2, %v909_v7, %v9598_v12 }
 0x1c7   : > { %6629 = vrot.lane.b32.xlu1 %v9498_v5, %s7276_s16  ;;  %v2720_v25 = vrot.slane %v2718_v22, 3  ;;  %v2723_v41 = vrot.slane %v2721_v4, 4  ;;  %v2554_v54 = vsel %vm2541_vm10, %v2520_v60, %v6301_v27  ;;  %v977_v58 = vmul.f32 %v9616_v14, %v9402_v62 }
 0x1c8   : > { %v9612_v48 = vsel %vm849_vm2, %v11942_v26, %v909_v7  ;;  %v978_v49 = vmul.f32 %v9598_v12, %v9410_v10  ;;  %v2555_v43 = vsel %vm2541_vm10, %v2521_v56, %v6302_v15  ;;  %v6322_v40 = vunpack.i.h.bf16 %v6320_v28 }
 0x1c9   : > { %6644 = vrot.lane.b32.xlu0 %v9489_v32, %s7270_s19  ;;  %v976_v34 = vmul.f32 %v9612_v48, %v9324_v13  ;;  %v6321_v8 = vunpack.i.l.bf16 %v6320_v28  ;;  %v2724_v51 = vor.u32 %v2723_v41, %v2720_v25  ;;  %v2588_v44 = vsel %vm2575_vm11, %v2554_v54, %v6311_v63  ;;  %v9635_v33 = vpop.permute.xlu0 %6334  ;;  %v9645_v27 = vpop.permute.xlu1 %6329  ;;  %v462_v54 = vld [vmem:[%s7535_s24 + $0x130] sm:$0xff]  ;;  %v7186_v28 = vld [vmem:[%s7535_s24 + $0x80] sm:$0xff] }
 0x1ca   : > { %v2589_v32 = vsel %vm2575_vm11, %v2555_v43, %v6312_v46  ;;  %v1400_v17 = vrot.slane %v977_v58, 2  ;;  %v11943_v19 = vrot.slane %v11926_v24, 1  ;;  %v1402_v7 = vrot.slane %v978_v49, 2  ;;  %v11945_v46 = vld [vmem:[#allocation64_spill] sm:$0xff] }
 0x1cb   : > { %6639 = vrot.lane.b32.xlu1 %v6638_v35, %s7277_s22  ;;  %v1398_v59 = vrot.slane %v976_v34, 2  ;;  %v2622_v13 = vsel %vm2609_vm0, %v2588_v44, %v6321_v8  ;;  %v2623_v18 = vsel %vm2609_vm0, %v2589_v32, %v6322_v40  ;;  %v2725_v1 = vsel %vm2672_vm12, %v9420_v16, %v2724_v51  ;;  %v11946_v34 = vld [vmem:[#allocation66_spill] sm:$0xff]  ;;  %v7187_v49 = vld [vmem:[%s7535_s24 + $0x88] sm:$0xff] }
 0x1cc   : > { %v9643_v61 = vsel %vm591_vm1, %v11943_v19, %v9446_v2  ;;  %v2649_v45 = vpack.c.bf16 %v2623_v18, %v2622_v13  ;;  %5796 = vmatprep.mubr.msk.bf16.mxu0 %vm2840_vm13, %v2725_v1  ;;  %v11944_v35 = vrot.slane %v9391_v38, 2  ;;  %v1009_v4 = vmul.f32 %v9485_v0, %v9402_v62  ;;  %v7185_v38 = vld [vmem:[%s7535_s24 + $0x78] sm:$0xff]  ;;  %v460_v62 = vld [vmem:[%s7535_s24 + $0x120] sm:$0xff]  ;;  %v11947_v43 = vld [vmem:[#allocation68_spill] sm:$0xff] }
 0x1cd   : > { %v1401_v16 = vsel %vm1338_vm3, %v1398_v59, %v1400_v17  ;;  %v1010_v60 = vmul.f32 %v9643_v61, %v9410_v10  ;;  %v702_v63 = vmul.f32 %v7185_v38, %v11945_v46  ;;  %v9660_v26 = vpop.permute.xlu0 %6344  ;;  %v9666_v41 = vmul.f32 %v9616_v14, %v9416_v21  ;;  %v9677_v8 = vpop.permute.xlu1 %6339  ;;  %v9681_v32 = vld [vmem:[%s7535_s24 + $0x128] sm:$0xff]  ;;  %v11948_v13 = vld [vmem:[#allocation69_spill] sm:$0xff] }
 0x1ce   : > { %v1399_v15 = vsel %vm1338_vm3, %v11944_v35, %v1398_v59  ;;  %v2727_v56 = vshrl.u32 %v2649_v45, 16  ;;  %v2730_v25 = vshll.u32 %v2649_v45, 16  ;;  %v703_v58 = vmul.f32 %v7186_v28, %v11946_v34  ;;  %v7188_v59 = vld [vmem:[%s7535_s24 + $0x90] sm:$0xff] }
 0x1cf   : > { %1270 = vrot.lane.b32.xlu1 %v9407_v29, %s7270_s19  ;;  %v6648_v22 = vpack.i.bf16 %v1401_v16, %v1399_v15  ;;  %v1042_v29 = vmul.f32 %v9612_v48, %v9410_v10  ;;  %v9674_v40 = vmul.f32 %v7187_v49, %v11947_v43  ;;  %v1403_v44 = vsel %vm1338_vm3, %v1400_v17, %v1402_v7 }
 0x1d0   : > { %v2729_v10 = vrot.slane %v2727_v56, 3  ;;  %v705_v18 = vmul.f32 %v7188_v59, %v11948_v13  ;;  %v2732_v1 = vrot.slane %v2730_v25, 4  ;;  %v2073_v19 = vrot.slane %v9681_v32, 1 }
 0x1d1   : > { %6649 = vrot.lane.b32.xlu0 %v6648_v22, %s7273_s11  ;;  %v2071_v45 = vrot.slane %v460_v62, 1  ;;  %v6653_v35 = vpack.i.bf16 %v1010_v60, %v1009_v4  ;;  %v9689_v15 = vmul.f32 %v9485_v0, %v9416_v21  ;;  %v9692_v16 = vmul.f32 %v9643_v61, %v460_v62  ;;  %v9695_v7 = vpop.permute.xlu0 %6354  ;;  %v6350_v25 = vpop.permute.xlu1 %6349 }
 0x1d2   : > { %v1110_v17 = vmul.f32 %v9598_v12, %v462_v54  ;;  %v1011_v22 = vmul.f32 %v9446_v2, %v9416_v21  ;;  %v9699_v56 = vor.u32 %v2732_v1, %v2729_v10  ;;  %v1832_v38 = vrot.slane %v1042_v29, 2 }
 0x1d3   : > { %1468 = vrot.lane.b32.xlu1 %v1403_v44, %s7273_s11  ;;  %v1834_v46 = vrot.slane %v9666_v41, 2  ;;  %v6327_v4 = vunpack.i.h.bf16 %v9618_v55  ;;  %v6326_v60 = vunpack.i.l.bf16 %v9618_v55  ;;  %v1044_v28 = vmul.f32 %v9598_v12, %v460_v62 }
 0x1d4   : > { %v2734_v54 = vsel %vm2672_vm12, %v2724_v51, %v9699_v56  ;;  %v9711_v21 = vmul.f32 %v9616_v14, %v9681_v32  ;;  %v9715_v29 = vsel %vm591_vm1, %v9428_v53, %v2071_v45  ;;  %v9720_v55 = vsel %vm591_vm1, %v2071_v45, %v2073_v19 }
 0x1d5   : > { %6654 = vrot.lane.b32.xlu0 %v6653_v35, %s7272_s30  ;;  %v6336_v12 = vunpack.i.l.bf16 %v9635_v33  ;;  %5797 = vmatmul.mubr.msk.bf16.gmra.mrb[8].mxu0 %vm2840_vm13, %v2734_v54  ;;  %v6668_v51 = vpack.i.bf16 %v9692_v16, %v9689_v15  ;;  %v1077_v14 = vmul.f32 %v9446_v2, %v9681_v32  ;;  %v2270_v41 = vrot.slane %v1110_v17, 2  ;;  %v6365_v49 = vpop.permute.xlu0 %6364  ;;  %v9738_v45 = vpop.permute.xlu1 %6359 }
 0x1d6   : > { %v6337_v34 = vunpack.i.h.bf16 %v9635_v33  ;;  %v11949_v43 = vrot.slane %v9476_v20, 2  ;;  %v1835_v10 = vsel %vm1338_vm3, %v1832_v38, %v1834_v46  ;;  %v2268_v59 = vrot.slane %v9711_v21, 2 }
 0x1d7   : > { %1600 = vrot.lane.b32.xlu1 %v1011_v22, %s7272_s30  ;;  %v2387_v13 = vsel %vm2371_vm5, %v703_v58, %v6327_v4  ;;  %v2386_v1 = vsel %vm2371_vm5, %v702_v63, %v6326_v60  ;;  %v1836_v35 = vrot.slane %v1044_v28, 2  ;;  %v6673_v33 = vpack.i.bf16 %v9720_v55, %v9715_v29 }
 0x1d8   : > { %v1833_v44 = vsel %vm1338_vm3, %v11949_v43, %v1832_v38  ;;  %v6332_v20 = vunpack.i.h.bf16 %v9645_v27  ;;  %v6331_v15 = vunpack.i.l.bf16 %v9645_v27  ;;  %v6346_v16 = vunpack.i.l.bf16 %v9660_v26 }
 0x1d9   : > { %6659 = vrot.lane.b32.xlu0 %v9498_v5, %s7271_s29  ;;  %v9748_v63 = vsel %vm1338_vm3, %v2268_v59, %v2270_v41  ;;  %v2420_v5 = vsel %vm2405_vm6, %v2386_v1, %v6336_v12  ;;  %v6347_v58 = vunpack.i.h.bf16 %v9660_v26  ;;  %v6663_v17 = vpack.i.bf16 %v1835_v10, %v1833_v44  ;;  %v6375_v28 = vpop.permute.xlu0 %6374  ;;  %v6370_v29 = vpop.permute.xlu1 %6369 }
 0x1da   : > { %v1108_v22 = vmul.f32 %v9612_v48, %v460_v62  ;;  %v2421_v38 = vsel %vm2405_vm6, %v2387_v13, %v6337_v34  ;;  %v6342_v4 = vunpack.i.h.bf16 %v9677_v8  ;;  %v6341_v27 = vunpack.i.l.bf16 %v9677_v8 }
 0x1db   : > { %1705 = vrot.lane.b32.xlu1 %v9428_v53, %s7271_s29  ;;  %v6357_v60 = vunpack.i.h.bf16 %v9695_v7  ;;  %v6356_v53 = vunpack.i.l.bf16 %v9695_v7  ;;  %v6352_v54 = vunpack.i.h.bf16 %v6350_v25  ;;  %v6351_v21 = vunpack.i.l.bf16 %v6350_v25 }
 0x1dc   : > { %v1837_v26 = vsel %vm1338_vm3, %v1834_v46, %v1836_v35  ;;  %v2389_v48 = vsel %vm2371_vm5, %v705_v18, %v6332_v20  ;;  %v2388_v62 = vsel %vm2371_vm5, %v9674_v40, %v6331_v15  ;;  %v2454_v55 = vsel %vm2439_vm7, %v2420_v5, %v6346_v16 }
 0x1dd   : > { %6664 = vrot.lane.b32.xlu0 %v6663_v17, %s7274_s12  ;;  %v6366_v8 = vunpack.i.l.bf16 %v6365_v49  ;;  %v2455_v12 = vsel %vm2439_vm7, %v2421_v38, %v6347_v58  ;;  %v6367_v7 = vunpack.i.h.bf16 %v6365_v49  ;;  %v6361_v25 = vunpack.i.l.bf16 %v9738_v45  ;;  %v6385_v44 = vpop.permute.xlu0 %6384  ;;  %v6380_v49 = vpop.permute.xlu1 %6379 }
 0x1de   : > { %v2266_v41 = vrot.slane %v1108_v22, 2  ;;  %v2422_v34 = vsel %vm2405_vm6, %v2388_v62, %v6341_v27  ;;  %v2423_v46 = vsel %vm2405_vm6, %v2389_v48, %v6342_v4  ;;  %v6377_v43 = vunpack.i.h.bf16 %v6375_v28 }
 0x1df   : > { %1902 = vrot.lane.b32.xlu1 %v1837_v26, %s7274_s12  ;;  %v6376_v18 = vunpack.i.l.bf16 %v6375_v28  ;;  %v2488_v40 = vsel %vm2473_vm8, %v2454_v55, %v6356_v53  ;;  %v2489_v10 = vsel %vm2473_vm8, %v2455_v12, %v6357_v60  ;;  %v2456_v13 = vsel %vm2439_vm7, %v2422_v34, %v6351_v21  ;;  %s7278_s12 = smov 96  }
 0x1e0   : > { %v2457_v1 = vsel %vm2439_vm7, %v2423_v46, %v6352_v54  ;;  %v2522_v35 = vsel %vm2507_vm9, %v2488_v40, %v6366_v8  ;;  %v6362_v20 = vunpack.i.h.bf16 %v9738_v45  ;;  %v6387_v15 = vunpack.i.h.bf16 %v6385_v44 }
 0x1e1   : > { %6669 = vrot.lane.b32.xlu0 %v6668_v51, %s7275_s15  ;;  %v6386_v16 = vunpack.i.l.bf16 %v6385_v44  ;;  %v2523_v5 = vsel %vm2507_vm9, %v2489_v10, %v6367_v7  ;;  %v2490_v58 = vsel %vm2473_vm8, %v2456_v13, %v6361_v25  ;;  %v2267_v17 = vsel %vm1338_vm3, %v2264_v52, %v2266_v41  ;;  %v6395_v27 = vpop.permute.xlu0 %6394  ;;  %v6390_v54 = vpop.permute.xlu1 %6389 }
 0x1e2   : > { %v2269_v22 = vsel %vm1338_vm3, %v2266_v41, %v2268_v59  ;;  %v2556_v51 = vsel %vm2541_vm10, %v2522_v35, %v6376_v18  ;;  %v2557_v38 = vsel %vm2541_vm10, %v2523_v5, %v6377_v43  ;;  %v6372_v4 = vunpack.i.h.bf16 %v6370_v29 }
 0x1e3   : > { %2034 = vrot.lane.b32.xlu1 %v1077_v14, %s7275_s15  ;;  %v6371_v45 = vunpack.i.l.bf16 %v6370_v29  ;;  %v6382_v60 = vunpack.i.h.bf16 %v6380_v49  ;;  %v6381_v28 = vunpack.i.l.bf16 %v6380_v49  ;;  %v6397_v14 = vunpack.i.h.bf16 %v6395_v27 }
 0x1e4   : > { %v6396_v53 = vunpack.i.l.bf16 %v6395_v27  ;;  %v2491_v9 = vsel %vm2473_vm8, %v2457_v1, %v6362_v20  ;;  %v2590_v52 = vsel %vm2575_vm11, %v2556_v51, %v6386_v16  ;;  %v2591_v59 = vsel %vm2575_vm11, %v2557_v38, %v6387_v15 }
 0x1e5   : > { %6674 = vrot.lane.b32.xlu0 %v6673_v33, %s7276_s16  ;;  %v6678_v21 = vpack.i.bf16 %v2269_v22, %v2267_v17  ;;  %v2625_v26 = vsel %vm2609_vm0, %v2591_v59, %v6397_v14  ;;  %v6392_v48 = vunpack.i.h.bf16 %v6390_v54  ;;  %v6391_v33 = vunpack.i.l.bf16 %v6390_v54  ;;  %v6405_v12 = vpop.permute.xlu0 %6404  ;;  %v6400_v32 = vpop.permute.xlu1 %6399 }
 0x1e6   : > { %v2624_v29 = vsel %vm2609_vm0, %v2590_v52, %v6396_v53  ;;  %v2524_v62 = vsel %vm2507_vm9, %v2490_v58, %v6371_v45  ;;  %v2525_v55 = vsel %vm2507_vm9, %v2491_v9, %v6372_v4  ;;  %v6401_v41 = vunpack.i.l.bf16 %v6400_v32  ;;  %v11950_v53 = vld [vmem:[#allocation75_spill] sm:$0xff]  ;;  %v11951_v52 = vld [vmem:[#allocation76_spill] sm:$0xff] }
 0x1e7   : > { %2139 = vrot.lane.b32.xlu1 %v2073_v19, %s7276_s16  ;;  %v2650_v8 = vpack.c.bf16 %v2625_v26, %v2624_v29  ;;  %v2558_v7 = vsel %vm2541_vm10, %v2524_v62, %v6381_v28  ;;  %v2559_v25 = vsel %vm2541_vm10, %v2525_v55, %v6382_v60  ;;  %v6402_v19 = vunpack.i.h.bf16 %v6400_v32  ;;  %v7190_v9 = vld [vmem:[%s7535_s24 + $0xa0] sm:$0xff]  ;;  %v7191_v62 = vld [vmem:[%s7535_s24 + $0xa8] sm:$0xff]  ;;  %s7279_s16 = smov 64  }
 0x1e8   : > { %v2592_v43 = vsel %vm2575_vm11, %v2558_v7, %v6391_v33  ;;  %v2593_v18 = vsel %vm2575_vm11, %v2559_v25, %v6392_v48  ;;  %v6407_v60 = vunpack.i.h.bf16 %v6405_v12  ;;  %v6406_v28 = vunpack.i.l.bf16 %v6405_v12  ;;  %v11952_v55 = vld [vmem:[#allocation83_spill] sm:$0xff]  ;;  %v7192_v7 = vld [vmem:[%s7535_s24 + $0xb0] sm:$0xff]  ;;  %v11953_v25 = vld [vmem:[#allocation84_spill] sm:$0xff] }
 0x1e9   : > { %6679 = vrot.lane.b32.xlu0 %v6678_v21, %s7277_s22  ;;  %v2736_v34 = vshrl.u32 %v2650_v8, 16  ;;  %v2739_v46 = vshll.u32 %v2650_v8, 16  ;;  %v2626_v44 = vsel %vm2609_vm0, %v2592_v43, %v6401_v41  ;;  %v2627_v40 = vsel %vm2609_vm0, %v2593_v18, %v6402_v19  ;;  %v6415_v10 = vpop.permute.xlu0 %6414  ;;  %v6410_v35 = vpop.permute.xlu1 %6409 }
 0x1ea   : > { %v2651_v49 = vpack.c.bf16 %v2627_v40, %v2626_v44  ;;  %v707_v59 = vmul.f32 %v7190_v9, %v11951_v52  ;;  %v6417_v29 = vunpack.i.h.bf16 %v6415_v10  ;;  %v6416_v26 = vunpack.i.l.bf16 %v6415_v10 }
 0x1eb   : > { %v2738_v13 = vrot.slane %v2736_v34, 3  ;;  %v2741_v1 = vrot.slane %v2739_v46, 4  ;;  %v6412_v48 = vunpack.i.h.bf16 %v6410_v35  ;;  %v6411_v33 = vunpack.i.l.bf16 %v6410_v35 }
 0x1ec   : > { %v2745_v15 = vshrl.u32 %v2651_v49, 16  ;;  %v2748_v16 = vshll.u32 %v2651_v49, 16  ;;  %v708_v8 = vmul.f32 %v7191_v62, %v11952_v55  ;;  %v709_v32 = vmul.f32 %v7192_v7, %v11953_v25 }
 0x1ed   : > { %v2742_v20 = vor.u32 %v2741_v1, %v2738_v13  ;;  %v6425_v5 = vpop.permute.xlu0 %6424  ;;  %v6420_v17 = vpop.permute.xlu1 %6419  ;;  %v2391_v12 = vsel %vm2371_vm5, %v707_v59, %v6407_v60 }
 0x1ee   : > { %v2747_v22 = vrot.slane %v2745_v15, 3  ;;  %v2750_v51 = vrot.slane %v2748_v16, 4  ;;  %v6427_v41 = vunpack.i.h.bf16 %v6425_v5  ;;  %v6426_v34 = vunpack.i.l.bf16 %v6425_v5 }
 0x1ef   : > { %v2743_v58 = vsel %vm2672_vm12, %v9699_v56, %v2742_v20  ;;  %v7189_v56 = vld [vmem:[%s7535_s24 + $0x98] sm:$0xff]  ;;  %v6422_v43 = vunpack.i.h.bf16 %v6420_v17  ;;  %v6421_v18 = vunpack.i.l.bf16 %v6420_v17  ;;  %v2425_v1 = vsel %vm2405_vm6, %v2391_v12, %v6417_v29 }
 0x1f0   : > { %5800 = vmatprep.mubr.msk.bf16.mxu0 %vm2840_vm13, %v2743_v58  ;;  %v9806_v38 = vor.u32 %v2750_v51, %v2747_v22  ;;  %v706_v54 = vmul.f32 %v7189_v56, %v11950_v53  ;;  %v2393_v49 = vsel %vm2371_vm5, %v709_v32, %v6412_v48  ;;  %v2392_v35 = vsel %vm2371_vm5, %v708_v8, %v6411_v33 }
 0x1f1   : > { %v6435_v4 = vpop.permute.xlu0 %6434  ;;  %v6430_v45 = vpop.permute.xlu1 %6429  ;;  %v2459_v22 = vsel %vm2439_vm7, %v2425_v1, %v6427_v41  ;;  %v2427_v60 = vsel %vm2405_vm6, %v2393_v49, %v6422_v43 }
 0x1f2   : > { %v2752_v27 = vsel %vm2672_vm12, %v2742_v20, %v9806_v38  ;;  %v2390_v19 = vsel %vm2371_vm5, %v706_v54, %v6406_v28  ;;  %v6437_v44 = vunpack.i.h.bf16 %v6435_v4  ;;  %v6436_v40 = vunpack.i.l.bf16 %v6435_v4 }
 0x1f3   : > { %5801 = vmatmul.mubr.msk.bf16.gmra.mrb[12].mxu0 %vm2840_vm13, %v2752_v27  ;;  %v2424_v13 = vsel %vm2405_vm6, %v2390_v19, %v6416_v26  ;;  %v6432_v20 = vunpack.i.h.bf16 %v6430_v45  ;;  %v6431_v15 = vunpack.i.l.bf16 %v6430_v45  ;;  %v2426_v27 = vsel %vm2405_vm6, %v2392_v35, %v6421_v18 }
 0x1f4   : > { %v2458_v5 = vsel %vm2439_vm7, %v2424_v13, %v6426_v34  ;;  %v2493_v56 = vsel %vm2473_vm8, %v2459_v22, %v6437_v44 }
 0x1f5   : > { %v6445_v14 = vpop.permute.xlu0 %6444  ;;  %v6440_v21 = vpop.permute.xlu1 %6439  ;;  %v2492_v28 = vsel %vm2473_vm8, %v2458_v5, %v6436_v40  ;;  %v2460_v52 = vsel %vm2439_vm7, %v2426_v27, %v6431_v15  ;;  %v2461_v59 = vsel %vm2439_vm7, %v2427_v60, %v6432_v20 }
 0x1f6   : > { %v6447_v16 = vunpack.i.h.bf16 %v6445_v14  ;;  %v6446_v58 = vunpack.i.l.bf16 %v6445_v14  ;;  %v6442_v54 = vunpack.i.h.bf16 %v6440_v21  ;;  %v6441_v45 = vunpack.i.l.bf16 %v6440_v21 }
 0x1f8   : > { %v2526_v29 = vsel %vm2507_vm9, %v2492_v28, %v6446_v58  ;;  %v2527_v26 = vsel %vm2507_vm9, %v2493_v56, %v6447_v16  ;;  %v2494_v19 = vsel %vm2473_vm8, %v2460_v52, %v6441_v45  ;;  %v2495_v41 = vsel %vm2473_vm8, %v2461_v59, %v6442_v54 }
 0x1f9   : > { %v6455_v46 = vpop.permute.xlu0 %6454  ;;  %v6450_v10 = vpop.permute.xlu1 %6449 }
 0x1fa   : > { %v6457_v17 = vunpack.i.h.bf16 %v6455_v46  ;;  %v6456_v51 = vunpack.i.l.bf16 %v6455_v46  ;;  %v6452_v62 = vunpack.i.h.bf16 %v6450_v10  ;;  %v6451_v55 = vunpack.i.l.bf16 %v6450_v10 }
 0x1fc   : > { %v2560_v48 = vsel %vm2541_vm10, %v2526_v29, %v6456_v51  ;;  %v2561_v33 = vsel %vm2541_vm10, %v2527_v26, %v6457_v17  ;;  %v2528_v10 = vsel %vm2507_vm9, %v2494_v19, %v6451_v55  ;;  %v2529_v13 = vsel %vm2507_vm9, %v2495_v41, %v6452_v62  ;;  %v7194_v19 = vld [vmem:[%s7535_s24 + $0xc0] sm:$0xff]  ;;  %v11955_v41 = vld [vmem:[#allocation89_spill] sm:$0xff] }
 0x1fd   : > { %v6465_v4 = vpop.permute.xlu0 %6464  ;;  %v6460_v53 = vpop.permute.xlu1 %6459 }
 0x1fe   : > { %v6467_v9 = vunpack.i.h.bf16 %v6465_v4  ;;  %v6466_v14 = vunpack.i.l.bf16 %v6465_v4  ;;  %v6462_v7 = vunpack.i.h.bf16 %v6460_v53  ;;  %v6461_v25 = vunpack.i.l.bf16 %v6460_v53 }
 0x200   : > { %v2594_v34 = vsel %vm2575_vm11, %v2560_v48, %v6466_v14  ;;  %v2595_v46 = vsel %vm2575_vm11, %v2561_v33, %v6467_v9  ;;  %v2562_v35 = vsel %vm2541_vm10, %v2528_v10, %v6461_v25  ;;  %v2563_v20 = vsel %vm2541_vm10, %v2529_v13, %v6462_v7  ;;  %v7195_v10 = vld [vmem:[%s7535_s24 + $0xc8] sm:$0xff] }
 0x201   : > { %v6475_v8 = vpop.permute.xlu0 %6474  ;;  %v6470_v12 = vpop.permute.xlu1 %6469  ;;  %v712_v13 = vmul.f32 %v7195_v10, %v11890_v50 }
 0x202   : > { %v6477_v21 = vunpack.i.h.bf16 %v6475_v8  ;;  %v6476_v32 = vunpack.i.l.bf16 %v6475_v8  ;;  %v6472_v44 = vunpack.i.h.bf16 %v6470_v12  ;;  %v6471_v40 = vunpack.i.l.bf16 %v6470_v12 }
 0x204   : > { %v2628_v43 = vsel %vm2609_vm0, %v2594_v34, %v6476_v32  ;;  %v2629_v18 = vsel %vm2609_vm0, %v2595_v46, %v6477_v21  ;;  %v2596_v17 = vsel %vm2575_vm11, %v2562_v35, %v6471_v40  ;;  %v2597_v51 = vsel %vm2575_vm11, %v2563_v20, %v6472_v44  ;;  %v11954_v32 = vld [vmem:[#allocation88_spill] sm:$0xff] }
 0x205   : > { %v2652_v1 = vpack.c.bf16 %v2629_v18, %v2628_v43  ;;  %v6485_v49 = vpop.permute.xlu0 %6484  ;;  %v6480_v15 = vpop.permute.xlu1 %6479  ;;  %v711_v34 = vmul.f32 %v7194_v19, %v11955_v41 }
 0x206   : > { %v6482_v16 = vunpack.i.h.bf16 %v6480_v15  ;;  %v6481_v58 = vunpack.i.l.bf16 %v6480_v15  ;;  %v6487_v7 = vunpack.i.h.bf16 %v6485_v49  ;;  %v6486_v25 = vunpack.i.l.bf16 %v6485_v49 }
 0x207   : > { %v2754_v5 = vshrl.u32 %v2652_v1, 16  ;;  %v2757_v22 = vshll.u32 %v2652_v1, 16  ;;  %v7196_v1 = vld [vmem:[%s7535_s24 + $0xd0] sm:$0xff] }
 0x208   : > { %v2630_v4 = vsel %vm2609_vm0, %v2596_v17, %v6481_v58  ;;  %v2631_v27 = vsel %vm2609_vm0, %v2597_v51, %v6482_v16  ;;  %v713_v35 = vmul.f32 %v7196_v1, %v8559_v57  ;;  %v2395_v49 = vsel %vm2371_vm5, %v711_v34, %v6487_v7 }
 0x209   : > { %v6495_v60 = vpop.permute.xlu0 %6494  ;;  %v2756_v28 = vrot.slane %v2754_v5, 3  ;;  %v2759_v56 = vrot.slane %v2757_v22, 4  ;;  %v2653_v53 = vpack.c.bf16 %v2631_v27, %v2630_v4  ;;  %v6490_v54 = vpop.permute.xlu1 %6489 }
 0x20a   : > { %v6497_v43 = vunpack.i.h.bf16 %v6495_v60  ;;  %v6496_v18 = vunpack.i.l.bf16 %v6495_v60  ;;  %v6492_v44 = vunpack.i.h.bf16 %v6490_v54  ;;  %v6491_v40 = vunpack.i.l.bf16 %v6490_v54 }
 0x20b   : > { %v2760_v45 = vor.u32 %v2759_v56, %v2756_v28  ;;  %v2763_v9 = vshrl.u32 %v2653_v53, 16  ;;  %v2766_v14 = vshll.u32 %v2653_v53, 16 }
 0x20c   : > { %v2429_v60 = vsel %vm2405_vm6, %v2395_v49, %v6497_v43  ;;  %v2397_v50 = vsel %vm2371_vm5, %v713_v35, %v6492_v44  ;;  %v2396_v57 = vsel %vm2371_vm5, %v712_v13, %v6491_v40 }
 0x20d   : > { %v6505_v52 = vpop.permute.xlu0 %6504  ;;  %v2761_v59 = vsel %vm2672_vm12, %v9806_v38, %v2760_v45  ;;  %v6500_v29 = vpop.permute.xlu1 %6499  ;;  %v2765_v26 = vrot.slane %v2763_v9, 3  ;;  %v2768_v48 = vrot.slane %v2766_v14, 4  ;;  %v7193_v38 = vld [vmem:[%s7535_s24 + $0xb8] sm:$0xff] }
 0x20e   : > { %5804 = vmatprep.mubr.msk.bf16.mxu0 %vm2840_vm13, %v2761_v59  ;;  %v710_v12 = vmul.f32 %v7193_v38, %v11954_v32  ;;  %v6507_v15 = vunpack.i.h.bf16 %v6505_v52  ;;  %v6506_v16 = vunpack.i.l.bf16 %v6505_v52  ;;  %v6502_v5 = vunpack.i.h.bf16 %v6500_v29 }
 0x20f   : > { %v9854_v33 = vor.u32 %v2768_v48, %v2765_v26  ;;  %v6501_v22 = vunpack.i.l.bf16 %v6500_v29 }
 0x210   : > { %v2394_v20 = vsel %vm2371_vm5, %v710_v12, %v6486_v25  ;;  %v2463_v9 = vsel %vm2439_vm7, %v2429_v60, %v6507_v15  ;;  %v2431_v26 = vsel %vm2405_vm6, %v2397_v50, %v6502_v5 }
 0x211   : > { %v6515_v62 = vpop.permute.xlu0 %6514  ;;  %v6510_v55 = vpop.permute.xlu1 %6509  ;;  %v2770_v8 = vsel %vm2672_vm12, %v2760_v45, %v9854_v33  ;;  %v2428_v27 = vsel %vm2405_vm6, %v2394_v20, %v6496_v18  ;;  %v2430_v29 = vsel %vm2405_vm6, %v2396_v57, %v6501_v22 }
 0x212   : > { %5805 = vmatmul.mubr.msk.bf16.gmra.mrb[16].mxu0 %vm2840_vm13, %v2770_v8  ;;  %v6517_v17 = vunpack.i.h.bf16 %v6515_v62  ;;  %v6516_v51 = vunpack.i.l.bf16 %v6515_v62  ;;  %v6512_v28 = vunpack.i.h.bf16 %v6510_v55  ;;  %v6511_v56 = vunpack.i.l.bf16 %v6510_v55 }
 0x213   : > { %v2462_v45 = vsel %vm2439_vm7, %v2428_v27, %v6506_v16 }
 0x214   : > { %v2496_v48 = vsel %vm2473_vm8, %v2462_v45, %v6516_v51  ;;  %v2497_v62 = vsel %vm2473_vm8, %v2463_v9, %v6517_v17  ;;  %v2464_v38 = vsel %vm2439_vm7, %v2430_v29, %v6511_v56  ;;  %v2465_v32 = vsel %vm2439_vm7, %v2431_v26, %v6512_v28 }
 0x215   : > { %v6525_v21 = vpop.permute.xlu0 %6524  ;;  %v6520_v46 = vpop.permute.xlu1 %6519 }
 0x216   : > { %v6527_v53 = vunpack.i.h.bf16 %v6525_v21  ;;  %v6526_v54 = vunpack.i.l.bf16 %v6525_v21  ;;  %v6522_v7 = vunpack.i.h.bf16 %v6520_v46  ;;  %v6521_v55 = vunpack.i.l.bf16 %v6520_v46 }
 0x218   : > { %v2530_v12 = vsel %vm2507_vm9, %v2496_v48, %v6526_v54  ;;  %v2531_v19 = vsel %vm2507_vm9, %v2497_v62, %v6527_v53  ;;  %v2498_v35 = vsel %vm2473_vm8, %v2464_v38, %v6521_v55  ;;  %v2499_v49 = vsel %vm2473_vm8, %v2465_v32, %v6522_v7 }
 0x219   : > { %v6535_v58 = vpop.permute.xlu0 %6534  ;;  %v6530_v4 = vpop.permute.xlu1 %6529 }
 0x21a   : > { %v6537_v14 = vunpack.i.h.bf16 %v6535_v58  ;;  %v6536_v52 = vunpack.i.l.bf16 %v6535_v58  ;;  %v6532_v43 = vunpack.i.h.bf16 %v6530_v4  ;;  %v6531_v18 = vunpack.i.l.bf16 %v6530_v4 }
 0x21c   : > { %v2564_v41 = vsel %vm2541_vm10, %v2530_v12, %v6536_v52  ;;  %v2565_v34 = vsel %vm2541_vm10, %v2531_v19, %v6537_v14  ;;  %v2532_v17 = vsel %vm2507_vm9, %v2498_v35, %v6531_v18  ;;  %v2533_v51 = vsel %vm2507_vm9, %v2499_v49, %v6532_v43 }
 0x21d   : > { %v6545_v59 = vpop.permute.xlu0 %6544  ;;  %v6540_v8 = vpop.permute.xlu1 %6539 }
 0x21e   : > { %v6547_v25 = vunpack.i.h.bf16 %v6545_v59  ;;  %v6546_v21 = vunpack.i.l.bf16 %v6545_v59  ;;  %v6542_v40 = vunpack.i.h.bf16 %v6540_v8  ;;  %v6541_v10 = vunpack.i.l.bf16 %v6540_v8 }
 0x220   : > { %v2598_v20 = vsel %vm2575_vm11, %v2564_v41, %v6546_v21  ;;  %v2599_v15 = vsel %vm2575_vm11, %v2565_v34, %v6547_v25  ;;  %v2566_v60 = vsel %vm2541_vm10, %v2532_v17, %v6541_v10  ;;  %v2567_v50 = vsel %vm2541_vm10, %v2533_v51, %v6542_v40 }
 0x221   : > { %v6555_v44 = vpop.permute.xlu0 %6554  ;;  %v6550_v1 = vpop.permute.xlu1 %6549 }
 0x222   : > { %v6557_v46 = vunpack.i.h.bf16 %v6555_v44  ;;  %v6556_v13 = vunpack.i.l.bf16 %v6555_v44  ;;  %v6552_v5 = vunpack.i.h.bf16 %v6550_v1  ;;  %v6551_v22 = vunpack.i.l.bf16 %v6550_v1 }
 0x224   : > { %v2632_v16 = vsel %vm2609_vm0, %v2598_v20, %v6556_v13  ;;  %v2633_v58 = vsel %vm2609_vm0, %v2599_v15, %v6557_v46  ;;  %v2600_v45 = vsel %vm2575_vm11, %v2566_v60, %v6551_v22  ;;  %v2601_v9 = vsel %vm2575_vm11, %v2567_v50, %v6552_v5  ;;  %v7198_v46 = vld [vmem:[%s7535_s24 + $0xe0] sm:$0xff]  ;;  %v7200_v5 = vld [vmem:[%s7535_s24 + $0xf0] sm:$0xff] }
 0x225   : > { %v2654_v4 = vpack.c.bf16 %v2633_v58, %v2632_v16  ;;  %v6565_v27 = vpop.permute.xlu0 %6564  ;;  %v6560_v57 = vpop.permute.xlu1 %6559  ;;  %v715_v13 = vmul.f32 %v7198_v46, %v9172_v23  ;;  %v7199_v16 = vld [vmem:[%s7535_s24 + $0xe8] sm:$0xff]  ;;  %v717_v22 = vmul.f32 %v7200_v5, %v9368_v37 }
 0x226   : > { %v6562_v28 = vunpack.i.h.bf16 %v6560_v57  ;;  %v6561_v56 = vunpack.i.l.bf16 %v6560_v57  ;;  %v6567_v18 = vunpack.i.h.bf16 %v6565_v27  ;;  %v6566_v44 = vunpack.i.l.bf16 %v6565_v27 }
 0x227   : > { %v2772_v53 = vshrl.u32 %v2654_v4, 16  ;;  %v2775_v54 = vshll.u32 %v2654_v4, 16  ;;  %v716_v58 = vmul.f32 %v7199_v16, %v9361_v31 }
 0x228   : > { %v2634_v14 = vsel %vm2609_vm0, %v2600_v45, %v6561_v56  ;;  %v2635_v52 = vsel %vm2609_vm0, %v2601_v9, %v6562_v28  ;;  %v2399_v17 = vsel %vm2371_vm5, %v715_v13, %v6567_v18 }
 0x229   : > { %v6575_v59 = vpop.permute.xlu0 %6574  ;;  %v2774_v29 = vrot.slane %v2772_v53, 3  ;;  %v2777_v26 = vrot.slane %v2775_v54, 4  ;;  %v2655_v48 = vpack.c.bf16 %v2635_v52, %v2634_v14  ;;  %v6570_v62 = vpop.permute.xlu1 %6569 }
 0x22a   : > { %v6577_v35 = vunpack.i.h.bf16 %v6575_v59  ;;  %v6576_v49 = vunpack.i.l.bf16 %v6575_v59  ;;  %v6572_v20 = vunpack.i.h.bf16 %v6570_v62  ;;  %v6571_v15 = vunpack.i.l.bf16 %v6570_v62 }
 0x22b   : > { %v2778_v8 = vor.u32 %v2777_v26, %v2774_v29  ;;  %v2781_v7 = vshrl.u32 %v2655_v48, 16  ;;  %v2784_v55 = vshll.u32 %v2655_v48, 16 }
 0x22c   : > { %v2433_v56 = vsel %vm2405_vm6, %v2399_v17, %v6577_v35  ;;  %v2401_v31 = vsel %vm2371_vm5, %v717_v22, %v6572_v20  ;;  %v2400_v37 = vsel %vm2371_vm5, %v716_v58, %v6571_v15 }
 0x22d   : > { %v6585_v25 = vpop.permute.xlu0 %6584  ;;  %v2779_v21 = vsel %vm2672_vm12, %v9854_v33, %v2778_v8  ;;  %v6580_v38 = vpop.permute.xlu1 %6579  ;;  %v2783_v32 = vrot.slane %v2781_v7, 3  ;;  %v2786_v12 = vrot.slane %v2784_v55, 4  ;;  %v7197_v33 = vld [vmem:[%s7535_s24 + $0xd8] sm:$0xff] }
 0x22e   : > { %5808 = vmatprep.mubr.msk.bf16.mxu0 %vm2840_vm13, %v2779_v21  ;;  %v714_v10 = vmul.f32 %v7197_v33, %v9165_v42  ;;  %v6587_v4 = vunpack.i.h.bf16 %v6585_v25  ;;  %v6586_v42 = vunpack.i.l.bf16 %v6585_v25  ;;  %v6582_v60 = vunpack.i.h.bf16 %v6580_v38 }
 0x22f   : > { %v9902_v19 = vor.u32 %v2786_v12, %v2783_v32  ;;  %v6581_v23 = vunpack.i.l.bf16 %v6580_v38 }
 0x230   : > { %v2398_v51 = vsel %vm2371_vm5, %v714_v10, %v6566_v44  ;;  %v2467_v59 = vsel %vm2439_vm7, %v2433_v56, %v6587_v4 }
 0x231   : > { %v6595_v41 = vpop.permute.xlu0 %6594  ;;  %v6590_v34 = vpop.permute.xlu1 %6589  ;;  %v2788_v43 = vsel %vm2672_vm12, %v2778_v8, %v9902_v19  ;;  %v2432_v53 = vsel %vm2405_vm6, %v2398_v51, %v6576_v49  ;;  %v2434_v62 = vsel %vm2405_vm6, %v2400_v37, %v6581_v23  ;;  %v2435_v8 = vsel %vm2405_vm6, %v2401_v31, %v6582_v60 }
 0x232   : > { %5809 = vmatmul.mubr.msk.bf16.gmra.mrb[20].mxu0 %vm2840_vm13, %v2788_v43  ;;  %v6597_v50 = vunpack.i.h.bf16 %v6595_v41  ;;  %v6596_v57 = vunpack.i.l.bf16 %v6595_v41  ;;  %v6592_v54 = vunpack.i.h.bf16 %v6590_v34  ;;  %v6591_v45 = vunpack.i.l.bf16 %v6590_v34 }
 0x233   : > { %v2466_v52 = vsel %vm2439_vm7, %v2432_v53, %v6586_v42 }
 0x234   : > { %v2500_v7 = vsel %vm2473_vm8, %v2466_v52, %v6596_v57  ;;  %v2501_v55 = vsel %vm2473_vm8, %v2467_v59, %v6597_v50  ;;  %v2468_v41 = vsel %vm2439_vm7, %v2434_v62, %v6591_v45  ;;  %v2469_v34 = vsel %vm2439_vm7, %v2435_v8, %v6592_v54  ;;  %v7166_v50 = vld [vmem:[%s11475_s3 + $0x40] sm:$0xff]  }
 0x235   : > { %v6605_v40 = vpop.permute.xlu0 %6604  ;;  %v6600_v1 = vpop.permute.xlu1 %6599  ;;  %5579 = vmatprep.subr.bf16.mxu1 %v7166_v50  ;;  %v9957_v62 = vld [vmem:[%s11474_s2] ss:$0 sm:$0xff]  ;;  %v7201_v50 = vld [vmem:[%s7535_s24 + $0xf8] sm:$0xff] }
 0x236   : > { %v6607_v9 = vunpack.i.h.bf16 %v6605_v40  ;;  %v6606_v14 = vunpack.i.l.bf16 %v6605_v40  ;;  %v6602_v21 = vunpack.i.h.bf16 %v6600_v1  ;;  %v6601_v38 = vunpack.i.l.bf16 %v6600_v1 }
 0x238   : > { %v2534_v43 = vsel %vm2507_vm9, %v2500_v7, %v6606_v14  ;;  %v2535_v18 = vsel %vm2507_vm9, %v2501_v55, %v6607_v9  ;;  %v2502_v15 = vsel %vm2473_vm8, %v2468_v41, %v6601_v38  ;;  %v2503_v16 = vsel %vm2473_vm8, %v2469_v34, %v6602_v21  ;;  %v7167_v7 = vld [vmem:[%s11475_s3] sm:$0xff]  }
 0x239   : > { %v6615_v27 = vpop.permute.xlu0 %6614  ;;  %v6610_v28 = vpop.permute.xlu1 %6609  ;;  %5580 = vmatpush3.bf16.msra.mxu1 %v7167_v7 }
 0x23a   : > { %v6617_v29 = vunpack.i.h.bf16 %v6615_v27  ;;  %v6616_v26 = vunpack.i.l.bf16 %v6615_v27  ;;  %v6612_v33 = vunpack.i.h.bf16 %v6610_v28  ;;  %v6611_v10 = vunpack.i.l.bf16 %v6610_v28 }
 0x23c   : > { %v2568_v44 = vsel %vm2541_vm10, %v2534_v43, %v6616_v26  ;;  %v2569_v40 = vsel %vm2541_vm10, %v2535_v18, %v6617_v29  ;;  %v2536_v42 = vsel %vm2507_vm9, %v2502_v15, %v6611_v10  ;;  %v2537_v27 = vsel %vm2507_vm9, %v2503_v16, %v6612_v33  ;;  %v7168_v43 = vld [vmem:[%s11475_s3 + $0x48] sm:$0xff]   ;;  %v7171_v15 = vld [vmem:[%s11475_s3 + $0x10] sm:$0xff]  }
 0x23d   : > { %v6625_v48 = vpop.permute.xlu0 %6624  ;;  %v6620_v25 = vpop.permute.xlu1 %6619  ;;  %v7169_v18 = vld [vmem:[%s11475_s3 + $0x8] sm:$0xff]   ;;  %5581 = vmatprep.subr.bf16.mxu1 %v7168_v43 }
 0x23e   : > { %v6627_v32 = vunpack.i.h.bf16 %v6625_v48  ;;  %v6626_v12 = vunpack.i.l.bf16 %v6625_v48  ;;  %v6622_v13 = vunpack.i.h.bf16 %v6620_v25  ;;  %v6621_v35 = vunpack.i.l.bf16 %v6620_v25  ;;  %5582 = vmatpush3.bf16.msra.mxu1 %v7169_v18  ;;  %v7174_v18 = vld [vmem:[%s11475_s3 + $0x60] sm:$0xff]  }
 0x240   : > { %v2602_v58 = vsel %vm2575_vm11, %v2568_v44, %v6626_v12  ;;  %v2603_v5 = vsel %vm2575_vm11, %v2569_v40, %v6627_v32  ;;  %v2570_v57 = vsel %vm2541_vm10, %v2536_v42, %v6621_v35  ;;  %v2571_v28 = vsel %vm2541_vm10, %v2537_v27, %v6622_v13  ;;  %v7170_v44 = vld [vmem:[%s11475_s3 + $0x50] sm:$0xff]  }
 0x241   : > { %v6635_v46 = vpop.permute.xlu0 %6634  ;;  %v6630_v20 = vpop.permute.xlu1 %6629  ;;  %5583 = vmatprep.subr.bf16.mxu1 %v7170_v44 }
 0x242   : > { %v6637_v1 = vunpack.i.h.bf16 %v6635_v46  ;;  %v6636_v49 = vunpack.i.l.bf16 %v6635_v46  ;;  %v6632_v51 = vunpack.i.h.bf16 %v6630_v20  ;;  %v6631_v4 = vunpack.i.l.bf16 %v6630_v20  ;;  %5584 = vmatpush3.bf16.msra.mxu1 %v7171_v15 }
 0x244   : > { %v2636_v22 = vsel %vm2609_vm0, %v2602_v58, %v6636_v49  ;;  %v2637_v17 = vsel %vm2609_vm0, %v2603_v5, %v6637_v1  ;;  %v2604_v45 = vsel %vm2575_vm11, %v2570_v57, %v6631_v4  ;;  %v2605_v9 = vsel %vm2575_vm11, %v2571_v28, %v6632_v51  ;;  %v7172_v58 = vld [vmem:[%s11475_s3 + $0x58] sm:$0xff]   ;;  %v7202_v28 = vld [vmem:[%s7535_s24 + $0x100] sm:$0xff] }
 0x245   : > { %v2656_v60 = vpack.c.bf16 %v2637_v17, %v2636_v22  ;;  %v9941_v23 = vpop.permute.xlu0 %6644  ;;  %v6640_v56 = vpop.permute.xlu1 %6639  ;;  %v7173_v51 = vld [vmem:[%s11475_s3 + $0x18] sm:$0xff]   ;;  %5585 = vmatprep.subr.bf16.mxu1 %v7172_v58  ;;  %v718_v57 = vmul.f32 %v7201_v50, %v9485_v0 }
 0x246   : > { %v6642_v53 = vunpack.i.h.bf16 %v6640_v56  ;;  %v6641_v31 = vunpack.i.l.bf16 %v6640_v56  ;;  %v6647_v4 = vunpack.i.h.bf16 %v9941_v23  ;;  %v6646_v42 = vunpack.i.l.bf16 %v9941_v23  ;;  %5586 = vmatpush3.bf16.msra.mxu1 %v7173_v51  ;;  %v11964_v51 = vld [vmem:[#allocation6_spill] sm:$0xff] }
 0x247   : > { %v2790_v37 = vshrl.u32 %v2656_v60, 16  ;;  %v2793_v54 = vshll.u32 %v2656_v60, 16  ;;  %v719_v56 = vmul.f32 %v7202_v28, %v9643_v61  ;;  %5587 = vmatprep.subr.bf16.mxu1 %v7174_v18  ;;  %v7178_v28 = vld [vmem:[%s11475_s3 + $0x70] sm:$0xff]  }
 0x248   : > { %v2638_v14 = vsel %vm2609_vm0, %v2604_v45, %v6641_v31  ;;  %v2639_v52 = vsel %vm2609_vm0, %v2605_v9, %v6642_v53 }
 0x249   : > { %v9952_v59 = vpop.permute.xlu0 %6649  ;;  %v2792_v29 = vrot.slane %v2790_v37, 3  ;;  %v2795_v26 = vrot.slane %v2793_v54, 4  ;;  %v2657_v48 = vpack.c.bf16 %v2639_v52, %v2638_v14  ;;  %v2403_v37 = vsel %vm2371_vm5, %v719_v56, %v6647_v4  ;;  %v3286_v56 = vld [vmem:[#allocation2 + $0x11] sm:$0xff] }
 0x24a   : > { %v6652_v27 = vunpack.i.h.bf16 %v9952_v59  ;;  %v6651_v60 = vunpack.i.l.bf16 %v9952_v59  ;;  %v2402_v54 = vsel %vm2371_vm5, %v718_v57, %v6646_v42 }
 0x24b   : > { %v2796_v8 = vor.u32 %v2795_v26, %v2792_v29  ;;  %v2799_v55 = vshrl.u32 %v2657_v48, 16  ;;  %v2802_v25 = vshll.u32 %v2657_v48, 16 }
 0x24c   : > { %v5790_v21 = vpop.f32.mrb[0].mxu0  ;;  %v2437_v45 = vsel %vm2405_vm6, %v2403_v37, %v6652_v27  ;;  %v2436_v9 = vsel %vm2405_vm6, %v2402_v54, %v6651_v60  ;;  %v7177_v27 = vld [vmem:[%s11475_s3 + $0x28] sm:$0xff]  }
 0x24d   : > { %v9962_v38 = vpop.permute.xlu0 %6654  ;;  %v2797_v32 = vsel %vm2672_vm12, %v9902_v19, %v2796_v8  ;;  %v2936_v12 = vadd.f32 %v5790_v21, %v9957_v62  ;;  %v2927_v41 = vpop.f32.mrb[1].mxu0  ;;  %v2801_v34 = vrot.slane %v2799_v55, 3  ;;  %v2804_v33 = vrot.slane %v2802_v25, 4 }
 0x24e   : > { %5812 = vmatprep.mubr.msk.bf16.mxu0 %vm2840_vm13, %v2797_v32  ;;  %v2928_v19 = vadd.f32 %v9957_v62, %v2927_v41  ;;  %v5791_v40 = vpop.f32.mrb[2].mxu0  ;;  %v6656_v53 = vunpack.i.l.bf16 %v9962_v38  ;;  %v6657_v23 = vunpack.i.h.bf16 %v9962_v38  ;;  %v11958_v38 = vld [vmem:[#allocation36_spill] sm:$0xff] }
 0x24f   : > { %v3056_v10 = vmax.f32 %v2936_v12, 0.0  ;;  %v2939_v46 = vadd.f32 %v5791_v40, %v9957_v62  ;;  %v2930_v13 = vpop.f32.mrb[3].mxu0  ;;  %v9982_v20 = vor.u32 %v2804_v33, %v2801_v34  ;;  %v11959_v12 = vld [vmem:[#allocation35_spill] sm:$0xff]  ;;  %v11962_v33 = vld [vmem:[#allocation38_spill] sm:$0xff] }
 0x250   : > { %v3054_v35 = vmax.f32 %v2928_v19, 0.0  ;;  %v2931_v1 = vadd.f32 %v9957_v62, %v2930_v13  ;;  %v2470_v61 = vsel %vm2439_vm7, %v2436_v9, %v6656_v53  ;;  %v2471_v44 = vsel %vm2439_vm7, %v2437_v45, %v6657_v23  ;;  %v7176_v13 = vld [vmem:[%s11475_s3 + $0x68] sm:$0xff]  }
 0x251   : > { %v9980_v49 = vpop.permute.xlu0 %6659  ;;  %3128 = vst.msk [vmem:[#allocation2 + $0x30] sm:$0xff] %vm2609_vm0, %v3056_v10  ;;  %v3057_v16 = vmax.f32 %v2939_v46, 0.0  ;;  %v2806_v22 = vsel %vm2672_vm12, %v2796_v8, %v9982_v20  ;;  %v3254_v8 = vld [vmem:[#allocation2 + $0x10] sm:$0xff]  ;;  %v7175_v46 = vld [vmem:[%s11475_s3 + $0x20] sm:$0xff]  }
 0x252   : > { %3126 = vst.msk [vmem:[#allocation2 + $0x20] sm:$0xff] %vm2609_vm0, %v3054_v35  ;;  %v3055_v5 = vmax.f32 %v2931_v1, 0.0  ;;  %5813 = vmatmul.mubr.msk.bf16.gmra.mrb[24].mxu0 %vm2840_vm13, %v2806_v22  ;;  %v6662_v59 = vunpack.i.h.bf16 %v9980_v49  ;;  %v6661_v29 = vunpack.i.l.bf16 %v9980_v49  ;;  %v11963_v22 = vld [vmem:[#allocation4_spill] sm:$0xff]  ;;  %5588 = vmatpush3.bf16.msra.mxu1 %v7175_v46  ;;  %v7182_v46 = vld [vmem:[%s11475_s3 + $0x38] sm:$0xff]  }
 0x253   : > { %3129 = vst.msk [vmem:[#allocation2 + $0x38] sm:$0xff] %vm2609_vm0, %v3057_v16  ;;  %v3255_v16 = vld [vmem:[#allocation2 + $0x18] sm:$0xff]  ;;  %5589 = vmatprep.subr.bf16.mxu1 %v7176_v13 }
 0x254   : > { %3127 = vst.msk [vmem:[#allocation2 + $0x28] sm:$0xff] %vm2609_vm0, %v3055_v5  ;;  %v2504_v58 = vsel %vm2473_vm8, %v2470_v61, %v6661_v29  ;;  %v2505_v5 = vsel %vm2473_vm8, %v2471_v44, %v6662_v59 }
 0x255   : > { %v9997_v17 = vpop.permute.xlu0 %6664 }
 0x256   : > { %v6667_v55 = vunpack.i.h.bf16 %v9997_v17  ;;  %v6666_v25 = vunpack.i.l.bf16 %v9997_v17  ;;  %5590 = vmatpush3.bf16.msra.mxu1 %v7177_v27 }
 0x257   : > { %5591 = vmatprep.subr.bf16.mxu1 %v7178_v28 }
 0x258   : > { %v10016_v14 = vld [vmem:[#allocation2 + $0x30] sm:$0xff]  ;;  %v2538_v60 = vsel %vm2507_vm9, %v2504_v58, %v6666_v25  ;;  %v2539_v50 = vsel %vm2507_vm9, %v2505_v5, %v6667_v55  ;;  %v7183_v25 = vld [vmem:[%s11475_s3 + $0x88] sm:$0xff]  }
 0x259   : > { %v6670_v31 = vpop.permute.xlu0 %6669  ;;  %11956 = vst [vmem:[#allocation85_spill] sm:$0xff] %v10016_v14  ;;  %v3287_v42 = vld [vmem:[#allocation2 + $0x19] sm:$0xff]  ;;  %v7179_v55 = vld [vmem:[%s11475_s3 + $0x30] sm:$0xff]  }
 0x25a   : > { %v10018_v0 = vld [vmem:[#allocation2 + $0x38] sm:$0xff]  ;;  %v6672_v19 = vunpack.i.h.bf16 %v6670_v31  ;;  %v6671_v40 = vunpack.i.l.bf16 %v6670_v31  ;;  %v3351_v61 = vmul.f32 %v3287_v42, %v11959_v12  ;;  %5592 = vmatpush3.bf16.msra.mxu1 %v7179_v55  ;;  %v11966_v58 = vld [vmem:[#allocation37_spill] sm:$0xff]  ;;  %v11967_v42 = vld [vmem:[#allocation3_spill] sm:$0xff] }
 0x25b   : > { %11957 = vst [vmem:[#allocation78_spill] sm:$0xff] %v10018_v0  ;;  %v10020_v52 = vld [vmem:[#allocation2 + $0x31] sm:$0xff]  ;;  %v6698_v26 = vpack.i.bf16 %v10018_v0, %v10016_v14  ;;  %v10027_v48 = vld [vmem:[#allocation2 + $0x21] sm:$0xff]  ;;  %v10029_v7 = vld [vmem:[#allocation2 + $0x29] sm:$0xff] }
 0x25c   : > { %v3420_v32 = vmul.f32 %v10027_v48, %v11958_v38  ;;  %v3421_v41 = vmul.f32 %v10029_v7, %v11959_v12  ;;  %v10037_v34 = vld [vmem:[#allocation2 + $0x2f] sm:$0xff]  ;;  %v10039_v43 = vld [vmem:[#allocation2 + $0x37] sm:$0xff]  ;;  %v3422_v10 = vmul.f32 %v10020_v52, %v11962_v33  ;;  %v2572_v53 = vsel %vm2541_vm10, %v2538_v60, %v6671_v40  ;;  %v10095_v18 = vld [vmem:[#allocation2 + $0x1f] sm:$0xff] }
 0x25d   : > { %v6675_v21 = vpop.permute.xlu0 %6674  ;;  %11960 = vst [vmem:[#allocation77_spill] sm:$0xff] %v10037_v34  ;;  %11961 = vst [vmem:[#allocation81_spill] sm:$0xff] %v10039_v43  ;;  %6699 = vrot.lane.b32.xlu0 %v6698_v26, %s7278_s12  ;;  %v3454_v17 = vmul.f32 %v10037_v34, %v11963_v22  ;;  %v3455_v4 = vmul.f32 %v10039_v43, %v11964_v51  ;;  %v2573_v31 = vsel %vm2541_vm10, %v2539_v50, %v6672_v19  ;;  %v11970_v55 = vld [vmem:[#allocation39_spill] sm:$0xff] }
 0x25e   : > { %v6677_v35 = vunpack.i.h.bf16 %v6675_v21  ;;  %v6676_v1 = vunpack.i.l.bf16 %v6675_v21  ;;  %v6683_v49 = vpack.i.bf16 %v3420_v32, %v9748_v63  ;;  %v6703_v15 = vpack.i.bf16 %v3254_v8, %v3421_v41  ;;  %v7180_v63 = vld [vmem:[%s11475_s3 + $0x80] sm:$0xff]   ;;  %v7181_v41 = vld [vmem:[%s11475_s3 + $0x78] sm:$0xff]  }
 0x25f   : > { %v6688_v9 = vpack.i.bf16 %v3422_v10, %v3255_v16  ;;  %5820 = vmatprep.subr.bf16.mxu0 %v7180_v63  ;;  %v6708_v26 = vpack.i.bf16 %v3455_v4, %v3454_v17  ;;  %v10081_v8 = vld [vmem:[#allocation2 + $0x27] sm:$0xff]  ;;  %v3350_v21 = vmul.f32 %v3286_v56, %v11958_v38  ;;  %5593 = vmatprep.subr.bf16.mxu1 %v7181_v41 }
 0x260   : > { %6684 = vrot.lane.b32.xlu1 %v6683_v49, %s7277_s22  ;;  %v2606_v23 = vsel %vm2575_vm11, %v2572_v53, %v6676_v1  ;;  %v2607_v45 = vsel %vm2575_vm11, %v2573_v31, %v6677_v35  ;;  %11965 = vst [vmem:[#allocation80_spill] sm:$0xff] %v10081_v8  ;;  %5821 = vmatpush3.bf16.msra.mxu0 %v7180_v63  ;;  %v11968_v63 = vld [vmem:[#allocation5_spill] sm:$0xff] }
 0x261   : > { %v6680_v57 = vpop.permute.xlu0 %6679  ;;  %6704 = vrot.lane.b32.xlu0 %v6703_v15, %s7277_s22  ;;  %5822 = vmatprep.subr.bf16.mxu0 %v7183_v25  ;;  %v6693_v40 = vpack.i.bf16 %v3351_v61, %v3350_v21  ;;  %v3385_v10 = vmul.f32 %v10081_v8, %v11964_v51  ;;  %v3384_v1 = vmul.f32 %v10095_v18, %v11963_v22 }
 0x262   : > { %v6682_v37 = vunpack.i.h.bf16 %v6680_v57  ;;  %v6681_v54 = vunpack.i.l.bf16 %v6680_v57  ;;  %v3352_v16 = vmul.f32 %v10027_v48, %v11962_v33  ;;  %v3353_v5 = vmul.f32 %v10029_v7, %v11966_v58  ;;  %5594 = vmatpush3.bf16.msra.mxu1 %v7182_v46 }
 0x263   : > { %v6713_v49 = vpack.i.bf16 %v3385_v10, %v3384_v1  ;;  %v3386_v27 = vmul.f32 %v10037_v34, %v11967_v42  ;;  %v3387_v60 = vmul.f32 %v10039_v43, %v11968_v63 }
 0x264   : > { %v2640_v59 = vsel %vm2609_vm0, %v2606_v23, %v6681_v54  ;;  %v2641_v29 = vsel %vm2609_vm0, %v2607_v45, %v6682_v37  ;;  %6689 = vrot.lane.b32.xlu1 %v6688_v9, %s7277_s22  ;;  %5823 = vmatpush3.bf16.msra.mxu0 %v7183_v25  ;;  %v6718_v4 = vpack.i.bf16 %v3353_v5, %v3352_v16 }
 0x265   : > { %v2658_v32 = vpack.c.bf16 %v2641_v29, %v2640_v59  ;;  %6709 = vrot.lane.b32.xlu0 %v6708_v26, %s7279_s16  ;;  %v6723_v48 = vpack.i.bf16 %v3387_v60, %v3386_v27  ;;  %v11969_v29 = vld [vmem:[#allocation40_spill] sm:$0xff]  ;;  %v10166_v27 = vmul.f32 %v10020_v52, %v11958_v38 }
 0x266   : > { %v3354_v26 = vmul.f32 %v10020_v52, %v11969_v29 }
 0x267   : > { %v2808_v44 = vshrl.u32 %v2658_v32, 16  ;;  %v2811_v19 = vshll.u32 %v2658_v32, 16 }
 0x268   : > { %6694 = vrot.lane.b32.xlu1 %v6693_v40, %s7279_s16  ;;  %v11971_v40 = vld [vmem:[#allocation42_spill] sm:$0xff] }
 0x269   : > { %v2810_v13 = vrot.slane %v2808_v44, 3  ;;  %v2813_v35 = vrot.slane %v2811_v19, 4 }
 0x26b   : > { %v10105_v15 = vor.u32 %v2813_v35, %v2810_v13  ;;  %v10149_v35 = vld [vmem:[#allocation2 + $0x20] sm:$0xff] }
 0x26c   : > { %6714 = vrot.lane.b32.xlu1 %v6713_v49, %s7278_s12 }
 0x26d   : > { %v2815_v17 = vsel %vm2672_vm12, %v9982_v20, %v10105_v15 }
 0x26e   : > { %5816 = vmatprep.mubr.msk.bf16.mxu0 %vm2840_vm13, %v2815_v17 }
 0x270   : > { %6719 = vrot.lane.b32.xlu1 %v6718_v4, %s7279_s16 }
 0x274   : > { %6724 = vrot.lane.b32.xlu1 %v6723_v48, %s7278_s12 }
 0x281   : > { %v5794_v7 = vpop.f32.mrb[4].mxu0 }
 0x282   : > { %v2952_v50 = vadd.f32 %v5794_v7, %v9957_v62  ;;  %v2943_v57 = vpop.f32.mrb[5].mxu0 }
 0x283   : > { %v2944_v20 = vadd.f32 %v9957_v62, %v2943_v57  ;;  %v5795_v28 = vpop.f32.mrb[6].mxu0 }
 0x284   : > { %v3060_v56 = vmax.f32 %v2952_v50, 0.0  ;;  %v2955_v53 = vadd.f32 %v5795_v28, %v9957_v62  ;;  %v2946_v31 = vpop.f32.mrb[7].mxu0  ;;  %v10178_v50 = vld [vmem:[#allocation2 + $0x28] sm:$0xff] }
 0x285   : > { %v3058_v37 = vmax.f32 %v2944_v20, 0.0  ;;  %v2947_v54 = vadd.f32 %v9957_v62, %v2946_v31 }
 0x286   : > { %3132 = vst.msk [vmem:[#allocation2 + $0x50] sm:$0xff] %vm2609_vm0, %v3060_v56  ;;  %v3061_v23 = vmax.f32 %v2955_v53, 0.0  ;;  %v11977_v56 = vld [vmem:[#allocation8_spill] sm:$0xff] }
 0x287   : > { %3130 = vst.msk [vmem:[#allocation2 + $0x40] sm:$0xff] %vm2609_vm0, %v3058_v37  ;;  %v3059_v45 = vmax.f32 %v2947_v54, 0.0 }
 0x288   : > { %3133 = vst.msk [vmem:[#allocation2 + $0x58] sm:$0xff] %vm2609_vm0, %v3061_v23 }
 0x289   : > { %3131 = vst.msk [vmem:[#allocation2 + $0x48] sm:$0xff] %vm2609_vm0, %v3059_v45  ;;  %v11978_v45 = vld [vmem:[#allocation41_spill] sm:$0xff] }
 0x28d   : > { %v10130_v61 = vld [vmem:[#allocation2 + $0x50] sm:$0xff] }
 0x28e   : > { %v3291_v9 = vld [vmem:[#allocation2 + $0x39] sm:$0xff] }
 0x28f   : > { %v10132_v59 = vld [vmem:[#allocation2 + $0x58] sm:$0xff]  ;;  %v3355_v25 = vmul.f32 %v3291_v9, %v11970_v55  ;;  %v3423_v41 = vmul.f32 %v3291_v9, %v11966_v58  ;;  %v10172_v60 = vld [vmem:[#allocation2 + $0x40] sm:$0xff] }
 0x290   : > { %v10137_v21 = vld [vmem:[#allocation2 + $0x51] sm:$0xff]  ;;  %v6728_v32 = vpack.i.bf16 %v10132_v59, %v10130_v61  ;;  %v3292_v44 = vld [vmem:[#allocation2 + $0x41] sm:$0xff]  ;;  %v3293_v46 = vld [vmem:[#allocation2 + $0x49] sm:$0xff]  ;;  %11974 = vst [vmem:[#allocation99_spill] sm:$0xff] %v10172_v60 }
 0x291   : > { %v6743_v19 = vpack.i.bf16 %v3355_v25, %v3354_v26  ;;  %v3426_v10 = vmul.f32 %v10137_v21, %v11971_v40  ;;  %v10146_v13 = vmul.f32 %v3292_v44, %v11962_v33  ;;  %v10152_v1 = vmul.f32 %v3293_v46, %v11966_v58  ;;  %v10156_v5 = vld [vmem:[#allocation2 + $0x48] sm:$0xff]  ;;  %v10174_v48 = vld [vmem:[#allocation2 + $0x3f] sm:$0xff]  ;;  %v10198_v25 = vld [vmem:[#allocation2 + $0x57] sm:$0xff] }
 0x292   : > { %6729 = vrot.lane.b32.xlu0 %v6728_v32, %s7278_s12  ;;  %v6733_v49 = vpack.i.bf16 %v10149_v35, %v3423_v41  ;;  %11972 = vst [vmem:[#allocation86_spill] sm:$0xff] %v10156_v5  ;;  %v3424_v17 = vmul.f32 %v3292_v44, %v11969_v29  ;;  %v10159_v4 = vld [vmem:[#allocation2 + $0x47] sm:$0xff]  ;;  %v10169_v58 = vmul.f32 %v3291_v9, %v11959_v12  ;;  %11975 = vst [vmem:[#allocation100_spill] sm:$0xff] %v10174_v48  ;;  %v10196_v26 = vld [vmem:[#allocation2 + $0x4f] sm:$0xff] }
 0x293   : > { %6744 = vrot.lane.b32.xlu1 %v6743_v19, %s7279_s16  ;;  %v6748_v16 = vpack.i.bf16 %v3426_v10, %v10018_v0  ;;  %11973 = vst [vmem:[#allocation90_spill] sm:$0xff] %v10159_v4  ;;  %v6738_v7 = vpack.i.bf16 %v10156_v5, %v10172_v60  ;;  %v3457_v57 = vmul.f32 %v10159_v4, %v11968_v63  ;;  %v11976_v12 = vld [vmem:[#allocation7_spill] sm:$0xff]  ;;  %11979 = vst [vmem:[#allocation92_spill] sm:$0xff] %v10196_v26 }
 0x294   : > { %v6753_v38 = vpack.i.bf16 %v3424_v17, %v10178_v50  ;;  %v3389_v20 = vmul.f32 %v10159_v4, %v11976_v12  ;;  %v3456_v28 = vmul.f32 %v10174_v48, %v11967_v42  ;;  %v3388_v53 = vmul.f32 %v10174_v48, %v11977_v56  ;;  %11980 = vst [vmem:[#allocation91_spill] sm:$0xff] %v10198_v25 }
 0x295   : > { %v3425_v37 = vmul.f32 %v3293_v46, %v11970_v55  ;;  %v3356_v23 = vmul.f32 %v3292_v44, %v11971_v40  ;;  %v3357_v9 = vmul.f32 %v3293_v46, %v11978_v45  ;;  %v3458_v41 = vmul.f32 %v10196_v26, %v11977_v56  ;;  %v11981_v44 = vld [vmem:[#allocation10_spill] sm:$0xff] }
 0x296   : > { %6734 = vrot.lane.b32.xlu0 %v6733_v49, %s7277_s22  ;;  %v6758_v31 = vpack.i.bf16 %v3457_v57, %v3456_v28  ;;  %v6773_v54 = vpack.i.bf16 %v3389_v20, %v3388_v53  ;;  %v3459_v19 = vmul.f32 %v10198_v25, %v11976_v12  ;;  %v3390_v46 = vmul.f32 %v10196_v26, %v11981_v44  ;;  %v11982_v49 = vld [vmem:[#allocation9_spill] sm:$0xff] }
 0x297   : > { %6749 = vrot.lane.b32.xlu1 %v6748_v16, %s7277_s22  ;;  %v6763_v32 = vpack.i.bf16 %v10016_v14, %v3425_v37  ;;  %v6778_v10 = vpack.i.bf16 %v3357_v9, %v3356_v23  ;;  %v3391_v16 = vmul.f32 %v10198_v25, %v11982_v49  ;;  %v10218_v23 = vpop.permute.xlu1 %1270 }
 0x298   : > { %v6768_v17 = vpack.i.bf16 %v3459_v19, %v3458_v41 }
 0x29a   : > { %6739 = vrot.lane.b32.xlu0 %v6738_v7, %s7278_s12  ;;  %v6783_v7 = vpack.i.bf16 %v3391_v16, %v3390_v46 }
 0x29b   : > { %6754 = vrot.lane.b32.xlu1 %v6753_v38, %s7277_s22 }
 0x29e   : > { %6759 = vrot.lane.b32.xlu0 %v6758_v31, %s7279_s16 }
 0x29f   : > { %6774 = vrot.lane.b32.xlu1 %v6773_v54, %s7278_s12 }
 0x2a2   : > { %6764 = vrot.lane.b32.xlu0 %v6763_v32, %s7277_s22 }
 0x2a3   : > { %6779 = vrot.lane.b32.xlu1 %v6778_v10, %s7279_s16  ;;  %v10225_v10 = vpop.permute.xlu1 %1468 }
 0x2a6   : > { %6769 = vrot.lane.b32.xlu0 %v6768_v17, %s7279_s16 }
 0x2a7   : > { %6784 = vrot.lane.b32.xlu1 %v6783_v7, %s7278_s12  ;;  %v11983_v7 = vld [vmem:[#allocation44_spill] sm:$0xff] }
 0x2a8   : > { %v5798_v57 = vpop.f32.mrb[8].mxu0 }
 0x2a9   : > { %v2968_v38 = vadd.f32 %v5798_v57, %v9957_v62  ;;  %v2959_v20 = vpop.f32.mrb[9].mxu0  ;;  %v3358_v57 = vmul.f32 %v10137_v21, %v11983_v7 }
 0x2aa   : > { %v2960_v28 = vadd.f32 %v9957_v62, %v2959_v20  ;;  %v5799_v53 = vpop.f32.mrb[10].mxu0 }
 0x2ab   : > { %v3064_v31 = vmax.f32 %v2968_v38, 0.0  ;;  %v2971_v37 = vadd.f32 %v5799_v53, %v9957_v62  ;;  %v2962_v54 = vpop.f32.mrb[11].mxu0  ;;  %v11984_v38 = vld [vmem:[#allocation43_spill] sm:$0xff] }
 0x2ac   : > { %v3062_v9 = vmax.f32 %v2960_v28, 0.0  ;;  %v2963_v32 = vadd.f32 %v9957_v62, %v2962_v54 }
 0x2ad   : > { %3136 = vst.msk [vmem:[#allocation2 + $0x70] sm:$0xff] %vm2609_vm0, %v3064_v31  ;;  %v3065_v41 = vmax.f32 %v2971_v37, 0.0  ;;  %v10243_v37 = vpop.permute.xlu1 %1600 }
 0x2ae   : > { %3134 = vst.msk [vmem:[#allocation2 + $0x60] sm:$0xff] %vm2609_vm0, %v3062_v9  ;;  %v3063_v19 = vmax.f32 %v2963_v32, 0.0  ;;  %v11985_v9 = vld [vmem:[#allocation45_spill] sm:$0xff] }
 0x2af   : > { %3137 = vst.msk [vmem:[#allocation2 + $0x78] sm:$0xff] %vm2609_vm0, %v3065_v41 }
 0x2b0   : > { %3135 = vst.msk [vmem:[#allocation2 + $0x68] sm:$0xff] %vm2609_vm0, %v3063_v19 }
 0x2b4   : > { %v10229_v16 = vld [vmem:[#allocation2 + $0x70] sm:$0xff] }
 0x2b5   : > { %v10227_v46 = vld [vmem:[#allocation2 + $0x59] sm:$0xff] }
 0x2b6   : > { %v10231_v17 = vld [vmem:[#allocation2 + $0x78] sm:$0xff]  ;;  %v3359_v20 = vmul.f32 %v10227_v46, %v11984_v38  ;;  %v3427_v31 = vmul.f32 %v10227_v46, %v11978_v45 }
 0x2b7   : > { %v10237_v28 = vld [vmem:[#allocation2 + $0x71] sm:$0xff]  ;;  %v6788_v53 = vpack.i.bf16 %v10231_v17, %v10229_v16  ;;  %v10248_v41 = vld [vmem:[#allocation2 + $0x61] sm:$0xff]  ;;  %v10266_v3 = vld [vmem:[#allocation2 + $0x69] sm:$0xff] }
 0x2b8   : > { %v6803_v54 = vpack.i.bf16 %v3359_v20, %v3358_v57  ;;  %v3430_v32 = vmul.f32 %v10237_v28, %v11985_v9  ;;  %v6793_v19 = vpack.i.bf16 %v10172_v60, %v3427_v31  ;;  %v10253_v52 = vld [vmem:[#allocation2 + $0x68] sm:$0xff]  ;;  %v3428_v24 = vmul.f32 %v10248_v41, %v11983_v7  ;;  %v1706_v57 = vpop.permute.xlu1 %1705  ;;  %v10259_v20 = vld [vmem:[#allocation2 + $0x60] sm:$0xff] }
 0x2b9   : > { %6789 = vrot.lane.b32.xlu0 %v6788_v53, %s7278_s12  ;;  %v3169_v36 = vld [vmem:[#allocation2 + $0x67] sm:$0xff]  ;;  %11986 = vst [vmem:[#allocation52_spill] sm:$0xff] %v10259_v20  ;;  %v3168_v53 = vld [vmem:[#allocation2 + $0x5f] sm:$0xff]  ;;  %v3429_v4 = vmul.f32 %v10266_v3, %v11984_v38  ;;  %v3170_v30 = vld [vmem:[#allocation2 + $0x6f] sm:$0xff] }
 0x2ba   : > { %6804 = vrot.lane.b32.xlu1 %v6803_v54, %s7279_s16  ;;  %v6808_v33 = vpack.i.bf16 %v3430_v32, %v10132_v59  ;;  %v6798_v54 = vpack.i.bf16 %v10253_v52, %v10259_v20  ;;  %v3461_v31 = vmul.f32 %v3169_v36, %v11982_v49  ;;  %v6813_v59 = vpack.i.bf16 %v3428_v24, %v10156_v5  ;;  %v11987_v32 = vld [vmem:[#allocation11_spill] sm:$0xff]  ;;  %v11990_v5 = vld [vmem:[#allocation14_spill] sm:$0xff] }
 0x2bb   : > { %v3393_v39 = vmul.f32 %v3169_v36, %v11987_v32  ;;  %v3360_v24 = vmul.f32 %v10248_v41, %v11985_v9  ;;  %v11989_v36 = vld [vmem:[#allocation46_spill] sm:$0xff]  ;;  %v3394_v6 = vmul.f32 %v3170_v30, %v11990_v5 }
 0x2bc   : > { %v1903_v25 = vpop.permute.xlu1 %1902  ;;  %v3361_v48 = vmul.f32 %v10266_v3, %v11989_v36 }
 0x2bd   : > { %6794 = vrot.lane.b32.xlu0 %v6793_v19, %s7277_s22  ;;  %v3460_v19 = vmul.f32 %v3168_v53, %v11981_v44 }
 0x2be   : > { %6809 = vrot.lane.b32.xlu1 %v6808_v33, %s7277_s22  ;;  %v11988_v33 = vld [vmem:[#allocation12_spill] sm:$0xff]  ;;  %v6838_v44 = vpack.i.bf16 %v3361_v48, %v3360_v24 }
 0x2bf   : > { %v3392_v47 = vmul.f32 %v3168_v53, %v11988_v33  ;;  %v6818_v26 = vpack.i.bf16 %v3461_v31, %v3460_v19  ;;  %v6823_v53 = vpack.i.bf16 %v10130_v61, %v3429_v4  ;;  %v3462_v31 = vmul.f32 %v3170_v30, %v11988_v33 }
 0x2c0   : > { %v2035_v0 = vpop.permute.xlu1 %2034 }
 0x2c1   : > { %6799 = vrot.lane.b32.xlu0 %v6798_v54, %s7278_s12  ;;  %v6833_v49 = vpack.i.bf16 %v3393_v39, %v3392_v47  ;;  %v3171_v54 = vld [vmem:[#allocation2 + $0x77] sm:$0xff] }
 0x2c2   : > { %6814 = vrot.lane.b32.xlu1 %v6813_v59, %s7277_s22  ;;  %v3463_v19 = vmul.f32 %v3171_v54, %v11987_v32  ;;  %v3395_v60 = vmul.f32 %v3171_v54, %v11991_v11  ;;  %v7203_v32 = vld [vmem:[%s7535_s24 + $0x108] sm:$0xff] }
 0x2c4   : > { %v6828_v24 = vpack.i.bf16 %v3463_v19, %v3462_v31  ;;  %v6843_v54 = vpack.i.bf16 %v3395_v60, %v3394_v6  ;;  %v2140_v60 = vpop.permute.xlu1 %2139  ;;  %v3159_v19 = vld [vmem:[#allocation2 + $0x17] sm:$0xff] }
 0x2c5   : > { %6819 = vrot.lane.b32.xlu0 %v6818_v26, %s7279_s16 }
 0x2c6   : > { %6834 = vrot.lane.b32.xlu1 %v6833_v49, %s7278_s12  ;;  %v5802_v59 = vpop.f32.mrb[12].mxu0 }
 0x2c7   : > { %v2984_v47 = vadd.f32 %v5802_v59, %v9957_v62  ;;  %v2975_v39 = vpop.f32.mrb[13].mxu0 }
 0x2c8   : > { %v2976_v26 = vadd.f32 %v9957_v62, %v2975_v39  ;;  %v5803_v49 = vpop.f32.mrb[14].mxu0  ;;  %v720_v39 = vmul.f32 %v7203_v32, %v9446_v2 }
 0x2c9   : > { %6824 = vrot.lane.b32.xlu0 %v6823_v53, %s7277_s22  ;;  %v3068_v61 = vmax.f32 %v2984_v47, 0.0  ;;  %v2987_v4 = vadd.f32 %v5803_v49, %v9957_v62  ;;  %v2978_v33 = vpop.f32.mrb[15].mxu0 }
 0x2ca   : > { %6839 = vrot.lane.b32.xlu1 %v6838_v44, %s7279_s16  ;;  %v3066_v59 = vmax.f32 %v2976_v26, 0.0  ;;  %v2979_v48 = vadd.f32 %v9957_v62, %v2978_v33  ;;  %v2404_v44 = vsel %vm2371_vm5, %v720_v39, %v10218_v23  ;;  %v3158_v33 = vld [vmem:[#allocation2 + $0xf] sm:$0xff] }
 0x2cb   : > { %3140 = vst.msk [vmem:[#allocation2 + $0x90] sm:$0xff] %vm2609_vm0, %v3068_v61  ;;  %v3069_v30 = vmax.f32 %v2987_v4, 0.0  ;;  %v2438_v6 = vsel %vm2405_vm6, %v2404_v44, %v10225_v10  ;;  %v3222_v26 = vmul.f32 %v3158_v33, %v11963_v22 }
 0x2cc   : > { %3138 = vst.msk [vmem:[#allocation2 + $0x80] sm:$0xff] %vm2609_vm0, %v3066_v59  ;;  %v3067_v53 = vmax.f32 %v2979_v48, 0.0  ;;  %v2472_v2 = vsel %vm2439_vm7, %v2438_v6, %v10243_v37  ;;  %v11992_v37 = vld [vmem:[#allocation47_spill] sm:$0xff] }
 0x2cd   : > { %6829 = vrot.lane.b32.xlu0 %v6828_v24, %s7279_s16  ;;  %3141 = vst.msk [vmem:[#allocation2 + $0x98] sm:$0xff] %vm2609_vm0, %v3069_v30  ;;  %v2506_v31 = vsel %vm2473_vm8, %v2472_v2, %v1706_v57  ;;  %v3362_v24 = vmul.f32 %v10237_v28, %v11992_v37  ;;  %v11993_v57 = vld [vmem:[#allocation48_spill] sm:$0xff] }
 0x2ce   : > { %6844 = vrot.lane.b32.xlu1 %v6843_v54, %s7278_s12  ;;  %3139 = vst.msk [vmem:[#allocation2 + $0x88] sm:$0xff] %vm2609_vm0, %v3067_v53  ;;  %v2540_v47 = vsel %vm2507_vm9, %v2506_v31, %v1903_v25  ;;  %v11994_v53 = vld [vmem:[#allocation49_spill] sm:$0xff] }
 0x2cf   : > { %v6700_v32 = vpop.permute.xlu0 %6699  ;;  %v2574_v23 = vsel %vm2541_vm10, %v2540_v47, %v2035_v0  ;;  %v3223_v0 = vmul.f32 %v3159_v19, %v11964_v51 }
 0x2d0   : > { %v2608_v54 = vsel %vm2575_vm11, %v2574_v23, %v2140_v60  ;;  %v6702_v47 = vunpack.i.h.bf16 %v6700_v32  ;;  %v6701_v60 = vunpack.i.l.bf16 %v6700_v32 }
 0x2d2   : > { %v6685_v49 = vpop.permute.xlu1 %6684  ;;  %v10311_v59 = vld [vmem:[#allocation2 + $0x90] sm:$0xff] }
 0x2d3   : > { %v10309_v61 = vld [vmem:[#allocation2 + $0x79] sm:$0xff]  ;;  %v6686_v4 = vunpack.i.l.bf16 %v6685_v49  ;;  %v6705_v10 = vpop.permute.xlu0 %6704  ;;  %v6687_v6 = vunpack.i.h.bf16 %v6685_v49 }
 0x2d4   : > { %v10313_v48 = vld [vmem:[#allocation2 + $0x98] sm:$0xff]  ;;  %v3363_v30 = vmul.f32 %v10309_v61, %v11993_v57  ;;  %v3431_v22 = vmul.f32 %v10309_v61, %v11989_v36  ;;  %v6706_v2 = vunpack.i.l.bf16 %v6705_v10  ;;  %v6707_v19 = vunpack.i.h.bf16 %v6705_v10 }
 0x2d5   : > { %v10321_v25 = vld [vmem:[#allocation2 + $0x91] sm:$0xff]  ;;  %v6848_v39 = vpack.i.bf16 %v10313_v48, %v10311_v59  ;;  %v2642_v33 = vsel %vm2609_vm0, %v2608_v54, %v6686_v4  ;;  %v10333_v51 = vld [vmem:[#allocation2 + $0x81] sm:$0xff]  ;;  %v4360_v8 = vsel %vm2609_vm0, %v10149_v35, %v6687_v6 }
 0x2d6   : > { %v3434_v44 = vmul.f32 %v10321_v25, %v11994_v53  ;;  %v6863_v31 = vpack.i.bf16 %v3363_v30, %v3362_v24  ;;  %v2659_v14 = vpack.c.bf16 %v2642_v33, %v2642_v33  ;;  %v10330_v34 = vpop.permute.xlu1 %6689  ;;  %v6853_v49 = vpack.i.bf16 %v10259_v20, %v3431_v22  ;;  %v10338_v56 = vld [vmem:[#allocation2 + $0x88] sm:$0xff] }
 0x2d7   : > { %6849 = vrot.lane.b32.xlu0 %v6848_v39, %s7278_s12  ;;  %v6710_v23 = vpop.permute.xlu0 %6709  ;;  %v6691_v39 = vunpack.i.l.bf16 %v10330_v34  ;;  %v4361_v32 = vsel %vm2609_vm0, %v10178_v50, %v6706_v2  ;;  %v3432_v10 = vmul.f32 %v10333_v51, %v11992_v37  ;;  %v3173_v22 = vld [vmem:[#allocation2 + $0x87] sm:$0xff]  ;;  %v3172_v2 = vld [vmem:[#allocation2 + $0x7f] sm:$0xff] }
 0x2d8   : > { %6864 = vrot.lane.b32.xlu1 %v6863_v31, %s7279_s16  ;;  %v6868_v4 = vpack.i.bf16 %v3434_v44, %v10231_v17  ;;  %v2817_v24 = vshrl.u32 %v2659_v14, 16  ;;  %v2820_v30 = vshll.u32 %v2659_v14, 16  ;;  %v6712_v54 = vunpack.i.h.bf16 %v6710_v23  ;;  %v10348_v14 = vld [vmem:[#allocation2 + $0x80] sm:$0xff] }
 0x2d9   : > { %v6711_v33 = vunpack.i.l.bf16 %v6710_v23  ;;  %v6858_v35 = vpack.i.bf16 %v10338_v56, %v10348_v14  ;;  %v3465_v43 = vmul.f32 %v3173_v22, %v11991_v11  ;;  %v4263_v12 = vsel %vm2609_vm0, %v3223_v0, %v6691_v39 }
 0x2da   : > { %v2819_v31 = vrot.slane %v2817_v24, 3  ;;  %v2822_v17 = vrot.slane %v2820_v30, 4  ;;  %v6695_v44 = vpop.permute.xlu1 %6694  ;;  %v4393_v20 = vsel %vm4294_vm14, %v4361_v32, %v6712_v54  ;;  %v6873_v54 = vpack.i.bf16 %v3432_v10, %v10253_v52  ;;  %v11996_v52 = vld [vmem:[#allocation16_spill] sm:$0xff] }
 0x2db   : > { %6854 = vrot.lane.b32.xlu0 %v6853_v49, %s7277_s22  ;;  %v4392_v23 = vsel %vm4294_vm14, %v4360_v8, %v6711_v33  ;;  %v6697_v63 = vunpack.i.h.bf16 %v6695_v44  ;;  %v4425_v6 = vsel %vm4327_vm15, %v4393_v20, %v6702_v47  ;;  %v6696_v24 = vunpack.i.l.bf16 %v6695_v44  ;;  %v11995_v33 = vld [vmem:[#allocation15_spill] sm:$0xff] }
 0x2dc   : > { %6869 = vrot.lane.b32.xlu1 %v6868_v4, %s7277_s22  ;;  %v4424_v50 = vsel %vm4327_vm15, %v4392_v23, %v6701_v60  ;;  %v2823_v49 = vor.u32 %v2822_v17, %v2819_v31  ;;  %v4262_v8 = vsel %vm2609_vm0, %v3222_v26, %v6707_v19  ;;  %v3397_v32 = vmul.f32 %v3173_v22, %v11995_v33  ;;  %v10361_v4 = vld [vmem:[#allocation2 + $0x89] sm:$0xff]  ;;  %v11998_v23 = vld [vmem:[#allocation50_spill] sm:$0xff] }
 0x2dd   : > { %v4457_v30 = vpack.c.bf16 %v4425_v6, %v4424_v50  ;;  %v3464_v60 = vmul.f32 %v3172_v2, %v11990_v5  ;;  %v4296_v31 = vsel %vm4294_vm14, %v4263_v12, %v6697_v63  ;;  %v3396_v10 = vmul.f32 %v3172_v2, %v11996_v52  ;;  %v3174_v50 = vld [vmem:[#allocation2 + $0x8f] sm:$0xff]  ;;  %v3175_v6 = vld [vmem:[#allocation2 + $0x97] sm:$0xff] }
 0x2de   : > { %v6715_v20 = vpop.permute.xlu1 %6714  ;;  %v2824_v47 = vsel %vm2672_vm12, %v10105_v15, %v2823_v49  ;;  %v4295_v0 = vsel %vm4294_vm14, %v4262_v8, %v6696_v24  ;;  %v11997_v39 = vpack.c.bf16 %v10169_v58, %v10166_v27  ;;  %v3433_v22 = vmul.f32 %v10361_v4, %v11993_v57 }
 0x2df   : > { %6859 = vrot.lane.b32.xlu0 %v6858_v35, %s7278_s12  ;;  %4735 = vmatprep.mubr.bf16.mxu1 %v4457_v30  ;;  %v6717_v26 = vunpack.i.h.bf16 %v6715_v20  ;;  %v6716_v19 = vunpack.i.l.bf16 %v6715_v20  ;;  %v6878_v15 = vpack.i.bf16 %v3465_v43, %v3464_v60  ;;  %v3364_v63 = vmul.f32 %v10333_v51, %v11994_v53  ;;  %v12000_v20 = vld [vmem:[#allocation17_spill] sm:$0xff] }
 0x2e0   : > { %5817 = vmatmul.mubr.msk.bf16.gmra.mrb[28].mxu0 %vm2840_vm13, %v2824_v47  ;;  %6874 = vrot.lane.b32.xlu1 %v6873_v54, %s7277_s22  ;;  %v6893_v12 = vpack.i.bf16 %v3397_v32, %v3396_v10  ;;  %v3365_v35 = vmul.f32 %v10361_v4, %v11998_v23  ;;  %v3495_v43 = vmul.f32 %v10227_v46, %v11970_v55  ;;  %v11999_v54 = vld [vmem:[#allocation18_spill] sm:$0xff] }
 0x2e1   : > { %5824 = vmatprep.mubr.msk.bf16.mxu0 %vm2609_vm0, %v11997_v39  ;;  %v4328_v17 = vsel %vm4327_vm15, %v4295_v0, %v6716_v19  ;;  %v4329_v44 = vsel %vm4327_vm15, %v4296_v31, %v6717_v26  ;;  %v6883_v58 = vpack.i.bf16 %v10229_v16, %v3433_v22  ;;  %v3494_v2 = vmul.f32 %v10137_v21, %v11969_v29 }
 0x2e2   : > { %v4456_v27 = vpack.c.bf16 %v4329_v44, %v4328_v17  ;;  %v3466_v24 = vmul.f32 %v3174_v50, %v11996_v52  ;;  %v3467_v30 = vmul.f32 %v3175_v6, %v11995_v33  ;;  %v6898_v8 = vpack.i.bf16 %v3365_v35, %v3364_v63  ;;  %v12003_v44 = vld [vmem:[#allocation53_spill] sm:$0xff] }
 0x2e3   : > { %6879 = vrot.lane.b32.xlu0 %v6878_v15, %s7279_s16  ;;  %v3398_v32 = vmul.f32 %v3174_v50, %v11999_v54  ;;  %v3399_v47 = vmul.f32 %v3175_v6, %v12000_v20  ;;  %v4464_v60 = vpack.c.bf16 %v3495_v43, %v3494_v2  ;;  %v12001_v29 = vpack.c.bf16 %v10152_v1, %v10146_v13 }
 0x2e4   : > { %6894 = vrot.lane.b32.xlu1 %v6893_v12, %s7278_s12  ;;  %4736 = vmatmul.mubr.bf16.vlgmr.msra.gmra.mrb[0].mxu1 %v4456_v27  ;;  %v6888_v10 = vpack.i.bf16 %v3467_v30, %v3466_v24  ;;  %v3496_v0 = vmul.f32 %v10248_v41, %v11971_v40  ;;  %v3497_v13 = vmul.f32 %v10266_v3, %v11978_v45 }
 0x2e5   : > { %v5806_v49 = vpop.f32.mrb[16].mxu0  ;;  %v6903_v22 = vpack.i.bf16 %v3399_v47, %v3398_v32  ;;  %v3499_v63 = vmul.f32 %v10309_v61, %v11984_v38  ;;  %v3500_v45 = vmul.f32 %v10333_v51, %v11985_v9  ;;  %v3501_v38 = vmul.f32 %v10361_v4, %v11989_v36 }
 0x2e6   : > { %v3000_v55 = vadd.f32 %v5806_v49, %v9957_v62  ;;  %v2991_v46 = vpop.f32.mrb[17].mxu0  ;;  %v4467_v3 = vpack.c.bf16 %v3497_v13, %v3496_v0  ;;  %v3502_v50 = vmul.f32 %v10321_v25, %v11992_v37  ;;  %v10447_v37 = vpop.permute.xlu1 %6719 }
 0x2e7   : > { %6884 = vrot.lane.b32.xlu0 %v6883_v58, %s7277_s22  ;;  %v2992_v16 = vadd.f32 %v9957_v62, %v2991_v46  ;;  %v5807_v31 = vpop.f32.mrb[18].mxu0  ;;  %v4473_v51 = vpack.c.bf16 %v3501_v38, %v3500_v45  ;;  %v12004_v58 = vld [vmem:[#allocation54_spill] sm:$0xff] }
 0x2e8   : > { %5825 = vmatmul.mubr.msk.bf16.vlgmr.msra.gmra.mrb[32].mxu0 %vm2609_vm0, %v12001_v29  ;;  %6899 = vrot.lane.b32.xlu1 %v6898_v8, %s7279_s16  ;;  %v3072_v21 = vmax.f32 %v3000_v55, 0.0  ;;  %v3003_v26 = vadd.f32 %v5807_v31, %v9957_v62  ;;  %v2994_v19 = vpop.f32.mrb[19].mxu0  ;;  %v12005_v31 = vld [vmem:[#allocation19_spill] sm:$0xff]  ;;  %v12009_v38 = vld [vmem:[#allocation22_spill] sm:$0xff] }
 0x2e9   : > { %5828 = vmatprep.mubr.msk.bf16.mxu0 %vm2609_vm0, %v4464_v60  ;;  %v3070_v39 = vmax.f32 %v2992_v16, 0.0  ;;  %v2995_v15 = vadd.f32 %v9957_v62, %v2994_v19  ;;  %v3498_v62 = vmul.f32 %v10237_v28, %v11983_v7  ;;  %v12002_v7 = vld [vmem:[#allocation51_spill] sm:$0xff]  ;;  %v12006_v19 = vld [vmem:[#allocation20_spill] sm:$0xff] }
 0x2ea   : > { %3144 = vst.msk [vmem:[#allocation2 + $0xb0] sm:$0xff] %vm2609_vm0, %v3072_v21  ;;  %v3073_v1 = vmax.f32 %v3003_v26, 0.0  ;;  %v3366_v28 = vmul.f32 %v10321_v25, %v12002_v7  ;;  %v10472_v21 = vpop.permute.xlu1 %6724 }
 0x2eb   : > { %6889 = vrot.lane.b32.xlu0 %v6888_v10, %s7279_s16  ;;  %3142 = vst.msk [vmem:[#allocation2 + $0xa0] sm:$0xff] %vm2609_vm0, %v3070_v39  ;;  %v3071_v12 = vmax.f32 %v2995_v15, 0.0  ;;  %v4470_v40 = vpack.c.bf16 %v3499_v63, %v3498_v62  ;;  %v12008_v63 = vld [vmem:[#allocation60_spill] sm:$0xff] }
 0x2ec   : > { %6904 = vrot.lane.b32.xlu1 %v6903_v22, %s7278_s12  ;;  %3145 = vst.msk [vmem:[#allocation2 + $0xb8] sm:$0xff] %vm2609_vm0, %v3073_v1 }
 0x2ed   : > { %3143 = vst.msk [vmem:[#allocation2 + $0xa8] sm:$0xff] %vm2609_vm0, %v3071_v12 }
 0x2f0   : > { %5829 = vmatmul.mubr.msk.bf16.gmra.mrb[36].mxu0 %vm2609_vm0, %v4467_v3 }
 0x2f1   : > { %5832 = vmatprep.mubr.msk.bf16.mxu0 %vm2609_vm0, %v4470_v40  ;;  %v10427_v61 = vld [vmem:[#allocation2 + $0xb0] sm:$0xff] }
 0x2f2   : > { %v3303_v41 = vld [vmem:[#allocation2 + $0x99] sm:$0xff] }
 0x2f3   : > { %v10429_v17 = vld [vmem:[#allocation2 + $0xb8] sm:$0xff]  ;;  %v3367_v35 = vmul.f32 %v3303_v41, %v12003_v44  ;;  %v3503_v6 = vmul.f32 %v3303_v41, %v11993_v57  ;;  %v3435_v36 = vmul.f32 %v3303_v41, %v11998_v23  ;;  %v10461_v46 = vld [vmem:[#allocation2 + $0xa0] sm:$0xff] }
 0x2f4   : > { %v10437_v27 = vld [vmem:[#allocation2 + $0xb1] sm:$0xff]  ;;  %v6908_v9 = vpack.i.bf16 %v10429_v17, %v10427_v61  ;;  %v3304_v24 = vld [vmem:[#allocation2 + $0xa1] sm:$0xff]  ;;  %v3305_v30 = vld [vmem:[#allocation2 + $0xa9] sm:$0xff] }
 0x2f5   : > { %v6923_v4 = vpack.i.bf16 %v3367_v35, %v3366_v28  ;;  %v4476_v43 = vpack.c.bf16 %v3503_v6, %v3502_v50  ;;  %v3438_v2 = vmul.f32 %v10437_v27, %v12004_v58  ;;  %v6913_v57 = vpack.i.bf16 %v10348_v14, %v3435_v36  ;;  %v10452_v49 = vld [vmem:[#allocation2 + $0xa8] sm:$0xff]  ;;  %v10463_v60 = vld [vmem:[#allocation2 + $0x9f] sm:$0xff]  ;;  %v10484_v15 = vld [vmem:[#allocation2 + $0xb7] sm:$0xff] }
 0x2f6   : > { %6909 = vrot.lane.b32.xlu0 %v6908_v9, %s7278_s12  ;;  %v3504_v8 = vmul.f32 %v3304_v24, %v11994_v53  ;;  %v3505_v32 = vmul.f32 %v3305_v30, %v11998_v23  ;;  %v3436_v47 = vmul.f32 %v3304_v24, %v12002_v7  ;;  %v10457_v55 = vld [vmem:[#allocation2 + $0xa7] sm:$0xff]  ;;  %v3468_v26 = vmul.f32 %v10463_v60, %v11999_v54  ;;  %v10482_v39 = vld [vmem:[#allocation2 + $0xaf] sm:$0xff] }
 0x2f7   : > { %6924 = vrot.lane.b32.xlu1 %v6923_v4, %s7279_s16  ;;  %v6928_v25 = vpack.i.bf16 %v3438_v2, %v10313_v48  ;;  %v6918_v48 = vpack.i.bf16 %v10452_v49, %v10461_v46  ;;  %v3469_v53 = vmul.f32 %v10457_v55, %v12000_v20  ;;  %v3401_v29 = vmul.f32 %v10457_v55, %v12005_v31  ;;  %v12010_v28 = vld [vmem:[#allocation21_spill] sm:$0xff]  ;;  %v10508_v4 = vld [vmem:[%s11474_s2] ss:$0 sm:$0xff] }
 0x2f8   : > { %5833 = vmatmul.mubr.msk.bf16.gmra.mrb[40].mxu0 %vm2609_vm0, %v4473_v51  ;;  %v4479_v16 = vpack.c.bf16 %v3505_v32, %v3504_v8  ;;  %v6933_v23 = vpack.i.bf16 %v3436_v47, %v10338_v56  ;;  %v3400_v10 = vmul.f32 %v10463_v60, %v12006_v19  ;;  %v3437_v56 = vmul.f32 %v3305_v30, %v12003_v44 }
 0x2f9   : > { %5836 = vmatprep.mubr.msk.bf16.mxu0 %vm2609_vm0, %v4476_v43  ;;  %v6938_v0 = vpack.i.bf16 %v3469_v53, %v3468_v26  ;;  %12007 = vst [vmem:[#allocation56_spill] sm:$0xff] %v10482_v39  ;;  %v3368_v1 = vmul.f32 %v3304_v24, %v12004_v58  ;;  %v3369_v12 = vmul.f32 %v3305_v30, %v12008_v63  ;;  %v6692_v24 = vunpack.i.h.bf16 %v10330_v34  ;;  %v12011_v30 = vld [vmem:[#allocation7_spill] sm:$0xff] }
 0x2fa   : > { %6914 = vrot.lane.b32.xlu0 %v6913_v57, %s7277_s22  ;;  %v6953_v13 = vpack.i.bf16 %v3401_v29, %v3400_v10  ;;  %v3470_v3 = vmul.f32 %v10482_v39, %v12006_v19  ;;  %v3471_v40 = vmul.f32 %v10484_v15, %v12005_v31  ;;  %v6943_v45 = vpack.i.bf16 %v10311_v59, %v3437_v56  ;;  %v12012_v57 = vld [vmem:[#allocation81_spill] sm:$0xff] }
 0x2fb   : > { %6929 = vrot.lane.b32.xlu1 %v6928_v25, %s7277_s22  ;;  %v3402_v41 = vmul.f32 %v10482_v39, %v12009_v38  ;;  %v3403_v35 = vmul.f32 %v10484_v15, %v12010_v28  ;;  %v6958_v9 = vpack.i.bf16 %v3369_v12, %v3368_v1  ;;  %v3224_v51 = vmul.f32 %v10095_v18, %v11967_v42  ;;  %v12014_v1 = vld [vmem:[#allocation80_spill] sm:$0xff] }
 0x2fc   : > { %v3227_v25 = vmul.f32 %v12012_v57, %v12011_v30  ;;  %v6948_v42 = vpack.i.bf16 %v3471_v40, %v3470_v3  ;;  %v12015_v40 = vld [vmem:[#allocation8_spill] sm:$0xff]  ;;  %v3506_v30 = vmul.f32 %v10437_v27, %v12002_v7 }
 0x2fe   : > { %6919 = vrot.lane.b32.xlu0 %v6918_v48, %s7278_s12 }
 0x2ff   : > { %6934 = vrot.lane.b32.xlu1 %v6933_v23, %s7277_s22 }
 0x300   : > { %5837 = vmatmul.mubr.msk.bf16.gmra.mrb[44].mxu0 %vm2609_vm0, %v4479_v16  ;;  %v6963_v16 = vpack.i.bf16 %v3403_v35, %v3402_v41  ;;  %v12017_v35 = vld [vmem:[#allocation85_spill] sm:$0xff] }
 0x302   : > { %6939 = vrot.lane.b32.xlu0 %v6938_v0, %s7279_s16  ;;  %v6721_v0 = vunpack.i.l.bf16 %v10447_v37 }
 0x303   : > { %6954 = vrot.lane.b32.xlu1 %v6953_v13, %s7278_s12  ;;  %v12013_v13 = vld [vmem:[#allocation5_spill] sm:$0xff] }
 0x304   : > { %v10486_v22 = vpop.permute.xlu0 %6729  ;;  %v3225_v12 = vmul.f32 %v12014_v1, %v12013_v13 }
 0x305   : > { %v10490_v62 = vpop.permute.xlu1 %6744  ;;  %v5810_v6 = vpop.f32.mrb[20].mxu0 }
 0x306   : > { %v3016_v59 = vadd.f32 %v10508_v4, %v5810_v6  ;;  %v3007_v2 = vpop.f32.mrb[21].mxu0  ;;  %6944 = vrot.lane.b32.xlu0 %v6943_v45, %s7277_s22  ;;  %v12016_v45 = vld [vmem:[#allocation77_spill] sm:$0xff]  ;;  %v6722_v6 = vunpack.i.h.bf16 %v10447_v37  ;;  %v6746_v13 = vunpack.i.l.bf16 %v10490_v62 }
 0x307   : > { %v3008_v8 = vadd.f32 %v10508_v4, %v3007_v2  ;;  %v5811_v18 = vpop.f32.mrb[22].mxu0  ;;  %6959 = vrot.lane.b32.xlu1 %v6958_v9, %s7279_s16  ;;  %v3226_v41 = vmul.f32 %v12016_v45, %v12015_v40 }
 0x308   : > { %v6735_v50 = vpop.permute.xlu0 %6734  ;;  %v3076_v47 = vmax.f32 %v3016_v59, 0.0  ;;  %v3019_v48 = vadd.f32 %v10508_v4, %v5811_v18  ;;  %v3010_v53 = vpop.f32.mrb[23].mxu0  ;;  %v6726_v59 = vunpack.i.l.bf16 %v10472_v21 }
 0x309   : > { %v6737_v36 = vunpack.i.h.bf16 %v6735_v50  ;;  %v10511_v43 = vpop.permute.xlu1 %6749  ;;  %v6736_v32 = vunpack.i.l.bf16 %v6735_v50  ;;  %v3074_v34 = vmax.f32 %v3008_v8, 0.0  ;;  %v3011_v26 = vadd.f32 %v10508_v4, %v3010_v53 }
 0x30a   : > { %v6751_v29 = vunpack.i.l.bf16 %v10511_v43  ;;  %3148 = vst.msk [vmem:[#allocation2 + $0xd0] sm:$0xff] %vm2609_vm0, %v3076_v47  ;;  %v3077_v56 = vmax.f32 %v3019_v48, 0.0  ;;  %6949 = vrot.lane.b32.xlu0 %v6948_v42, %s7279_s16  ;;  %v4362_v50 = vsel %vm2609_vm0, %v12017_v35, %v6692_v24  ;;  %v12018_v24 = vld [vmem:[#allocation78_spill] sm:$0xff]  ;;  %v12019_v42 = vld [vmem:[#allocation61_spill] sm:$0xff] }
 0x30b   : > { %v4264_v23 = vsel %vm2609_vm0, %v3224_v51, %v6737_v36  ;;  %3146 = vst.msk [vmem:[#allocation2 + $0xc0] sm:$0xff] %vm2609_vm0, %v3074_v34  ;;  %v3075_v9 = vmax.f32 %v3011_v26, 0.0  ;;  %6964 = vrot.lane.b32.xlu1 %v6963_v16, %s7278_s12  ;;  %v6727_v51 = vunpack.i.h.bf16 %v10472_v21  ;;  %v4363_v37 = vsel %vm2609_vm0, %v12018_v24, %v6736_v32 }
 0x30c   : > { %v6740_v10 = vpop.permute.xlu0 %6739  ;;  %3149 = vst.msk [vmem:[#allocation2 + $0xd8] sm:$0xff] %vm2609_vm0, %v3077_v56  ;;  %v4297_v2 = vsel %vm4294_vm14, %v4264_v23, %v6721_v0  ;;  %v4267_v57 = vsel %vm2609_vm0, %v3227_v25, %v6751_v29  ;;  %v3370_v21 = vmul.f32 %v10437_v27, %v12019_v42  ;;  %v6747_v29 = vunpack.i.h.bf16 %v10490_v62 }
 0x30d   : > { %v6755_v3 = vpop.permute.xlu1 %6754  ;;  %3147 = vst.msk [vmem:[#allocation2 + $0xc8] sm:$0xff] %vm2609_vm0, %v3075_v9  ;;  %v6742_v47 = vunpack.i.h.bf16 %v6740_v10  ;;  %v6741_v23 = vunpack.i.l.bf16 %v6740_v10  ;;  %v4330_v32 = vsel %vm4327_vm15, %v4297_v2, %v6726_v59  ;;  %v6732_v27 = vunpack.i.h.bf16 %v10486_v22  ;;  %v12020_v9 = vld [vmem:[#allocation99_spill] sm:$0xff] }
 0x30e   : > { %v6756_v36 = vunpack.i.l.bf16 %v6755_v3  ;;  %v6757_v7 = vunpack.i.h.bf16 %v6755_v3  ;;  %v12021_v2 = vld [vmem:[#allocation67_spill] sm:$0xff] }
 0x310   : > { %v4265_v8 = vsel %vm2609_vm0, %v3225_v12, %v6756_v36  ;;  %v6760_v18 = vpop.permute.xlu0 %6759 }
 0x311   : > { %v6762_v48 = vunpack.i.h.bf16 %v6760_v18  ;;  %v6761_v53 = vunpack.i.l.bf16 %v6760_v18  ;;  %v4298_v16 = vsel %vm4294_vm14, %v4265_v8, %v6722_v6  ;;  %v6775_v34 = vpop.permute.xlu1 %6774  ;;  %v4300_v6 = vsel %vm4294_vm14, %v4267_v57, %v6747_v29 }
 0x312   : > { %v4331_v25 = vsel %vm4327_vm15, %v4298_v16, %v6727_v51  ;;  %v6777_v3 = vunpack.i.h.bf16 %v6775_v34  ;;  %v3307_v35 = vld [vmem:[#allocation2 + $0xb9] sm:$0xff]  ;;  %v10561_v51 = vld [vmem:[#allocation2 + $0xd0] sm:$0xff]  ;;  %v6776_v8 = vunpack.i.l.bf16 %v6775_v34 }
 0x313   : > { %v4394_v26 = vsel %vm4294_vm14, %v4362_v50, %v6761_v53  ;;  %v4395_v0 = vsel %vm4294_vm14, %v4363_v37, %v6762_v48  ;;  %v4459_v56 = vpack.c.bf16 %v4331_v25, %v4330_v32  ;;  %v4364_v50 = vsel %vm2609_vm0, %v12020_v9, %v6757_v7  ;;  %v10563_v59 = vld [vmem:[#allocation2 + $0xd8] sm:$0xff] }
 0x314   : > { %v6765_v1 = vpop.permute.xlu0 %6764  ;;  %v4426_v10 = vsel %vm4327_vm15, %v4394_v26, %v6741_v23  ;;  %v4427_v12 = vsel %vm4327_vm15, %v4395_v0, %v6742_v47  ;;  %v3507_v62 = vmul.f32 %v3307_v35, %v12003_v44  ;;  %v3371_v24 = vmul.f32 %v3307_v35, %v12021_v2  ;;  %v10567_v37 = vld [vmem:[#allocation2 + $0xd1] sm:$0xff]  ;;  %v3308_v47 = vld [vmem:[#allocation2 + $0xc1] sm:$0xff]  ;;  %v3309_v48 = vld [vmem:[#allocation2 + $0xc9] sm:$0xff] }
 0x315   : > { %v6767_v40 = vunpack.i.h.bf16 %v6765_v1  ;;  %v4460_v45 = vpack.c.bf16 %v4427_v12, %v4426_v10  ;;  %v6766_v36 = vunpack.i.l.bf16 %v6765_v1  ;;  %v6968_v57 = vpack.i.bf16 %v10563_v59, %v10561_v51  ;;  %v12023_v1 = vld [vmem:[#allocation86_spill] sm:$0xff] }
 0x316   : > { %v3439_v53 = vmul.f32 %v3307_v35, %v12008_v63  ;;  %v4482_v23 = vpack.c.bf16 %v3507_v62, %v3506_v30  ;;  %v6983_v7 = vpack.i.bf16 %v3371_v24, %v3370_v21  ;;  %v3508_v44 = vmul.f32 %v3308_v47, %v12004_v58  ;;  %v10593_v35 = vld [vmem:[#allocation2 + $0xc8] sm:$0xff]  ;;  %v12026_v24 = vld [vmem:[#allocation23_spill] sm:$0xff] }
 0x317   : > { %v4266_v18 = vsel %vm2609_vm0, %v3226_v41, %v6767_v40  ;;  %4743 = vmatprep.mubr.bf16.mxu1 %v4460_v45  ;;  %v3509_v32 = vmul.f32 %v3309_v48, %v12008_v63  ;;  %6969 = vrot.lane.b32.xlu0 %v6968_v57, %s7278_s12  ;;  %v12022_v41 = vld [vmem:[#allocation79_spill] sm:$0xff]  ;;  %v4333_v26 = vsel %vm4327_vm15, %v4300_v6, %v6777_v3  ;;  %v6731_v0 = vunpack.i.l.bf16 %v10486_v22  ;;  %v12027_v57 = vld [vmem:[#allocation24_spill] sm:$0xff] }
 0x318   : > { %v6770_v16 = vpop.permute.xlu0 %6769  ;;  %4744 = vmatmul.mubr.bf16.gmra.mrb[4].mxu1 %v4459_v56  ;;  %v3442_v29 = vmul.f32 %v10567_v37, %v12022_v41  ;;  %v4365_v56 = vsel %vm2609_vm0, %v12023_v1, %v6766_v36  ;;  %5840 = vmatprep.mubr.msk.bf16.mxu0 %vm2609_vm0, %v4482_v23  ;;  %v4299_v63 = vsel %vm4294_vm14, %v4266_v18, %v6746_v13  ;;  %v10595_v13 = vld [vmem:[#allocation2 + $0xc7] sm:$0xff]  ;;  %v10602_v36 = vld [vmem:[#allocation2 + $0xbf] sm:$0xff] }
 0x319   : > { %v6772_v25 = vunpack.i.h.bf16 %v6770_v16  ;;  %v6771_v34 = vunpack.i.l.bf16 %v6770_v16  ;;  %6984 = vrot.lane.b32.xlu1 %v6983_v7, %s7279_s16  ;;  %v4485_v58 = vpack.c.bf16 %v3509_v32, %v3508_v44  ;;  %v6973_v10 = vpack.i.bf16 %v10461_v46, %v3439_v53  ;;  %12024 = vst [vmem:[#allocation55_spill] sm:$0xff] %v10595_v13  ;;  %12025 = vst [vmem:[#allocation94_spill] sm:$0xff] %v10602_v36  ;;  %v10617_v16 = vpop.permute.xlu1 %6779 }
 0x31a   : > { %v4332_v12 = vsel %vm4327_vm15, %v4299_v63, %v6776_v8  ;;  %v6988_v22 = vpack.i.bf16 %v3442_v29, %v10429_v17  ;;  %v3440_v9 = vmul.f32 %v3308_v47, %v12019_v42  ;;  %v3405_v8 = vmul.f32 %v10595_v13, %v12026_v24  ;;  %v10622_v29 = vld [vmem:[#allocation2 + $0xcf] sm:$0xff] }
 0x31b   : > { %v4396_v30 = vsel %vm4294_vm14, %v4364_v50, %v6771_v34  ;;  %v4397_v21 = vsel %vm4294_vm14, %v4365_v56, %v6772_v25  ;;  %5841 = vmatmul.mubr.msk.bf16.gmra.mrb[48].mxu0 %vm2609_vm0, %v4485_v58  ;;  %v4462_v45 = vpack.c.bf16 %v4333_v26, %v4332_v12  ;;  %6974 = vrot.lane.b32.xlu0 %v6973_v10, %s7277_s22  ;;  %v10600_v50 = vld [vmem:[#allocation2 + $0xc0] sm:$0xff]  ;;  %v10624_v26 = vld [vmem:[#allocation2 + $0xd7] sm:$0xff] }
 0x31c   : > { %v4428_v3 = vsel %vm4327_vm15, %v4396_v30, %v6731_v0  ;;  %v4429_v40 = vsel %vm4327_vm15, %v4397_v21, %v6732_v27  ;;  %v6978_v17 = vpack.i.bf16 %v10593_v35, %v10600_v50  ;;  %v3473_v27 = vmul.f32 %v10595_v13, %v12010_v28  ;;  %v12028_v25 = vld [vmem:[#allocation87_spill] sm:$0xff]  ;;  %12029 = vst [vmem:[#allocation93_spill] sm:$0xff] %v10622_v29  ;;  %v12032_v63 = vld [vmem:[#allocation25_spill] sm:$0xff] }
 0x31d   : > { %v4463_v6 = vpack.c.bf16 %v4429_v40, %v4428_v3  ;;  %6989 = vrot.lane.b32.xlu1 %v6988_v22, %s7277_s22  ;;  %v6993_v62 = vpack.i.bf16 %v3440_v9, %v10452_v49  ;;  %v3472_v18 = vmul.f32 %v10602_v36, %v12009_v38  ;;  %v3404_v53 = vmul.f32 %v10602_v36, %v12027_v57  ;;  %v10637_v21 = vpop.permute.xlu1 %6784 }
 0x31e   : > { %v3441_v7 = vmul.f32 %v3309_v48, %v12021_v2  ;;  %v3372_v32 = vmul.f32 %v3308_v47, %v12022_v41  ;;  %v3373_v34 = vmul.f32 %v3309_v48, %v12028_v25  ;;  %12030 = vst [vmem:[#allocation58_spill] sm:$0xff] %v10624_v26  ;;  %v3474_v1 = vmul.f32 %v10622_v29, %v12027_v57  ;;  %v12031_v47 = vld [vmem:[#allocation26_spill] sm:$0xff] }
 0x31f   : > { %4751 = vmatprep.mubr.bf16.mxu1 %v4463_v6  ;;  %6979 = vrot.lane.b32.xlu0 %v6978_v17, %s7278_s12  ;;  %v6998_v23 = vpack.i.bf16 %v3473_v27, %v3472_v18  ;;  %v7013_v44 = vpack.i.bf16 %v3405_v8, %v3404_v53  ;;  %v3475_v56 = vmul.f32 %v10624_v26, %v12026_v24 }
 0x320   : > { %4752 = vmatmul.mubr.bf16.gmra.mrb[8].mxu1 %v4462_v45  ;;  %v7003_v0 = vpack.i.bf16 %v10427_v61, %v3441_v7  ;;  %v7018_v58 = vpack.i.bf16 %v3373_v34, %v3372_v32  ;;  %v3406_v48 = vmul.f32 %v10622_v29, %v12031_v47  ;;  %v3407_v30 = vmul.f32 %v10624_v26, %v12032_v63  ;;  %v12033_v34 = vld [vmem:[#allocation10_spill] sm:$0xff] }
 0x321   : > { %6994 = vrot.lane.b32.xlu1 %v6993_v62, %s7277_s22  ;;  %v7008_v40 = vpack.i.bf16 %v3475_v56, %v3474_v1  ;;  %v12035_v56 = vld [vmem:[#allocation11_spill] sm:$0xff] }
 0x322   : > { %v7023_v27 = vpack.i.bf16 %v3407_v30, %v3406_v48  ;;  %v7205_v30 = vld [vmem:[#allocation2 + $0x50] sm:$0xff] }
 0x323   : > { %6999 = vrot.lane.b32.xlu0 %v6998_v23, %s7279_s16  ;;  %v6752_v23 = vunpack.i.h.bf16 %v10511_v43 }
 0x325   : > { %7014 = vrot.lane.b32.xlu1 %v7013_v44, %s7278_s12  ;;  %v5814_v10 = vpop.f32.mrb[24].mxu0  ;;  %v4366_v43 = vsel %vm2609_vm0, %v7205_v30, %v6752_v23  ;;  %v6786_v23 = vunpack.i.l.bf16 %v10637_v21  ;;  %v7206_v30 = vld [vmem:[#allocation2 + $0x58] sm:$0xff] }
 0x326   : > { %v3032_v61 = vadd.f32 %v10508_v4, %v5814_v10  ;;  %v3023_v12 = vpop.f32.mrb[25].mxu0 }
 0x327   : > { %7004 = vrot.lane.b32.xlu0 %v7003_v0, %s7277_s22  ;;  %v3024_v22 = vadd.f32 %v10508_v4, %v3023_v12  ;;  %v5815_v3 = vpop.f32.mrb[26].mxu0  ;;  %v12034_v0 = vld [vmem:[#allocation100_spill] sm:$0xff]  ;;  %v12038_v12 = vld [vmem:[#allocation90_spill] sm:$0xff] }
 0x328   : > { %v3080_v45 = vmax.f32 %v3032_v61, 0.0  ;;  %v3035_v6 = vadd.f32 %v10508_v4, %v5815_v3  ;;  %v3026_v9 = vpop.f32.mrb[27].mxu0  ;;  %v3228_v1 = vmul.f32 %v12034_v0, %v12033_v34  ;;  %v12037_v61 = vld [vmem:[#allocation9_spill] sm:$0xff]  ;;  %v12039_v3 = vld [vmem:[#allocation12_spill] sm:$0xff] }
 0x329   : > { %7019 = vrot.lane.b32.xlu1 %v7018_v58, %s7279_s16  ;;  %v3078_v62 = vmax.f32 %v3024_v22, 0.0  ;;  %v3027_v8 = vadd.f32 %v10508_v4, %v3026_v9  ;;  %v12036_v58 = vld [vmem:[#allocation91_spill] sm:$0xff]  ;;  %v3229_v22 = vmul.f32 %v12038_v12, %v12037_v61  ;;  %v6781_v9 = vunpack.i.l.bf16 %v10617_v16  ;;  %v12041_v34 = vld [vmem:[#allocation97_spill] sm:$0xff] }
 0x32a   : > { %3152 = vst.msk [vmem:[#allocation2 + $0xf0] sm:$0xff] %vm2609_vm0, %v3080_v45  ;;  %v3081_v53 = vmax.f32 %v3035_v6, 0.0  ;;  %v3231_v48 = vmul.f32 %v12036_v58, %v12035_v56  ;;  %v6782_v6 = vunpack.i.h.bf16 %v10617_v16  ;;  %v10679_v0 = vmul.f32 %v10567_v37, %v12041_v34 }
 0x32b   : > { %v10644_v17 = vpop.permute.xlu0 %6789  ;;  %7009 = vrot.lane.b32.xlu0 %v7008_v40, %s7279_s16  ;;  %3150 = vst.msk [vmem:[#allocation2 + $0xe0] sm:$0xff] %vm2609_vm0, %v3078_v62  ;;  %v3079_v7 = vmax.f32 %v3027_v8, 0.0  ;;  %v12040_v40 = vld [vmem:[#allocation92_spill] sm:$0xff] }
 0x32c   : > { %v10647_v18 = vpop.permute.xlu1 %6804  ;;  %3153 = vst.msk [vmem:[#allocation2 + $0xf8] sm:$0xff] %vm2609_vm0, %v3081_v53  ;;  %v10667_v45 = vmul.f32 %v12040_v40, %v12039_v3  ;;  %v6787_v53 = vunpack.i.h.bf16 %v10637_v21 }
 0x32d   : > { %7024 = vrot.lane.b32.xlu1 %v7023_v27, %s7278_s12  ;;  %3151 = vst.msk [vmem:[#allocation2 + $0xe8] sm:$0xff] %vm2609_vm0, %v3079_v7 }
 0x32f   : > { %v6795_v44 = vpop.permute.xlu0 %6794 }
 0x330   : > { %v6797_v4 = vunpack.i.h.bf16 %v6795_v44  ;;  %v10656_v32 = vpop.permute.xlu1 %6809  ;;  %v6796_v10 = vunpack.i.l.bf16 %v6795_v44  ;;  %v3510_v44 = vmul.f32 %v10567_v37, %v12019_v42 }
 0x331   : > { %v6811_v62 = vunpack.i.l.bf16 %v10656_v32 }
 0x332   : > { %v4268_v27 = vsel %vm2609_vm0, %v3228_v1, %v6797_v4  ;;  %v3311_v58 = vld [vmem:[#allocation2 + $0xd9] sm:$0xff]  ;;  %v4367_v61 = vsel %vm2609_vm0, %v7206_v30, %v6796_v10 }
 0x333   : > { %v6800_v8 = vpop.permute.xlu0 %6799  ;;  %v3511_v21 = vmul.f32 %v3311_v58, %v12021_v2  ;;  %v3443_v12 = vmul.f32 %v3311_v58, %v12028_v25  ;;  %v10687_v42 = vld [vmem:[#allocation2 + $0xf1] sm:$0xff]  ;;  %v4301_v37 = vsel %vm4294_vm14, %v4268_v27, %v6781_v9  ;;  %v10691_v3 = vsel %vm2609_vm0, %v3231_v48, %v6811_v62  ;;  %v3184_v39 = vld [vmem:[#allocation2 + $0xdf] sm:$0xff] }
 0x334   : > { %v6815_v7 = vpop.permute.xlu1 %6814  ;;  %12042 = vst [vmem:[#allocation57_spill] sm:$0xff] %v10687_v42  ;;  %v6802_v40 = vunpack.i.h.bf16 %v6800_v8  ;;  %v6801_v56 = vunpack.i.l.bf16 %v6800_v8  ;;  %v12043_v4 = vld [vmem:[#allocation82_spill] sm:$0xff]  ;;  %v10695_v13 = vld [vmem:[#allocation2 + $0xe1] sm:$0xff]  ;;  %v10697_v10 = vld [vmem:[#allocation2 + $0xe9] sm:$0xff]  ;;  %v4334_v8 = vsel %vm4327_vm15, %v4301_v37, %v6786_v23 }
 0x335   : > { %v6816_v1 = vunpack.i.l.bf16 %v6815_v7  ;;  %v3446_v29 = vmul.f32 %v10687_v42, %v12043_v4  ;;  %v4488_v26 = vpack.c.bf16 %v3511_v21, %v3510_v44  ;;  %v7028_v36 = vpack.i.bf16 %v10600_v50, %v3443_v12  ;;  %v10704_v62 = vld [vmem:[#allocation2 + $0xe8] sm:$0xff] }
 0x336   : > { %v3512_v27 = vmul.f32 %v10695_v13, %v12022_v41  ;;  %v6817_v42 = vunpack.i.h.bf16 %v6815_v7  ;;  %v10714_v41 = vld [vmem:[#allocation2 + $0xe0] sm:$0xff] }
 0x337   : > { %v6820_v16 = vpop.permute.xlu0 %6819  ;;  %v4269_v9 = vsel %vm2609_vm0, %v3229_v22, %v6816_v1  ;;  %v7038_v48 = vpack.i.bf16 %v3446_v29, %v10563_v59  ;;  %5844 = vmatprep.mubr.msk.bf16.mxu0 %vm2609_vm0, %v4488_v26  ;;  %7029 = vrot.lane.b32.xlu0 %v7028_v36, %s7277_s22  ;;  %v3513_v22 = vmul.f32 %v10697_v10, %v12028_v25  ;;  %v3185_v21 = vld [vmem:[#allocation2 + $0xe7] sm:$0xff] }
 0x338   : > { %v6822_v2 = vunpack.i.h.bf16 %v6820_v16  ;;  %v6821_v30 = vunpack.i.l.bf16 %v6820_v16  ;;  %v6835_v29 = vpop.permute.xlu1 %6834  ;;  %v3476_v26 = vmul.f32 %v3184_v39, %v12031_v47  ;;  %v7033_v25 = vpack.i.bf16 %v10704_v62, %v10714_v41 }
 0x339   : > { %7039 = vrot.lane.b32.xlu1 %v7038_v48, %s7277_s22  ;;  %v4491_v36 = vpack.c.bf16 %v3513_v22, %v3512_v27  ;;  %v6837_v22 = vunpack.i.h.bf16 %v6835_v29 }
 0x33a   : > { %v4398_v57 = vsel %vm4294_vm14, %v4366_v43, %v6821_v30  ;;  %v4399_v16 = vsel %vm4294_vm14, %v4367_v61, %v6822_v2  ;;  %v3444_v43 = vmul.f32 %v10695_v13, %v12041_v34  ;;  %v4302_v2 = vsel %vm4294_vm14, %v4269_v9, %v6782_v6  ;;  %v12045_v30 = vld [vmem:[#allocation52_spill] sm:$0xff] }
 0x33b   : > { %v6825_v44 = vpop.permute.xlu0 %6824  ;;  %v4430_v23 = vsel %vm4327_vm15, %v4398_v57, %v6801_v56  ;;  %v4431_v7 = vsel %vm4327_vm15, %v4399_v16, %v6802_v40  ;;  %v12044_v57 = vld [vmem:[#allocation98_spill] sm:$0xff]  ;;  %v6806_v40 = vunpack.i.l.bf16 %v10647_v18  ;;  %v4368_v48 = vsel %vm2609_vm0, %v12045_v30, %v6817_v42  ;;  %5845 = vmatmul.mubr.msk.bf16.gmra.mrb[52].mxu0 %vm2609_vm0, %v4491_v36  ;;  %7034 = vrot.lane.b32.xlu0 %v7033_v25, %s7278_s12 }
 0x33c   : > { %v6827_v1 = vunpack.i.h.bf16 %v6825_v44  ;;  %v4466_v61 = vpack.c.bf16 %v4431_v7, %v4430_v23  ;;  %v6826_v12 = vunpack.i.l.bf16 %v6825_v44  ;;  %v7043_v37 = vpack.i.bf16 %v3444_v43, %v10593_v35  ;;  %v12046_v7 = vld [vmem:[#allocation27_spill] sm:$0xff] }
 0x33d   : > { %v3375_v56 = vmul.f32 %v3311_v58, %v12044_v57  ;;  %v4335_v16 = vsel %vm4327_vm15, %v4302_v2, %v6787_v53  ;;  %v6836_v44 = vunpack.i.l.bf16 %v6835_v29  ;;  %v3477_v9 = vmul.f32 %v3185_v21, %v12032_v63  ;;  %v10740_v53 = vpop.permute.xlu1 %6839  ;;  %v12047_v2 = vld [vmem:[#allocation28_spill] sm:$0xff] }
 0x33e   : > { %v4270_v27 = vsel %vm2609_vm0, %v10667_v45, %v6827_v1  ;;  %4759 = vmatprep.mubr.bf16.mxu1 %v4466_v61  ;;  %7044 = vrot.lane.b32.xlu1 %v7043_v37, %s7277_s22  ;;  %v4465_v58 = vpack.c.bf16 %v4335_v16, %v4334_v8  ;;  %v3445_v45 = vmul.f32 %v10697_v10, %v12044_v57  ;;  %v7207_v1 = vld [vmem:[#allocation2 + $0x68] sm:$0xff]  ;;  %v12048_v16 = vunpack.i.h.bf16 %v10647_v18 }
 0x33f   : > { %v6830_v6 = vpop.permute.xlu0 %6829  ;;  %v3409_v43 = vmul.f32 %v3185_v21, %v12046_v7  ;;  %v4369_v36 = vsel %vm2609_vm0, %v7207_v1, %v6826_v12  ;;  %v7048_v29 = vpack.i.bf16 %v3477_v9, %v3476_v26  ;;  %v7063_v25 = vpack.i.bf16 %v3375_v56, %v10679_v0  ;;  %v3186_v12 = vld [vmem:[#allocation2 + $0xef] sm:$0xff] }
 0x340   : > { %v6832_v23 = vunpack.i.h.bf16 %v6830_v6  ;;  %v6831_v42 = vunpack.i.l.bf16 %v6830_v6  ;;  %4760 = vmatmul.mubr.bf16.gmra.mrb[12].mxu1 %v4465_v58  ;;  %v4303_v8 = vsel %vm4294_vm14, %v4270_v27, %v6806_v40  ;;  %v3408_v30 = vmul.f32 %v3184_v39, %v12047_v2  ;;  %v3187_v6 = vld [vmem:[#allocation2 + $0xf7] sm:$0xff] }
 0x341   : > { %v4304_v21 = vsel %vm4294_vm14, %v10691_v3, %v12048_v16  ;;  %7049 = vrot.lane.b32.xlu0 %v7048_v29, %s7279_s16  ;;  %v12049_v0 = vunpack.i.l.bf16 %v10644_v17  ;;  %v12050_v56 = vunpack.i.h.bf16 %v10644_v17  ;;  %v4336_v39 = vsel %vm4327_vm15, %v4303_v8, %v6836_v44  ;;  %v12051_v17 = vld [vmem:[#allocation71_spill] sm:$0xff]  ;;  %v12052_v44 = vld [vmem:[#allocation30_spill] sm:$0xff] }
 0x342   : > { %v4400_v61 = vsel %vm4294_vm14, %v4368_v48, %v6831_v42  ;;  %v4401_v37 = vsel %vm4294_vm14, %v4369_v36, %v6832_v23  ;;  %7064 = vrot.lane.b32.xlu1 %v7063_v25, %s7279_s16  ;;  %v7053_v18 = vpack.i.bf16 %v10561_v51, %v3445_v45  ;;  %v7073_v3 = vpack.i.bf16 %v3409_v43, %v3408_v30  ;;  %v12053_v43 = vld [vmem:[#allocation29_spill] sm:$0xff]  ;;  %v10786_v8 = vld [vmem:[#allocation2 + $0xf8] sm:$0xff] }
 0x343   : > { %v4432_v26 = vsel %vm4327_vm15, %v4400_v61, %v12049_v0  ;;  %v4433_v40 = vsel %vm4327_vm15, %v4401_v37, %v12050_v56  ;;  %v4337_v27 = vsel %vm4327_vm15, %v4304_v21, %v6837_v22  ;;  %v3478_v9 = vmul.f32 %v3186_v12, %v12047_v2  ;;  %v6845_v22 = vpop.permute.xlu1 %6844  ;;  %12054 = vst [vmem:[#allocation96_spill] sm:$0xff] %v10786_v8  ;;  %v10791_v37 = vld [vmem:[#allocation2 + $0xf0] sm:$0xff] }
 0x344   : > { %v4469_v48 = vpack.c.bf16 %v4433_v40, %v4432_v26  ;;  %v4468_v58 = vpack.c.bf16 %v4337_v27, %v4336_v39  ;;  %v3479_v23 = vmul.f32 %v3187_v6, %v12046_v7  ;;  %v10766_v42 = vmul.f32 %v10695_v13, %v12043_v4  ;;  %12055 = vst [vmem:[#allocation95_spill] sm:$0xff] %v10791_v37 }
 0x345   : > { %v10770_v1 = vmul.f32 %v10697_v10, %v12051_v17  ;;  %v10773_v45 = vmul.f32 %v3186_v12, %v12052_v44  ;;  %v10776_v36 = vmul.f32 %v3187_v6, %v12053_v43  ;;  %7054 = vrot.lane.b32.xlu0 %v7053_v18, %s7277_s22  ;;  %v7068_v30 = vpack.i.bf16 %v10786_v8, %v10791_v37  ;;  %v7208_v6 = vld [vmem:[#allocation2 + $0x5f] sm:$0xff]  ;;  %v7212_v37 = vld [vmem:[#allocation2 + $0x77] sm:$0xff] }
 0x346   : > { %4767 = vmatprep.mubr.bf16.mxu1 %v4469_v48  ;;  %7074 = vrot.lane.b32.xlu1 %v7073_v3, %s7278_s12  ;;  %v7058_v10 = vpack.i.bf16 %v3479_v23, %v3478_v9  ;;  %v3232_v0 = vmul.f32 %v7208_v6, %v11990_v5  ;;  %v6812_v26 = vunpack.i.h.bf16 %v10656_v32  ;;  %v6841_v39 = vunpack.i.l.bf16 %v10740_v53  ;;  %v7209_v3 = vld [vmem:[#allocation2 + $0x67] sm:$0xff]  ;;  %v5041_v9 = vld [vmem:[%s11477_s5] sm:$0x3]  ;;  %v7210_v23 = vld [vmem:[#allocation2 + $0x70] sm:$0xff] }
 0x347   : > { %v3233_v27 = vmul.f32 %v7209_v3, %v11991_v11  ;;  %v6842_v32 = vunpack.i.h.bf16 %v10740_v53  ;;  %6019 = vmatprep.subr.msk.bf16.mxu0 %vm2889_vm4, %v5041_v9  ;;  %v7211_v3 = vld [vmem:[#allocation2 + $0x78] sm:$0xff] }
 0x348   : > { %4768 = vmatmul.mubr.bf16.gmra.mrb[16].mxu1 %v4468_v58  ;;  %v4370_v5 = vsel %vm2609_vm0, %v7210_v23, %v6812_v26 }
 0x349   : > { %v10784_v25 = vpop.permute.xlu0 %6849  ;;  %7059 = vrot.lane.b32.xlu0 %v7058_v10, %s7279_s16  ;;  %v6847_v10 = vunpack.i.h.bf16 %v6845_v22 }
 0x34a   : > { %v10789_v61 = vpop.permute.xlu1 %6864 }
 0x34d   : > { %v6855_v16 = vpop.permute.xlu0 %6854  ;;  %7069 = vrot.lane.b32.xlu0 %v7068_v30, %s7278_s12 }
 0x34e   : > { %v6857_v21 = vunpack.i.h.bf16 %v6855_v16  ;;  %v10796_v12 = vpop.permute.xlu1 %6869  ;;  %v6856_v18 = vunpack.i.l.bf16 %v6855_v16  ;;  %v6846_v16 = vunpack.i.l.bf16 %v6845_v22 }
 0x350   : > { %v4272_v56 = vsel %vm2609_vm0, %v3232_v0, %v6857_v21  ;;  %v6871_v21 = vunpack.i.l.bf16 %v10796_v12  ;;  %v5098_v0 = vsel %vm2889_vm4, %v5041_v9, 0  ;;  %v4371_v29 = vsel %vm2609_vm0, %v7211_v3, %v6856_v18  ;;  %v7213_v3 = vld [vmem:[#allocation2 + $0x6f] sm:$0xff] }
 0x351   : > { %v6860_v40 = vpop.permute.xlu0 %6859  ;;  %v4305_v30 = vsel %vm4294_vm14, %v4272_v56, %v6841_v39  ;;  %5857 = vmatpush3.bf16.msra.mxu0 %v5098_v0 }
 0x352   : > { %v6875_v48 = vpop.permute.xlu1 %6874  ;;  %v6862_v23 = vunpack.i.h.bf16 %v6860_v40  ;;  %v6861_v56 = vunpack.i.l.bf16 %v6860_v40  ;;  %v4338_v22 = vsel %vm4327_vm15, %v4305_v30, %v6846_v16 }
 0x353   : > { %v6876_v58 = vunpack.i.l.bf16 %v6875_v48 }
 0x355   : > { %v4273_v11 = vsel %vm2609_vm0, %v3233_v27, %v6876_v58  ;;  %v6880_v6 = vpop.permute.xlu0 %6879  ;;  %v3235_v27 = vmul.f32 %v7212_v37, %v11995_v33  ;;  %v6867_v33 = vunpack.i.h.bf16 %v10789_v61  ;;  %v6866_v37 = vunpack.i.l.bf16 %v10789_v61 }
 0x356   : > { %v6882_v13 = vunpack.i.h.bf16 %v6880_v6  ;;  %v6881_v26 = vunpack.i.l.bf16 %v6880_v6  ;;  %v4306_v53 = vsel %vm4294_vm14, %v4273_v11, %v6842_v32  ;;  %v6895_v39 = vpop.permute.xlu1 %6894  ;;  %v3234_v6 = vmul.f32 %v7213_v3, %v11996_v52 }
 0x357   : > { %v4339_v8 = vsel %vm4327_vm15, %v4306_v53, %v6847_v10  ;;  %v4275_v30 = vsel %vm2609_vm0, %v3235_v27, %v6871_v21  ;;  %v6897_v16 = vunpack.i.h.bf16 %v6895_v39  ;;  %v6852_v52 = vunpack.i.h.bf16 %v10784_v25  ;;  %v7214_v27 = vld [vmem:[#allocation2 + $0x88] sm:$0xff] }
 0x358   : > { %v4402_v58 = vsel %vm4294_vm14, %v4370_v5, %v6881_v26  ;;  %v4403_v9 = vsel %vm4294_vm14, %v4371_v29, %v6882_v13  ;;  %v4471_v18 = vpack.c.bf16 %v4339_v8, %v4338_v22  ;;  %v6877_v5 = vunpack.i.h.bf16 %v6875_v48 }
 0x359   : > { %v6885_v32 = vpop.permute.xlu0 %6884  ;;  %v4434_v11 = vsel %vm4327_vm15, %v4402_v58, %v6861_v56  ;;  %v4435_v40 = vsel %vm4327_vm15, %v4403_v9, %v6862_v23  ;;  %v6896_v29 = vunpack.i.l.bf16 %v6895_v39  ;;  %v4308_v21 = vsel %vm4294_vm14, %v4275_v30, %v6867_v33  ;;  %v7215_v33 = vld [vmem:[#allocation2 + $0x7f] sm:$0xff] }
 0x35a   : > { %v6887_v10 = vunpack.i.h.bf16 %v6885_v32  ;;  %v4472_v0 = vpack.c.bf16 %v4435_v40, %v4434_v11  ;;  %v6886_v13 = vunpack.i.l.bf16 %v6885_v32  ;;  %v4341_v61 = vsel %vm4327_vm15, %v4308_v21, %v6897_v16 }
 0x35b   : > { %v6851_v48 = vunpack.i.l.bf16 %v10784_v25  ;;  %v4372_v39 = vsel %vm2609_vm0, %v10348_v14, %v6877_v5  ;;  %v6872_v5 = vunpack.i.h.bf16 %v10796_v12 }
 0x35c   : > { %v4274_v8 = vsel %vm2609_vm0, %v3234_v6, %v6887_v10  ;;  %4775 = vmatprep.mubr.bf16.mxu1 %v4472_v0  ;;  %v4373_v58 = vsel %vm2609_vm0, %v7214_v27, %v6886_v13 }
 0x35d   : > { %v6890_v26 = vpop.permute.xlu0 %6889  ;;  %4776 = vmatmul.mubr.bf16.gmra.mrb[20].mxu1 %v4471_v18  ;;  %v4307_v53 = vsel %vm4294_vm14, %v4274_v8, %v6866_v37  ;;  %v6900_v18 = vpop.permute.xlu1 %6899  ;;  %v3236_v37 = vmul.f32 %v7215_v33, %v11999_v54 }
 0x35e   : > { %v6892_v23 = vunpack.i.h.bf16 %v6890_v26  ;;  %v6891_v56 = vunpack.i.l.bf16 %v6890_v26  ;;  %v4340_v22 = vsel %vm4327_vm15, %v4307_v53, %v6896_v29  ;;  %v6901_v8 = vunpack.i.l.bf16 %v6900_v18  ;;  %v7216_v53 = vld [vmem:[#allocation2 + $0x87] sm:$0xff] }
 0x35f   : > { %v4474_v9 = vpack.c.bf16 %v4341_v61, %v4340_v22  ;;  %v3237_v21 = vmul.f32 %v7216_v53, %v12000_v20  ;;  %v6902_v61 = vunpack.i.h.bf16 %v6900_v18 }
 0x360   : > { %v4404_v3 = vsel %vm4294_vm14, %v4372_v39, %v6891_v56  ;;  %v4405_v6 = vsel %vm4294_vm14, %v4373_v58, %v6892_v23  ;;  %v7217_v56 = vld [vmem:[#allocation2 + $0x90] sm:$0xff] }
 0x361   : > { %v4436_v32 = vsel %vm4327_vm15, %v4404_v3, %v6851_v48  ;;  %v4437_v11 = vsel %vm4327_vm15, %v4405_v6, %v6852_v52  ;;  %v6905_v25 = vpop.permute.xlu1 %6904  ;;  %v4374_v22 = vsel %vm2609_vm0, %v7217_v56, %v6872_v5 }
 0x362   : > { %v4475_v40 = vpack.c.bf16 %v4437_v11, %v4436_v32  ;;  %v6907_v39 = vunpack.i.h.bf16 %v6905_v25  ;;  %v6906_v54 = vunpack.i.l.bf16 %v6905_v25  ;;  %v7219_v25 = vld [vmem:[#allocation2 + $0x97] sm:$0xff] }
 0x363   : > { %v3239_v33 = vmul.f32 %v7219_v25, %v12005_v31 }
 0x364   : > { %4783 = vmatprep.mubr.bf16.mxu1 %v4475_v40 }
 0x365   : > { %4784 = vmatmul.mubr.bf16.gmra.mrb[24].mxu1 %v4474_v9  ;;  %v7218_v9 = vld [vmem:[#allocation2 + $0x98] sm:$0xff] }
 0x368   : > { %v10840_v30 = vpop.permute.xlu0 %6909 }
 0x369   : > { %v6925_v14 = vpop.permute.xlu1 %6924 }
 0x36a   : > { %v6926_v31 = vunpack.i.l.bf16 %v6925_v14 }
 0x36c   : > { %v6915_v16 = vpop.permute.xlu0 %6914 }
 0x36d   : > { %v6917_v10 = vunpack.i.h.bf16 %v6915_v16  ;;  %v10842_v0 = vpop.permute.xlu1 %6929  ;;  %v6916_v52 = vunpack.i.l.bf16 %v6915_v16 }
 0x36e   : > { %v6931_v12 = vunpack.i.l.bf16 %v10842_v0 }
 0x36f   : > { %v4276_v13 = vsel %vm2609_vm0, %v3236_v37, %v6917_v10  ;;  %v4375_v3 = vsel %vm2609_vm0, %v7218_v9, %v6916_v52 }
 0x370   : > { %v6920_v29 = vpop.permute.xlu0 %6919  ;;  %v4309_v48 = vsel %vm4294_vm14, %v4276_v13, %v6901_v8  ;;  %v7220_v8 = vld [vmem:[#allocation2 + $0x8f] sm:$0xff] }
 0x371   : > { %v6935_v26 = vpop.permute.xlu1 %6934  ;;  %v6922_v11 = vunpack.i.h.bf16 %v6920_v29  ;;  %v6921_v40 = vunpack.i.l.bf16 %v6920_v29  ;;  %v4342_v18 = vsel %vm4327_vm15, %v4309_v48, %v6906_v54  ;;  %v3238_v52 = vmul.f32 %v7220_v8, %v12006_v19 }
 0x372   : > { %v6936_v23 = vunpack.i.l.bf16 %v6935_v26  ;;  %v6937_v54 = vunpack.i.h.bf16 %v6935_v26  ;;  %v6912_v19 = vunpack.i.h.bf16 %v10840_v30  ;;  %v6911_v26 = vunpack.i.l.bf16 %v10840_v30 }
 0x374   : > { %v4277_v27 = vsel %vm2609_vm0, %v3237_v21, %v6936_v23  ;;  %v6940_v58 = vpop.permute.xlu0 %6939  ;;  %v4279_v23 = vsel %vm2609_vm0, %v3239_v33, %v6931_v12 }
 0x375   : > { %v6942_v6 = vunpack.i.h.bf16 %v6940_v58  ;;  %v6941_v32 = vunpack.i.l.bf16 %v6940_v58  ;;  %v4310_v20 = vsel %vm4294_vm14, %v4277_v27, %v6902_v61  ;;  %v6955_v16 = vpop.permute.xlu1 %6954 }
 0x376   : > { %v4343_v10 = vsel %vm4327_vm15, %v4310_v20, %v6907_v39  ;;  %v6957_v56 = vunpack.i.h.bf16 %v6955_v16  ;;  %v6927_v39 = vunpack.i.h.bf16 %v6925_v14  ;;  %v6956_v27 = vunpack.i.l.bf16 %v6955_v16 }
 0x377   : > { %v4406_v37 = vsel %vm4294_vm14, %v4374_v22, %v6941_v32  ;;  %v4407_v5 = vsel %vm4294_vm14, %v4375_v3, %v6942_v6  ;;  %v4477_v13 = vpack.c.bf16 %v4343_v10, %v4342_v18 }
 0x378   : > { %v6945_v53 = vpop.permute.xlu0 %6944  ;;  %v4438_v21 = vsel %vm4327_vm15, %v4406_v37, %v6921_v40  ;;  %v4439_v29 = vsel %vm4327_vm15, %v4407_v5, %v6922_v11  ;;  %v4312_v6 = vsel %vm4294_vm14, %v4279_v23, %v6927_v39  ;;  %v4376_v11 = vsel %vm2609_vm0, %v10461_v46, %v6937_v54  ;;  %v7221_v54 = vld [vmem:[#allocation2 + $0xb0] sm:$0xff] }
 0x379   : > { %v6947_v61 = vunpack.i.h.bf16 %v6945_v53  ;;  %v4478_v48 = vpack.c.bf16 %v4439_v29, %v4438_v21  ;;  %v6946_v22 = vunpack.i.l.bf16 %v6945_v53  ;;  %v4345_v14 = vsel %vm4327_vm15, %v4312_v6, %v6957_v56  ;;  %v6960_v18 = vpop.permute.xlu1 %6959 }
 0x37a   : > { %v3240_v53 = vmul.f32 %v10463_v60, %v12009_v38  ;;  %v6932_v21 = vunpack.i.h.bf16 %v10842_v0  ;;  %v6961_v56 = vunpack.i.l.bf16 %v6960_v18  ;;  %v3241_v39 = vmul.f32 %v10457_v55, %v12010_v28 }
 0x37b   : > { %v4278_v58 = vsel %vm2609_vm0, %v3238_v52, %v6947_v61  ;;  %4791 = vmatprep.mubr.bf16.mxu1 %v4478_v48  ;;  %v4377_v40 = vsel %vm2609_vm0, %v10452_v49, %v6946_v22 }
 0x37c   : > { %v6950_v9 = vpop.permute.xlu0 %6949  ;;  %4792 = vmatmul.mubr.bf16.gmra.mrb[28].mxu1 %v4477_v13  ;;  %v4311_v3 = vsel %vm4294_vm14, %v4278_v58, %v6926_v31  ;;  %v4378_v22 = vsel %vm2609_vm0, %v7221_v54, %v6932_v21 }
 0x37d   : > { %v6952_v12 = vunpack.i.h.bf16 %v6950_v9  ;;  %v6951_v32 = vunpack.i.l.bf16 %v6950_v9  ;;  %v4344_v20 = vsel %vm4327_vm15, %v4311_v3, %v6956_v27  ;;  %v6965_v30 = vpop.permute.xlu1 %6964  ;;  %v6962_v27 = vunpack.i.h.bf16 %v6960_v18  ;;  %v7222_v3 = vld [vmem:[#allocation2 + $0xb8] sm:$0xff] }
 0x37e   : > { %v4480_v16 = vpack.c.bf16 %v4345_v14, %v4344_v20  ;;  %v6966_v60 = vunpack.i.l.bf16 %v6965_v30 }
 0x37f   : > { %v4408_v10 = vsel %vm4294_vm14, %v4376_v11, %v6951_v32  ;;  %v4409_v25 = vsel %vm4294_vm14, %v4377_v40, %v6952_v12  ;;  %v3243_v40 = vmul.f32 %v10484_v15, %v12026_v24 }
 0x380   : > { %v4440_v33 = vsel %vm4327_vm15, %v4408_v10, %v6911_v26  ;;  %v4441_v37 = vsel %vm4327_vm15, %v4409_v25, %v6912_v19  ;;  %v6967_v19 = vunpack.i.h.bf16 %v6965_v30  ;;  %v12056_v25 = vld [vmem:[#allocation24_spill] sm:$0xff] }
 0x381   : > { %v4481_v5 = vpack.c.bf16 %v4441_v37, %v4440_v33  ;;  %v12057_v33 = vld [vmem:[#allocation56_spill] sm:$0xff] }
 0x382   : > { %v3242_v37 = vmul.f32 %v12057_v33, %v12056_v25 }
 0x383   : > { %4799 = vmatprep.mubr.bf16.mxu1 %v4481_v5 }
 0x384   : > { %4800 = vmatmul.mubr.bf16.gmra.mrb[32].mxu1 %v4480_v16 }
 0x389   : > { %v10878_v13 = vpop.permute.xlu0 %6969 }
 0x38b   : > { %v6985_v46 = vpop.permute.xlu1 %6984 }
 0x38c   : > { %v6986_v15 = vunpack.i.l.bf16 %v6985_v46 }
 0x38d   : > { %v6975_v8 = vpop.permute.xlu0 %6974 }
 0x38e   : > { %v6977_v52 = vunpack.i.h.bf16 %v6975_v8  ;;  %v6976_v61 = vunpack.i.l.bf16 %v6975_v8 }
 0x38f   : > { %v10880_v49 = vpop.permute.xlu1 %6989 }
 0x390   : > { %v4280_v29 = vsel %vm2609_vm0, %v3240_v53, %v6977_v52  ;;  %v6991_v38 = vunpack.i.l.bf16 %v10880_v49  ;;  %v4379_v6 = vsel %vm2609_vm0, %v7222_v3, %v6976_v61 }
 0x391   : > { %v6980_v23 = vpop.permute.xlu0 %6979  ;;  %v4313_v58 = vsel %vm4294_vm14, %v4280_v29, %v6961_v56 }
 0x392   : > { %v6982_v28 = vunpack.i.h.bf16 %v6980_v23  ;;  %v6981_v20 = vunpack.i.l.bf16 %v6980_v23  ;;  %v4346_v26 = vsel %vm4327_vm15, %v4313_v58, %v6966_v60  ;;  %v4283_v52 = vsel %vm2609_vm0, %v3243_v40, %v6991_v38 }
 0x393   : > { %v6995_v48 = vpop.permute.xlu1 %6994  ;;  %v6987_v23 = vunpack.i.h.bf16 %v6985_v46 }
 0x394   : > { %v6996_v31 = vunpack.i.l.bf16 %v6995_v48  ;;  %v6997_v24 = vunpack.i.h.bf16 %v6995_v48  ;;  %v6971_v48 = vunpack.i.l.bf16 %v10878_v13 }
 0x395   : > { %v7000_v9 = vpop.permute.xlu0 %6999 }
 0x396   : > { %v4281_v0 = vsel %vm2609_vm0, %v3241_v39, %v6996_v31  ;;  %v7002_v12 = vunpack.i.h.bf16 %v7000_v9  ;;  %v7001_v32 = vunpack.i.l.bf16 %v7000_v9  ;;  %v6972_v31 = vunpack.i.h.bf16 %v10878_v13 }
 0x397   : > { %v4314_v55 = vsel %vm4294_vm14, %v4281_v0, %v6962_v27  ;;  %v7015_v14 = vpop.permute.xlu1 %7014  ;;  %v4316_v27 = vsel %vm4294_vm14, %v4283_v52, %v6987_v23  ;;  %v4380_v38 = vsel %vm2609_vm0, %v10600_v50, %v6997_v24 }
 0x398   : > { %v4347_v11 = vsel %vm4327_vm15, %v4314_v55, %v6967_v19  ;;  %v4410_v16 = vsel %vm4294_vm14, %v4378_v22, %v7001_v32  ;;  %v4411_v18 = vsel %vm4294_vm14, %v4379_v6, %v7002_v12  ;;  %v7017_v53 = vunpack.i.h.bf16 %v7015_v14 }
 0x399   : > { %v4483_v10 = vpack.c.bf16 %v4347_v11, %v4346_v26  ;;  %v7005_v5 = vpop.permute.xlu0 %7004  ;;  %v4442_v30 = vsel %vm4327_vm15, %v4410_v16, %v6981_v20  ;;  %v4443_v8 = vsel %vm4327_vm15, %v4411_v18, %v6982_v28  ;;  %v7016_v61 = vunpack.i.l.bf16 %v7015_v14  ;;  %v12058_v26 = vld [vmem:[#allocation94_spill] sm:$0xff] }
 0x39a   : > { %v7007_v21 = vunpack.i.h.bf16 %v7005_v5  ;;  %v4484_v29 = vpack.c.bf16 %v4443_v8, %v4442_v30  ;;  %v7006_v56 = vunpack.i.l.bf16 %v7005_v5  ;;  %v4349_v46 = vsel %vm4327_vm15, %v4316_v27, %v7017_v53  ;;  %v12060_v30 = vld [vmem:[#allocation55_spill] sm:$0xff] }
 0x39b   : > { %v7020_v55 = vpop.permute.xlu1 %7019  ;;  %v3244_v11 = vmul.f32 %v12058_v26, %v12031_v47  ;;  %v3245_v8 = vmul.f32 %v12060_v30, %v12032_v63 }
 0x39c   : > { %v4282_v39 = vsel %vm2609_vm0, %v3242_v37, %v7007_v21  ;;  %4807 = vmatprep.mubr.bf16.mxu1 %v4484_v29  ;;  %v4381_v0 = vsel %vm2609_vm0, %v10593_v35, %v7006_v56  ;;  %v6992_v35 = vunpack.i.h.bf16 %v10880_v49  ;;  %v7021_v33 = vunpack.i.l.bf16 %v7020_v55  ;;  %v12059_v37 = vld [vmem:[#allocation58_spill] sm:$0xff]  ;;  %v12061_v21 = vld [vmem:[#allocation93_spill] sm:$0xff] }
 0x39d   : > { %v7010_v54 = vpop.permute.xlu0 %7009  ;;  %4808 = vmatmul.mubr.bf16.gmra.mrb[36].mxu1 %v4483_v10  ;;  %v4315_v22 = vsel %vm4294_vm14, %v4282_v39, %v6986_v15  ;;  %v3247_v5 = vmul.f32 %v12059_v37, %v12046_v7  ;;  %v7022_v52 = vunpack.i.h.bf16 %v7020_v55  ;;  %v3246_v29 = vmul.f32 %v12061_v21, %v12047_v2 }
 0x39e   : > { %v7012_v58 = vunpack.i.h.bf16 %v7010_v54  ;;  %v7011_v19 = vunpack.i.l.bf16 %v7010_v54  ;;  %v4348_v60 = vsel %vm4327_vm15, %v4315_v22, %v7016_v61  ;;  %v4382_v47 = vsel %vm2609_vm0, %v10561_v51, %v6992_v35  ;;  %v7223_v51 = vld [vmem:[%s11474_s2] ss:$0 sm:$0xff] }
 0x39f   : > { %v4486_v9 = vpack.c.bf16 %v4349_v46, %v4348_v60  ;;  %v7025_v13 = vpop.permute.xlu1 %7024 }
 0x3a0   : > { %v4412_v3 = vsel %vm4294_vm14, %v4380_v38, %v7011_v19  ;;  %v4413_v6 = vsel %vm4294_vm14, %v4381_v0, %v7012_v58  ;;  %v7027_v53 = vunpack.i.h.bf16 %v7025_v13  ;;  %v7026_v23 = vunpack.i.l.bf16 %v7025_v13 }
 0x3a1   : > { %v4444_v12 = vsel %vm4327_vm15, %v4412_v3, %v6971_v48  ;;  %v4445_v32 = vsel %vm4327_vm15, %v4413_v6, %v6972_v31 }
 0x3a2   : > { %v4487_v28 = vpack.c.bf16 %v4445_v32, %v4444_v12 }
 0x3a4   : > { %4815 = vmatprep.mubr.bf16.mxu1 %v4487_v28 }
 0x3a5   : > { %4816 = vmatmul.mubr.bf16.gmra.mrb[40].mxu1 %v4486_v9 }
 0x3a9   : > { %v7030_v20 = vpop.permute.xlu0 %7029 }
 0x3aa   : > { %v7032_v14 = vunpack.i.h.bf16 %v7030_v20  ;;  %v7031_v40 = vunpack.i.l.bf16 %v7030_v20 }
 0x3ab   : > { %v10920_v50 = vpop.permute.xlu1 %7039 }
 0x3ac   : > { %v4284_v18 = vsel %vm2609_vm0, %v3244_v11, %v7032_v14  ;;  %v7041_v10 = vunpack.i.l.bf16 %v10920_v50  ;;  %v4383_v15 = vsel %vm2609_vm0, %v10563_v59, %v7031_v40 }
 0x3ad   : > { %v7035_v16 = vpop.permute.xlu0 %7034  ;;  %v4317_v56 = vsel %vm4294_vm14, %v4284_v18, %v7021_v33 }
 0x3ae   : > { %v4287_v63 = vsel %vm2609_vm0, %v3247_v5, %v7041_v10  ;;  %v7037_v61 = vunpack.i.h.bf16 %v7035_v16  ;;  %v7036_v22 = vunpack.i.l.bf16 %v7035_v16  ;;  %v4350_v0 = vsel %vm4327_vm15, %v4317_v56, %v7026_v23 }
 0x3b0   : > { %v10927_v25 = vpop.permute.xlu1 %7044 }
 0x3b1   : > { %v7046_v49 = vunpack.i.l.bf16 %v10927_v25 }
 0x3b3   : > { %v4285_v24 = vsel %vm2609_vm0, %v3245_v8, %v7046_v49  ;;  %v5818_v7 = vpop.f32.mrb[28].mxu0  ;;  %v7050_v39 = vpop.permute.xlu0 %7049 }
 0x3b4   : > { %v3048_v31 = vadd.f32 %v7223_v51, %v5818_v7  ;;  %v7065_v54 = vpop.permute.xlu1 %7064  ;;  %v4318_v2 = vsel %vm4294_vm14, %v4285_v24, %v7022_v52  ;;  %v7052_v27 = vunpack.i.h.bf16 %v7050_v39  ;;  %v7051_v59 = vunpack.i.l.bf16 %v7050_v39  ;;  %v3039_v19 = vpop.f32.mrb[29].mxu0 }
 0x3b5   : > { %v7067_v58 = vunpack.i.h.bf16 %v7065_v54  ;;  %v7066_v46 = vunpack.i.l.bf16 %v7065_v54  ;;  %v3040_v48 = vadd.f32 %v7223_v51, %v3039_v19  ;;  %v5819_v38 = vpop.f32.mrb[30].mxu0  ;;  %v4351_v32 = vsel %vm4327_vm15, %v4318_v2, %v7027_v53 }
 0x3b6   : > { %v3084_v60 = vmax.f32 %v3048_v31, 0.0  ;;  %v4414_v9 = vsel %vm4294_vm14, %v4382_v47, %v7051_v59  ;;  %v4415_v3 = vsel %vm4294_vm14, %v4383_v15, %v7052_v27  ;;  %v3051_v6 = vadd.f32 %v7223_v51, %v5819_v38  ;;  %v3042_v12 = vpop.f32.mrb[31].mxu0 }
 0x3b7   : > { %v3082_v55 = vmax.f32 %v3040_v48, 0.0  ;;  %v3043_v28 = vadd.f32 %v7223_v51, %v3042_v12  ;;  %v7055_v13 = vpop.permute.xlu0 %7054  ;;  %v4446_v14 = vsel %vm4327_vm15, %v4414_v9, %v7036_v22  ;;  %v4447_v35 = vsel %vm4327_vm15, %v4415_v3, %v7037_v61  ;;  %v5595_v18 = vpop.f32.mrb[0].mxu1  ;;  %v12062_v51 = vld [vmem:[#allocation57_spill] sm:$0xff]  ;;  %v12064_v12 = vld [vmem:[#allocation72_spill] sm:$0xff] }
 0x3b8   : > { %3156 = vst.msk [vmem:[#allocation2 + $0x110] sm:$0xff] %vm2609_vm0, %v3084_v60  ;;  %v7075_v20 = vpop.permute.xlu1 %7074  ;;  %v4320_v26 = vsel %vm4294_vm14, %v4287_v63, %v7067_v58  ;;  %v3085_v11 = vmax.f32 %v3051_v6, 0.0  ;;  %v7057_v40 = vunpack.i.h.bf16 %v7055_v13  ;;  %v5596_v37 = vpop.f32.mrb[1].mxu1  ;;  %v4490_v5 = vpack.c.bf16 %v4447_v35, %v4446_v14  ;;  %v12063_v3 = vld [vmem:[#allocation73_spill] sm:$0xff] }
 0x3b9   : > { %v7077_v16 = vunpack.i.h.bf16 %v7075_v20  ;;  %3154 = vst.msk [vmem:[#allocation2 + $0x100] sm:$0xff] %vm2609_vm0, %v3082_v55  ;;  %v3083_v10 = vmax.f32 %v3043_v28, 0.0  ;;  %v7076_v33 = vunpack.i.l.bf16 %v7075_v20  ;;  %v4489_v30 = vpack.c.bf16 %v4351_v32, %v4350_v0  ;;  %v5598_v47 = vpop.f32.mrb[2].mxu1 }
 0x3ba   : > { %3157 = vst.msk [vmem:[#allocation2 + $0x118] sm:$0xff] %vm2609_vm0, %v3085_v11  ;;  %v4286_v8 = vsel %vm2609_vm0, %v3246_v29, %v7057_v40  ;;  %v10958_v49 = vadd.f32 %v5596_v37, %v5595_v18  ;;  %4823 = vmatprep.mubr.bf16.mxu1 %v4490_v5  ;;  %v5599_v21 = vpop.f32.mrb[3].mxu1  ;;  %v7047_v15 = vunpack.i.h.bf16 %v10927_v25  ;;  %v7056_v24 = vunpack.i.l.bf16 %v7055_v13  ;;  %v12065_v37 = vld [vmem:[#allocation74_spill] sm:$0xff] }
 0x3bb   : > { %v4353_v52 = vsel %vm4327_vm15, %v4320_v26, %v7077_v16  ;;  %3155 = vst.msk [vmem:[#allocation2 + $0x108] sm:$0xff] %vm2609_vm0, %v3083_v10  ;;  %v7060_v53 = vpop.permute.xlu0 %7059  ;;  %v4319_v23 = vsel %vm4294_vm14, %v4286_v8, %v7066_v46  ;;  %4824 = vmatmul.mubr.bf16.gmra.mrb[44].mxu1 %v4489_v30  ;;  %v10964_v7 = vadd.f32 %v5599_v21, %v5598_v47  ;;  %v3489_v16 = vld [vmem:[#allocation2 + $0x129] sm:$0xff] }
 0x3bc   : > { %v4352_v29 = vsel %vm4327_vm15, %v4319_v23, %v7076_v33  ;;  %v7062_v56 = vunpack.i.h.bf16 %v7060_v53  ;;  %v7061_v63 = vunpack.i.l.bf16 %v7060_v53  ;;  %v3514_v31 = vmul.f32 %v12062_v51, %v12041_v34 }
 0x3bd   : > { %v4492_v61 = vpack.c.bf16 %v4353_v52, %v4352_v29  ;;  %v4384_v54 = vsel %vm2609_vm0, %v10714_v41, %v7047_v15  ;;  %v4385_v2 = vsel %vm2609_vm0, %v10704_v62, %v7056_v24  ;;  %v3521_v5 = vmul.f32 %v3489_v16, %v12065_v37  ;;  %v7224_v15 = vld [vmem:[%s7535_s24 + $0x20] sm:$0xff]  ;;  %v7225_v24 = vld [vmem:[%s7535_s24 + $0x28] sm:$0xff] }
 0x3be   : > { %v4416_v59 = vsel %vm4294_vm14, %v4384_v54, %v7061_v63  ;;  %v4417_v58 = vsel %vm4294_vm14, %v4385_v2, %v7062_v56  ;;  %v12067_v47 = vpack.i.bf16 %v10770_v1, %v10766_v42  ;;  %v5025_v29 = vpack.c.bf16 %v7225_v24, %v7224_v15  ;;  %v12069_v63 = vld [vmem:[#allocation95_spill] sm:$0xff] }
 0x3bf   : > { %v7070_v39 = vpop.permute.xlu0 %7069  ;;  %v12068_v1 = vpack.i.bf16 %v10776_v36, %v10773_v45  ;;  %v12071_v54 = vld [vmem:[#allocation31_spill] sm:$0xff]  ;;  %v7226_v36 = vld [vmem:[%s7535_s24 + $0x30] sm:$0xff] }
 0x3c0   : > { %v7072_v25 = vunpack.i.h.bf16 %v7070_v39  ;;  %v7071_v22 = vunpack.i.l.bf16 %v7070_v39  ;;  %v3315_v27 = vld [vmem:[#allocation2 + $0xf9] sm:$0xff]  ;;  %v12070_v39 = vld [vmem:[#allocation32_spill] sm:$0xff] }
 0x3c1   : > { %v3515_v19 = vmul.f32 %v3315_v27, %v12044_v57  ;;  %v3447_v60 = vmul.f32 %v3315_v27, %v12051_v17  ;;  %v3418_v46 = vld [vmem:[#allocation2 + $0x111] sm:$0xff]  ;;  %v10977_v48 = vld [vmem:[#allocation2 + $0x119] sm:$0xff] }
 0x3c2   : > { %v4448_v34 = vsel %vm4327_vm15, %v4416_v59, %v7071_v22  ;;  %v4449_v38 = vsel %vm4327_vm15, %v4417_v58, %v7072_v25  ;;  %v10981_v0 = vld [vmem:[#allocation2 + $0x101] sm:$0xff]  ;;  %v10983_v9 = vld [vmem:[#allocation2 + $0x109] sm:$0xff]  ;;  %v3518_v6 = vmul.f32 %v3418_v46, %v12063_v3  ;;  %v3519_v32 = vmul.f32 %v10977_v48, %v12064_v12  ;;  %v11026_v23 = vld [vmem:[#allocation2 + $0x117] sm:$0xff] }
 0x3c3   : > { %v10988_v55 = vld [vmem:[#allocation2 + $0x107] sm:$0xff]  ;;  %v4493_v57 = vpack.c.bf16 %v4449_v38, %v4448_v34  ;;  %v4494_v28 = vpack.c.bf16 %v3515_v19, %v3514_v31  ;;  %v7078_v13 = vpack.i.bf16 %v10714_v41, %v3447_v60  ;;  %v3516_v20 = vmul.f32 %v10981_v0, %v12043_v4  ;;  %v10993_v14 = vld [vmem:[#allocation2 + $0xff] sm:$0xff]  ;;  %v11024_v21 = vld [vmem:[#allocation2 + $0x10f] sm:$0xff] }
 0x3c4   : > { %v3517_v35 = vmul.f32 %v10983_v9, %v12051_v17  ;;  %v3448_v26 = vmul.f32 %v10981_v0, %v12063_v3  ;;  %v3481_v11 = vmul.f32 %v10988_v55, %v12053_v43  ;;  %v3480_v40 = vmul.f32 %v10993_v14, %v12052_v44  ;;  %v3488_v17 = vld [vmem:[#allocation2 + $0x121] sm:$0xff]  ;;  %v7227_v58 = vld [vmem:[%s7535_s24 + $0x38] sm:$0xff] }
 0x3c5   : > { %4831 = vmatprep.mubr.bf16.mxu1 %v4493_v57  ;;  %5848 = vmatprep.mubr.msk.bf16.mxu0 %vm2609_vm0, %v4494_v28  ;;  %v4500_v18 = vpack.c.bf16 %v3519_v32, %v3518_v6  ;;  %v11009_v33 = vld [vmem:[#allocation2 + $0x108] sm:$0xff]  ;;  %v11014_v8 = vld [vmem:[#allocation2 + $0x100] sm:$0xff]  ;;  %v3449_v53 = vmul.f32 %v10983_v9, %v12064_v12  ;;  %v3482_v31 = vmul.f32 %v11024_v21, %v12070_v39 }
 0x3c6   : > { %7079 = vrot.lane.b32.xlu0 %v7078_v13, %s7277_s22  ;;  %4832 = vmatmul.mubr.bf16.gmra.mrb[48].mxu1 %v4492_v61  ;;  %v4497_v41 = vpack.c.bf16 %v3517_v35, %v3516_v20  ;;  %v7083_v4 = vpack.i.bf16 %v3448_v26, %v10704_v62  ;;  %v7088_v10 = vpack.i.bf16 %v3481_v11, %v3480_v40  ;;  %v12066_v62 = vld [vmem:[#allocation70_spill] sm:$0xff]  ;;  %v12072_v25 = vld [vmem:[#allocation96_spill] sm:$0xff]  ;;  %v7228_v34 = vld [vmem:[%s7535_s24 + $0x40] sm:$0xff] }
 0x3c7   : > { %v3520_v30 = vmul.f32 %v3488_v17, %v12066_v62  ;;  %v7098_v52 = vpack.i.bf16 %v11009_v33, %v11014_v8  ;;  %v3450_v42 = vmul.f32 %v3418_v46, %v12066_v62  ;;  %v7108_v61 = vpack.i.bf16 %v12069_v63, %v3449_v53  ;;  %v11051_v46 = vld [vmem:[#allocation2 + $0x118] sm:$0xff]  ;;  %v7229_v38 = vld [vmem:[%s7535_s24 + $0x48] sm:$0xff]  ;;  %v7230_v26 = vld [vmem:[%s7535_s24 + $0x50] sm:$0xff] }
 0x3c8   : > { %5849 = vmatmul.mubr.msk.bf16.gmra.mrb[56].mxu0 %vm2609_vm0, %v4497_v41  ;;  %7084 = vrot.lane.b32.xlu1 %v7083_v4, %s7277_s22  ;;  %v3483_v2 = vmul.f32 %v11026_v23, %v12071_v54  ;;  %v3379_v59 = vmul.f32 %v3315_v27, %v12064_v12  ;;  %v5026_v19 = vpack.c.bf16 %v7227_v58, %v7226_v36  ;;  %v11058_v12 = vld [vmem:[#allocation2 + $0x110] sm:$0xff]  ;;  %v3452_v28 = vld [vmem:[#allocation2 + $0x11f] sm:$0xff]  ;;  %v3453_v20 = vld [vmem:[#allocation2 + $0x127] sm:$0xff] }
 0x3c9   : > { %5852 = vmatprep.mubr.msk.bf16.mxu0 %vm2609_vm0, %v4500_v18  ;;  %v4503_v56 = vpack.c.bf16 %v3521_v5, %v3520_v30  ;;  %v7113_v22 = vpack.i.bf16 %v3450_v42, %v12072_v25  ;;  %v3378_v60 = vmul.f32 %v12062_v51, %v12063_v3  ;;  %v5027_v6 = vpack.c.bf16 %v7229_v38, %v7228_v34  ;;  %v7231_v11 = vld [vmem:[%s7535_s24 + $0x58] sm:$0xff]  ;;  %v7232_v16 = vld [vmem:[%s7535_s24 + $0x60] sm:$0xff]  ;;  %v7233_v17 = vld [vmem:[%s7535_s24 + $0x68] sm:$0xff] }
 0x3ca   : > { %7089 = vrot.lane.b32.xlu0 %v7088_v10, %s7279_s16  ;;  %v7118_v45 = vpack.i.bf16 %v3483_v2, %v3482_v31  ;;  %v3413_v27 = vmul.f32 %v10988_v55, %v12071_v54  ;;  %v7128_v51 = vpack.i.bf16 %v11051_v46, %v11058_v12  ;;  %v3412_v3 = vmul.f32 %v10993_v14, %v12070_v39  ;;  %v12073_v4 = vld [vmem:[#allocation34_spill] sm:$0xff]  ;;  %v7237_v42 = vld [vmem:[%s7535_s24 + $0x88] sm:$0xff] }
 0x3cb   : > { %v7123_v32 = vpack.i.bf16 %v3379_v59, %v3378_v60  ;;  %v3451_v57 = vmul.f32 %v10977_v48, %v12065_v37  ;;  %v5028_v41 = vpack.c.bf16 %v7231_v11, %v7230_v26  ;;  %v3484_v40 = vmul.f32 %v3452_v28, %v12073_v4  ;;  %v12074_v48 = vld [vmem:[#allocation33_spill] sm:$0xff]  ;;  %v7239_v36 = vld [vmem:[%s7535_s24 + $0x98] sm:$0xff]  ;;  %v7241_v60 = vld [vmem:[%s7535_s24 + $0xa8] sm:$0xff] }
 0x3cc   : > { %7094 = vrot.lane.b32.xlu1 %v12067_v47, %s7279_s16  ;;  %v7133_v13 = vpack.i.bf16 %v3413_v27, %v3412_v3  ;;  %v5029_v18 = vpack.c.bf16 %v7233_v17, %v7232_v16  ;;  %v3485_v10 = vmul.f32 %v3453_v20, %v12074_v48  ;;  %v3380_v5 = vmul.f32 %v10981_v0, %v12066_v62  ;;  %v3486_v47 = vld [vmem:[#allocation2 + $0x120] sm:$0xff]  ;;  %v7235_v62 = vld [vmem:[%s7535_s24 + $0x78] sm:$0xff]  ;;  %v7246_v11 = vld [vmem:[%s7535_s24 + $0xd0] sm:$0xff] }
 0x3cd   : > { %v7138_v35 = vpack.i.bf16 %v11014_v8, %v3451_v57  ;;  %v3381_v30 = vmul.f32 %v10983_v9, %v12065_v37  ;;  %v3414_v0 = vmul.f32 %v11024_v21, %v12073_v4  ;;  %v3415_v9 = vmul.f32 %v11026_v23, %v12074_v48  ;;  %v7234_v37 = vld [vmem:[%s7535_s24 + $0x70] sm:$0xff]  ;;  %v7243_v28 = vld [vmem:[%s7535_s24 + $0xb8] sm:$0xff]  ;;  %v7244_v20 = vld [vmem:[%s7535_s24 + $0xc0] sm:$0xff] }
 0x3ce   : > { %7099 = vrot.lane.b32.xlu0 %v7098_v52, %s7278_s12  ;;  %v3487_v52 = vld [vmem:[#allocation2 + $0x128] sm:$0xff]  ;;  %v7143_v53 = vpack.i.bf16 %v3485_v10, %v3484_v40  ;;  %v7242_v57 = vld [vmem:[%s7535_s24 + $0xb0] sm:$0xff]  ;;  %v7248_v16 = vld [vmem:[%s7535_s24 + $0xe0] sm:$0xff] }
 0x3cf   : > { %v7148_v15 = vpack.i.bf16 %v3381_v30, %v3380_v5  ;;  %v7153_v24 = vpack.i.bf16 %v3487_v52, %v3486_v47  ;;  %v7249_v17 = vld [vmem:[%s7535_s24 + $0xe8] sm:$0xff]  ;;  %v7250_v10 = vld [vmem:[%s7535_s24 + $0xf0] sm:$0xff]  ;;  %v7251_v5 = vld [vmem:[%s7535_s24 + $0xf8] sm:$0xff] }
 0x3d0   : > { %5853 = vmatmul.mubr.msk.bf16.gmra.mrb[60].mxu0 %vm2609_vm0, %v4503_v56  ;;  %7104 = vrot.lane.b32.xlu1 %v12068_v1, %s7278_s12  ;;  %v7236_v56 = vld [vmem:[%s7535_s24 + $0x80] sm:$0xff]  ;;  %v5038_v30 = vpack.c.bf16 %v7251_v5, %v7250_v10  ;;  %v7253_v52 = vld [vmem:[%s7535_s24 + $0x108] sm:$0xff] }
 0x3d1   : > { %5858 = vmatprep.mubr.msk.bf16.mxu0 %vm2371_vm5, %v5025_v29  ;;  %v5030_v29 = vpack.c.bf16 %v7235_v62, %v7234_v37  ;;  %v5031_v1 = vpack.c.bf16 %v7237_v42, %v7236_v56  ;;  %v7252_v47 = vld [vmem:[%s7535_s24 + $0x100] sm:$0xff] }
 0x3d2   : > { %7109 = vrot.lane.b32.xlu0 %v7108_v61, %s7277_s22  ;;  %v7158_v61 = vpack.i.bf16 %v3415_v9, %v3414_v0  ;;  %v7256_v10 = vld [vmem:[#allocation2 + $0xdf] sm:$0xff] }
 0x3d3   : > { %v3248_v5 = vmul.f32 %v7256_v10, %v12052_v44 }
 0x3d4   : > { %7114 = vrot.lane.b32.xlu1 %v7113_v22, %s7277_s22 }
 0x3d6   : > { %7119 = vrot.lane.b32.xlu0 %v7118_v45, %s7279_s16  ;;  %v7238_v45 = vld [vmem:[%s7535_s24 + $0x90] sm:$0xff] }
 0x3d7   : > { %v5032_v58 = vpack.c.bf16 %v7239_v36, %v7238_v45 }
 0x3d8   : > { %5859 = vmatmul.mubr.msk.bf16.vlgmr.msra.gmra.mrb[32].mxu0 %vm2371_vm5, %v5026_v19  ;;  %7124 = vrot.lane.b32.xlu1 %v7123_v32, %s7279_s16  ;;  %v7240_v19 = vld [vmem:[%s7535_s24 + $0xa0] sm:$0xff] }
 0x3d9   : > { %5862 = vmatprep.mubr.msk.bf16.mxu0 %vm2371_vm5, %v5027_v6  ;;  %v5033_v34 = vpack.c.bf16 %v7241_v60, %v7240_v19 }
 0x3da   : > { %7129 = vrot.lane.b32.xlu0 %v7128_v51, %s7278_s12 }
 0x3dc   : > { %7134 = vrot.lane.b32.xlu1 %v7133_v13, %s7278_s12  ;;  %v5034_v13 = vpack.c.bf16 %v7243_v28, %v7242_v57 }
 0x3de   : > { %7139 = vrot.lane.b32.xlu0 %v7138_v35, %s7277_s22  ;;  %v7245_v35 = vld [vmem:[%s7535_s24 + $0xc8] sm:$0xff] }
 0x3df   : > { %v5035_v26 = vpack.c.bf16 %v7245_v35, %v7244_v20 }
 0x3e0   : > { %5863 = vmatmul.mubr.msk.bf16.gmra.mrb[36].mxu0 %vm2371_vm5, %v5028_v41  ;;  %3616 = vrot.lane.b32.xlu1 %v11009_v33, %s7277_s22  ;;  %v7247_v41 = vld [vmem:[%s7535_s24 + $0xd8] sm:$0xff] }
 0x3e1   : > { %5866 = vmatprep.mubr.msk.bf16.mxu0 %vm2371_vm5, %v5029_v18  ;;  %v5036_v40 = vpack.c.bf16 %v7247_v41, %v7246_v11  ;;  %v5037_v18 = vpack.c.bf16 %v7249_v17, %v7248_v16 }
 0x3e2   : > { %7144 = vrot.lane.b32.xlu0 %v7143_v53, %s7279_s16  ;;  %v5039_v53 = vpack.c.bf16 %v7253_v52, %v7252_v47 }
 0x3e4   : > { %7149 = vrot.lane.b32.xlu1 %v7148_v15, %s7279_s16  ;;  %v7254_v15 = vld [vmem:[%s7535_s24 + $0x110] sm:$0xff] }
 0x3e6   : > { %7154 = vrot.lane.b32.xlu0 %v7153_v24, %s7278_s12  ;;  %v7255_v24 = vld [vmem:[%s7535_s24 + $0x118] sm:$0xff]  ;;  %s5559_s24 = sshll.u32 %s12076_s14, 6 }
 0x3e7   : > { %v5040_v0 = vpack.c.bf16 %v7255_v24, %v7254_v15  ;;  %s11451_s28 = scalar_lea.vmem %s11482_s10, %s5559_s24 }
 0x3e8   : > { %5867 = vmatmul.mubr.msk.bf16.gmra.mrb[40].mxu0 %vm2371_vm5, %v5030_v29  ;;  %7159 = vrot.lane.b32.xlu1 %v7158_v61, %s7278_s12 }
 0x3e9   : > { %5870 = vmatprep.mubr.msk.bf16.mxu0 %vm2371_vm5, %v5031_v1 }
 0x3eb   : > { %v5601_v21 = vpop.f32.mrb[4].mxu1 }
 0x3ec   : > { %v5602_v23 = vpop.f32.mrb[5].mxu1 }
 0x3ed   : > { %v11101_v31 = vadd.f32 %v5602_v23, %v5601_v21  ;;  %v5604_v2 = vpop.f32.mrb[6].mxu1 }
 0x3ee   : > { %v5605_v22 = vpop.f32.mrb[7].mxu1 }
 0x3ef   : > { %v11103_v59 = vadd.f32 %v5605_v22, %v5604_v2 }
 0x3f0   : > { %5871 = vmatmul.mubr.msk.bf16.gmra.mrb[44].mxu0 %vm2371_vm5, %v5032_v58 }
 0x3f1   : > { %5874 = vmatprep.mubr.msk.bf16.mxu0 %vm2371_vm5, %v5033_v34 }
 0x3f3   : > { %v5607_v38 = vpop.f32.mrb[8].mxu1 }
 0x3f4   : > { %v5608_v6 = vpop.f32.mrb[9].mxu1 }
 0x3f5   : > { %v11111_v32 = vadd.f32 %v5608_v6, %v5607_v38  ;;  %v5610_v27 = vpop.f32.mrb[10].mxu1 }
 0x3f6   : > { %v5611_v51 = vpop.f32.mrb[11].mxu1 }
 0x3f7   : > { %v11113_v3 = vadd.f32 %v5611_v51, %v5610_v27 }
 0x3f8   : > { %5875 = vmatmul.mubr.msk.bf16.gmra.mrb[48].mxu0 %vm2371_vm5, %v5034_v13 }
 0x3f9   : > { %5878 = vmatprep.mubr.msk.bf16.mxu0 %vm2371_vm5, %v5035_v26  ;;  %v7042_v26 = vunpack.i.h.bf16 %v10920_v50 }
 0x3fb   : > { %v4386_v24 = vsel %vm2609_vm0, %v12069_v63, %v7042_v26 }
 0x400   : > { %5879 = vmatmul.mubr.msk.bf16.gmra.mrb[52].mxu0 %vm2371_vm5, %v5036_v40 }
 0x401   : > { %5882 = vmatprep.mubr.msk.bf16.mxu0 %vm2371_vm5, %v5037_v18 }
 0x408   : > { %5883 = vmatmul.mubr.msk.bf16.gmra.mrb[56].mxu0 %vm2371_vm5, %v5038_v30  ;;  %v7257_v30 = vld [vmem:[#allocation2 + $0xe7] sm:$0xff] }
 0x409   : > { %5886 = vmatprep.mubr.msk.bf16.mxu0 %vm2371_vm5, %v5039_v53  ;;  %v3249_v47 = vmul.f32 %v7257_v30, %v12053_v43 }
 0x410   : > { %5887 = vmatmul.mubr.msk.bf16.gmra.mrb[60].mxu0 %vm2371_vm5, %v5040_v0 }
 0x413   : > { %v5613_v9 = vpop.f32.mrb[12].mxu1 }
 0x414   : > { %v5614_v37 = vpop.f32.mrb[13].mxu1 }
 0x415   : > { %v11136_v62 = vadd.f32 %v5614_v37, %v5613_v9  ;;  %v5616_v29 = vpop.f32.mrb[14].mxu1 }
 0x416   : > { %v5617_v56 = vpop.f32.mrb[15].mxu1 }
 0x417   : > { %v11138_v42 = vadd.f32 %v5617_v56, %v5616_v29 }
 0x41b   : > { %v5619_v1 = vpop.f32.mrb[16].mxu1 }
 0x41c   : > { %v5620_v61 = vpop.f32.mrb[17].mxu1 }
 0x41d   : > { %v11140_v21 = vadd.f32 %v5620_v61, %v5619_v1  ;;  %v5622_v23 = vpop.f32.mrb[18].mxu1 }
 0x41e   : > { %v5623_v2 = vpop.f32.mrb[19].mxu1 }
 0x41f   : > { %v11142_v22 = vadd.f32 %v5623_v2, %v5622_v23 }
 0x430   : > { %v5625_v45 = vpop.f32.mrb[20].mxu1 }
 0x431   : > { %v5626_v36 = vpop.f32.mrb[21].mxu1 }
 0x432   : > { %v11144_v58 = vadd.f32 %v5626_v36, %v5625_v45  ;;  %v5628_v19 = vpop.f32.mrb[22].mxu1 }
 0x433   : > { %v5629_v60 = vpop.f32.mrb[23].mxu1 }
 0x434   : > { %v11146_v34 = vadd.f32 %v5629_v60, %v5628_v19 }
 0x438   : > { %v5631_v38 = vpop.f32.mrb[24].mxu1  ;;  %v7080_v6 = vpop.permute.xlu0 %7079 }
 0x439   : > { %v5632_v27 = vpop.f32.mrb[25].mxu1  ;;  %v7081_v11 = vunpack.i.l.bf16 %v7080_v6  ;;  %v7082_v41 = vunpack.i.h.bf16 %v7080_v6 }
 0x43a   : > { %v11148_v51 = vadd.f32 %v5632_v27, %v5631_v38  ;;  %v5634_v57 = vpop.f32.mrb[26].mxu1  ;;  %v7085_v28 = vpop.permute.xlu1 %7084 }
 0x43b   : > { %v5635_v13 = vpop.f32.mrb[27].mxu1  ;;  %v7086_v40 = vunpack.i.l.bf16 %v7085_v28  ;;  %v4387_v50 = vsel %vm2609_vm0, %v12072_v25, %v7081_v11  ;;  %v4288_v37 = vsel %vm2609_vm0, %v3248_v5, %v7082_v41  ;;  %v7087_v27 = vunpack.i.h.bf16 %v7085_v28 }
 0x43c   : > { %v7090_v20 = vpop.permute.xlu0 %7089  ;;  %v11150_v35 = vadd.f32 %v5635_v13, %v5634_v57 }
 0x43d   : > { %v7092_v16 = vunpack.i.h.bf16 %v7090_v20  ;;  %v7091_v17 = vunpack.i.l.bf16 %v7090_v20  ;;  %v4289_v29 = vsel %vm2609_vm0, %v3249_v47, %v7086_v40  ;;  %v4388_v40 = vsel %vm2609_vm0, %v11014_v8, %v7087_v27 }
 0x43e   : > { %v7095_v18 = vpop.permute.xlu1 %7094 }
 0x43f   : > { %v7097_v52 = vunpack.i.h.bf16 %v7095_v18  ;;  %v7096_v53 = vunpack.i.l.bf16 %v7095_v18  ;;  %v4418_v44 = vsel %vm4294_vm14, %v4386_v24, %v7091_v17  ;;  %v4419_v56 = vsel %vm4294_vm14, %v4387_v50, %v7092_v16  ;;  %v7258_v16 = vld [vmem:[#allocation2 + $0xef] sm:$0xff] }
 0x440   : > { %v7100_v15 = vpop.permute.xlu0 %7099  ;;  %v3250_v17 = vmul.f32 %v7258_v16, %v12070_v39 }
 0x441   : > { %v7102_v0 = vunpack.i.h.bf16 %v7100_v15  ;;  %v7101_v9 = vunpack.i.l.bf16 %v7100_v15  ;;  %v4321_v2 = vsel %vm4294_vm14, %v4288_v37, %v7096_v53  ;;  %v4322_v25 = vsel %vm4294_vm14, %v4289_v29, %v7097_v52  ;;  %v7259_v15 = vld [vmem:[#allocation2 + $0xf7] sm:$0xff] }
 0x442   : > { %v7105_v43 = vpop.permute.xlu1 %7104  ;;  %v3251_v24 = vmul.f32 %v7259_v15, %v12071_v54 }
 0x443   : > { %v7107_v1 = vunpack.i.h.bf16 %v7105_v43  ;;  %v7106_v61 = vunpack.i.l.bf16 %v7105_v43  ;;  %v4450_v23 = vsel %vm4327_vm15, %v4418_v44, %v7101_v9  ;;  %v4451_v63 = vsel %vm4327_vm15, %v4419_v56, %v7102_v0 }
 0x444   : > { %v7110_v45 = vpop.permute.xlu0 %7109  ;;  %v4496_v36 = vpack.c.bf16 %v4451_v63, %v4450_v23 }
 0x445   : > { %v4354_v19 = vsel %vm4327_vm15, %v4321_v2, %v7106_v61  ;;  %v4355_v60 = vsel %vm4327_vm15, %v4322_v25, %v7107_v1  ;;  %v7111_v13 = vunpack.i.l.bf16 %v7110_v45  ;;  %v7112_v20 = vunpack.i.h.bf16 %v7110_v45 }
 0x446   : > { %v7115_v38 = vpop.permute.xlu1 %7114  ;;  %4839 = vmatprep.mubr.bf16.mxu1 %v4496_v36  ;;  %v4495_v6 = vpack.c.bf16 %v4355_v60, %v4354_v19 }
 0x447   : > { %v7116_v18 = vunpack.i.l.bf16 %v7115_v38  ;;  %v4389_v30 = vsel %vm2609_vm0, %v11009_v33, %v7111_v13  ;;  %v4290_v53 = vsel %vm2609_vm0, %v3250_v17, %v7112_v20  ;;  %v7117_v19 = vunpack.i.h.bf16 %v7115_v38 }
 0x448   : > { %v7120_v57 = vpop.permute.xlu0 %7119  ;;  %4840 = vmatmul.mubr.bf16.gmra.mrb[52].mxu1 %v4495_v6  ;;  %v3253_v38 = vmul.f32 %v10988_v55, %v12074_v48 }
 0x449   : > { %v7122_v26 = vunpack.i.h.bf16 %v7120_v57  ;;  %v7121_v11 = vunpack.i.l.bf16 %v7120_v57  ;;  %v4291_v44 = vsel %vm2609_vm0, %v3251_v24, %v7116_v18  ;;  %v4390_v16 = vsel %vm2609_vm0, %v11058_v12, %v7117_v19 }
 0x44a   : > { %v7125_v41 = vpop.permute.xlu1 %7124 }
 0x44b   : > { %v7126_v10 = vunpack.i.l.bf16 %v7125_v41  ;;  %v7127_v28 = vunpack.i.h.bf16 %v7125_v41  ;;  %v4420_v50 = vsel %vm4294_vm14, %v4388_v40, %v7121_v11  ;;  %v4421_v8 = vsel %vm4294_vm14, %v4389_v30, %v7122_v26 }
 0x44c   : > { %v7130_v5 = vpop.permute.xlu0 %7129  ;;  %v3252_v41 = vmul.f32 %v10993_v14, %v12073_v4 }
 0x44d   : > { %v7132_v47 = vunpack.i.h.bf16 %v7130_v5  ;;  %v7131_v52 = vunpack.i.l.bf16 %v7130_v5  ;;  %v4323_v56 = vsel %vm4294_vm14, %v4290_v53, %v7126_v10  ;;  %v4324_v54 = vsel %vm4294_vm14, %v4291_v44, %v7127_v28 }
 0x44e   : > { %v7135_v0 = vpop.permute.xlu1 %7134 }
 0x44f   : > { %v7137_v39 = vunpack.i.h.bf16 %v7135_v0  ;;  %v7136_v9 = vunpack.i.l.bf16 %v7135_v0  ;;  %v5637_v37 = vpop.f32.mrb[28].mxu1  ;;  %v4452_v29 = vsel %vm4327_vm15, %v4420_v50, %v7131_v52  ;;  %v4453_v33 = vsel %vm4327_vm15, %v4421_v8, %v7132_v47 }
 0x450   : > { %v7140_v43 = vpop.permute.xlu0 %7139  ;;  %v5638_v1 = vpop.f32.mrb[29].mxu1  ;;  %v4499_v61 = vpack.c.bf16 %v4453_v33, %v4452_v29 }
 0x451   : > { %v11183_v23 = vadd.f32 %v5638_v1, %v5637_v37  ;;  %v5640_v63 = vpop.f32.mrb[30].mxu1  ;;  %v4356_v2 = vsel %vm4327_vm15, %v4323_v56, %v7136_v9  ;;  %v4357_v36 = vsel %vm4327_vm15, %v4324_v54, %v7137_v39  ;;  %v7142_v57 = vunpack.i.h.bf16 %v7140_v43 }
 0x452   : > { %v3617_v25 = vpop.permute.xlu1 %3616  ;;  %4847 = vmatprep.mubr.bf16.mxu1 %v4499_v61  ;;  %v5641_v45 = vpop.f32.mrb[31].mxu1  ;;  %v4498_v27 = vpack.c.bf16 %v4357_v36, %v4356_v2  ;;  %v7141_v13 = vunpack.i.l.bf16 %v7140_v43 }
 0x453   : > { %v11187_v6 = vadd.f32 %v5641_v45, %v5640_v63  ;;  %v4292_v30 = vsel %vm2609_vm0, %v3252_v41, %v7142_v57  ;;  %v4293_v14 = vsel %vm2609_vm0, %v3253_v38, %v3617_v25 }
 0x454   : > { %v7145_v60 = vpop.permute.xlu0 %7144  ;;  %4848 = vmatmul.mubr.bf16.gmra.mrb[56].mxu1 %v4498_v27  ;;  %v4391_v28 = vsel %vm2609_vm0, %v11051_v46, %v7141_v13 }
 0x455   : > { %v7147_v20 = vunpack.i.h.bf16 %v7145_v60  ;;  %v7146_v26 = vunpack.i.l.bf16 %v7145_v60 }
 0x456   : > { %v7150_v11 = vpop.permute.xlu1 %7149 }
 0x457   : > { %v5643_v40 = vpop.f32.mrb[32].mxu1  ;;  %v7152_v17 = vunpack.i.h.bf16 %v7150_v11  ;;  %v7151_v18 = vunpack.i.l.bf16 %v7150_v11  ;;  %v4422_v4 = vsel %vm4294_vm14, %v4390_v16, %v7146_v26  ;;  %v4423_v12 = vsel %vm4294_vm14, %v4391_v28, %v7147_v20 }
 0x458   : > { %v7155_v10 = vpop.permute.xlu0 %7154  ;;  %v5644_v5 = vpop.f32.mrb[33].mxu1 }
 0x459   : > { %v7157_v47 = vunpack.i.h.bf16 %v7155_v10  ;;  %v7156_v52 = vunpack.i.l.bf16 %v7155_v10  ;;  %v5646_v53 = vpop.f32.mrb[34].mxu1  ;;  %v11201_v55 = vadd.f32 %v5644_v5, %v5643_v40  ;;  %v4326_v46 = vsel %vm4294_vm14, %v4293_v14, %v7152_v17  ;;  %v11230_v10 = vld [vmem:[%s11476_s4] ss:$0 sm:$0xff] }
 0x45a   : > { %v7160_v15 = vpop.permute.xlu1 %7159  ;;  %v5647_v48 = vpop.f32.mrb[35].mxu1  ;;  %v4325_v39 = vsel %vm4294_vm14, %v4292_v30, %v7151_v18  ;;  %v4749_v5 = vadd.f32 %v11103_v59, %v11230_v10  ;;  %v4741_v30 = vadd.f32 %v10964_v7, %v11230_v10  ;;  %v4746_v28 = vadd.f32 %v11101_v31, %v11230_v10 }
 0x45b   : > { %v7162_v24 = vunpack.i.h.bf16 %v7160_v15  ;;  %v7161_v50 = vunpack.i.l.bf16 %v7160_v15  ;;  %v11203_v8 = vadd.f32 %v5647_v48, %v5646_v53  ;;  %v4454_v0 = vsel %vm4327_vm15, %v4422_v4, %v7156_v52 }
 0x45c   : > { %v4455_v9 = vsel %vm4327_vm15, %v4423_v12, %v7157_v47  ;;  %v11241_v47 = vld [vmem:[%s11478_s6] ss:$0 sm:$0xff]  ;;  %v4738_v53 = vadd.f32 %v10958_v49, %v11230_v10  ;;  %v4762_v31 = vadd.f32 %v11136_v62, %v11230_v10  ;;  %v4754_v49 = vadd.f32 %v11111_v32, %v11230_v10 }
 0x45d   : > { %v4502_v37 = vpack.c.bf16 %v4455_v9, %v4454_v0  ;;  %v4358_v29 = vsel %vm4327_vm15, %v4325_v39, %v7161_v50  ;;  %v4359_v33 = vsel %vm4327_vm15, %v4326_v46, %v7162_v24  ;;  %v5926_v12 = vadd.f32 %v11241_v47, %v4749_v5 }
 0x45e   : > { %v4501_v44 = vpack.c.bf16 %v4359_v33, %v4358_v29  ;;  %v5928_v7 = vadd.f32 %v11241_v47, %v4741_v30  ;;  %v4765_v39 = vadd.f32 %v11138_v42, %v11230_v10  ;;  %v4757_v9 = vadd.f32 %v11113_v3, %v11230_v10 }
 0x45f   : > { %4855 = vmatprep.mubr.bf16.mxu1 %v4502_v37  ;;  %v5930_v29 = vadd.f32 %v11241_v47, %v4762_v31  ;;  %v5932_v33 = vadd.f32 %v11241_v47, %v4754_v49  ;;  %v4778_v3 = vadd.f32 %v11144_v58, %v11230_v10 }
 0x460   : > { %4856 = vmatmul.mubr.bf16.gmra.mrb[60].mxu1 %v4501_v44 }
 0x470   : > { %v5649_v56 = vpop.f32.mrb[36].mxu1 }
 0x471   : > { %v5650_v43 = vpop.f32.mrb[37].mxu1 }
 0x472   : > { %v11211_v1 = vadd.f32 %v5650_v43, %v5649_v56  ;;  %v5652_v61 = vpop.f32.mrb[38].mxu1  ;;  %v5934_v43 = vadd.f32 %v11241_v47, %v4765_v39 }
 0x473   : > { %v5653_v54 = vpop.f32.mrb[39].mxu1 }
 0x474   : > { %v11213_v63 = vadd.f32 %v5653_v54, %v5652_v61  ;;  %v5936_v54 = vadd.f32 %v11241_v47, %v4757_v9 }
 0x478   : > { %v5655_v2 = vpop.f32.mrb[40].mxu1 }
 0x479   : > { %v5656_v25 = vpop.f32.mrb[41].mxu1 }
 0x47a   : > { %v11215_v45 = vadd.f32 %v5656_v25, %v5655_v2  ;;  %v5658_v36 = vpop.f32.mrb[42].mxu1 }
 0x47b   : > { %v5659_v19 = vpop.f32.mrb[43].mxu1 }
 0x47c   : > { %v11217_v60 = vadd.f32 %v5659_v19, %v5658_v36  ;;  %v4770_v36 = vadd.f32 %v11140_v21, %v11230_v10 }
 0x48e   : > { %v5661_v27 = vpop.f32.mrb[44].mxu1 }
 0x48f   : > { %v5662_v57 = vpop.f32.mrb[45].mxu1 }
 0x490   : > { %v11219_v13 = vadd.f32 %v5662_v57, %v5661_v27  ;;  %v5664_v20 = vpop.f32.mrb[46].mxu1  ;;  %v4781_v27 = vadd.f32 %v11146_v34, %v11230_v10 }
 0x491   : > { %v5665_v26 = vpop.f32.mrb[47].mxu1 }
 0x492   : > { %v11221_v11 = vadd.f32 %v5665_v26, %v5664_v20  ;;  %v4773_v20 = vadd.f32 %v11142_v22, %v11230_v10  ;;  %v5938_v26 = vadd.f32 %v11241_v47, %v4778_v3  ;;  %v4794_v22 = vadd.f32 %v11183_v23, %v11230_v10 }
 0x493   : > { %v4805_v3 = vadd.f32 %v11203_v8, %v11230_v10 }
 0x494   : > { %v5944_v30 = vadd.f32 %v11241_v47, %v4773_v20 }
 0x499   : > { %v5667_v41 = vpop.f32.mrb[48].mxu1 }
 0x49a   : > { %v5668_v40 = vpop.f32.mrb[49].mxu1 }
 0x49b   : > { %v11223_v16 = vadd.f32 %v5668_v40, %v5667_v41  ;;  %v5670_v38 = vpop.f32.mrb[50].mxu1  ;;  %v5940_v40 = vadd.f32 %v11241_v47, %v4770_v36 }
 0x49c   : > { %v5671_v17 = vpop.f32.mrb[51].mxu1 }
 0x49d   : > { %v11225_v18 = vadd.f32 %v5671_v17, %v5670_v38  ;;  %v5942_v17 = vadd.f32 %v11241_v47, %v4781_v27 }
 0x4ab   : > { %v5860_v52 = vpop.f32.mrb[32].mxu0 }
 0x4ac   : > { %v5922_v14 = vadd.f32 %v5860_v52, %v4746_v28  ;;  %v5134_v4 = vpop.f32.mrb[33].mxu0 }
 0x4ad   : > { %v5924_v59 = vadd.f32 %v5134_v4, %v4738_v53  ;;  %v5861_v15 = vpop.f32.mrb[34].mxu0  ;;  %v4786_v53 = vadd.f32 %v11148_v51, %v11230_v10  ;;  %v4797_v4 = vadd.f32 %v11187_v6, %v11230_v10  ;;  %v5262_v51 = vld [vmem:[%s11481_s9 + $0x8] sm:$0xff] }
 0x4ae   : > { %v11250_v48 = vadd.f32 %v5922_v14, %v11241_v47  ;;  %v11252_v24 = vadd.f32 %v5926_v12, %v5861_v15  ;;  %v5137_v50 = vpop.f32.mrb[35].mxu0  ;;  %v5946_v15 = vadd.f32 %v11241_v47, %v4794_v22  ;;  %5373 = vmatprep.mubr.f32.mxu1 %v5262_v51  ;;  %v4829_v22 = vadd.f32 %v11221_v11, %v11230_v10 }
 0x4af   : > { %v11257_v0 = vadd.f32 %v5924_v59, %v11241_v47  ;;  %v11259_v46 = vadd.f32 %v5928_v7, %v5137_v50  ;;  %v4789_v59 = vadd.f32 %v11150_v35, %v11230_v10  ;;  %v5948_v31 = vadd.f32 %v11241_v47, %v4786_v53 }
 0x4b0   : > { %v5896_v62 = vpack.c.bf16 %v11252_v24, %v11250_v48  ;;  %v5950_v49 = vadd.f32 %v11241_v47, %v4797_v4  ;;  %v4821_v53 = vadd.f32 %v11217_v60, %v11230_v10 }
 0x4b1   : > { %v5892_v37 = vpack.c.bf16 %v11259_v46, %v11257_v0  ;;  %v5952_v9 = vadd.f32 %v11241_v47, %v4789_v59  ;;  %v4837_v0 = vadd.f32 %v11225_v18, %v11230_v10 }
 0x4b2   : > { %v5968_v60 = vadd.f32 %v11241_v47, %v4821_v53 }
 0x4b3   : > { %v5864_v32 = vpop.f32.mrb[36].mxu0 }
 0x4b4   : > { %v11271_v44 = vadd.f32 %v5930_v29, %v5864_v32  ;;  %v5150_v56 = vpop.f32.mrb[37].mxu0  ;;  %v4810_v29 = vadd.f32 %v11211_v1, %v11230_v10 }
 0x4b5   : > { %v11274_v42 = vadd.f32 %v5932_v33, %v5150_v56  ;;  %v5865_v61 = vpop.f32.mrb[38].mxu0  ;;  %v4802_v56 = vadd.f32 %v11201_v55, %v11230_v10 }
 0x4b6   : > { %v11279_v2 = vadd.f32 %v5934_v43, %v5865_v61  ;;  %v5153_v25 = vpop.f32.mrb[39].mxu0  ;;  %v4813_v61 = vadd.f32 %v11213_v63, %v11230_v10 }
 0x4b7   : > { %v11283_v19 = vadd.f32 %v5936_v54, %v5153_v25  ;;  %v5954_v25 = vadd.f32 %v11241_v47, %v4810_v29  ;;  %v5956_v27 = vadd.f32 %v11241_v47, %v4802_v56 }
 0x4b8   : > { %v5904_v57 = vpack.c.bf16 %v11279_v2, %v11271_v44 }
 0x4b9   : > { %v5900_v58 = vpack.c.bf16 %v11283_v19, %v11274_v42 }
 0x4bb   : > { %v5868_v41 = vpop.f32.mrb[40].mxu0 }
 0x4bc   : > { %v11295_v21 = vadd.f32 %v5938_v26, %v5868_v41  ;;  %v5166_v38 = vpop.f32.mrb[41].mxu0  ;;  %v5958_v26 = vadd.f32 %v11241_v47, %v4813_v61 }
 0x4bd   : > { %v11298_v34 = vadd.f32 %v5940_v40, %v5166_v38  ;;  %v5869_v5 = vpop.f32.mrb[42].mxu0  ;;  %v5960_v40 = vadd.f32 %v11241_v47, %v4805_v3  ;;  %v4826_v38 = vadd.f32 %v11219_v13, %v11230_v10  ;;  %v5976_v3 = vadd.f32 %v11241_v47, %v4837_v0  ;;  %v5271_v0 = vld [vmem:[%s11481_s9 + $0x50] sm:$0xff] }
 0x4be   : > { %v11303_v28 = vadd.f32 %v5942_v17, %v5869_v5  ;;  %v5169_v52 = vpop.f32.mrb[43].mxu0  ;;  %v4818_v5 = vadd.f32 %v11215_v45, %v11230_v10  ;;  %v5966_v45 = vadd.f32 %v11241_v47, %v4829_v22 }
 0x4bf   : > { %v11307_v14 = vadd.f32 %v5944_v30, %v5169_v52  ;;  %v5962_v59 = vadd.f32 %v11241_v47, %v4826_v38 }
 0x4c0   : > { %v5912_v12 = vpack.c.bf16 %v11303_v28, %v11295_v21  ;;  %v5964_v13 = vadd.f32 %v11241_v47, %v4818_v5 }
 0x4c1   : > { %v5908_v23 = vpack.c.bf16 %v11307_v14, %v11298_v34 }
 0x4c3   : > { %v5872_v7 = vpop.f32.mrb[44].mxu0 }
 0x4c4   : > { %v11322_v6 = vadd.f32 %v5946_v15, %v5872_v7  ;;  %v5182_v50 = vpop.f32.mrb[45].mxu0 }
 0x4c5   : > { %v11325_v39 = vadd.f32 %v5948_v31, %v5182_v50  ;;  %v5873_v35 = vpop.f32.mrb[46].mxu0 }
 0x4c6   : > { %v11330_v32 = vadd.f32 %v5950_v49, %v5873_v35  ;;  %v5185_v33 = vpop.f32.mrb[47].mxu0  ;;  %v4834_v35 = vadd.f32 %v11223_v16, %v11230_v10 }
 0x4c7   : > { %v11334_v43 = vadd.f32 %v5952_v9, %v5185_v33 }
 0x4c8   : > { %v5920_v54 = vpack.c.bf16 %v11330_v32, %v11322_v6  ;;  %v5972_v33 = vadd.f32 %v11241_v47, %v4834_v35  ;;  %v5265_v6 = vld [vmem:[%s11481_s9 + $0x20] sm:$0xff]  ;;  %v5268_v32 = vld [vmem:[%s11481_s9 + $0x38] sm:$0xff] }
 0x4c9   : > { %v5916_v1 = vpack.c.bf16 %v11334_v43, %v11325_v39  ;;  %v5264_v39 = vld [vmem:[%s11481_s9 + $0x18] sm:$0xff]  ;;  %v5267_v43 = vld [vmem:[%s11481_s9 + $0x30] sm:$0xff] }
 0x4cb   : > { %v5876_v36 = vpop.f32.mrb[48].mxu0 }
 0x4cc   : > { %v5955_v55 = vadd.f32 %v5954_v25, %v5876_v36  ;;  %v5198_v20 = vpop.f32.mrb[49].mxu0 }
 0x4cd   : > { %v5957_v41 = vadd.f32 %v5956_v27, %v5198_v20  ;;  %v5877_v63 = vpop.f32.mrb[50].mxu0 }
 0x4ce   : > { %v5959_v8 = vadd.f32 %v5958_v26, %v5877_v63  ;;  %v5201_v17 = vpop.f32.mrb[51].mxu0 }
 0x4cf   : > { %v5961_v30 = vadd.f32 %v5960_v40, %v5201_v17 }
 0x4d0   : > { %v5894_v52 = vpack.c.bf16 %v5959_v8, %v5955_v55 }
 0x4d1   : > { %v5890_v4 = vpack.c.bf16 %v5961_v30, %v5957_v41 }
 0x4d3   : > { %v5880_v15 = vpop.f32.mrb[52].mxu0  ;;  %5891 = vmatprep.subr.bf16.mxu1 %v5890_v4 }
 0x4d4   : > { %v5963_v51 = vadd.f32 %v5962_v59, %v5880_v15  ;;  %v5214_v7 = vpop.f32.mrb[53].mxu0  ;;  %5893 = vmatpush3.bf16.msra.mxu1 %v5892_v37 }
 0x4d5   : > { %v5965_v11 = vadd.f32 %v5964_v13, %v5214_v7  ;;  %v5881_v31 = vpop.f32.mrb[54].mxu0  ;;  %5895 = vmatprep.subr.bf16.mxu1 %v5894_v52 }
 0x4d6   : > { %v5967_v50 = vadd.f32 %v5966_v45, %v5881_v31  ;;  %v5217_v49 = vpop.f32.mrb[55].mxu0 }
 0x4d7   : > { %v5969_v9 = vadd.f32 %v5968_v60, %v5217_v49 }
 0x4d8   : > { %v5902_v29 = vpack.c.bf16 %v5967_v50, %v5963_v51  ;;  %5897 = vmatpush3.bf16.msra.mxu1 %v5896_v62 }
 0x4d9   : > { %v5898_v46 = vpack.c.bf16 %v5969_v9, %v5965_v11  ;;  %v5261_v9 = vld [vmem:[%s11481_s9] sm:$0xff] }
 0x4db   : > { %v5884_v37 = vpop.f32.mrb[56].mxu0  ;;  %5899 = vmatprep.subr.bf16.mxu1 %v5898_v46  ;;  %v5274_v46 = vld [vmem:[%s11481_s9 + $0x68] sm:$0xff] }
 0x4dc   : > { %v5230_v56 = vpop.f32.mrb[57].mxu0  ;;  %5901 = vmatpush3.bf16.msra.mxu1 %v5900_v58 }
 0x4dd   : > { %v5973_v16 = vadd.f32 %v5972_v33, %v5230_v56  ;;  %v5885_v61 = vpop.f32.mrb[58].mxu0  ;;  %5903 = vmatprep.subr.bf16.mxu1 %v5902_v29  ;;  %v5272_v29 = vld [vmem:[%s11481_s9 + $0x58] sm:$0xff]  ;;  %v5275_v56 = vld [vmem:[%s11481_s9 + $0x70] sm:$0xff] }
 0x4de   : > { %v5233_v48 = vpop.f32.mrb[59].mxu0  ;;  %v5276_v33 = vld [vmem:[%s11481_s9 + $0x78] sm:$0xff] }
 0x4df   : > { %v5977_v24 = vadd.f32 %v5976_v3, %v5233_v48 }
 0x4e0   : > { %5905 = vmatpush3.bf16.msra.mxu1 %v5904_v57 }
 0x4e1   : > { %v5906_v18 = vpack.c.bf16 %v5977_v24, %v5973_v16 }
 0x4e3   : > { %v5888_v62 = vpop.f32.mrb[60].mxu0  ;;  %5907 = vmatprep.subr.bf16.mxu1 %v5906_v18 }
 0x4e4   : > { %v5246_v25 = vpop.f32.mrb[61].mxu0  ;;  %5909 = vmatpush3.bf16.msra.mxu1 %v5908_v23 }
 0x4e5   : > { %v5889_v42 = vpop.f32.mrb[62].mxu0 }
 0x4e6   : > { %v5249_v19 = vpop.f32.mrb[63].mxu0 }
 0x51b   : > { %v5673_v58 = vpop.f32.mrb[52].mxu1 }
 0x51c   : > { %v5674_v36 = vpop.f32.mrb[53].mxu1 }
 0x51d   : > { %v5675_v27 = vadd.f32 %v5674_v36, %v5673_v58  ;;  %v5676_v55 = vpop.f32.mrb[54].mxu1 }
 0x51e   : > { %v5677_v20 = vpop.f32.mrb[55].mxu1 }
 0x51f   : > { %v4842_v26 = vadd.f32 %v5675_v27, %v11230_v10  ;;  %v5678_v41 = vadd.f32 %v5677_v20, %v5676_v55 }
 0x521   : > { %v5970_v44 = vadd.f32 %v11241_v47, %v4842_v26  ;;  %v4845_v2 = vadd.f32 %v5678_v41, %v11230_v10 }
 0x523   : > { %v5974_v57 = vadd.f32 %v11241_v47, %v4845_v2  ;;  %v5971_v63 = vadd.f32 %v5970_v44, %v5884_v37  ;;  %v5273_v37 = vld [vmem:[%s11481_s9 + $0x60] sm:$0xff] }
 0x525   : > { %v5975_v40 = vadd.f32 %v5974_v57, %v5885_v61 }
 0x527   : > { %v5910_v34 = vpack.c.bf16 %v5975_v40, %v5971_v63  ;;  %v5679_v14 = vpop.f32.mrb[56].mxu1 }
 0x528   : > { %v5680_v23 = vpop.f32.mrb[57].mxu1 }
 0x529   : > { %5911 = vmatprep.subr.bf16.mxu1 %v5910_v34  ;;  %v5681_v38 = vadd.f32 %v5680_v23, %v5679_v14  ;;  %v5682_v8 = vpop.f32.mrb[58].mxu1 }
 0x52a   : > { %5913 = vmatpush3.bf16.msra.mxu1 %v5912_v12  ;;  %v5683_v17 = vpop.f32.mrb[59].mxu1 }
 0x52b   : > { %v4850_v5 = vadd.f32 %v5681_v38, %v11230_v10  ;;  %v5684_v30 = vadd.f32 %v5683_v17, %v5682_v8 }
 0x52d   : > { %v5980_v22 = vadd.f32 %v11241_v47, %v4850_v5  ;;  %v4853_v52 = vadd.f32 %v5684_v30, %v11230_v10 }
 0x52f   : > { %v5984_v53 = vadd.f32 %v11241_v47, %v4853_v52  ;;  %v5981_v4 = vadd.f32 %v5980_v22, %v5246_v25 }
 0x531   : > { %v5985_v15 = vadd.f32 %v5984_v53, %v5249_v19 }
 0x533   : > { %v5685_v59 = vpop.f32.mrb[60].mxu1  ;;  %v5914_v21 = vpack.c.bf16 %v5985_v15, %v5981_v4 }
 0x534   : > { %v5686_v13 = vpop.f32.mrb[61].mxu1 }
 0x535   : > { %v5687_v51 = vadd.f32 %v5686_v13, %v5685_v59  ;;  %v5688_v7 = vpop.f32.mrb[62].mxu1  ;;  %5915 = vmatprep.subr.bf16.mxu1 %v5914_v21 }
 0x536   : > { %v5689_v28 = vpop.f32.mrb[63].mxu1  ;;  %5917 = vmatpush3.bf16.msra.mxu1 %v5916_v1  ;;  %v5269_v1 = vld [vmem:[%s11481_s9 + $0x40] sm:$0xff] }
 0x537   : > { %v4858_v12 = vadd.f32 %v5687_v51, %v11230_v10  ;;  %v5690_v45 = vadd.f32 %v5689_v28, %v5688_v7 }
 0x539   : > { %v5978_v11 = vadd.f32 %v11241_v47, %v4858_v12  ;;  %v4861_v31 = vadd.f32 %v5690_v45, %v11230_v10  ;;  %v5263_v10 = vld [vmem:[%s11481_s9 + $0x10] sm:$0xff] }
 0x53b   : > { %v5982_v60 = vadd.f32 %v11241_v47, %v4861_v31  ;;  %v5979_v50 = vadd.f32 %v5978_v11, %v5888_v62  ;;  %v5266_v47 = vld [vmem:[%s11481_s9 + $0x28] sm:$0xff] }
 0x53d   : > { %v5983_v49 = vadd.f32 %v5982_v60, %v5889_v42 }
 0x53f   : > { %v5918_v35 = vpack.c.bf16 %v5983_v49, %v5979_v50 }
 0x541   : > { %5919 = vmatprep.subr.bf16.mxu1 %v5918_v35 }
 0x542   : > { %5921 = vmatpush3.bf16.msra.mxu1 %v5920_v54  ;;  %v5270_v54 = vld [vmem:[%s11481_s9 + $0x48] sm:$0xff] }
 0x545   : > { %5374 = vmatmul.mubr.f32.vlgmr.msra.gmra.mrb[64].mxu1 %v5261_v9 }
 0x546   : > { %5378 = vmatprep.mubr.f32.mxu1 %v5264_v39 }
 0x549   : > { %5379 = vmatmul.mubr.f32.gmra.mrb[66].mxu1 %v5263_v10 }
 0x54a   : > { %5383 = vmatprep.mubr.f32.mxu1 %v5266_v47 }
 0x54d   : > { %5384 = vmatmul.mubr.f32.gmra.mrb[68].mxu1 %v5265_v6 }
 0x54e   : > { %5388 = vmatprep.mubr.f32.mxu1 %v5268_v32 }
 0x551   : > { %5389 = vmatmul.mubr.f32.gmra.mrb[70].mxu1 %v5267_v43 }
 0x552   : > { %5393 = vmatprep.mubr.f32.mxu1 %v5270_v54 }
 0x555   : > { %5394 = vmatmul.mubr.f32.gmra.mrb[72].mxu1 %v5269_v1 }
 0x556   : > { %5398 = vmatprep.mubr.f32.mxu1 %v5272_v29 }
 0x559   : > { %5399 = vmatmul.mubr.f32.gmra.mrb[74].mxu1 %v5271_v0 }
 0x55a   : > { %5403 = vmatprep.mubr.f32.mxu1 %v5274_v46 }
 0x55d   : > { %5404 = vmatmul.mubr.f32.gmra.mrb[76].mxu1 %v5273_v37 }
 0x55e   : > { %5408 = vmatprep.mubr.f32.mxu1 %v5276_v33 }
 0x561   : > { %5409 = vmatmul.mubr.f32.gmra.mrb[78].mxu1 %v5275_v56 }
 0x618   : > { %v5758_v16 = vpop.f32.mrb[64].mxu1 }
 0x619   : > { %v5759_v61 = vpop.f32.mrb[65].mxu1 }
 0x61a   : > { %v5760_v3 = vadd.f32 %v5759_v61, %v5758_v16 }
 0x61c   : > { %5414 = vst.msk [vmem:[%s11451_s28] sm:$0xff] %vm2609_vm0, %v5760_v3  ;;  %v5761_v48 = vpop.f32.mrb[66].mxu1 }
 0x61d   : > { %v5762_v24 = vpop.f32.mrb[67].mxu1 }
 0x61e   : > { %v5763_v18 = vadd.f32 %v5762_v24, %v5761_v48 }
 0x620   : > { %5415 = vst.msk [vmem:[%s11451_s28 + $0x8] sm:$0xff] %vm2609_vm0, %v5763_v18  ;;  %v5764_v62 = vpop.f32.mrb[68].mxu1 }
 0x621   : > { %v5765_v25 = vpop.f32.mrb[69].mxu1 }
 0x622   : > { %v5766_v42 = vadd.f32 %v5765_v25, %v5764_v62 }
 0x624   : > { %5416 = vst.msk [vmem:[%s11451_s28 + $0x10] sm:$0xff] %vm2609_vm0, %v5766_v42  ;;  %v5767_v19 = vpop.f32.mrb[70].mxu1 }
 0x625   : > { %v5768_v58 = vpop.f32.mrb[71].mxu1 }
 0x626   : > { %v5769_v36 = vadd.f32 %v5768_v58, %v5767_v19 }
 0x628   : > { %5417 = vst.msk [vmem:[%s11451_s28 + $0x18] sm:$0xff] %vm2609_vm0, %v5769_v36  ;;  %v5770_v27 = vpop.f32.mrb[72].mxu1 }
 0x629   : > { %v5771_v55 = vpop.f32.mrb[73].mxu1 }
 0x62a   : > { %v5772_v20 = vadd.f32 %v5771_v55, %v5770_v27 }
 0x62c   : > { %5418 = vst.msk [vmem:[%s11451_s28 + $0x20] sm:$0xff] %vm2609_vm0, %v5772_v20  ;;  %v5773_v26 = vpop.f32.mrb[74].mxu1 }
 0x62d   : > { %v5774_v41 = vpop.f32.mrb[75].mxu1 }
 0x62e   : > { %v5775_v44 = vadd.f32 %v5774_v41, %v5773_v26 }
 0x630   : > { %5419 = vst.msk [vmem:[%s11451_s28 + $0x28] sm:$0xff] %vm2609_vm0, %v5775_v44  ;;  %v5776_v2 = vpop.f32.mrb[76].mxu1 }
 0x631   : > { %v5777_v57 = vpop.f32.mrb[77].mxu1 }
 0x632   : > { %v5778_v63 = vadd.f32 %v5777_v57, %v5776_v2 }
 0x634   : > { %5420 = vst.msk [vmem:[%s11451_s28 + $0x30] sm:$0xff] %vm2609_vm0, %v5778_v63  ;;  %v5779_v40 = vpop.f32.mrb[78].mxu1 }
 0x635   : > { %v5780_v34 = vpop.f32.mrb[79].mxu1 }
 0x636   : > { %v5781_v14 = vadd.f32 %v5780_v34, %v5779_v40 }
 0x638   : > { %5421 = vst.msk [vmem:[%s11451_s28 + $0x38] sm:$0xff] %vm2609_vm0, %v5781_v14 }
 0x639 PF: > { %s20_s13 = sadd.s32 1, %s7266_s13  }
 0x63a   : > { %p17_p4 = scmp.ge.s32.totalorder %s20_s13, 4  }
 0x63c   :  { %19 = sbr.rel (!%p17_p4) target bundleno = 1 (0x1), region = 90 }

</bundles_post_ra>
